<compile_context>
chip_gen: v5e
topology: v5e:2x2
jax: 0.10.0
libtpu: 0.0.40
codegen_flags: <defaults>
</compile_context>

<pallas_src>
import functools

import jax
import jax.numpy as jnp
from jax import lax
from jax.experimental import pallas as pl
from jax.experimental.pallas import tpu as pltpu


# ------------------------------- small helpers ---------------------------------------

def _round_up(v, m):
    return (v + m - 1) // m * m


def _row_tiling(rows, cap=256):
    """Pick a row tile (multiple of 8) and the padded row count it divides."""
    if rows >= cap:
        return cap, _round_up(rows, cap)
    t = _round_up(rows, 8)
    return t, t


# ------------------------- tiled matmul + affine epilogue -----------------------------

def _mm_affine_kernel(x_ref, w_ref, s_ref, t_ref, o_ref, acc_ref, *, leaky):
    k = pl.program_id(2)

    @pl.when(k == 0)
    def _():
        acc_ref[...] = jnp.zeros_like(acc_ref)

    acc_ref[...] += jnp.dot(x_ref[...], w_ref[...], preferred_element_type=jnp.float32)

    @pl.when(k == pl.num_programs(2) - 1)
    def _():
        y = acc_ref[...] * s_ref[...] + t_ref[...]
        if leaky:
            y = jnp.where(y > 0, y, 0.2 * y)
        o_ref[...] = y


def matmul_affine(x, w, scale, shift, *, leaky):
    """y = leaky_relu((x @ w) * scale + shift). bf16 MXU inputs, f32 accumulate.

    K and N are zero-padded to multiples of 128 (pad scale/shift are 0 so padded output
    columns are exactly 0 and are sliced off before returning)."""
    M, K = x.shape
    _, N = w.shape

    Kp = _round_up(K, 128)
    Np = _round_up(N, 128)
    tm, Mp = _row_tiling(M, cap=256)
    tn = 256 if (Np % 256 == 0 and Np >= 256) else 128
    tk = next(t for t in (1024, 512, 256, 128) if Kp % t == 0)

    xb = x.astype(jnp.bfloat16)
    wb = w.astype(jnp.bfloat16)
    if (Mp, Kp) != (M, K):
        xb = jnp.zeros((Mp, Kp), jnp.bfloat16).at[:M, :K].set(xb)
    if (Kp, Np) != (K, N):
        wb = jnp.zeros((Kp, Np), jnp.bfloat16).at[:K, :N].set(wb)
    sp = jnp.zeros((1, Np), jnp.float32).at[0, :N].set(scale.astype(jnp.float32))
    tp = jnp.zeros((1, Np), jnp.float32).at[0, :N].set(shift.astype(jnp.float32))

    out = pl.pallas_call(
        functools.partial(_mm_affine_kernel, leaky=leaky),
        out_shape=jax.ShapeDtypeStruct((Mp, Np), jnp.float32),
        grid_spec=pltpu.PrefetchScalarGridSpec(
            num_scalar_prefetch=0,
            grid=(Mp // tm, Np // tn, Kp // tk),
            in_specs=[
                pl.BlockSpec((tm, tk), lambda i, j, k: (i, k)),
                pl.BlockSpec((tk, tn), lambda i, j, k: (k, j)),
                pl.BlockSpec((1, tn), lambda i, j, k: (0, j)),
                pl.BlockSpec((1, tn), lambda i, j, k: (0, j)),
            ],
            out_specs=pl.BlockSpec((tm, tn), lambda i, j, k: (i, j)),
            scratch_shapes=[pltpu.VMEM((tm, tn), jnp.float32)],
        ),
        compiler_params=pltpu.CompilerParams(
            dimension_semantics=("parallel", "parallel", "arbitrary")),
    )(xb, wb, sp, tp)
    return out[:M, :N]


# ------------------------- memory module (att + fused entropy loss) -------------------

def _memory_kernel(z_ref, m_ref, out_ref, ent_ref, *, shrink_thres, t_valid, inv_t):
    i = pl.program_id(0)

    @pl.when(i == 0)
    def _():
        ent_ref[...] = jnp.zeros_like(ent_ref)

    z = z_ref[...]                                         # (tr, C)
    m = m_ref[...]                                         # (Mdim, C)
    # logits = z @ m.T without materializing the transpose (contract dim 1 of both).
    logits = lax.dot_general(z, m, (((1,), (1,)), ((), ())),
                             preferred_element_type=jnp.float32)       # (tr, Mdim)
    logits = logits - jnp.max(logits, axis=1, keepdims=True)
    e = jnp.exp(logits)
    att = e * pl.reciprocal(jnp.sum(e, axis=1, keepdims=True), approx=True)
    if shrink_thres > 0:
        # hard_shrink_relu(a) = relu(a - lambd) * a / (|a - lambd| + eps)
        att = (jnp.maximum(att - shrink_thres, 0.0) * att) / (
            jnp.abs(att - shrink_thres) + 1e-12)
        l1 = jnp.maximum(jnp.sum(jnp.abs(att), axis=1, keepdims=True), 1e-12)
        att = att * pl.reciprocal(l1, approx=True)          # F.normalize(att, p=1, dim=1)
    out_ref[...] = jnp.dot(att, m, preferred_element_type=jnp.float32)

    # Fused EntropyLossEncap: mean over valid rows of -sum_j att*log(att + eps).
    tr = att.shape[0]
    row_ids = lax.broadcasted_iota(jnp.int32, (tr, 1), 0) + i * tr
    valid = (row_ids < t_valid).astype(jnp.float32)
    ent_rows = -jnp.sum(att * jnp.log(att + 1e-12), axis=1, keepdims=True)
    ent_ref[...] += jnp.sum(ent_rows * valid, axis=0, keepdims=True) * inv_t


def memory_module(z, mem_w, *, shrink_thres):
    T, C = z.shape
    Mdim = mem_w.shape[0]
    tr, Tp = _row_tiling(T, cap=256)
    zp = z if Tp == T else jnp.zeros((Tp, C), jnp.float32).at[:T].set(z)

    out, ent = pl.pallas_call(
        functools.partial(_memory_kernel, shrink_thres=shrink_thres,
                          t_valid=T, inv_t=1.0 / T),
        out_shape=(jax.ShapeDtypeStruct((Tp, C), jnp.float32),
                   jax.ShapeDtypeStruct((1, 1), jnp.float32)),
        grid_spec=pltpu.PrefetchScalarGridSpec(
            num_scalar_prefetch=0,
            grid=(Tp // tr,),
            in_specs=[pl.BlockSpec((tr, C), lambda i: (i, 0)),
                      pl.BlockSpec((Mdim, C), lambda i: (0, 0))],
            out_specs=(pl.BlockSpec((tr, C), lambda i: (i, 0)),
                       pl.BlockSpec((1, 1), lambda i: (0, 0))),
        ),
        compiler_params=pltpu.CompilerParams(dimension_semantics=("arbitrary",)),
    )(zp.astype(jnp.float32), mem_w.astype(jnp.float32))
    return out[:T], ent[0, 0]


# ------------------------------- MSE loss (tiled reduction) ----------------------------

def _mse_kernel(a_ref, b_ref, o_ref, *, inv_n):
    i = pl.program_id(0)

    @pl.when(i == 0)
    def _():
        o_ref[...] = jnp.zeros_like(o_ref)

    d = a_ref[...] - b_ref[...]
    o_ref[...] += jnp.sum(d * d, keepdims=True) * inv_n


def mse_loss(a, b):
    af = a.reshape(-1).astype(jnp.float32)
    bf = b.reshape(-1).astype(jnp.float32)
    E = af.shape[0]
    R = pl.cdiv(E, 128)
    tr, Rp = _row_tiling(R, cap=512)
    Ep = Rp * 128
    ap = jnp.zeros((Ep,), jnp.float32).at[:E].set(af).reshape(Rp, 128)
    bp = jnp.zeros((Ep,), jnp.float32).at[:E].set(bf).reshape(Rp, 128)

    out = pl.pallas_call(
        functools.partial(_mse_kernel, inv_n=1.0 / E),
        out_shape=jax.ShapeDtypeStruct((1, 1), jnp.float32),
        grid_spec=pltpu.PrefetchScalarGridSpec(
            num_scalar_prefetch=0,
            grid=(Rp // tr,),
            in_specs=[pl.BlockSpec((tr, 128), lambda i: (i, 0)),
                      pl.BlockSpec((tr, 128), lambda i: (i, 0))],
            out_specs=pl.BlockSpec((1, 1), lambda i: (0, 0)),
        ),
        compiler_params=pltpu.CompilerParams(dimension_semantics=("arbitrary",)),
    )(ap, bp)
    return out[0, 0]


# ------------------------------- conv layers (NHWC) ------------------------------------

def conv2d_block(x, w_mat, scale, shift):
    """3x3, stride 2, pad 1 conv + fused BN + LeakyReLU. x: NHWC."""
    N, H, W, Cin = x.shape
    Ho = (H - 1) // 2 + 1
    Wo = (W - 1) // 2 + 1
    xp = jnp.pad(x, ((0, 0), (1, 1), (1, 1), (0, 0)))
    taps = [xp[:, kh:kh + 2 * (Ho - 1) + 1:2, kw:kw + 2 * (Wo - 1) + 1:2, :]
            for kh in range(3) for kw in range(3)]
    cols = jnp.stack(taps, axis=3).reshape(N * Ho * Wo, 9 * Cin)   # (T, 9*Cin), (kh,kw,ci)
    y = matmul_affine(cols, w_mat, scale, shift, leaky=True)
    return y.reshape(N, Ho, Wo, -1)


def convT2d_block(x, w_comb, scale4, shift4, *, leaky):
    """3x3, stride 2, pad 1, output_pad 1 ConvTranspose via sub-pixel decomposition."""
    N, H, W, Cin = x.shape
    Cout = w_comb.shape[1] // 4
    xp = jnp.pad(x, ((0, 0), (0, 1), (0, 1), (0, 0)))
    taps = [xp[:, dr:dr + H, ds:ds + W, :] for dr in range(2) for ds in range(2)]
    cols = jnp.stack(taps, axis=3).reshape(N * H * W, 4 * Cin)     # (T, 4*Cin)
    y = matmul_affine(cols, w_comb, scale4, shift4, leaky=leaky)   # (T, 4*Cout)
    y = y.reshape(N, H, W, 2, 2, Cout).transpose(0, 1, 3, 2, 4, 5)
    return y.reshape(N, 2 * H, 2 * W, Cout)


def _build_convT_subpixel_weight(w_t):
    """w_t: (Cin, Cout, 3, 3) PyTorch ConvTranspose2d weight -> (4*Cin, 4*Cout).

    Rows are grouped by input tap (di, dj) in {0,1}^2 (Cin each); columns by output
    parity phase (r, s) in {0,1}^2 (Cout each). out[2i+r, 2j+s] uses tap (i+di, j+dj)
    with kernel index kh = r - 2*di + 1, kw = s - 2*dj + 1 when in range."""
    Cin, Cout = w_t.shape[0], w_t.shape[1]
    blocks = jnp.zeros((4, Cin, 4, Cout), w_t.dtype)
    for di in range(2):
        for dj in range(2):
            for r in range(2):
                for s in range(2):
                    kh = r - 2 * di + 1
                    kw = s - 2 * dj + 1
                    if 0 <= kh <= 2 and 0 <= kw <= 2:
                        blocks = blocks.at[2 * di + dj, :, 2 * r + s, :].set(
                            w_t[:, :, kh, kw])
    return blocks.reshape(4 * Cin, 4 * Cout)


# ------------------------------------ parameters ---------------------------------------

def init_params(key, chnum_in, mem_dim, feature_num=128, feature_num_2=96):
    fnx2 = feature_num * 2
    enc_io = [(chnum_in, feature_num_2), (feature_num_2, feature_num),
              (feature_num, fnx2), (fnx2, fnx2)]
    dec_io = [(fnx2, fnx2), (fnx2, feature_num),
              (feature_num, feature_num_2), (feature_num_2, chnum_in)]
    keys = iter(jax.random.split(key, 64))

    def bn_fold(cout):
        gamma = 1.0 + 0.1 * jax.random.normal(next(keys), (cout,), jnp.float32)
        beta = 0.1 * jax.random.normal(next(keys), (cout,), jnp.float32)
        rmean = 0.1 * jax.random.normal(next(keys), (cout,), jnp.float32)
        rvar = 1.0 + 0.1 * jax.random.uniform(next(keys), (cout,), jnp.float32)
        s = gamma / jnp.sqrt(rvar + 1e-5)
        t = beta - rmean * s
        return s, t

    enc = []
    for cin, cout in enc_io:
        std = 1.0 / jnp.sqrt(jnp.float32(cin * 9))
        w = std * jax.random.normal(next(keys), (cout, cin, 3, 3), jnp.float32)
        b = std * jax.random.normal(next(keys), (cout,), jnp.float32)
        s, t = bn_fold(cout)
        # im2col matmul weight; row order (kh, kw, cin) to match the NHWC patch layout.
        w_mat = w.transpose(2, 3, 1, 0).reshape(9 * cin, cout)
        enc.append((w_mat, s, b * s + t))                 # conv bias folded with BN

    dec = []
    for i, (cin, cout) in enumerate(dec_io):
        std = 1.0 / jnp.sqrt(jnp.float32(cin * 9))
        w_t = std * jax.random.normal(next(keys), (cin, cout, 3, 3), jnp.float32)
        b = std * jax.random.normal(next(keys), (cout,), jnp.float32)
        if i < 3:
            s, t = bn_fold(cout)
            scale, shift = s, b * s + t
        else:                                             # last layer: no BN / activation
            scale, shift = jnp.ones((cout,), jnp.float32), b
        w_comb = _build_convT_subpixel_weight(w_t)        # (4*cin, 4*cout)
        dec.append((w_comb, jnp.tile(scale, 4), jnp.tile(shift, 4)))

    stdv = 1.0 / jnp.sqrt(jnp.float32(fnx2))
    mem_w = jax.random.uniform(next(keys), (mem_dim, fnx2), jnp.float32, -stdv, stdv)
    return {"enc": enc, "dec": dec, "mem": mem_w}


# -------------------------------------- forward ----------------------------------------

def memae_forward(params, x, *, shrink_thres=0.0025, entropy_loss_weight=0.0002):
    # x: NCHW (PyTorch layout). Convert once; keep NHWC end-to-end.
    x_nhwc = jnp.transpose(x, (0, 2, 3, 1)).astype(jnp.float32)

    f = x_nhwc
    for (w_mat, s, t) in params["enc"]:
        f = conv2d_block(f, w_mat, s, t)

    N, Hf, Wf, C = f.shape
    z = f.reshape(N * Hf * Wf, C)
    y, memo_loss = memory_module(z, params["mem"], shrink_thres=shrink_thres)
    r = y.reshape(N, Hf, Wf, C)

    for i, (w_comb, s4, t4) in enumerate(params["dec"]):
        r = convT2d_block(r, w_comb, s4, t4, leaky=(i < 3))

    # MSE is layout-invariant (mean over all elements), so compare in NHWC directly.
    recon_loss = mse_loss(r, x_nhwc)
    total_loss = recon_loss + entropy_loss_weight * memo_loss
    return {"total_loss": total_loss, "recon_loss": recon_loss, "memo_loss": memo_loss}


# --------------------------------------- main -------------------------------------------

if __name__ == "__main__":
    key = jax.random.PRNGKey(0)
    kp, kx = jax.random.split(key)

    chnum_in = 1
    mem_dim = 128
    params = init_params(kp, chnum_in, mem_dim, feature_num=128, feature_num_2=96)

    x = jax.random.normal(kx, (2, chnum_in, 16, 16), jnp.float32)

    fwd = jax.jit(memae_forward)
    out = fwd(params, x)
    out = jax.block_until_ready(out)

    assert jnp.isfinite(out["total_loss"]).item()
    assert jnp.isfinite(out["recon_loss"]).item()
    assert jnp.isfinite(out["memo_loss"]).item()
    print("KERNEL_OK")
</pallas_src>

<mosaic_0001>
module attributes {stable_mosaic.version = 11 : i64} {
  func.func @_mm_affine_kernel(%arg0: i32, %arg1: i32, %arg2: i32, %arg3: memref<128x128xbf16, #tpu.memory_space<vmem>>, %arg4: memref<128x128xbf16, #tpu.memory_space<vmem>>, %arg5: memref<1x128xf32, #tpu.memory_space<vmem>>, %arg6: memref<1x128xf32, #tpu.memory_space<vmem>>, %arg7: memref<128x128xf32, #tpu.memory_space<vmem>>, %arg8: memref<128x128xf32, #tpu.memory_space<vmem>>) attributes {dimension_semantics = [#tpu.dimension_semantics<parallel>, #tpu.dimension_semantics<parallel>, #tpu.dimension_semantics<arbitrary>], iteration_bounds = array<i64: 1, 1, 1>, scalar_prefetch = 0 : i64, scratch_operands = 1 : i64, tpu.core_type = #tpu.core_type<tc>, window_params = [{transform_indices = @transform_0, window_bounds = array<i64: 128, 128>}, {transform_indices = @transform_1, window_bounds = array<i64: 128, 128>}, {transform_indices = @transform_2, window_bounds = array<i64: 1, 128>}, {transform_indices = @transform_3, window_bounds = array<i64: 1, 128>}, {transform_indices = @transform_4, window_bounds = array<i64: 128, 128>}]} {
    %c0_i32 = arith.constant 0 : i32
    %0 = arith.cmpi eq, %arg2, %c0_i32 : i32
    %1 = arith.extui %0 : i1 to i32
    %c0_i32_0 = arith.constant 0 : i32
    %2 = arith.cmpi ne, %1, %c0_i32_0 : i32
    scf.if %2 {
      %cst_10 = arith.constant 0.000000e+00 : f32
      %12 = vector.broadcast %cst_10 : f32 to vector<128x128xf32>
      %c0_11 = arith.constant 0 : index
      %c0_12 = arith.constant 0 : index
      %13 = vector.load %arg8[%c0_11, %c0_12] : memref<128x128xf32, #tpu.memory_space<vmem>>, vector<128x128xf32>
      tpu.vector_store %arg8[%c0_11, %c0_12], %12 {strides = array<i32>} : memref<128x128xf32, #tpu.memory_space<vmem>>, vector<128x128xf32>,
    } else {
    }
    %c0 = arith.constant 0 : index
    %c0_1 = arith.constant 0 : index
    %3 = vector.load %arg8[%c0, %c0_1] : memref<128x128xf32, #tpu.memory_space<vmem>>, vector<128x128xf32>
    %c0_2 = arith.constant 0 : index
    %c0_3 = arith.constant 0 : index
    %4 = vector.load %arg3[%c0_2, %c0_3] : memref<128x128xbf16, #tpu.memory_space<vmem>>, vector<128x128xbf16>
    %c0_4 = arith.constant 0 : index
    %c0_5 = arith.constant 0 : index
    %5 = vector.load %arg4[%c0_4, %c0_5] : memref<128x128xbf16, #tpu.memory_space<vmem>>, vector<128x128xbf16>
    %cst = arith.constant dense<0.000000e+00> : vector<128x128xf32>
    %6 = tpu.matmul %4, %5, %cst {dimension_numbers = #tpu.dot_dimension_numbers<[1], [0], [0], [1], [0, 0, 1, 1], [], []>} : vector<128x128xbf16>, vector<128x128xbf16>, vector<128x128xf32> -> vector<128x128xf32>
    %7 = arith.addf %3, %6 : vector<128x128xf32>
    %c0_6 = arith.constant 0 : index
    %c0_7 = arith.constant 0 : index
    %8 = vector.load %arg8[%c0_6, %c0_7] : memref<128x128xf32, #tpu.memory_space<vmem>>, vector<128x128xf32>
    tpu.vector_store %arg8[%c0_6, %c0_7], %7 {strides = array<i32>} : memref<128x128xf32, #tpu.memory_space<vmem>>, vector<128x128xf32>,
    %c0_i32_8 = arith.constant 0 : i32
    %9 = arith.cmpi eq, %arg2, %c0_i32_8 : i32
    %10 = arith.extui %9 : i1 to i32
    %c0_i32_9 = arith.constant 0 : i32
    %11 = arith.cmpi ne, %10, %c0_i32_9 : i32
    scf.if %11 {
      %c0_10 = arith.constant 0 : index
      %c0_11 = arith.constant 0 : index
      %12 = vector.load %arg8[%c0_10, %c0_11] : memref<128x128xf32, #tpu.memory_space<vmem>>, vector<128x128xf32>
      %c0_12 = arith.constant 0 : index
      %c0_13 = arith.constant 0 : index
      %13 = vector.load %arg5[%c0_12, %c0_13] : memref<1x128xf32, #tpu.memory_space<vmem>>, vector<1x128xf32>
      %14 = vector.broadcast %13 : vector<1x128xf32> to vector<128x128xf32>
      %15 = arith.mulf %12, %14 : vector<128x128xf32>
      %c0_14 = arith.constant 0 : index
      %c0_15 = arith.constant 0 : index
      %16 = vector.load %arg6[%c0_14, %c0_15] : memref<1x128xf32, #tpu.memory_space<vmem>>, vector<1x128xf32>
      %17 = vector.broadcast %16 : vector<1x128xf32> to vector<128x128xf32>
      %18 = arith.addf %15, %17 : vector<128x128xf32>
      %cst_16 = arith.constant 0.000000e+00 : f32
      %19 = vector.broadcast %cst_16 : f32 to vector<128x128xf32>
      %20 = arith.cmpf ogt, %18, %19 : vector<128x128xf32>
      %cst_17 = arith.constant 2.000000e-01 : f32
      %21 = vector.broadcast %cst_17 : f32 to vector<128x128xf32>
      %22 = arith.mulf %21, %18 : vector<128x128xf32>
      %23 = arith.select %20, %18, %22 : vector<128x128xi1>, vector<128x128xf32>
      %c0_18 = arith.constant 0 : index
      %c0_19 = arith.constant 0 : index
      %24 = vector.load %arg7[%c0_18, %c0_19] : memref<128x128xf32, #tpu.memory_space<vmem>>, vector<128x128xf32>
      tpu.vector_store %arg7[%c0_18, %c0_19], %23 {strides = array<i32>} : memref<128x128xf32, #tpu.memory_space<vmem>>, vector<128x128xf32>,
    } else {
    }
    return
  }
  func.func @transform_0(%arg0: i32, %arg1: i32, %arg2: i32) -> (i32, i32) {
    %c0_i32 = arith.constant 0 : i32
    return %arg0, %arg2 : i32, i32
  }
  func.func @transform_1(%arg0: i32, %arg1: i32, %arg2: i32) -> (i32, i32) {
    %c0_i32 = arith.constant 0 : i32
    return %arg2, %arg1 : i32, i32
  }
  func.func @transform_2(%arg0: i32, %arg1: i32, %arg2: i32) -> (i32, i32) {
    %c0_i32 = arith.constant 0 : i32
    %c0_i32_0 = arith.constant 0 : i32
    return %c0_i32, %arg1 : i32, i32
  }
  func.func @transform_3(%arg0: i32, %arg1: i32, %arg2: i32) -> (i32, i32) {
    %c0_i32 = arith.constant 0 : i32
    %c0_i32_0 = arith.constant 0 : i32
    return %c0_i32, %arg1 : i32, i32
  }
  func.func @transform_4(%arg0: i32, %arg1: i32, %arg2: i32) -> (i32, i32) {
    %c0_i32 = arith.constant 0 : i32
    return %arg0, %arg1 : i32, i32
  }
}

module attributes {stable_mosaic.version = 11 : i64} {
  func.func @_mm_affine_kernel(%arg0: i32, %arg1: i32, %arg2: i32, %arg3: memref<32x128xbf16, #tpu.memory_space<vmem>>, %arg4: memref<128x128xbf16, #tpu.memory_space<vmem>>, %arg5: memref<1x128xf32, #tpu.memory_space<vmem>>, %arg6: memref<1x128xf32, #tpu.memory_space<vmem>>, %arg7: memref<32x128xf32, #tpu.memory_space<vmem>>, %arg8: memref<32x128xf32, #tpu.memory_space<vmem>>) attributes {dimension_semantics = [#tpu.dimension_semantics<parallel>, #tpu.dimension_semantics<parallel>, #tpu.dimension_semantics<arbitrary>], iteration_bounds = array<i64: 1, 1, 7>, scalar_prefetch = 0 : i64, scratch_operands = 1 : i64, tpu.core_type = #tpu.core_type<tc>, window_params = [{transform_indices = @transform_0, window_bounds = array<i64: 32, 128>}, {transform_indices = @transform_1, window_bounds = array<i64: 128, 128>}, {transform_indices = @transform_2, window_bounds = array<i64: 1, 128>}, {transform_indices = @transform_3, window_bounds = array<i64: 1, 128>}, {transform_indices = @transform_4, window_bounds = array<i64: 32, 128>}]} {
    %c0_i32 = arith.constant 0 : i32
    %0 = arith.cmpi eq, %arg2, %c0_i32 : i32
    %1 = arith.extui %0 : i1 to i32
    %c0_i32_0 = arith.constant 0 : i32
    %2 = arith.cmpi ne, %1, %c0_i32_0 : i32
    scf.if %2 {
      %cst_9 = arith.constant 0.000000e+00 : f32
      %12 = vector.broadcast %cst_9 : f32 to vector<32x128xf32>
      %c0_10 = arith.constant 0 : index
      %c0_11 = arith.constant 0 : index
      %13 = vector.load %arg8[%c0_10, %c0_11] : memref<32x128xf32, #tpu.memory_space<vmem>>, vector<32x128xf32>
      tpu.vector_store %arg8[%c0_10, %c0_11], %12 {strides = array<i32>} : memref<32x128xf32, #tpu.memory_space<vmem>>, vector<32x128xf32>,
    } else {
    }
    %c0 = arith.constant 0 : index
    %c0_1 = arith.constant 0 : index
    %3 = vector.load %arg8[%c0, %c0_1] : memref<32x128xf32, #tpu.memory_space<vmem>>, vector<32x128xf32>
    %c0_2 = arith.constant 0 : index
    %c0_3 = arith.constant 0 : index
    %4 = vector.load %arg3[%c0_2, %c0_3] : memref<32x128xbf16, #tpu.memory_space<vmem>>, vector<32x128xbf16>
    %c0_4 = arith.constant 0 : index
    %c0_5 = arith.constant 0 : index
    %5 = vector.load %arg4[%c0_4, %c0_5] : memref<128x128xbf16, #tpu.memory_space<vmem>>, vector<128x128xbf16>
    %cst = arith.constant dense<0.000000e+00> : vector<32x128xf32>
    %6 = tpu.matmul %4, %5, %cst {dimension_numbers = #tpu.dot_dimension_numbers<[1], [0], [0], [1], [0, 0, 1, 1], [], []>} : vector<32x128xbf16>, vector<128x128xbf16>, vector<32x128xf32> -> vector<32x128xf32>
    %7 = arith.addf %3, %6 : vector<32x128xf32>
    %c0_6 = arith.constant 0 : index
    %c0_7 = arith.constant 0 : index
    %8 = vector.load %arg8[%c0_6, %c0_7] : memref<32x128xf32, #tpu.memory_space<vmem>>, vector<32x128xf32>
    tpu.vector_store %arg8[%c0_6, %c0_7], %7 {strides = array<i32>} : memref<32x128xf32, #tpu.memory_space<vmem>>, vector<32x128xf32>,
    %c6_i32 = arith.constant 6 : i32
    %9 = arith.cmpi eq, %arg2, %c6_i32 : i32
    %10 = arith.extui %9 : i1 to i32
    %c0_i32_8 = arith.constant 0 : i32
    %11 = arith.cmpi ne, %10, %c0_i32_8 : i32
    scf.if %11 {
      %c0_9 = arith.constant 0 : index
      %c0_10 = arith.constant 0 : index
      %12 = vector.load %arg8[%c0_9, %c0_10] : memref<32x128xf32, #tpu.memory_space<vmem>>, vector<32x128xf32>
      %c0_11 = arith.constant 0 : index
      %c0_12 = arith.constant 0 : index
      %13 = vector.load %arg5[%c0_11, %c0_12] : memref<1x128xf32, #tpu.memory_space<vmem>>, vector<1x128xf32>
      %14 = vector.broadcast %13 : vector<1x128xf32> to vector<32x128xf32>
      %15 = arith.mulf %12, %14 : vector<32x128xf32>
      %c0_13 = arith.constant 0 : index
      %c0_14 = arith.constant 0 : index
      %16 = vector.load %arg6[%c0_13, %c0_14] : memref<1x128xf32, #tpu.memory_space<vmem>>, vector<1x128xf32>
      %17 = vector.broadcast %16 : vector<1x128xf32> to vector<32x128xf32>
      %18 = arith.addf %15, %17 : vector<32x128xf32>
      %cst_15 = arith.constant 0.000000e+00 : f32
      %19 = vector.broadcast %cst_15 : f32 to vector<32x128xf32>
      %20 = arith.cmpf ogt, %18, %19 : vector<32x128xf32>
      %cst_16 = arith.constant 2.000000e-01 : f32
      %21 = vector.broadcast %cst_16 : f32 to vector<32x128xf32>
      %22 = arith.mulf %21, %18 : vector<32x128xf32>
      %23 = arith.select %20, %18, %22 : vector<32x128xi1>, vector<32x128xf32>
      %c0_17 = arith.constant 0 : index
      %c0_18 = arith.constant 0 : index
      %24 = vector.load %arg7[%c0_17, %c0_18] : memref<32x128xf32, #tpu.memory_space<vmem>>, vector<32x128xf32>
      tpu.vector_store %arg7[%c0_17, %c0_18], %23 {strides = array<i32>} : memref<32x128xf32, #tpu.memory_space<vmem>>, vector<32x128xf32>,
    } else {
    }
    return
  }
  func.func @transform_0(%arg0: i32, %arg1: i32, %arg2: i32) -> (i32, i32) {
    %c0_i32 = arith.constant 0 : i32
    return %arg0, %arg2 : i32, i32
  }
  func.func @transform_1(%arg0: i32, %arg1: i32, %arg2: i32) -> (i32, i32) {
    %c0_i32 = arith.constant 0 : i32
    return %arg2, %arg1 : i32, i32
  }
  func.func @transform_2(%arg0: i32, %arg1: i32, %arg2: i32) -> (i32, i32) {
    %c0_i32 = arith.constant 0 : i32
    %c0_i32_0 = arith.constant 0 : i32
    return %c0_i32, %arg1 : i32, i32
  }
  func.func @transform_3(%arg0: i32, %arg1: i32, %arg2: i32) -> (i32, i32) {
    %c0_i32 = arith.constant 0 : i32
    %c0_i32_0 = arith.constant 0 : i32
    return %c0_i32, %arg1 : i32, i32
  }
  func.func @transform_4(%arg0: i32, %arg1: i32, %arg2: i32) -> (i32, i32) {
    %c0_i32 = arith.constant 0 : i32
    return %arg0, %arg1 : i32, i32
  }
}

module attributes {stable_mosaic.version = 11 : i64} {
  func.func @_mm_affine_kernel(%arg0: i32, %arg1: i32, %arg2: i32, %arg3: memref<8x128xbf16, #tpu.memory_space<vmem>>, %arg4: memref<128x256xbf16, #tpu.memory_space<vmem>>, %arg5: memref<1x256xf32, #tpu.memory_space<vmem>>, %arg6: memref<1x256xf32, #tpu.memory_space<vmem>>, %arg7: memref<8x256xf32, #tpu.memory_space<vmem>>, %arg8: memref<8x256xf32, #tpu.memory_space<vmem>>) attributes {dimension_semantics = [#tpu.dimension_semantics<parallel>, #tpu.dimension_semantics<parallel>, #tpu.dimension_semantics<arbitrary>], iteration_bounds = array<i64: 1, 1, 9>, scalar_prefetch = 0 : i64, scratch_operands = 1 : i64, tpu.core_type = #tpu.core_type<tc>, window_params = [{transform_indices = @transform_0, window_bounds = array<i64: 8, 128>}, {transform_indices = @transform_1, window_bounds = array<i64: 128, 256>}, {transform_indices = @transform_2, window_bounds = array<i64: 1, 256>}, {transform_indices = @transform_3, window_bounds = array<i64: 1, 256>}, {transform_indices = @transform_4, window_bounds = array<i64: 8, 256>}]} {
    %c0_i32 = arith.constant 0 : i32
    %0 = arith.cmpi eq, %arg2, %c0_i32 : i32
    %1 = arith.extui %0 : i1 to i32
    %c0_i32_0 = arith.constant 0 : i32
    %2 = arith.cmpi ne, %1, %c0_i32_0 : i32
    scf.if %2 {
      %cst_9 = arith.constant 0.000000e+00 : f32
      %12 = vector.broadcast %cst_9 : f32 to vector<8x256xf32>
      %c0_10 = arith.constant 0 : index
      %c0_11 = arith.constant 0 : index
      %13 = vector.load %arg8[%c0_10, %c0_11] : memref<8x256xf32, #tpu.memory_space<vmem>>, vector<8x256xf32>
      tpu.vector_store %arg8[%c0_10, %c0_11], %12 {strides = array<i32>} : memref<8x256xf32, #tpu.memory_space<vmem>>, vector<8x256xf32>,
    } else {
    }
    %c0 = arith.constant 0 : index
    %c0_1 = arith.constant 0 : index
    %3 = vector.load %arg8[%c0, %c0_1] : memref<8x256xf32, #tpu.memory_space<vmem>>, vector<8x256xf32>
    %c0_2 = arith.constant 0 : index
    %c0_3 = arith.constant 0 : index
    %4 = vector.load %arg3[%c0_2, %c0_3] : memref<8x128xbf16, #tpu.memory_space<vmem>>, vector<8x128xbf16>
    %c0_4 = arith.constant 0 : index
    %c0_5 = arith.constant 0 : index
    %5 = vector.load %arg4[%c0_4, %c0_5] : memref<128x256xbf16, #tpu.memory_space<vmem>>, vector<128x256xbf16>
    %cst = arith.constant dense<0.000000e+00> : vector<8x256xf32>
    %6 = tpu.matmul %4, %5, %cst {dimension_numbers = #tpu.dot_dimension_numbers<[1], [0], [0], [1], [0, 0, 1, 1], [], []>} : vector<8x128xbf16>, vector<128x256xbf16>, vector<8x256xf32> -> vector<8x256xf32>
    %7 = arith.addf %3, %6 : vector<8x256xf32>
    %c0_6 = arith.constant 0 : index
    %c0_7 = arith.constant 0 : index
    %8 = vector.load %arg8[%c0_6, %c0_7] : memref<8x256xf32, #tpu.memory_space<vmem>>, vector<8x256xf32>
    tpu.vector_store %arg8[%c0_6, %c0_7], %7 {strides = array<i32>} : memref<8x256xf32, #tpu.memory_space<vmem>>, vector<8x256xf32>,
    %c8_i32 = arith.constant 8 : i32
    %9 = arith.cmpi eq, %arg2, %c8_i32 : i32
    %10 = arith.extui %9 : i1 to i32
    %c0_i32_8 = arith.constant 0 : i32
    %11 = arith.cmpi ne, %10, %c0_i32_8 : i32
    scf.if %11 {
      %c0_9 = arith.constant 0 : index
      %c0_10 = arith.constant 0 : index
      %12 = vector.load %arg8[%c0_9, %c0_10] : memref<8x256xf32, #tpu.memory_space<vmem>>, vector<8x256xf32>
      %c0_11 = arith.constant 0 : index
      %c0_12 = arith.constant 0 : index
      %13 = vector.load %arg5[%c0_11, %c0_12] : memref<1x256xf32, #tpu.memory_space<vmem>>, vector<1x256xf32>
      %14 = vector.broadcast %13 : vector<1x256xf32> to vector<8x256xf32>
      %15 = arith.mulf %12, %14 : vector<8x256xf32>
      %c0_13 = arith.constant 0 : index
      %c0_14 = arith.constant 0 : index
      %16 = vector.load %arg6[%c0_13, %c0_14] : memref<1x256xf32, #tpu.memory_space<vmem>>, vector<1x256xf32>
      %17 = vector.broadcast %16 : vector<1x256xf32> to vector<8x256xf32>
      %18 = arith.addf %15, %17 : vector<8x256xf32>
      %cst_15 = arith.constant 0.000000e+00 : f32
      %19 = vector.broadcast %cst_15 : f32 to vector<8x256xf32>
      %20 = arith.cmpf ogt, %18, %19 : vector<8x256xf32>
      %cst_16 = arith.constant 2.000000e-01 : f32
      %21 = vector.broadcast %cst_16 : f32 to vector<8x256xf32>
      %22 = arith.mulf %21, %18 : vector<8x256xf32>
      %23 = arith.select %20, %18, %22 : vector<8x256xi1>, vector<8x256xf32>
      %c0_17 = arith.constant 0 : index
      %c0_18 = arith.constant 0 : index
      %24 = vector.load %arg7[%c0_17, %c0_18] : memref<8x256xf32, #tpu.memory_space<vmem>>, vector<8x256xf32>
      tpu.vector_store %arg7[%c0_17, %c0_18], %23 {strides = array<i32>} : memref<8x256xf32, #tpu.memory_space<vmem>>, vector<8x256xf32>,
    } else {
    }
    return
  }
  func.func @transform_0(%arg0: i32, %arg1: i32, %arg2: i32) -> (i32, i32) {
    %c0_i32 = arith.constant 0 : i32
    return %arg0, %arg2 : i32, i32
  }
  func.func @transform_1(%arg0: i32, %arg1: i32, %arg2: i32) -> (i32, i32) {
    %c0_i32 = arith.constant 0 : i32
    return %arg2, %arg1 : i32, i32
  }
  func.func @transform_2(%arg0: i32, %arg1: i32, %arg2: i32) -> (i32, i32) {
    %c0_i32 = arith.constant 0 : i32
    %c0_i32_0 = arith.constant 0 : i32
    return %c0_i32, %arg1 : i32, i32
  }
  func.func @transform_3(%arg0: i32, %arg1: i32, %arg2: i32) -> (i32, i32) {
    %c0_i32 = arith.constant 0 : i32
    %c0_i32_0 = arith.constant 0 : i32
    return %c0_i32, %arg1 : i32, i32
  }
  func.func @transform_4(%arg0: i32, %arg1: i32, %arg2: i32) -> (i32, i32) {
    %c0_i32 = arith.constant 0 : i32
    return %arg0, %arg1 : i32, i32
  }
}

module attributes {stable_mosaic.version = 11 : i64} {
  func.func @_mm_affine_kernel(%arg0: i32, %arg1: i32, %arg2: i32, %arg3: memref<8x256xbf16, #tpu.memory_space<vmem>>, %arg4: memref<256x256xbf16, #tpu.memory_space<vmem>>, %arg5: memref<1x256xf32, #tpu.memory_space<vmem>>, %arg6: memref<1x256xf32, #tpu.memory_space<vmem>>, %arg7: memref<8x256xf32, #tpu.memory_space<vmem>>, %arg8: memref<8x256xf32, #tpu.memory_space<vmem>>) attributes {dimension_semantics = [#tpu.dimension_semantics<parallel>, #tpu.dimension_semantics<parallel>, #tpu.dimension_semantics<arbitrary>], iteration_bounds = array<i64: 1, 1, 9>, scalar_prefetch = 0 : i64, scratch_operands = 1 : i64, tpu.core_type = #tpu.core_type<tc>, window_params = [{transform_indices = @transform_0, window_bounds = array<i64: 8, 256>}, {transform_indices = @transform_1, window_bounds = array<i64: 256, 256>}, {transform_indices = @transform_2, window_bounds = array<i64: 1, 256>}, {transform_indices = @transform_3, window_bounds = array<i64: 1, 256>}, {transform_indices = @transform_4, window_bounds = array<i64: 8, 256>}]} {
    %c0_i32 = arith.constant 0 : i32
    %0 = arith.cmpi eq, %arg2, %c0_i32 : i32
    %1 = arith.extui %0 : i1 to i32
    %c0_i32_0 = arith.constant 0 : i32
    %2 = arith.cmpi ne, %1, %c0_i32_0 : i32
    scf.if %2 {
      %cst_9 = arith.constant 0.000000e+00 : f32
      %12 = vector.broadcast %cst_9 : f32 to vector<8x256xf32>
      %c0_10 = arith.constant 0 : index
      %c0_11 = arith.constant 0 : index
      %13 = vector.load %arg8[%c0_10, %c0_11] : memref<8x256xf32, #tpu.memory_space<vmem>>, vector<8x256xf32>
      tpu.vector_store %arg8[%c0_10, %c0_11], %12 {strides = array<i32>} : memref<8x256xf32, #tpu.memory_space<vmem>>, vector<8x256xf32>,
    } else {
    }
    %c0 = arith.constant 0 : index
    %c0_1 = arith.constant 0 : index
    %3 = vector.load %arg8[%c0, %c0_1] : memref<8x256xf32, #tpu.memory_space<vmem>>, vector<8x256xf32>
    %c0_2 = arith.constant 0 : index
    %c0_3 = arith.constant 0 : index
    %4 = vector.load %arg3[%c0_2, %c0_3] : memref<8x256xbf16, #tpu.memory_space<vmem>>, vector<8x256xbf16>
    %c0_4 = arith.constant 0 : index
    %c0_5 = arith.constant 0 : index
    %5 = vector.load %arg4[%c0_4, %c0_5] : memref<256x256xbf16, #tpu.memory_space<vmem>>, vector<256x256xbf16>
    %cst = arith.constant dense<0.000000e+00> : vector<8x256xf32>
    %6 = tpu.matmul %4, %5, %cst {dimension_numbers = #tpu.dot_dimension_numbers<[1], [0], [0], [1], [0, 0, 1, 1], [], []>} : vector<8x256xbf16>, vector<256x256xbf16>, vector<8x256xf32> -> vector<8x256xf32>
    %7 = arith.addf %3, %6 : vector<8x256xf32>
    %c0_6 = arith.constant 0 : index
    %c0_7 = arith.constant 0 : index
    %8 = vector.load %arg8[%c0_6, %c0_7] : memref<8x256xf32, #tpu.memory_space<vmem>>, vector<8x256xf32>
    tpu.vector_store %arg8[%c0_6, %c0_7], %7 {strides = array<i32>} : memref<8x256xf32, #tpu.memory_space<vmem>>, vector<8x256xf32>,
    %c8_i32 = arith.constant 8 : i32
    %9 = arith.cmpi eq, %arg2, %c8_i32 : i32
    %10 = arith.extui %9 : i1 to i32
    %c0_i32_8 = arith.constant 0 : i32
    %11 = arith.cmpi ne, %10, %c0_i32_8 : i32
    scf.if %11 {
      %c0_9 = arith.constant 0 : index
      %c0_10 = arith.constant 0 : index
      %12 = vector.load %arg8[%c0_9, %c0_10] : memref<8x256xf32, #tpu.memory_space<vmem>>, vector<8x256xf32>
      %c0_11 = arith.constant 0 : index
      %c0_12 = arith.constant 0 : index
      %13 = vector.load %arg5[%c0_11, %c0_12] : memref<1x256xf32, #tpu.memory_space<vmem>>, vector<1x256xf32>
      %14 = vector.broadcast %13 : vector<1x256xf32> to vector<8x256xf32>
      %15 = arith.mulf %12, %14 : vector<8x256xf32>
      %c0_13 = arith.constant 0 : index
      %c0_14 = arith.constant 0 : index
      %16 = vector.load %arg6[%c0_13, %c0_14] : memref<1x256xf32, #tpu.memory_space<vmem>>, vector<1x256xf32>
      %17 = vector.broadcast %16 : vector<1x256xf32> to vector<8x256xf32>
      %18 = arith.addf %15, %17 : vector<8x256xf32>
      %cst_15 = arith.constant 0.000000e+00 : f32
      %19 = vector.broadcast %cst_15 : f32 to vector<8x256xf32>
      %20 = arith.cmpf ogt, %18, %19 : vector<8x256xf32>
      %cst_16 = arith.constant 2.000000e-01 : f32
      %21 = vector.broadcast %cst_16 : f32 to vector<8x256xf32>
      %22 = arith.mulf %21, %18 : vector<8x256xf32>
      %23 = arith.select %20, %18, %22 : vector<8x256xi1>, vector<8x256xf32>
      %c0_17 = arith.constant 0 : index
      %c0_18 = arith.constant 0 : index
      %24 = vector.load %arg7[%c0_17, %c0_18] : memref<8x256xf32, #tpu.memory_space<vmem>>, vector<8x256xf32>
      tpu.vector_store %arg7[%c0_17, %c0_18], %23 {strides = array<i32>} : memref<8x256xf32, #tpu.memory_space<vmem>>, vector<8x256xf32>,
    } else {
    }
    return
  }
  func.func @transform_0(%arg0: i32, %arg1: i32, %arg2: i32) -> (i32, i32) {
    %c0_i32 = arith.constant 0 : i32
    return %arg0, %arg2 : i32, i32
  }
  func.func @transform_1(%arg0: i32, %arg1: i32, %arg2: i32) -> (i32, i32) {
    %c0_i32 = arith.constant 0 : i32
    return %arg2, %arg1 : i32, i32
  }
  func.func @transform_2(%arg0: i32, %arg1: i32, %arg2: i32) -> (i32, i32) {
    %c0_i32 = arith.constant 0 : i32
    %c0_i32_0 = arith.constant 0 : i32
    return %c0_i32, %arg1 : i32, i32
  }
  func.func @transform_3(%arg0: i32, %arg1: i32, %arg2: i32) -> (i32, i32) {
    %c0_i32 = arith.constant 0 : i32
    %c0_i32_0 = arith.constant 0 : i32
    return %c0_i32, %arg1 : i32, i32
  }
  func.func @transform_4(%arg0: i32, %arg1: i32, %arg2: i32) -> (i32, i32) {
    %c0_i32 = arith.constant 0 : i32
    return %arg0, %arg1 : i32, i32
  }
}

module attributes {stable_mosaic.version = 11 : i64} {
  func.func @_memory_kernel(%arg0: i32, %arg1: memref<8x256xf32, #tpu.memory_space<vmem>>, %arg2: memref<128x256xf32, #tpu.memory_space<vmem>>, %arg3: memref<8x256xf32, #tpu.memory_space<vmem>>, %arg4: memref<1x1xf32, #tpu.memory_space<vmem>>) attributes {dimension_semantics = [#tpu.dimension_semantics<arbitrary>], iteration_bounds = array<i64: 1>, scalar_prefetch = 0 : i64, scratch_operands = 0 : i64, tpu.core_type = #tpu.core_type<tc>, window_params = [{transform_indices = @transform_0, window_bounds = array<i64: 8, 256>}, {pipeline_mode = #tpu.pipeline_mode<synchronous>, transform_indices = @transform_1, window_bounds = array<i64: 128, 256>}, {transform_indices = @transform_2, window_bounds = array<i64: 8, 256>}, {pipeline_mode = #tpu.pipeline_mode<synchronous>, transform_indices = @transform_3, window_bounds = array<i64: 1, 1>}]} {
    %c0_i32 = arith.constant 0 : i32
    %0 = arith.cmpi eq, %arg0, %c0_i32 : i32
    %1 = arith.extui %0 : i1 to i32
    %c0_i32_0 = arith.constant 0 : i32
    %2 = arith.cmpi ne, %1, %c0_i32_0 : i32
    scf.if %2 {
      %cst_24 = arith.constant 0.000000e+00 : f32
      %61 = vector.broadcast %cst_24 : f32 to vector<1x1xf32>
      %c0_25 = arith.constant 0 : index
      %c0_26 = arith.constant 0 : index
      %62 = vector.load %arg4[%c0_25, %c0_26] : memref<1x1xf32, #tpu.memory_space<vmem>>, vector<1x1xf32>
      tpu.vector_store %arg4[%c0_25, %c0_26], %61 {strides = array<i32>} : memref<1x1xf32, #tpu.memory_space<vmem>>, vector<1x1xf32>,
    } else {
    }
    %c0 = arith.constant 0 : index
    %c0_1 = arith.constant 0 : index
    %3 = vector.load %arg1[%c0, %c0_1] : memref<8x256xf32, #tpu.memory_space<vmem>>, vector<8x256xf32>
    %c0_2 = arith.constant 0 : index
    %c0_3 = arith.constant 0 : index
    %4 = vector.load %arg2[%c0_2, %c0_3] : memref<128x256xf32, #tpu.memory_space<vmem>>, vector<128x256xf32>
    %cst = arith.constant dense<0.000000e+00> : vector<8x128xf32>
    %5 = tpu.matmul %3, %4, %cst {dimension_numbers = #tpu.dot_dimension_numbers<[1], [1], [0], [0], [0, 0, 1, 0], [], []>} : vector<8x256xf32>, vector<128x256xf32>, vector<8x128xf32> -> vector<8x128xf32>
    %cst_4 = arith.constant dense<0xFF800000> : vector<8xf32>
    %6 = vector.multi_reduction <maximumf>, %5, %cst_4 [1] : vector<8x128xf32> to vector<8xf32>
    %7 = vector.shape_cast %6 : vector<8xf32> to vector<8x1xf32>
    %8 = vector.broadcast %7 : vector<8x1xf32> to vector<8x128xf32>
    %9 = arith.subf %5, %8 : vector<8x128xf32>
    %10 = math.exp %9 : vector<8x128xf32>
    %cst_5 = arith.constant dense<0.000000e+00> : vector<8xf32>
    %11 = vector.multi_reduction <add>, %10, %cst_5 [1] : vector<8x128xf32> to vector<8xf32>
    %12 = vector.shape_cast %11 : vector<8xf32> to vector<8x1xf32>
    %13 = tpu.reciprocal %12 {approx = true} : vector<8x1xf32> -> vector<8x1xf32>
    %14 = vector.broadcast %13 : vector<8x1xf32> to vector<8x128xf32>
    %15 = arith.mulf %10, %14 : vector<8x128xf32>
    %cst_6 = arith.constant 2.500000e-03 : f32
    %16 = vector.broadcast %cst_6 : f32 to vector<8x128xf32>
    %17 = arith.subf %15, %16 : vector<8x128xf32>
    %cst_7 = arith.constant 0.000000e+00 : f32
    %18 = vector.broadcast %cst_7 : f32 to vector<8x128xf32>
    %19 = arith.maximumf %17, %18 : vector<8x128xf32>
    %20 = arith.mulf %19, %15 : vector<8x128xf32>
    %cst_8 = arith.constant 2.500000e-03 : f32
    %21 = vector.broadcast %cst_8 : f32 to vector<8x128xf32>
    %22 = arith.subf %15, %21 : vector<8x128xf32>
    %23 = math.absf %22 : vector<8x128xf32>
    %cst_9 = arith.constant 9.99999996E-13 : f32
    %24 = vector.broadcast %cst_9 : f32 to vector<8x128xf32>
    %25 = arith.addf %23, %24 : vector<8x128xf32>
    %26 = arith.divf %20, %25 : vector<8x128xf32>
    %27 = math.absf %26 : vector<8x128xf32>
    %cst_10 = arith.constant dense<0.000000e+00> : vector<8xf32>
    %28 = vector.multi_reduction <add>, %27, %cst_10 [1] : vector<8x128xf32> to vector<8xf32>
    %29 = vector.shape_cast %28 : vector<8xf32> to vector<8x1xf32>
    %cst_11 = arith.constant 9.99999996E-13 : f32
    %30 = vector.broadcast %cst_11 : f32 to vector<8x1xf32>
    %31 = arith.maximumf %29, %30 : vector<8x1xf32>
    %32 = tpu.reciprocal %31 {approx = true} : vector<8x1xf32> -> vector<8x1xf32>
    %33 = vector.broadcast %32 : vector<8x1xf32> to vector<8x128xf32>
    %34 = arith.mulf %26, %33 : vector<8x128xf32>
    %cst_12 = arith.constant dense<0.000000e+00> : vector<8x256xf32>
    %35 = tpu.matmul %34, %4, %cst_12 {dimension_numbers = #tpu.dot_dimension_numbers<[1], [0], [0], [1], [0, 0, 1, 1], [], []>} : vector<8x128xf32>, vector<128x256xf32>, vector<8x256xf32> -> vector<8x256xf32>
    %c0_13 = arith.constant 0 : index
    %c0_14 = arith.constant 0 : index
    %36 = vector.load %arg3[%c0_13, %c0_14] : memref<8x256xf32, #tpu.memory_space<vmem>>, vector<8x256xf32>
    tpu.vector_store %arg3[%c0_13, %c0_14], %35 {strides = array<i32>} : memref<8x256xf32, #tpu.memory_space<vmem>>, vector<8x256xf32>,
    %37 = tpu.iota {dimensions = array<i32: 0>} : vector<8x1xi32>
    %c8_i32 = arith.constant 8 : i32
    %38 = arith.muli %arg0, %c8_i32 : i32
    %39 = vector.broadcast %38 : i32 to vector<8x1xi32>
    %40 = arith.addi %37, %39 : vector<8x1xi32>
    %c2_i32 = arith.constant 2 : i32
    %41 = vector.broadcast %c2_i32 : i32 to vector<8x1xi32>
    %42 = arith.cmpi slt, %40, %41 : vector<8x1xi32>
    %43 = arith.extui %42 : vector<8x1xi1> to vector<8x1xi32>
    %44 = arith.sitofp %43 : vector<8x1xi32> to vector<8x1xf32>
    %cst_15 = arith.constant 9.99999996E-13 : f32
    %45 = vector.broadcast %cst_15 : f32 to vector<8x128xf32>
    %46 = arith.addf %34, %45 : vector<8x128xf32>
    %47 = math.log %46 : vector<8x128xf32>
    %48 = arith.mulf %34, %47 : vector<8x128xf32>
    %cst_16 = arith.constant dense<0.000000e+00> : vector<8xf32>
    %49 = vector.multi_reduction <add>, %48, %cst_16 [1] : vector<8x128xf32> to vector<8xf32>
    %50 = vector.shape_cast %49 : vector<8xf32> to vector<8x1xf32>
    %cst_17 = arith.constant 0.000000e+00 : f32
    %51 = vector.broadcast %cst_17 : f32 to vector<8x1xf32>
    %52 = arith.subf %51, %50 : vector<8x1xf32>
    %c0_18 = arith.constant 0 : index
    %c0_19 = arith.constant 0 : index
    %53 = vector.load %arg4[%c0_18, %c0_19] : memref<1x1xf32, #tpu.memory_space<vmem>>, vector<1x1xf32>
    %54 = arith.mulf %52, %44 : vector<8x1xf32>
    %cst_20 = arith.constant dense<0.000000e+00> : vector<1xf32>
    %55 = vector.multi_reduction <add>, %54, %cst_20 [0] : vector<8x1xf32> to vector<1xf32>
    %56 = vector.shape_cast %55 : vector<1xf32> to vector<1x1xf32>
    %cst_21 = arith.constant 5.000000e-01 : f32
    %57 = vector.broadcast %cst_21 : f32 to vector<1x1xf32>
    %58 = arith.mulf %56, %57 : vector<1x1xf32>
    %59 = arith.addf %53, %58 : vector<1x1xf32>
    %c0_22 = arith.constant 0 : index
    %c0_23 = arith.constant 0 : index
    %60 = vector.load %arg4[%c0_22, %c0_23] : memref<1x1xf32, #tpu.memory_space<vmem>>, vector<1x1xf32>
    tpu.vector_store %arg4[%c0_22, %c0_23], %59 {strides = array<i32>} : memref<1x1xf32, #tpu.memory_space<vmem>>, vector<1x1xf32>,
    return
  }
  func.func @transform_0(%arg0: i32) -> (i32, i32) {
    %c0_i32 = arith.constant 0 : i32
    %c0_i32_0 = arith.constant 0 : i32
    return %arg0, %c0_i32 : i32, i32
  }
  func.func @transform_1(%arg0: i32) -> (i32, i32) {
    %c0_i32 = arith.constant 0 : i32
    %c0_i32_0 = arith.constant 0 : i32
    %c0_i32_1 = arith.constant 0 : i32
    return %c0_i32, %c0_i32_0 : i32, i32
  }
  func.func @transform_2(%arg0: i32) -> (i32, i32) {
    %c0_i32 = arith.constant 0 : i32
    %c0_i32_0 = arith.constant 0 : i32
    return %arg0, %c0_i32 : i32, i32
  }
  func.func @transform_3(%arg0: i32) -> (i32, i32) {
    %c0_i32 = arith.constant 0 : i32
    %c0_i32_0 = arith.constant 0 : i32
    %c0_i32_1 = arith.constant 0 : i32
    return %c0_i32, %c0_i32_0 : i32, i32
  }
}

module attributes {stable_mosaic.version = 11 : i64} {
  func.func @_mm_affine_kernel(%arg0: i32, %arg1: i32, %arg2: i32, %arg3: memref<8x1024xbf16, #tpu.memory_space<vmem>>, %arg4: memref<1024x256xbf16, #tpu.memory_space<vmem>>, %arg5: memref<1x256xf32, #tpu.memory_space<vmem>>, %arg6: memref<1x256xf32, #tpu.memory_space<vmem>>, %arg7: memref<8x256xf32, #tpu.memory_space<vmem>>, %arg8: memref<8x256xf32, #tpu.memory_space<vmem>>) attributes {dimension_semantics = [#tpu.dimension_semantics<parallel>, #tpu.dimension_semantics<parallel>, #tpu.dimension_semantics<arbitrary>], iteration_bounds = array<i64: 1, 4, 1>, scalar_prefetch = 0 : i64, scratch_operands = 1 : i64, tpu.core_type = #tpu.core_type<tc>, window_params = [{transform_indices = @transform_0, window_bounds = array<i64: 8, 1024>}, {transform_indices = @transform_1, window_bounds = array<i64: 1024, 256>}, {transform_indices = @transform_2, window_bounds = array<i64: 1, 256>}, {transform_indices = @transform_3, window_bounds = array<i64: 1, 256>}, {transform_indices = @transform_4, window_bounds = array<i64: 8, 256>}]} {
    %c0_i32 = arith.constant 0 : i32
    %0 = arith.cmpi eq, %arg2, %c0_i32 : i32
    %1 = arith.extui %0 : i1 to i32
    %c0_i32_0 = arith.constant 0 : i32
    %2 = arith.cmpi ne, %1, %c0_i32_0 : i32
    scf.if %2 {
      %cst_10 = arith.constant 0.000000e+00 : f32
      %12 = vector.broadcast %cst_10 : f32 to vector<8x256xf32>
      %c0_11 = arith.constant 0 : index
      %c0_12 = arith.constant 0 : index
      %13 = vector.load %arg8[%c0_11, %c0_12] : memref<8x256xf32, #tpu.memory_space<vmem>>, vector<8x256xf32>
      tpu.vector_store %arg8[%c0_11, %c0_12], %12 {strides = array<i32>} : memref<8x256xf32, #tpu.memory_space<vmem>>, vector<8x256xf32>,
    } else {
    }
    %c0 = arith.constant 0 : index
    %c0_1 = arith.constant 0 : index
    %3 = vector.load %arg8[%c0, %c0_1] : memref<8x256xf32, #tpu.memory_space<vmem>>, vector<8x256xf32>
    %c0_2 = arith.constant 0 : index
    %c0_3 = arith.constant 0 : index
    %4 = vector.load %arg3[%c0_2, %c0_3] : memref<8x1024xbf16, #tpu.memory_space<vmem>>, vector<8x1024xbf16>
    %c0_4 = arith.constant 0 : index
    %c0_5 = arith.constant 0 : index
    %5 = vector.load %arg4[%c0_4, %c0_5] : memref<1024x256xbf16, #tpu.memory_space<vmem>>, vector<1024x256xbf16>
    %cst = arith.constant dense<0.000000e+00> : vector<8x256xf32>
    %6 = tpu.matmul %4, %5, %cst {dimension_numbers = #tpu.dot_dimension_numbers<[1], [0], [0], [1], [0, 0, 1, 1], [], []>} : vector<8x1024xbf16>, vector<1024x256xbf16>, vector<8x256xf32> -> vector<8x256xf32>
    %7 = arith.addf %3, %6 : vector<8x256xf32>
    %c0_6 = arith.constant 0 : index
    %c0_7 = arith.constant 0 : index
    %8 = vector.load %arg8[%c0_6, %c0_7] : memref<8x256xf32, #tpu.memory_space<vmem>>, vector<8x256xf32>
    tpu.vector_store %arg8[%c0_6, %c0_7], %7 {strides = array<i32>} : memref<8x256xf32, #tpu.memory_space<vmem>>, vector<8x256xf32>,
    %c0_i32_8 = arith.constant 0 : i32
    %9 = arith.cmpi eq, %arg2, %c0_i32_8 : i32
    %10 = arith.extui %9 : i1 to i32
    %c0_i32_9 = arith.constant 0 : i32
    %11 = arith.cmpi ne, %10, %c0_i32_9 : i32
    scf.if %11 {
      %c0_10 = arith.constant 0 : index
      %c0_11 = arith.constant 0 : index
      %12 = vector.load %arg8[%c0_10, %c0_11] : memref<8x256xf32, #tpu.memory_space<vmem>>, vector<8x256xf32>
      %c0_12 = arith.constant 0 : index
      %c0_13 = arith.constant 0 : index
      %13 = vector.load %arg5[%c0_12, %c0_13] : memref<1x256xf32, #tpu.memory_space<vmem>>, vector<1x256xf32>
      %14 = vector.broadcast %13 : vector<1x256xf32> to vector<8x256xf32>
      %15 = arith.mulf %12, %14 : vector<8x256xf32>
      %c0_14 = arith.constant 0 : index
      %c0_15 = arith.constant 0 : index
      %16 = vector.load %arg6[%c0_14, %c0_15] : memref<1x256xf32, #tpu.memory_space<vmem>>, vector<1x256xf32>
      %17 = vector.broadcast %16 : vector<1x256xf32> to vector<8x256xf32>
      %18 = arith.addf %15, %17 : vector<8x256xf32>
      %cst_16 = arith.constant 0.000000e+00 : f32
      %19 = vector.broadcast %cst_16 : f32 to vector<8x256xf32>
      %20 = arith.cmpf ogt, %18, %19 : vector<8x256xf32>
      %cst_17 = arith.constant 2.000000e-01 : f32
      %21 = vector.broadcast %cst_17 : f32 to vector<8x256xf32>
      %22 = arith.mulf %21, %18 : vector<8x256xf32>
      %23 = arith.select %20, %18, %22 : vector<8x256xi1>, vector<8x256xf32>
      %c0_18 = arith.constant 0 : index
      %c0_19 = arith.constant 0 : index
      %24 = vector.load %arg7[%c0_18, %c0_19] : memref<8x256xf32, #tpu.memory_space<vmem>>, vector<8x256xf32>
      tpu.vector_store %arg7[%c0_18, %c0_19], %23 {strides = array<i32>} : memref<8x256xf32, #tpu.memory_space<vmem>>, vector<8x256xf32>,
    } else {
    }
    return
  }
  func.func @transform_0(%arg0: i32, %arg1: i32, %arg2: i32) -> (i32, i32) {
    %c0_i32 = arith.constant 0 : i32
    return %arg0, %arg2 : i32, i32
  }
  func.func @transform_1(%arg0: i32, %arg1: i32, %arg2: i32) -> (i32, i32) {
    %c0_i32 = arith.constant 0 : i32
    return %arg2, %arg1 : i32, i32
  }
  func.func @transform_2(%arg0: i32, %arg1: i32, %arg2: i32) -> (i32, i32) {
    %c0_i32 = arith.constant 0 : i32
    %c0_i32_0 = arith.constant 0 : i32
    return %c0_i32, %arg1 : i32, i32
  }
  func.func @transform_3(%arg0: i32, %arg1: i32, %arg2: i32) -> (i32, i32) {
    %c0_i32 = arith.constant 0 : i32
    %c0_i32_0 = arith.constant 0 : i32
    return %c0_i32, %arg1 : i32, i32
  }
  func.func @transform_4(%arg0: i32, %arg1: i32, %arg2: i32) -> (i32, i32) {
    %c0_i32 = arith.constant 0 : i32
    return %arg0, %arg1 : i32, i32
  }
}

module attributes {stable_mosaic.version = 11 : i64} {
  func.func @_mm_affine_kernel(%arg0: i32, %arg1: i32, %arg2: i32, %arg3: memref<8x1024xbf16, #tpu.memory_space<vmem>>, %arg4: memref<1024x256xbf16, #tpu.memory_space<vmem>>, %arg5: memref<1x256xf32, #tpu.memory_space<vmem>>, %arg6: memref<1x256xf32, #tpu.memory_space<vmem>>, %arg7: memref<8x256xf32, #tpu.memory_space<vmem>>, %arg8: memref<8x256xf32, #tpu.memory_space<vmem>>) attributes {dimension_semantics = [#tpu.dimension_semantics<parallel>, #tpu.dimension_semantics<parallel>, #tpu.dimension_semantics<arbitrary>], iteration_bounds = array<i64: 1, 2, 1>, scalar_prefetch = 0 : i64, scratch_operands = 1 : i64, tpu.core_type = #tpu.core_type<tc>, window_params = [{transform_indices = @transform_0, window_bounds = array<i64: 8, 1024>}, {transform_indices = @transform_1, window_bounds = array<i64: 1024, 256>}, {transform_indices = @transform_2, window_bounds = array<i64: 1, 256>}, {transform_indices = @transform_3, window_bounds = array<i64: 1, 256>}, {transform_indices = @transform_4, window_bounds = array<i64: 8, 256>}]} {
    %c0_i32 = arith.constant 0 : i32
    %0 = arith.cmpi eq, %arg2, %c0_i32 : i32
    %1 = arith.extui %0 : i1 to i32
    %c0_i32_0 = arith.constant 0 : i32
    %2 = arith.cmpi ne, %1, %c0_i32_0 : i32
    scf.if %2 {
      %cst_10 = arith.constant 0.000000e+00 : f32
      %12 = vector.broadcast %cst_10 : f32 to vector<8x256xf32>
      %c0_11 = arith.constant 0 : index
      %c0_12 = arith.constant 0 : index
      %13 = vector.load %arg8[%c0_11, %c0_12] : memref<8x256xf32, #tpu.memory_space<vmem>>, vector<8x256xf32>
      tpu.vector_store %arg8[%c0_11, %c0_12], %12 {strides = array<i32>} : memref<8x256xf32, #tpu.memory_space<vmem>>, vector<8x256xf32>,
    } else {
    }
    %c0 = arith.constant 0 : index
    %c0_1 = arith.constant 0 : index
    %3 = vector.load %arg8[%c0, %c0_1] : memref<8x256xf32, #tpu.memory_space<vmem>>, vector<8x256xf32>
    %c0_2 = arith.constant 0 : index
    %c0_3 = arith.constant 0 : index
    %4 = vector.load %arg3[%c0_2, %c0_3] : memref<8x1024xbf16, #tpu.memory_space<vmem>>, vector<8x1024xbf16>
    %c0_4 = arith.constant 0 : index
    %c0_5 = arith.constant 0 : index
    %5 = vector.load %arg4[%c0_4, %c0_5] : memref<1024x256xbf16, #tpu.memory_space<vmem>>, vector<1024x256xbf16>
    %cst = arith.constant dense<0.000000e+00> : vector<8x256xf32>
    %6 = tpu.matmul %4, %5, %cst {dimension_numbers = #tpu.dot_dimension_numbers<[1], [0], [0], [1], [0, 0, 1, 1], [], []>} : vector<8x1024xbf16>, vector<1024x256xbf16>, vector<8x256xf32> -> vector<8x256xf32>
    %7 = arith.addf %3, %6 : vector<8x256xf32>
    %c0_6 = arith.constant 0 : index
    %c0_7 = arith.constant 0 : index
    %8 = vector.load %arg8[%c0_6, %c0_7] : memref<8x256xf32, #tpu.memory_space<vmem>>, vector<8x256xf32>
    tpu.vector_store %arg8[%c0_6, %c0_7], %7 {strides = array<i32>} : memref<8x256xf32, #tpu.memory_space<vmem>>, vector<8x256xf32>,
    %c0_i32_8 = arith.constant 0 : i32
    %9 = arith.cmpi eq, %arg2, %c0_i32_8 : i32
    %10 = arith.extui %9 : i1 to i32
    %c0_i32_9 = arith.constant 0 : i32
    %11 = arith.cmpi ne, %10, %c0_i32_9 : i32
    scf.if %11 {
      %c0_10 = arith.constant 0 : index
      %c0_11 = arith.constant 0 : index
      %12 = vector.load %arg8[%c0_10, %c0_11] : memref<8x256xf32, #tpu.memory_space<vmem>>, vector<8x256xf32>
      %c0_12 = arith.constant 0 : index
      %c0_13 = arith.constant 0 : index
      %13 = vector.load %arg5[%c0_12, %c0_13] : memref<1x256xf32, #tpu.memory_space<vmem>>, vector<1x256xf32>
      %14 = vector.broadcast %13 : vector<1x256xf32> to vector<8x256xf32>
      %15 = arith.mulf %12, %14 : vector<8x256xf32>
      %c0_14 = arith.constant 0 : index
      %c0_15 = arith.constant 0 : index
      %16 = vector.load %arg6[%c0_14, %c0_15] : memref<1x256xf32, #tpu.memory_space<vmem>>, vector<1x256xf32>
      %17 = vector.broadcast %16 : vector<1x256xf32> to vector<8x256xf32>
      %18 = arith.addf %15, %17 : vector<8x256xf32>
      %cst_16 = arith.constant 0.000000e+00 : f32
      %19 = vector.broadcast %cst_16 : f32 to vector<8x256xf32>
      %20 = arith.cmpf ogt, %18, %19 : vector<8x256xf32>
      %cst_17 = arith.constant 2.000000e-01 : f32
      %21 = vector.broadcast %cst_17 : f32 to vector<8x256xf32>
      %22 = arith.mulf %21, %18 : vector<8x256xf32>
      %23 = arith.select %20, %18, %22 : vector<8x256xi1>, vector<8x256xf32>
      %c0_18 = arith.constant 0 : index
      %c0_19 = arith.constant 0 : index
      %24 = vector.load %arg7[%c0_18, %c0_19] : memref<8x256xf32, #tpu.memory_space<vmem>>, vector<8x256xf32>
      tpu.vector_store %arg7[%c0_18, %c0_19], %23 {strides = array<i32>} : memref<8x256xf32, #tpu.memory_space<vmem>>, vector<8x256xf32>,
    } else {
    }
    return
  }
  func.func @transform_0(%arg0: i32, %arg1: i32, %arg2: i32) -> (i32, i32) {
    %c0_i32 = arith.constant 0 : i32
    return %arg0, %arg2 : i32, i32
  }
  func.func @transform_1(%arg0: i32, %arg1: i32, %arg2: i32) -> (i32, i32) {
    %c0_i32 = arith.constant 0 : i32
    return %arg2, %arg1 : i32, i32
  }
  func.func @transform_2(%arg0: i32, %arg1: i32, %arg2: i32) -> (i32, i32) {
    %c0_i32 = arith.constant 0 : i32
    %c0_i32_0 = arith.constant 0 : i32
    return %c0_i32, %arg1 : i32, i32
  }
  func.func @transform_3(%arg0: i32, %arg1: i32, %arg2: i32) -> (i32, i32) {
    %c0_i32 = arith.constant 0 : i32
    %c0_i32_0 = arith.constant 0 : i32
    return %c0_i32, %arg1 : i32, i32
  }
  func.func @transform_4(%arg0: i32, %arg1: i32, %arg2: i32) -> (i32, i32) {
    %c0_i32 = arith.constant 0 : i32
    return %arg0, %arg1 : i32, i32
  }
}

module attributes {stable_mosaic.version = 11 : i64} {
  func.func @_mm_affine_kernel(%arg0: i32, %arg1: i32, %arg2: i32, %arg3: memref<32x512xbf16, #tpu.memory_space<vmem>>, %arg4: memref<512x128xbf16, #tpu.memory_space<vmem>>, %arg5: memref<1x128xf32, #tpu.memory_space<vmem>>, %arg6: memref<1x128xf32, #tpu.memory_space<vmem>>, %arg7: memref<32x128xf32, #tpu.memory_space<vmem>>, %arg8: memref<32x128xf32, #tpu.memory_space<vmem>>) attributes {dimension_semantics = [#tpu.dimension_semantics<parallel>, #tpu.dimension_semantics<parallel>, #tpu.dimension_semantics<arbitrary>], iteration_bounds = array<i64: 1, 3, 1>, scalar_prefetch = 0 : i64, scratch_operands = 1 : i64, tpu.core_type = #tpu.core_type<tc>, window_params = [{transform_indices = @transform_0, window_bounds = array<i64: 32, 512>}, {transform_indices = @transform_1, window_bounds = array<i64: 512, 128>}, {transform_indices = @transform_2, window_bounds = array<i64: 1, 128>}, {transform_indices = @transform_3, window_bounds = array<i64: 1, 128>}, {transform_indices = @transform_4, window_bounds = array<i64: 32, 128>}]} {
    %c0_i32 = arith.constant 0 : i32
    %0 = arith.cmpi eq, %arg2, %c0_i32 : i32
    %1 = arith.extui %0 : i1 to i32
    %c0_i32_0 = arith.constant 0 : i32
    %2 = arith.cmpi ne, %1, %c0_i32_0 : i32
    scf.if %2 {
      %cst_10 = arith.constant 0.000000e+00 : f32
      %12 = vector.broadcast %cst_10 : f32 to vector<32x128xf32>
      %c0_11 = arith.constant 0 : index
      %c0_12 = arith.constant 0 : index
      %13 = vector.load %arg8[%c0_11, %c0_12] : memref<32x128xf32, #tpu.memory_space<vmem>>, vector<32x128xf32>
      tpu.vector_store %arg8[%c0_11, %c0_12], %12 {strides = array<i32>} : memref<32x128xf32, #tpu.memory_space<vmem>>, vector<32x128xf32>,
    } else {
    }
    %c0 = arith.constant 0 : index
    %c0_1 = arith.constant 0 : index
    %3 = vector.load %arg8[%c0, %c0_1] : memref<32x128xf32, #tpu.memory_space<vmem>>, vector<32x128xf32>
    %c0_2 = arith.constant 0 : index
    %c0_3 = arith.constant 0 : index
    %4 = vector.load %arg3[%c0_2, %c0_3] : memref<32x512xbf16, #tpu.memory_space<vmem>>, vector<32x512xbf16>
    %c0_4 = arith.constant 0 : index
    %c0_5 = arith.constant 0 : index
    %5 = vector.load %arg4[%c0_4, %c0_5] : memref<512x128xbf16, #tpu.memory_space<vmem>>, vector<512x128xbf16>
    %cst = arith.constant dense<0.000000e+00> : vector<32x128xf32>
    %6 = tpu.matmul %4, %5, %cst {dimension_numbers = #tpu.dot_dimension_numbers<[1], [0], [0], [1], [0, 0, 1, 1], [], []>} : vector<32x512xbf16>, vector<512x128xbf16>, vector<32x128xf32> -> vector<32x128xf32>
    %7 = arith.addf %3, %6 : vector<32x128xf32>
    %c0_6 = arith.constant 0 : index
    %c0_7 = arith.constant 0 : index
    %8 = vector.load %arg8[%c0_6, %c0_7] : memref<32x128xf32, #tpu.memory_space<vmem>>, vector<32x128xf32>
    tpu.vector_store %arg8[%c0_6, %c0_7], %7 {strides = array<i32>} : memref<32x128xf32, #tpu.memory_space<vmem>>, vector<32x128xf32>,
    %c0_i32_8 = arith.constant 0 : i32
    %9 = arith.cmpi eq, %arg2, %c0_i32_8 : i32
    %10 = arith.extui %9 : i1 to i32
    %c0_i32_9 = arith.constant 0 : i32
    %11 = arith.cmpi ne, %10, %c0_i32_9 : i32
    scf.if %11 {
      %c0_10 = arith.constant 0 : index
      %c0_11 = arith.constant 0 : index
      %12 = vector.load %arg8[%c0_10, %c0_11] : memref<32x128xf32, #tpu.memory_space<vmem>>, vector<32x128xf32>
      %c0_12 = arith.constant 0 : index
      %c0_13 = arith.constant 0 : index
      %13 = vector.load %arg5[%c0_12, %c0_13] : memref<1x128xf32, #tpu.memory_space<vmem>>, vector<1x128xf32>
      %14 = vector.broadcast %13 : vector<1x128xf32> to vector<32x128xf32>
      %15 = arith.mulf %12, %14 : vector<32x128xf32>
      %c0_14 = arith.constant 0 : index
      %c0_15 = arith.constant 0 : index
      %16 = vector.load %arg6[%c0_14, %c0_15] : memref<1x128xf32, #tpu.memory_space<vmem>>, vector<1x128xf32>
      %17 = vector.broadcast %16 : vector<1x128xf32> to vector<32x128xf32>
      %18 = arith.addf %15, %17 : vector<32x128xf32>
      %cst_16 = arith.constant 0.000000e+00 : f32
      %19 = vector.broadcast %cst_16 : f32 to vector<32x128xf32>
      %20 = arith.cmpf ogt, %18, %19 : vector<32x128xf32>
      %cst_17 = arith.constant 2.000000e-01 : f32
      %21 = vector.broadcast %cst_17 : f32 to vector<32x128xf32>
      %22 = arith.mulf %21, %18 : vector<32x128xf32>
      %23 = arith.select %20, %18, %22 : vector<32x128xi1>, vector<32x128xf32>
      %c0_18 = arith.constant 0 : index
      %c0_19 = arith.constant 0 : index
      %24 = vector.load %arg7[%c0_18, %c0_19] : memref<32x128xf32, #tpu.memory_space<vmem>>, vector<32x128xf32>
      tpu.vector_store %arg7[%c0_18, %c0_19], %23 {strides = array<i32>} : memref<32x128xf32, #tpu.memory_space<vmem>>, vector<32x128xf32>,
    } else {
    }
    return
  }
  func.func @transform_0(%arg0: i32, %arg1: i32, %arg2: i32) -> (i32, i32) {
    %c0_i32 = arith.constant 0 : i32
    return %arg0, %arg2 : i32, i32
  }
  func.func @transform_1(%arg0: i32, %arg1: i32, %arg2: i32) -> (i32, i32) {
    %c0_i32 = arith.constant 0 : i32
    return %arg2, %arg1 : i32, i32
  }
  func.func @transform_2(%arg0: i32, %arg1: i32, %arg2: i32) -> (i32, i32) {
    %c0_i32 = arith.constant 0 : i32
    %c0_i32_0 = arith.constant 0 : i32
    return %c0_i32, %arg1 : i32, i32
  }
  func.func @transform_3(%arg0: i32, %arg1: i32, %arg2: i32) -> (i32, i32) {
    %c0_i32 = arith.constant 0 : i32
    %c0_i32_0 = arith.constant 0 : i32
    return %c0_i32, %arg1 : i32, i32
  }
  func.func @transform_4(%arg0: i32, %arg1: i32, %arg2: i32) -> (i32, i32) {
    %c0_i32 = arith.constant 0 : i32
    return %arg0, %arg1 : i32, i32
  }
}

module attributes {stable_mosaic.version = 11 : i64} {
  func.func @_mm_affine_kernel(%arg0: i32, %arg1: i32, %arg2: i32, %arg3: memref<128x128xbf16, #tpu.memory_space<vmem>>, %arg4: memref<128x128xbf16, #tpu.memory_space<vmem>>, %arg5: memref<1x128xf32, #tpu.memory_space<vmem>>, %arg6: memref<1x128xf32, #tpu.memory_space<vmem>>, %arg7: memref<128x128xf32, #tpu.memory_space<vmem>>, %arg8: memref<128x128xf32, #tpu.memory_space<vmem>>) attributes {dimension_semantics = [#tpu.dimension_semantics<parallel>, #tpu.dimension_semantics<parallel>, #tpu.dimension_semantics<arbitrary>], iteration_bounds = array<i64: 1, 1, 3>, scalar_prefetch = 0 : i64, scratch_operands = 1 : i64, tpu.core_type = #tpu.core_type<tc>, window_params = [{transform_indices = @transform_0, window_bounds = array<i64: 128, 128>}, {transform_indices = @transform_1, window_bounds = array<i64: 128, 128>}, {transform_indices = @transform_2, window_bounds = array<i64: 1, 128>}, {transform_indices = @transform_3, window_bounds = array<i64: 1, 128>}, {transform_indices = @transform_4, window_bounds = array<i64: 128, 128>}]} {
    %c0_i32 = arith.constant 0 : i32
    %0 = arith.cmpi eq, %arg2, %c0_i32 : i32
    %1 = arith.extui %0 : i1 to i32
    %c0_i32_0 = arith.constant 0 : i32
    %2 = arith.cmpi ne, %1, %c0_i32_0 : i32
    scf.if %2 {
      %cst_9 = arith.constant 0.000000e+00 : f32
      %12 = vector.broadcast %cst_9 : f32 to vector<128x128xf32>
      %c0_10 = arith.constant 0 : index
      %c0_11 = arith.constant 0 : index
      %13 = vector.load %arg8[%c0_10, %c0_11] : memref<128x128xf32, #tpu.memory_space<vmem>>, vector<128x128xf32>
      tpu.vector_store %arg8[%c0_10, %c0_11], %12 {strides = array<i32>} : memref<128x128xf32, #tpu.memory_space<vmem>>, vector<128x128xf32>,
    } else {
    }
    %c0 = arith.constant 0 : index
    %c0_1 = arith.constant 0 : index
    %3 = vector.load %arg8[%c0, %c0_1] : memref<128x128xf32, #tpu.memory_space<vmem>>, vector<128x128xf32>
    %c0_2 = arith.constant 0 : index
    %c0_3 = arith.constant 0 : index
    %4 = vector.load %arg3[%c0_2, %c0_3] : memref<128x128xbf16, #tpu.memory_space<vmem>>, vector<128x128xbf16>
    %c0_4 = arith.constant 0 : index
    %c0_5 = arith.constant 0 : index
    %5 = vector.load %arg4[%c0_4, %c0_5] : memref<128x128xbf16, #tpu.memory_space<vmem>>, vector<128x128xbf16>
    %cst = arith.constant dense<0.000000e+00> : vector<128x128xf32>
    %6 = tpu.matmul %4, %5, %cst {dimension_numbers = #tpu.dot_dimension_numbers<[1], [0], [0], [1], [0, 0, 1, 1], [], []>} : vector<128x128xbf16>, vector<128x128xbf16>, vector<128x128xf32> -> vector<128x128xf32>
    %7 = arith.addf %3, %6 : vector<128x128xf32>
    %c0_6 = arith.constant 0 : index
    %c0_7 = arith.constant 0 : index
    %8 = vector.load %arg8[%c0_6, %c0_7] : memref<128x128xf32, #tpu.memory_space<vmem>>, vector<128x128xf32>
    tpu.vector_store %arg8[%c0_6, %c0_7], %7 {strides = array<i32>} : memref<128x128xf32, #tpu.memory_space<vmem>>, vector<128x128xf32>,
    %c2_i32 = arith.constant 2 : i32
    %9 = arith.cmpi eq, %arg2, %c2_i32 : i32
    %10 = arith.extui %9 : i1 to i32
    %c0_i32_8 = arith.constant 0 : i32
    %11 = arith.cmpi ne, %10, %c0_i32_8 : i32
    scf.if %11 {
      %c0_9 = arith.constant 0 : index
      %c0_10 = arith.constant 0 : index
      %12 = vector.load %arg8[%c0_9, %c0_10] : memref<128x128xf32, #tpu.memory_space<vmem>>, vector<128x128xf32>
      %c0_11 = arith.constant 0 : index
      %c0_12 = arith.constant 0 : index
      %13 = vector.load %arg5[%c0_11, %c0_12] : memref<1x128xf32, #tpu.memory_space<vmem>>, vector<1x128xf32>
      %14 = vector.broadcast %13 : vector<1x128xf32> to vector<128x128xf32>
      %15 = arith.mulf %12, %14 : vector<128x128xf32>
      %c0_13 = arith.constant 0 : index
      %c0_14 = arith.constant 0 : index
      %16 = vector.load %arg6[%c0_13, %c0_14] : memref<1x128xf32, #tpu.memory_space<vmem>>, vector<1x128xf32>
      %17 = vector.broadcast %16 : vector<1x128xf32> to vector<128x128xf32>
      %18 = arith.addf %15, %17 : vector<128x128xf32>
      %c0_15 = arith.constant 0 : index
      %c0_16 = arith.constant 0 : index
      %19 = vector.load %arg7[%c0_15, %c0_16] : memref<128x128xf32, #tpu.memory_space<vmem>>, vector<128x128xf32>
      tpu.vector_store %arg7[%c0_15, %c0_16], %18 {strides = array<i32>} : memref<128x128xf32, #tpu.memory_space<vmem>>, vector<128x128xf32>,
    } else {
    }
    return
  }
  func.func @transform_0(%arg0: i32, %arg1: i32, %arg2: i32) -> (i32, i32) {
    %c0_i32 = arith.constant 0 : i32
    return %arg0, %arg2 : i32, i32
  }
  func.func @transform_1(%arg0: i32, %arg1: i32, %arg2: i32) -> (i32, i32) {
    %c0_i32 = arith.constant 0 : i32
    return %arg2, %arg1 : i32, i32
  }
  func.func @transform_2(%arg0: i32, %arg1: i32, %arg2: i32) -> (i32, i32) {
    %c0_i32 = arith.constant 0 : i32
    %c0_i32_0 = arith.constant 0 : i32
    return %c0_i32, %arg1 : i32, i32
  }
  func.func @transform_3(%arg0: i32, %arg1: i32, %arg2: i32) -> (i32, i32) {
    %c0_i32 = arith.constant 0 : i32
    %c0_i32_0 = arith.constant 0 : i32
    return %c0_i32, %arg1 : i32, i32
  }
  func.func @transform_4(%arg0: i32, %arg1: i32, %arg2: i32) -> (i32, i32) {
    %c0_i32 = arith.constant 0 : i32
    return %arg0, %arg1 : i32, i32
  }
}

module attributes {stable_mosaic.version = 11 : i64} {
  func.func @_mse_kernel(%arg0: i32, %arg1: memref<8x128xf32, #tpu.memory_space<vmem>>, %arg2: memref<8x128xf32, #tpu.memory_space<vmem>>, %arg3: memref<1x1xf32, #tpu.memory_space<vmem>>) attributes {dimension_semantics = [#tpu.dimension_semantics<arbitrary>], iteration_bounds = array<i64: 1>, scalar_prefetch = 0 : i64, scratch_operands = 0 : i64, tpu.core_type = #tpu.core_type<tc>, window_params = [{transform_indices = @transform_0, window_bounds = array<i64: 8, 128>}, {transform_indices = @transform_1, window_bounds = array<i64: 8, 128>}, {pipeline_mode = #tpu.pipeline_mode<synchronous>, transform_indices = @transform_2, window_bounds = array<i64: 1, 1>}]} {
    %c0_i32 = arith.constant 0 : i32
    %0 = arith.cmpi eq, %arg0, %c0_i32 : i32
    %1 = arith.extui %0 : i1 to i32
    %c0_i32_0 = arith.constant 0 : i32
    %2 = arith.cmpi ne, %1, %c0_i32_0 : i32
    scf.if %2 {
      %cst_9 = arith.constant 0.000000e+00 : f32
      %17 = vector.broadcast %cst_9 : f32 to vector<1x1xf32>
      %c0_10 = arith.constant 0 : index
      %c0_11 = arith.constant 0 : index
      %18 = vector.load %arg3[%c0_10, %c0_11] : memref<1x1xf32, #tpu.memory_space<vmem>>, vector<1x1xf32>
      tpu.vector_store %arg3[%c0_10, %c0_11], %17 {strides = array<i32>} : memref<1x1xf32, #tpu.memory_space<vmem>>, vector<1x1xf32>,
    } else {
    }
    %c0 = arith.constant 0 : index
    %c0_1 = arith.constant 0 : index
    %3 = vector.load %arg1[%c0, %c0_1] : memref<8x128xf32, #tpu.memory_space<vmem>>, vector<8x128xf32>
    %c0_2 = arith.constant 0 : index
    %c0_3 = arith.constant 0 : index
    %4 = vector.load %arg2[%c0_2, %c0_3] : memref<8x128xf32, #tpu.memory_space<vmem>>, vector<8x128xf32>
    %5 = arith.subf %3, %4 : vector<8x128xf32>
    %c0_4 = arith.constant 0 : index
    %c0_5 = arith.constant 0 : index
    %6 = vector.load %arg3[%c0_4, %c0_5] : memref<1x1xf32, #tpu.memory_space<vmem>>, vector<1x1xf32>
    %7 = arith.mulf %5, %5 : vector<8x128xf32>
    %8 = vector.shape_cast %7 : vector<8x128xf32> to vector<1x8x128xf32>
    %cst = arith.constant dense<0.000000e+00> : vector<1xf32>
    %9 = vector.multi_reduction <add>, %8, %cst [1, 2] : vector<1x8x128xf32> to vector<1xf32>
    %10 = vector.shape_cast %9 : vector<1xf32> to vector<1x1x1xf32>
    %11 = vector.extract %10[0, 0, 0] : f32 from vector<1x1x1xf32>
    %12 = vector.broadcast %11 : f32 to vector<1x1xf32>
    %cst_6 = arith.constant 0.001953125 : f32
    %13 = vector.broadcast %cst_6 : f32 to vector<1x1xf32>
    %14 = arith.mulf %12, %13 : vector<1x1xf32>
    %15 = arith.addf %6, %14 : vector<1x1xf32>
    %c0_7 = arith.constant 0 : index
    %c0_8 = arith.constant 0 : index
    %16 = vector.load %arg3[%c0_7, %c0_8] : memref<1x1xf32, #tpu.memory_space<vmem>>, vector<1x1xf32>
    tpu.vector_store %arg3[%c0_7, %c0_8], %15 {strides = array<i32>} : memref<1x1xf32, #tpu.memory_space<vmem>>, vector<1x1xf32>,
    return
  }
  func.func @transform_0(%arg0: i32) -> (i32, i32) {
    %c0_i32 = arith.constant 0 : i32
    %c0_i32_0 = arith.constant 0 : i32
    return %arg0, %c0_i32 : i32, i32
  }
  func.func @transform_1(%arg0: i32) -> (i32, i32) {
    %c0_i32 = arith.constant 0 : i32
    %c0_i32_0 = arith.constant 0 : i32
    return %arg0, %c0_i32 : i32, i32
  }
  func.func @transform_2(%arg0: i32) -> (i32, i32) {
    %c0_i32 = arith.constant 0 : i32
    %c0_i32_0 = arith.constant 0 : i32
    %c0_i32_1 = arith.constant 0 : i32
    return %c0_i32, %c0_i32_0 : i32, i32
  }
}

</mosaic_0001>

<bundles_post_ra>
// kernel: memae_forward.10
= control target key start
LH: loop header
LB: loop body
LE: loop exit
PB: predicated region body
PF: predicated region fallthrough
CT: control target
= control target key end

     0   :  { %s658_s1 = inlined_call_operand.vmem [shape: bf16[128,128], index: 1, kind: input, shape index: {}]   ;;  %s659_s2 = inlined_call_operand.vmem [shape: f32[1,128], index: 2, kind: input, shape index: {}]   ;;  %s660_s3 = inlined_call_operand.vmem [shape: f32[1,128], index: 3, kind: input, shape index: {}]   ;;  %s661_s0 = inlined_call_operand.vmem [shape: bf16[128,128], index: 0, kind: input, shape index: {}]   ;;  %s662_s4 = inlined_call_operand.vmem [shape: f32[128,128], index: 4, kind: output, shape index: {}]  }
   0x1   :  { %v468_v0 = vld [vmem:[%s658_s1 + $0x38] sm:$0xff]  ;;  %v467_v1 = vld [vmem:[%s658_s1 + $0x30] sm:$0xff]  ;;  %v466_v2 = vld [vmem:[%s658_s1 + $0x28] sm:$0xff] }
   0x2   :  { %181 = vmatpush.bf16.msra.mxu0 %v468_v0  ;;  %469 = vmatpush.bf16.msra.mxu1 %v468_v0  ;;  %v465_v3 = vld [vmem:[%s658_s1 + $0x20] sm:$0xff]  ;;  %v464_v4 = vld [vmem:[%s658_s1 + $0x18] sm:$0xff]  ;;  %v463_v5 = vld [vmem:[%s658_s1 + $0x10] sm:$0xff] }
   0x3   :  { %470 = vmatpush.bf16.msra.mxu2 %v468_v0  ;;  %471 = vmatpush.bf16.msra.mxu3 %v468_v0  ;;  %v462_v6 = vld [vmem:[%s658_s1 + $0x8] sm:$0xff]  ;;  %v461_v7 = vld [vmem:[%s658_s1] sm:$0xff]  ;;  %v455_v9 = vld [vmem:[%s661_s0 + $0x10] sm:$0xff] }
   0x4   :  { %v453_v8 = vld [vmem:[%s661_s0] sm:$0xff]  ;;  %v459_v11 = vld [vmem:[%s661_s0 + $0x30] sm:$0xff]  ;;  %v454_v12 = vld [vmem:[%s661_s0 + $0x8] sm:$0xff] }
   0x5   :  { %v457_v10 = vld [vmem:[%s661_s0 + $0x20] sm:$0xff]  ;;  %v456_v13 = vld [vmem:[%s661_s0 + $0x18] sm:$0xff]  ;;  %v458_v14 = vld [vmem:[%s661_s0 + $0x28] sm:$0xff] }
   0x6   :  { %182 = vmatpush.bf16.msra.mxu0 %v467_v1  ;;  %472 = vmatpush.bf16.msra.mxu1 %v467_v1  ;;  %v460_v15 = vld [vmem:[%s661_s0 + $0x38] sm:$0xff]  ;;  %v571_v16 = vld [vmem:[%s659_s2] ss:$0 sm:$0xff] }
   0x7   :  { %473 = vmatpush.bf16.msra.mxu2 %v467_v1  ;;  %474 = vmatpush.bf16.msra.mxu3 %v467_v1  ;;  %v576_v17 = vld [vmem:[%s660_s3] ss:$0 sm:$0xff] }
   0xa   :  { %183 = vmatpush.bf16.msra.mxu0 %v466_v2  ;;  %475 = vmatpush.bf16.msra.mxu1 %v466_v2 }
   0xb   :  { %476 = vmatpush.bf16.msra.mxu2 %v466_v2  ;;  %477 = vmatpush.bf16.msra.mxu3 %v466_v2 }
   0xe   :  { %184 = vmatpush.bf16.msra.mxu0 %v465_v3  ;;  %478 = vmatpush.bf16.msra.mxu1 %v465_v3 }
   0xf   :  { %479 = vmatpush.bf16.msra.mxu2 %v465_v3  ;;  %480 = vmatpush.bf16.msra.mxu3 %v465_v3 }
  0x12   :  { %185 = vmatpush.bf16.msra.mxu0 %v464_v4  ;;  %481 = vmatpush.bf16.msra.mxu1 %v464_v4 }
  0x13   :  { %482 = vmatpush.bf16.msra.mxu2 %v464_v4  ;;  %483 = vmatpush.bf16.msra.mxu3 %v464_v4 }
  0x16   :  { %186 = vmatpush.bf16.msra.mxu0 %v463_v5  ;;  %484 = vmatpush.bf16.msra.mxu1 %v463_v5 }
  0x17   :  { %485 = vmatpush.bf16.msra.mxu2 %v463_v5  ;;  %486 = vmatpush.bf16.msra.mxu3 %v463_v5 }
  0x1a   :  { %187 = vmatpush.bf16.msra.mxu0 %v462_v6  ;;  %487 = vmatpush.bf16.msra.mxu1 %v462_v6 }
  0x1b   :  { %488 = vmatpush.bf16.msra.mxu2 %v462_v6  ;;  %489 = vmatpush.bf16.msra.mxu3 %v462_v6 }
  0x1e   :  { %188 = vmatpush.bf16.msra.mxu0 %v461_v7  ;;  %490 = vmatpush.bf16.msra.mxu1 %v461_v7 }
  0x1f   :  { %491 = vmatpush.bf16.msra.mxu2 %v461_v7  ;;  %492 = vmatpush.bf16.msra.mxu3 %v461_v7 }
  0x21   :  { %189 = vmatmul.bf16.vlgmr.msra.gmra.mxu0 %v453_v8  ;;  %199 = vmatmul.bf16.vlgmr.msra.gmra.mxu1 %v455_v9 }
  0x22   :  { %209 = vmatmul.bf16.vlgmr.msra.gmra.mxu2 %v457_v10  ;;  %219 = vmatmul.bf16.vlgmr.msra.gmra.mxu3 %v459_v11 }
  0x31   :  { %194 = vmatmul.bf16.gmra.mxu0 %v454_v12  ;;  %204 = vmatmul.bf16.gmra.mxu1 %v456_v13 }
  0x32   :  { %214 = vmatmul.bf16.gmra.mxu2 %v458_v14  ;;  %224 = vmatmul.bf16.gmra.mxu3 %v460_v15 }
  0x9e   :  { %v190_v18 = vpop.f32.mrf.mxu0  ;;  %v200_v19 = vpop.f32.mrf.mxu1 }
  0x9f   :  { %v285_v20 = vmul.f32 %v571_v16, %v190_v18  ;;  %v289_v21 = vmul.f32 %v571_v16, %v200_v19 }
  0xa1   :  { %v305_v22 = vadd.f32 %v576_v17, %v285_v20  ;;  %v309_v23 = vadd.f32 %v576_v17, %v289_v21 }
  0xa3   :  { %vm321_vm0 = vcmp.gt.f32.partialorder %v305_v22, 0.0  ;;  %v337_v24 = vmul.f32 0.2, %v305_v22  ;;  %vm325_vm1 = vcmp.gt.f32.partialorder %v309_v23, 0.0  ;;  %v341_v25 = vmul.f32 0.2, %v309_v23 }
  0xa5   :  { %v353_v26 = vsel %vm321_vm0, %v305_v22, %v337_v24  ;;  %v357_v27 = vsel %vm325_vm1, %v309_v23, %v341_v25  ;;  %v210_v28 = vpop.f32.mrf.mxu2  ;;  %v220_v29 = vpop.f32.mrf.mxu3 }
  0xa6   :  { %369 = vst [vmem:[%s662_s4] sm:$0xff] %v353_v26  ;;  %v293_v30 = vmul.f32 %v571_v16, %v210_v28  ;;  %v297_v31 = vmul.f32 %v571_v16, %v220_v29  ;;  %v192_v32 = vpop.f32.mrf.mxu0  ;;  %v202_v33 = vpop.f32.mrf.mxu1 }
  0xa7   :  { %373 = vst [vmem:[%s662_s4 + $0x20] sm:$0xff] %v357_v27  ;;  %v286_v34 = vmul.f32 %v571_v16, %v192_v32  ;;  %v290_v35 = vmul.f32 %v571_v16, %v202_v33 }
  0xa8   :  { %v313_v36 = vadd.f32 %v576_v17, %v293_v30  ;;  %v317_v37 = vadd.f32 %v576_v17, %v297_v31 }
  0xa9   :  { %v306_v38 = vadd.f32 %v576_v17, %v286_v34  ;;  %v310_v39 = vadd.f32 %v576_v17, %v290_v35 }
  0xaa   :  { %vm329_vm2 = vcmp.gt.f32.partialorder %v313_v36, 0.0  ;;  %v345_v40 = vmul.f32 0.2, %v313_v36  ;;  %vm333_vm3 = vcmp.gt.f32.partialorder %v317_v37, 0.0  ;;  %v349_v41 = vmul.f32 0.2, %v317_v37 }
  0xab   :  { %vm322_vm4 = vcmp.gt.f32.partialorder %v306_v38, 0.0  ;;  %v338_v42 = vmul.f32 0.2, %v306_v38  ;;  %vm326_vm5 = vcmp.gt.f32.partialorder %v310_v39, 0.0  ;;  %v342_v43 = vmul.f32 0.2, %v310_v39 }
  0xac   :  { %v361_v44 = vsel %vm329_vm2, %v313_v36, %v345_v40  ;;  %v365_v45 = vsel %vm333_vm3, %v317_v37, %v349_v41 }
  0xad   :  { %377 = vst [vmem:[%s662_s4 + $0x40] sm:$0xff] %v361_v44  ;;  %v354_v46 = vsel %vm322_vm4, %v306_v38, %v338_v42  ;;  %v358_v47 = vsel %vm326_vm5, %v310_v39, %v342_v43  ;;  %v212_v48 = vpop.f32.mrf.mxu2  ;;  %v222_v49 = vpop.f32.mrf.mxu3 }
  0xae   :  { %381 = vst [vmem:[%s662_s4 + $0x60] sm:$0xff] %v365_v45  ;;  %v294_v50 = vmul.f32 %v571_v16, %v212_v48  ;;  %v298_v51 = vmul.f32 %v571_v16, %v222_v49  ;;  %v195_v52 = vpop.f32.mrf.mxu0  ;;  %v205_v53 = vpop.f32.mrf.mxu1 }
  0xaf   :  { %370 = vst [vmem:[%s662_s4 + $0x8] sm:$0xff] %v354_v46  ;;  %v287_v54 = vmul.f32 %v571_v16, %v195_v52  ;;  %v291_v55 = vmul.f32 %v571_v16, %v205_v53 }
  0xb0   :  { %374 = vst [vmem:[%s662_s4 + $0x28] sm:$0xff] %v358_v47  ;;  %v314_v56 = vadd.f32 %v576_v17, %v294_v50  ;;  %v318_v57 = vadd.f32 %v576_v17, %v298_v51 }
  0xb1   :  { %v307_v58 = vadd.f32 %v576_v17, %v287_v54  ;;  %v311_v59 = vadd.f32 %v576_v17, %v291_v55 }
  0xb2   :  { %vm330_vm6 = vcmp.gt.f32.partialorder %v314_v56, 0.0  ;;  %v346_v60 = vmul.f32 0.2, %v314_v56  ;;  %vm334_vm7 = vcmp.gt.f32.partialorder %v318_v57, 0.0  ;;  %v350_v61 = vmul.f32 0.2, %v318_v57 }
  0xb3   :  { %vm323_vm8 = vcmp.gt.f32.partialorder %v307_v58, 0.0  ;;  %v339_v62 = vmul.f32 0.2, %v307_v58  ;;  %vm327_vm9 = vcmp.gt.f32.partialorder %v311_v59, 0.0  ;;  %v343_v63 = vmul.f32 0.2, %v311_v59 }
  0xb4   :  { %v362_v0 = vsel %vm330_vm6, %v314_v56, %v346_v60  ;;  %v366_v1 = vsel %vm334_vm7, %v318_v57, %v350_v61 }
  0xb5   :  { %378 = vst [vmem:[%s662_s4 + $0x48] sm:$0xff] %v362_v0  ;;  %v355_v2 = vsel %vm323_vm8, %v307_v58, %v339_v62  ;;  %v359_v3 = vsel %vm327_vm9, %v311_v59, %v343_v63  ;;  %v215_v4 = vpop.f32.mrf.mxu2  ;;  %v225_v5 = vpop.f32.mrf.mxu3 }
  0xb6   :  { %382 = vst [vmem:[%s662_s4 + $0x68] sm:$0xff] %v366_v1  ;;  %v295_v6 = vmul.f32 %v571_v16, %v215_v4  ;;  %v299_v7 = vmul.f32 %v571_v16, %v225_v5  ;;  %v197_v8 = vpop.f32.mrf.mxu0  ;;  %v207_v9 = vpop.f32.mrf.mxu1 }
  0xb7   :  { %371 = vst [vmem:[%s662_s4 + $0x10] sm:$0xff] %v355_v2  ;;  %v288_v10 = vmul.f32 %v571_v16, %v197_v8  ;;  %v292_v11 = vmul.f32 %v571_v16, %v207_v9 }
  0xb8   :  { %375 = vst [vmem:[%s662_s4 + $0x30] sm:$0xff] %v359_v3  ;;  %v315_v12 = vadd.f32 %v576_v17, %v295_v6  ;;  %v319_v13 = vadd.f32 %v576_v17, %v299_v7 }
  0xb9   :  { %v308_v14 = vadd.f32 %v576_v17, %v288_v10  ;;  %v312_v15 = vadd.f32 %v576_v17, %v292_v11 }
  0xba   :  { %vm331_vm10 = vcmp.gt.f32.partialorder %v315_v12, 0.0  ;;  %v347_v18 = vmul.f32 0.2, %v315_v12  ;;  %vm335_vm11 = vcmp.gt.f32.partialorder %v319_v13, 0.0  ;;  %v351_v19 = vmul.f32 0.2, %v319_v13 }
  0xbb   :  { %vm324_vm12 = vcmp.gt.f32.partialorder %v308_v14, 0.0  ;;  %v340_v20 = vmul.f32 0.2, %v308_v14  ;;  %vm328_vm13 = vcmp.gt.f32.partialorder %v312_v15, 0.0  ;;  %v344_v21 = vmul.f32 0.2, %v312_v15 }
  0xbc   :  { %v363_v22 = vsel %vm331_vm10, %v315_v12, %v347_v18  ;;  %v367_v23 = vsel %vm335_vm11, %v319_v13, %v351_v19 }
  0xbd   :  { %379 = vst [vmem:[%s662_s4 + $0x50] sm:$0xff] %v363_v22  ;;  %v356_v24 = vsel %vm324_vm12, %v308_v14, %v340_v20  ;;  %v360_v25 = vsel %vm328_vm13, %v312_v15, %v344_v21  ;;  %v217_v26 = vpop.f32.mrf.mxu2  ;;  %v227_v27 = vpop.f32.mrf.mxu3 }
  0xbe   :  { %383 = vst [vmem:[%s662_s4 + $0x70] sm:$0xff] %v367_v23  ;;  %v296_v28 = vmul.f32 %v571_v16, %v217_v26  ;;  %v300_v29 = vmul.f32 %v571_v16, %v227_v27 }
  0xbf   :  { %372 = vst [vmem:[%s662_s4 + $0x18] sm:$0xff] %v356_v24 }
  0xc0   :  { %376 = vst [vmem:[%s662_s4 + $0x38] sm:$0xff] %v360_v25  ;;  %v316_v30 = vadd.f32 %v576_v17, %v296_v28  ;;  %v320_v31 = vadd.f32 %v576_v17, %v300_v29 }
  0xc2   :  { %vm332_vm14 = vcmp.gt.f32.partialorder %v316_v30, 0.0  ;;  %v348_v32 = vmul.f32 0.2, %v316_v30  ;;  %vm336_vm15 = vcmp.gt.f32.partialorder %v320_v31, 0.0  ;;  %v352_v33 = vmul.f32 0.2, %v320_v31 }
  0xc4   :  { %v364_v34 = vsel %vm332_vm14, %v316_v30, %v348_v32  ;;  %v368_v35 = vsel %vm336_vm15, %v320_v31, %v352_v33 }
  0xc5   :  { %380 = vst [vmem:[%s662_s4 + $0x58] sm:$0xff] %v364_v34 }
  0xc6   :  { %384 = vst [vmem:[%s662_s4 + $0x78] sm:$0xff] %v368_v35 }

// kernel: memae_forward.11
= control target key start
LH: loop header
LB: loop body
LE: loop exit
PB: predicated region body
PF: predicated region fallthrough
CT: control target
= control target key end

     0   :  { %s813_s15 = smov 0   ;;  %s815_s16 = smov 0   ;;  %s915_s0 = inlined_call_operand.vmem [shape: bf16[32,896], index: 0, kind: input, shape index: {}]   ;;  %s916_s1 = inlined_call_operand.vmem [shape: bf16[896,128], index: 1, kind: input, shape index: {}]   ;;  %s917_s2 = inlined_call_operand.vmem [shape: f32[1,128], index: 2, kind: input, shape index: {}]   ;;  %s918_s3 = inlined_call_operand.vmem [shape: f32[1,128], index: 3, kind: input, shape index: {}]   ;;  %s919_s4 = inlined_call_operand.vmem [shape: f32[32,128], index: 4, kind: output, shape index: {}]  }
   0x1   :  { %s817_s17 = smov 0   ;;  %s819_s18 = smov 0  }
   0x2   :  { %s821_s19 = smov 0  }
   0x3 LB: > { %s26_s20 = sadd.s32 1, %s781_s18  ;;  %p49_p1 = scmp.ne.s32.totalorder %s773_s16, %s769_s15  ;;  %s785_s19 = sphi %s821_s19, %s14_s19   ;;  %s781_s18 = sphi %s819_s18, %s923_s18   ;;  %s777_s17 = sphi %s817_s17, %s922_s17   ;;  %s773_s16 = sphi %s815_s16, %s921_s16   ;;  %s769_s15 = sphi %s813_s15, %s920_s15  }
   0x4   : > { %p27_p0 = scmp.ge.s32.totalorder %s26_s20, 7  ;;  %p50_p2 = scmp.eq.s32.totalorder %s785_s19, 0 }
   0x5   : > { %s42_s22 = sadd.s32 1, %s773_s16  ;;  %p633_p5 = scmp.ge.s32.totalorder %s785_s19, 7 }
   0x6   : > { %s925_s20 = smov (%p27_p0, %s26_s20), 0  ;;  %p51_p3 = por %p50_p2, %p49_p1 }
   0x7   : > { %s38_s21 = ssub.s32 %s781_s18, %s925_s20  ;;  %195 = sbr.rel (%p633_p5) target bundleno = 20 (0x14), region = 24 }
   0x8   : > { %p40_p4 = scmp.eq.s32.totalorder %s38_s21, 0 }
   0xa   : > { %s848_s23 = scalar_select %p40_p4, %s773_s16, %s42_s22  }
   0xc   : > { %198 = sbr.rel (!%p51_p3) target bundleno = 20 (0x14), region = 28  ;;  %s200_s24 = sand.u32 (%p51_p3), 1, %s773_s16  }
   0xd   : > { %s635_s25 = sshll.u32 (%p51_p3), %s781_s18, 2  ;;  %s634_s26 = sshll.u32 (%p51_p3), %s200_s24, 4 }
   0xe   : > { %s207_s29 = scalar_lea.vmem (%p51_p3), %s915_s0, %s635_s25  ;;  %s202_s30 = scalar_lea.vmem (%p51_p3), [#allocation3], %s634_s26 }
   0xf   : > { %v224_v0 = vld [vmem:[%s207_s29] sm:$0xf] (%p51_p3)  ;;  %v226_v1 = vld [vmem:[%s207_s29 + $0x1c] sm:$0xf] (%p51_p3)  ;;  %v228_v2 = vld [vmem:[%s207_s29 + $0x38] sm:$0xf] (%p51_p3) }
  0x10   : > { %225 = vst [vmem:[%s202_s30] sm:$0xf] (%p51_p3), %v224_v0  ;;  %v230_v3 = vld [vmem:[%s207_s29 + $0x54] sm:$0xf] (%p51_p3) }
  0x11   : > { %227 = vst [vmem:[%s202_s30 + $0x4] sm:$0xf] %v226_v1 }
  0x12   : > { %229 = vst [vmem:[%s202_s30 + $0x8] sm:$0xf] %v228_v2 }
  0x13   : > { %231 = vst [vmem:[%s202_s30 + $0xc] sm:$0xf] %v230_v3 }
  0x14 PF: > { %p636_p6 = scmp.ge.s32.totalorder %s785_s19, 1  ;;  %p274_p7 = scmp.lt.s32.totalorder %s785_s19, 8 }
  0x16   : > { %p275_p8 = pnand %p636_p6, %p274_p7 }
  0x17   : > { %s281_s5 = sand.u32 (!%p275_p8), 1, %s769_s15   ;;  %s638_s6 = sshll.u32 (!%p275_p8), %s777_s17, 4 }
  0x18   : > { %278 = sbr.rel (%p275_p8) target bundleno = 224 (0xe0), region = 73  ;;  %s860_s7 = sshll.u32 (!%p275_p8), %s281_s5, 4 }
  0x19   : > { %p325_p9 = scmp.lt.s32.totalorder (!%p275_p8), %s638_s6, 111  ;;  %s283_s12 = scalar_lea.vmem (!%p275_p8), [#allocation3], %s860_s7 }
  0x1a   : > { %p640_p10 = scmp.ne.s32.totalorder (!%p275_p8), %s777_s17, 0 }
  0x1d   : > { %s927_s6 = smov (!%p325_p9, %s638_s6), 111  ;;  %351 = sbr.rel (%p640_p10) target bundleno = 39 (0x27), region = 81 }
  0x1e   : > { %s639_s8 = sshll.u32 %s927_s6, 2 }
  0x1f   : > { %s865_s11 = scalar_lea.vmem %s916_s1, %s639_s8 }
  0x22   : > { %v787_v4 = vmov 0.0  }
  0x23   : > { %352 = vst [vmem:[#allocation2 + $0x10] sm:$0xff] %v787_v4 }
  0x24   : > { %353 = vst [vmem:[#allocation2] sm:$0xff] %v787_v4 }
  0x25   : > { %354 = vst [vmem:[#allocation2 + $0x18] sm:$0xff] %v787_v4 }
  0x26   : > { %355 = vst [vmem:[#allocation2 + $0x8] sm:$0xff] %v787_v4 }
  0x27 PF: > { %v695_v5 = vld [vmem:[%s865_s11 + $0x38] sm:$0xff]  ;;  %v694_v6 = vld [vmem:[%s865_s11 + $0x30] sm:$0xff]  ;;  %v693_v7 = vld [vmem:[%s865_s11 + $0x28] sm:$0xff]  ;;  %p681_p11 = scmp.ne.s32.totalorder %s777_s17, 6 }
  0x28   : > { %440 = vmatpush.bf16.msra.mxu0 %v695_v5  ;;  %696 = vmatpush.bf16.msra.mxu1 %v695_v5  ;;  %v692_v8 = vld [vmem:[%s865_s11 + $0x20] sm:$0xff]  ;;  %v691_v9 = vld [vmem:[%s865_s11 + $0x18] sm:$0xff]  ;;  %v690_v10 = vld [vmem:[%s865_s11 + $0x10] sm:$0xff] }
  0x29   : > { %v689_v11 = vld [vmem:[%s865_s11 + $0x8] sm:$0xff]  ;;  %v688_v12 = vld [vmem:[%s865_s11] sm:$0xff] }
  0x2a   : > { %v686_v13 = vld [vmem:[%s283_s12] sm:$0xff]  ;;  %v687_v14 = vld [vmem:[%s283_s12 + $0x8] sm:$0xff] }
  0x2b   : > { %v356_v15 = vld [vmem:[#allocation2 + $0x10] sm:$0xff]  ;;  %v357_v21 = vld [vmem:[#allocation2] sm:$0xff] }
  0x2c   : > { %441 = vmatpush.bf16.msra.mxu0 %v694_v6  ;;  %697 = vmatpush.bf16.msra.mxu1 %v694_v6  ;;  %v358_v16 = vld [vmem:[#allocation2 + $0x18] sm:$0xff] }
  0x2d   : > { %v359_v22 = vld [vmem:[#allocation2 + $0x8] sm:$0xff] }
  0x30   : > { %442 = vmatpush.bf16.msra.mxu0 %v693_v7  ;;  %698 = vmatpush.bf16.msra.mxu1 %v693_v7 }
  0x34   : > { %443 = vmatpush.bf16.msra.mxu0 %v692_v8  ;;  %699 = vmatpush.bf16.msra.mxu1 %v692_v8 }
  0x38   : > { %444 = vmatpush.bf16.msra.mxu0 %v691_v9  ;;  %700 = vmatpush.bf16.msra.mxu1 %v691_v9 }
  0x3c   : > { %445 = vmatpush.bf16.msra.mxu0 %v690_v10  ;;  %701 = vmatpush.bf16.msra.mxu1 %v690_v10 }
  0x40   : > { %446 = vmatpush.bf16.msra.mxu0 %v689_v11  ;;  %702 = vmatpush.bf16.msra.mxu1 %v689_v11 }
  0x44   : > { %447 = vmatpush.bf16.msra.mxu0 %v688_v12  ;;  %703 = vmatpush.bf16.msra.mxu1 %v688_v12 }
  0x47   : > { %448 = vmatmul.bf16.vlgmr.msra.gmra.mxu0 %v686_v13  ;;  %453 = vmatmul.bf16.vlgmr.msra.gmra.mxu1 %v687_v14 }
  0xc4   : > { %v449_v17 = vpop.f32.mrf.mxu0  ;;  %v454_v18 = vpop.f32.mrf.mxu1 }
  0xc5   : > { %v459_v19 = vadd.f32 %v449_v17, %v356_v15  ;;  %v461_v20 = vadd.f32 %v454_v18, %v358_v16 }
  0xc7   : > { %463 = vst [vmem:[#allocation2 + $0x10] sm:$0xff] %v459_v19 }
  0xc8   : > { %465 = vst [vmem:[#allocation2 + $0x18] sm:$0xff] %v461_v20 }
  0xcc   : > { %v451_v23 = vpop.f32.mrf.mxu0  ;;  %v456_v24 = vpop.f32.mrf.mxu1  ;;  %470 = sbr.rel (%p681_p11) target bundleno = 224 (0xe0), region = 85 }
  0xcd   : > { %v460_v25 = vadd.f32 %v451_v23, %v357_v21  ;;  %v462_v26 = vadd.f32 %v456_v24, %v359_v22 }
  0xcf   : > { %464 = vst [vmem:[#allocation2] sm:$0xff] %v460_v25 }
  0xd0   : > { %466 = vst [vmem:[#allocation2 + $0x8] sm:$0xff] %v462_v26 }
  0xd1   : > { %v471_v27 = vld [vmem:[#allocation2 + $0x10] sm:$0xff]  ;;  %v745_v28 = vld [vmem:[%s917_s2] ss:$0 sm:$0xff]  ;;  %v473_v33 = vld [vmem:[#allocation2 + $0x18] sm:$0xff] }
  0xd2   : > { %v746_v29 = vld [vmem:[%s918_s3] ss:$0 sm:$0xff]  ;;  %v479_v31 = vmul.f32 %v745_v28, %v471_v27  ;;  %v481_v35 = vmul.f32 %v745_v28, %v473_v33 }
  0xd4   : > { %v487_v37 = vadd.f32 %v746_v29, %v479_v31  ;;  %v489_v39 = vadd.f32 %v746_v29, %v481_v35 }
  0xd6   : > { %v472_v30 = vld [vmem:[#allocation2] sm:$0xff]  ;;  %vm491_vm0 = vcmp.gt.f32.partialorder %v487_v37, 0.0  ;;  %v495_v41 = vmul.f32 0.2, %v487_v37  ;;  %vm493_vm2 = vcmp.gt.f32.partialorder %v489_v39, 0.0 }
  0xd7   : > { %v480_v32 = vmul.f32 %v745_v28, %v472_v30  ;;  %v474_v34 = vld [vmem:[#allocation2 + $0x8] sm:$0xff]  ;;  %v497_v43 = vmul.f32 0.2, %v489_v39 }
  0xd8   : > { %v482_v36 = vmul.f32 %v745_v28, %v474_v34  ;;  %v499_v45 = vsel %vm491_vm0, %v487_v37, %v495_v41 }
  0xd9   : > { %v488_v38 = vadd.f32 %v746_v29, %v480_v32  ;;  %503 = vst [vmem:[%s919_s4] sm:$0xff] %v499_v45  ;;  %v501_v47 = vsel %vm493_vm2, %v489_v39, %v497_v43 }
  0xda   : > { %v490_v40 = vadd.f32 %v746_v29, %v482_v36  ;;  %505 = vst [vmem:[%s919_s4 + $0x10] sm:$0xff] %v501_v47 }
  0xdb   : > { %vm492_vm1 = vcmp.gt.f32.partialorder %v488_v38, 0.0  ;;  %v496_v42 = vmul.f32 0.2, %v488_v38 }
  0xdc   : > { %vm494_vm3 = vcmp.gt.f32.partialorder %v490_v40, 0.0  ;;  %v498_v44 = vmul.f32 0.2, %v490_v40 }
  0xdd   : > { %v500_v46 = vsel %vm492_vm1, %v488_v38, %v496_v42 }
  0xde   : > { %v502_v48 = vsel %vm494_vm3, %v490_v40, %v498_v44  ;;  %504 = vst [vmem:[%s919_s4 + $0x8] sm:$0xff] %v500_v46 }
  0xdf   : > { %506 = vst [vmem:[%s919_s4 + $0x18] sm:$0xff] %v502_v48 }
  0xe0 PF: > { %s14_s19 = sadd.s32 1, %s785_s19   ;;  %s920_s15 = smov %s773_s16 }
  0xe1   : > { %p11_p12 = scmp.ge.s32.totalorder %s14_s19, 9   ;;  %s921_s16 = smov %s848_s23 }
  0xe2   : > { %s922_s17 = smov %s781_s18  ;;  %s923_s18 = smov %s925_s20 }
  0xe3   :  { %13 = sbr.rel (!%p11_p12) target bundleno = 3 (0x3), region = 129 }

// kernel: memae_forward.12
= control target key start
LH: loop header
LB: loop body
LE: loop exit
PB: predicated region body
PF: predicated region fallthrough
CT: control target
= control target key end

     0   :  { %s784_s15 = smov 0   ;;  %s786_s16 = smov 0   ;;  %s873_s0 = inlined_call_operand.vmem [shape: bf16[8,1152], index: 0, kind: input, shape index: {}]   ;;  %s874_s1 = inlined_call_operand.vmem [shape: bf16[1152,256], index: 1, kind: input, shape index: {}]   ;;  %s875_s2 = inlined_call_operand.vmem [shape: f32[1,256], index: 2, kind: input, shape index: {}]   ;;  %s876_s3 = inlined_call_operand.vmem [shape: f32[1,256], index: 3, kind: input, shape index: {}]   ;;  %s877_s4 = inlined_call_operand.vmem [shape: f32[8,256], index: 4, kind: output, shape index: {}]  }
   0x1   :  { %s788_s17 = smov 0  }
   0x2 LB: > { %s26_s18 = sadd.s32 1, %s752_s16  ;;  %p617_p0 = scmp.ge.s32.totalorder %s756_s17, 1  ;;  %s756_s17 = sphi %s788_s17, %s14_s17   ;;  %s752_s16 = sphi %s786_s16, %s879_s16   ;;  %s748_s15 = sphi %s784_s15, %s878_s15  }
   0x3   : > { %p27_p1 = scmp.ge.s32.totalorder %s26_s18, 9  ;;  %p227_p2 = scmp.lt.s32.totalorder %s756_s17, 10 }
   0x5   : > { %s881_s18 = smov (%p27_p1, %s26_s18), 0  ;;  %p228_p3 = pnand %p617_p0, %p227_p2 }
   0x6   : > { %p280_p4 = scmp.lt.s32.totalorder (!%p228_p3), %s748_s15, 8  ;;  %s619_s19 = sshll.u32 (!%p228_p3), %s748_s15, 4 }
   0x7   : > { %231 = sbr.rel (%p228_p3) target bundleno = 203 (0xcb), region = 36  ;;  %p288_p5 = scmp.lt.s32.totalorder (!%p228_p3), %s619_s19, 143 }
   0x8   : > { %p622_p6 = scmp.ne.s32.totalorder (!%p228_p3), %s748_s15, 0 }
   0xc   : > { %s281_s20 = scalar_select %p280_p4, %s748_s15, 8 }
   0xd   : > { %s883_s19 = smov (!%p288_p5, %s619_s19), 143  ;;  %321 = sbr.rel (%p622_p6) target bundleno = 21 (0x15), region = 40 }
   0xe   : > { %s618_s21 = sshll.u32 %s281_s20, 2  ;;  %s692_s25 = sshll.u32 %s883_s19, 3 }
   0xf   : > { %s810_s24 = scalar_lea.vmem %s873_s0, %s618_s21  ;;  %s815_s28 = scalar_lea.vmem %s874_s1, %s692_s25 }
  0x12   : > { %v758_v0 = vmov 0.0  }
  0x13   : > { %322 = vst [vmem:[#allocation2] sm:$0xff] %v758_v0 }
  0x14   : > { %323 = vst [vmem:[#allocation2 + $0x8] sm:$0xff] %v758_v0 }
  0x15 PF: > { %v681_v1 = vld [vmem:[%s815_s28 + $0x70] sm:$0xf]  ;;  %v708_v2 = vld [vmem:[%s815_s28 + $0x74] sm:$0xf0]  ;;  %v707_v3 = vld [vmem:[%s815_s28 + $0x74] sm:$0xf] }
  0x16   : > { %v682_v4 = vor.u32 %v708_v2, %v681_v1  ;;  %v683_v5 = vld [vmem:[%s815_s28 + $0x78] sm:$0xf0]  ;;  %v673_v6 = vld [vmem:[%s815_s28 + $0x60] sm:$0xf]  ;;  %v706_v7 = vld [vmem:[%s815_s28 + $0x64] sm:$0xf0] }
  0x17   : > { %v686_v8 = vor.u32 %v707_v3, %v683_v5  ;;  %v705_v9 = vld [vmem:[%s815_s28 + $0x64] sm:$0xf]  ;;  %v675_v10 = vld [vmem:[%s815_s28 + $0x68] sm:$0xf0]  ;;  %v674_v11 = vor.u32 %v706_v7, %v673_v6  ;;  %v665_v13 = vld [vmem:[%s815_s28 + $0x50] sm:$0xf] }
  0x18   : > { %423 = vmatpush.bf16.msra.mxu0 %v682_v4  ;;  %v678_v12 = vor.u32 %v705_v9, %v675_v10  ;;  %v704_v14 = vld [vmem:[%s815_s28 + $0x54] sm:$0xf0]  ;;  %v703_v15 = vld [vmem:[%s815_s28 + $0x54] sm:$0xf]  ;;  %v667_v16 = vld [vmem:[%s815_s28 + $0x58] sm:$0xf0] }
  0x19   : > { %436 = vmatpush.bf16.msra.mxu1 %v686_v8  ;;  %v666_v17 = vor.u32 %v704_v14, %v665_v13  ;;  %v670_v18 = vor.u32 %v703_v15, %v667_v16  ;;  %v657_v19 = vld [vmem:[%s815_s28 + $0x40] sm:$0xf]  ;;  %v702_v20 = vld [vmem:[%s815_s28 + $0x44] sm:$0xf0]  ;;  %v701_v21 = vld [vmem:[%s815_s28 + $0x44] sm:$0xf] }
  0x1a   : > { %v659_v22 = vld [vmem:[%s815_s28 + $0x48] sm:$0xf0]  ;;  %v658_v23 = vor.u32 %v702_v20, %v657_v19  ;;  %v649_v25 = vld [vmem:[%s815_s28 + $0x30] sm:$0xf]  ;;  %v700_v26 = vld [vmem:[%s815_s28 + $0x34] sm:$0xf0] }
  0x1b   : > { %v662_v24 = vor.u32 %v701_v21, %v659_v22  ;;  %v699_v27 = vld [vmem:[%s815_s28 + $0x34] sm:$0xf]  ;;  %v651_v28 = vld [vmem:[%s815_s28 + $0x38] sm:$0xf0]  ;;  %v650_v29 = vor.u32 %v700_v26, %v649_v25  ;;  %v641_v31 = vld [vmem:[%s815_s28 + $0x20] sm:$0xf] }
  0x1c   : > { %424 = vmatpush.bf16.msra.mxu0 %v674_v11  ;;  %v654_v30 = vor.u32 %v699_v27, %v651_v28  ;;  %v698_v32 = vld [vmem:[%s815_s28 + $0x24] sm:$0xf0]  ;;  %v697_v33 = vld [vmem:[%s815_s28 + $0x24] sm:$0xf]  ;;  %v643_v34 = vld [vmem:[%s815_s28 + $0x28] sm:$0xf0] }
  0x1d   : > { %437 = vmatpush.bf16.msra.mxu1 %v678_v12  ;;  %v642_v35 = vor.u32 %v698_v32, %v641_v31  ;;  %v646_v36 = vor.u32 %v697_v33, %v643_v34  ;;  %v633_v37 = vld [vmem:[%s815_s28 + $0x10] sm:$0xf]  ;;  %v696_v38 = vld [vmem:[%s815_s28 + $0x14] sm:$0xf0]  ;;  %v695_v39 = vld [vmem:[%s815_s28 + $0x14] sm:$0xf] }
  0x1e   : > { %v635_v40 = vld [vmem:[%s815_s28 + $0x18] sm:$0xf0]  ;;  %v634_v41 = vor.u32 %v696_v38, %v633_v37  ;;  %v625_v43 = vld [vmem:[%s815_s28] sm:$0xf]  ;;  %v694_v44 = vld [vmem:[%s815_s28 + $0x4] sm:$0xf0] }
  0x1f   : > { %v638_v42 = vor.u32 %v695_v39, %v635_v40  ;;  %v693_v45 = vld [vmem:[%s815_s28 + $0x4] sm:$0xf]  ;;  %v627_v46 = vld [vmem:[%s815_s28 + $0x8] sm:$0xf0]  ;;  %v626_v47 = vor.u32 %v694_v44, %v625_v43  ;;  %v326_v49 = vld [vmem:[%s810_s24] sm:$0xf] }
  0x20   : > { %425 = vmatpush.bf16.msra.mxu0 %v666_v17  ;;  %v630_v48 = vor.u32 %v693_v45, %v627_v46  ;;  %v324_v50 = vld [vmem:[#allocation2] sm:$0xff]  ;;  %v325_v51 = vld [vmem:[#allocation2 + $0x8] sm:$0xff]  ;;  %p687_p7 = scmp.ne.s32.totalorder %s748_s15, 8 }
  0x21   : > { %438 = vmatpush.bf16.msra.mxu1 %v670_v18 }
  0x24   : > { %426 = vmatpush.bf16.msra.mxu0 %v658_v23 }
  0x25   : > { %439 = vmatpush.bf16.msra.mxu1 %v662_v24 }
  0x28   : > { %427 = vmatpush.bf16.msra.mxu0 %v650_v29 }
  0x29   : > { %440 = vmatpush.bf16.msra.mxu1 %v654_v30 }
  0x2c   : > { %428 = vmatpush.bf16.msra.mxu0 %v642_v35 }
  0x2d   : > { %441 = vmatpush.bf16.msra.mxu1 %v646_v36 }
  0x30   : > { %429 = vmatpush.bf16.msra.mxu0 %v634_v41 }
  0x31   : > { %442 = vmatpush.bf16.msra.mxu1 %v638_v42 }
  0x34   : > { %430 = vmatpush.bf16.msra.mxu0 %v626_v47 }
  0x35   : > { %443 = vmatpush.bf16.msra.mxu1 %v630_v48 }
  0x37   : > { %431 = vmatmul.bf16.vlgmr.msra.gmra.mxu0 %v326_v49 }
  0x38   : > { %444 = vmatmul.bf16.vlgmr.msra.gmra.mxu1 %v326_v49 }
  0xb4   : > { %v432_v52 = vpop.f32.mrf.mxu0 }
  0xb5   : > { %v449_v53 = vadd.f32 %v432_v52, %v324_v50  ;;  %v445_v54 = vpop.f32.mrf.mxu1 }
  0xb6   : > { %v450_v55 = vadd.f32 %v445_v54, %v325_v51 }
  0xb7   : > { %451 = vst [vmem:[#allocation2] sm:$0xff] %v449_v53 }
  0xb8   : > { %452 = vst [vmem:[#allocation2 + $0x8] sm:$0xff] %v450_v55 }
  0xb9   : > { %456 = sbr.rel (%p687_p7) target bundleno = 203 (0xcb), region = 44 }
  0xbc   : > { %v434_v56 = vpop.f32.mrf.mxu0 }
  0xbd   : > { %v447_v57 = vpop.f32.mrf.mxu1 }
  0xbe   : > { %v457_v58 = vld [vmem:[#allocation2] sm:$0xff] }
  0xbf   : > { %v459_v59 = vld [vmem:[%s875_s2] sm:$0x3]  ;;  %v458_v63 = vld [vmem:[#allocation2 + $0x8] sm:$0xff] }
  0xc0   : > { %v467_v60 = vld [vmem:[%s876_s3] sm:$0x3]  ;;  %v461_v61 = vperm.slane %v459_v59, 0  ;;  %v462_v0 = vperm.slane %v459_v59, 1 }
  0xc1   : > { %v469_v62 = vperm.slane %v467_v60, 0  ;;  %v470_v1 = vperm.slane %v467_v60, 1 }
  0xc2   : > { %v465_v2 = vmul.f32 %v461_v61, %v457_v58  ;;  %v466_v3 = vmul.f32 %v462_v0, %v458_v63 }
  0xc4   : > { %v473_v4 = vadd.f32 %v469_v62, %v465_v2  ;;  %v474_v5 = vadd.f32 %v470_v1, %v466_v3 }
  0xc6   : > { %vm475_vm0 = vcmp.gt.f32.partialorder %v473_v4, 0.0  ;;  %v477_v6 = vmul.f32 0.2, %v473_v4  ;;  %vm476_vm1 = vcmp.gt.f32.partialorder %v474_v5, 0.0  ;;  %v478_v7 = vmul.f32 0.2, %v474_v5 }
  0xc8   : > { %v479_v8 = vsel %vm475_vm0, %v473_v4, %v477_v6  ;;  %v480_v9 = vsel %vm476_vm1, %v474_v5, %v478_v7 }
  0xc9   : > { %481 = vst [vmem:[%s877_s4] sm:$0xff] %v479_v8 }
  0xca   : > { %482 = vst [vmem:[%s877_s4 + $0x8] sm:$0xff] %v480_v9 }
  0xcb PF: > { %s14_s17 = sadd.s32 1, %s756_s17   ;;  %s878_s15 = smov %s752_s16 }
  0xcc   : > { %p11_p8 = scmp.ge.s32.totalorder %s14_s17, 11   ;;  %s879_s16 = smov %s881_s18 }
  0xce   :  { %13 = sbr.rel (!%p11_p8) target bundleno = 2 (0x2), region = 83 }

// kernel: memae_forward.13
= control target key start
LH: loop header
LB: loop body
LE: loop exit
PB: predicated region body
PF: predicated region fallthrough
CT: control target
= control target key end

     0   :  { %s999_s15 = smov 0   ;;  %s1001_s16 = smov 0   ;;  %s1119_s0 = inlined_call_operand.vmem [shape: bf16[8,2304], index: 0, kind: input, shape index: {}]   ;;  %s1120_s1 = inlined_call_operand.vmem [shape: bf16[2304,256], index: 1, kind: input, shape index: {}]   ;;  %s1121_s2 = inlined_call_operand.vmem [shape: f32[1,256], index: 2, kind: input, shape index: {}]   ;;  %s1122_s3 = inlined_call_operand.vmem [shape: f32[1,256], index: 3, kind: input, shape index: {}]   ;;  %s1123_s4 = inlined_call_operand.vmem [shape: f32[8,256], index: 4, kind: output, shape index: {}]  }
   0x1   :  { %s1003_s17 = smov 0  }
   0x2 LB: > { %s26_s18 = sadd.s32 1, %s967_s16  ;;  %p751_p0 = scmp.ge.s32.totalorder %s971_s17, 1  ;;  %s971_s17 = sphi %s1003_s17, %s14_s17   ;;  %s967_s16 = sphi %s1001_s16, %s1125_s16   ;;  %s963_s15 = sphi %s999_s15, %s1124_s15  }
   0x3   : > { %p27_p1 = scmp.ge.s32.totalorder %s26_s18, 9  ;;  %p229_p2 = scmp.lt.s32.totalorder %s971_s17, 10 }
   0x5   : > { %s1127_s18 = smov (%p27_p1, %s26_s18), 0  ;;  %p230_p3 = pnand %p751_p0, %p229_p2 }
   0x6   : > { %s752_s19 = sshll.u32 (!%p230_p3), %s963_s15, 1  ;;  %s754_s20 = sshll.u32 (!%p230_p3), %s963_s15, 5 }
   0x7   : > { %233 = sbr.rel (%p230_p3) target bundleno = 212 (0xd4), region = 36  ;;  %p284_p4 = scmp.lt.s32.totalorder (!%p230_p3), %s752_s19, 17 }
   0x8   : > { %p293_p5 = scmp.lt.s32.totalorder (!%p230_p3), %s754_s20, 287  ;;  %p757_p6 = scmp.ne.s32.totalorder (!%p230_p3), %s963_s15, 0 }
   0xc   : > { %s1129_s19 = smov (!%p284_p4, %s752_s19), 17  ;;  %s1131_s20 = smov (!%p293_p5, %s754_s20), 287 }
   0xd   : > { %s753_s21 = sshll.u32 %s1129_s19, 2  ;;  %s891_s25 = sshll.u32 %s1131_s20, 3 }
   0xe   : > { %s1024_s24 = scalar_lea.vmem %s1119_s0, %s753_s21  ;;  %s1029_s28 = scalar_lea.vmem %s1120_s1, %s891_s25 }
   0xf   : > { %326 = sbr.rel (%p757_p6) target bundleno = 23 (0x17), region = 40 }
  0x14   : > { %v973_v0 = vmov 0.0  }
  0x15   : > { %327 = vst [vmem:[#allocation2] sm:$0xff] %v973_v0 }
  0x16   : > { %328 = vst [vmem:[#allocation2 + $0x8] sm:$0xff] %v973_v0 }
  0x17 PF: > { %v816_v1 = vld [vmem:[%s1029_s28 + $0x70] sm:$0xf]  ;;  %v907_v2 = vld [vmem:[%s1029_s28 + $0x74] sm:$0xf0]  ;;  %v906_v6 = vld [vmem:[%s1029_s28 + $0x74] sm:$0xf] }
  0x18   : > { %v880_v3 = vld [vmem:[%s1029_s28 + $0xf0] sm:$0xf]  ;;  %v817_v4 = vor.u32 %v907_v2, %v816_v1  ;;  %v923_v5 = vld [vmem:[%s1029_s28 + $0xf4] sm:$0xf0]  ;;  %v818_v7 = vld [vmem:[%s1029_s28 + $0x78] sm:$0xf0] }
  0x19   : > { %v881_v8 = vor.u32 %v923_v5, %v880_v3  ;;  %v821_v9 = vor.u32 %v906_v6, %v818_v7  ;;  %v922_v10 = vld [vmem:[%s1029_s28 + $0xf4] sm:$0xf]  ;;  %v882_v11 = vld [vmem:[%s1029_s28 + $0xf8] sm:$0xf0]  ;;  %v808_v12 = vld [vmem:[%s1029_s28 + $0x60] sm:$0xf] }
  0x1a   : > { %531 = vmatpush.bf16.msra.mxu0 %v817_v4  ;;  %v885_v13 = vor.u32 %v922_v10, %v882_v11  ;;  %v905_v14 = vld [vmem:[%s1029_s28 + $0x64] sm:$0xf0]  ;;  %v872_v15 = vld [vmem:[%s1029_s28 + $0xe0] sm:$0xf]  ;;  %v904_v19 = vld [vmem:[%s1029_s28 + $0x64] sm:$0xf] }
  0x1b   : > { %v921_v16 = vld [vmem:[%s1029_s28 + $0xe4] sm:$0xf0]  ;;  %544 = vmatpush.bf16.msra.mxu1 %v881_v8  ;;  %557 = vmatpush.bf16.msra.mxu2 %v821_v9  ;;  %v809_v17 = vor.u32 %v905_v14, %v808_v12  ;;  %v810_v20 = vld [vmem:[%s1029_s28 + $0x68] sm:$0xf0]  ;;  %v920_v21 = vld [vmem:[%s1029_s28 + $0xe4] sm:$0xf] }
  0x1c   : > { %v873_v18 = vor.u32 %v921_v16, %v872_v15  ;;  %570 = vmatpush.bf16.msra.mxu3 %v885_v13  ;;  %v813_v22 = vor.u32 %v904_v19, %v810_v20  ;;  %v874_v23 = vld [vmem:[%s1029_s28 + $0xe8] sm:$0xf0]  ;;  %v800_v24 = vld [vmem:[%s1029_s28 + $0x50] sm:$0xf]  ;;  %v903_v25 = vld [vmem:[%s1029_s28 + $0x54] sm:$0xf0] }
  0x1d   : > { %v877_v26 = vor.u32 %v920_v21, %v874_v23  ;;  %v864_v27 = vld [vmem:[%s1029_s28 + $0xd0] sm:$0xf]  ;;  %v919_v28 = vld [vmem:[%s1029_s28 + $0xd4] sm:$0xf0]  ;;  %v902_v29 = vld [vmem:[%s1029_s28 + $0x54] sm:$0xf]  ;;  %v801_v30 = vor.u32 %v903_v25, %v800_v24 }
  0x1e   : > { %532 = vmatpush.bf16.msra.mxu0 %v809_v17  ;;  %v802_v31 = vld [vmem:[%s1029_s28 + $0x58] sm:$0xf0]  ;;  %v918_v32 = vld [vmem:[%s1029_s28 + $0xd4] sm:$0xf]  ;;  %v865_v34 = vor.u32 %v919_v28, %v864_v27  ;;  %v792_v36 = vld [vmem:[%s1029_s28 + $0x40] sm:$0xf] }
  0x1f   : > { %v866_v33 = vld [vmem:[%s1029_s28 + $0xd8] sm:$0xf0]  ;;  %545 = vmatpush.bf16.msra.mxu1 %v873_v18  ;;  %558 = vmatpush.bf16.msra.mxu2 %v813_v22  ;;  %v805_v35 = vor.u32 %v902_v29, %v802_v31  ;;  %v901_v37 = vld [vmem:[%s1029_s28 + $0x44] sm:$0xf0]  ;;  %v856_v38 = vld [vmem:[%s1029_s28 + $0xc0] sm:$0xf] }
  0x20   : > { %571 = vmatpush.bf16.msra.mxu3 %v877_v26  ;;  %v869_v39 = vor.u32 %v918_v32, %v866_v33  ;;  %v917_v40 = vld [vmem:[%s1029_s28 + $0xc4] sm:$0xf0]  ;;  %v900_v41 = vld [vmem:[%s1029_s28 + $0x44] sm:$0xf]  ;;  %v794_v42 = vld [vmem:[%s1029_s28 + $0x48] sm:$0xf0]  ;;  %v793_v45 = vor.u32 %v901_v37, %v792_v36 }
  0x21   : > { %v916_v43 = vld [vmem:[%s1029_s28 + $0xc4] sm:$0xf]  ;;  %v858_v44 = vld [vmem:[%s1029_s28 + $0xc8] sm:$0xf0]  ;;  %v857_v46 = vor.u32 %v917_v40, %v856_v38  ;;  %v797_v47 = vor.u32 %v900_v41, %v794_v42  ;;  %v784_v48 = vld [vmem:[%s1029_s28 + $0x30] sm:$0xf] }
  0x22   : > { %533 = vmatpush.bf16.msra.mxu0 %v801_v30  ;;  %v899_v49 = vld [vmem:[%s1029_s28 + $0x34] sm:$0xf0]  ;;  %v848_v50 = vld [vmem:[%s1029_s28 + $0xb0] sm:$0xf]  ;;  %v861_v51 = vor.u32 %v916_v43, %v858_v44  ;;  %v898_v53 = vld [vmem:[%s1029_s28 + $0x34] sm:$0xf] }
  0x23   : > { %546 = vmatpush.bf16.msra.mxu1 %v865_v34  ;;  %559 = vmatpush.bf16.msra.mxu2 %v805_v35  ;;  %v915_v52 = vld [vmem:[%s1029_s28 + $0xb4] sm:$0xf0]  ;;  %v786_v54 = vld [vmem:[%s1029_s28 + $0x38] sm:$0xf0]  ;;  %v914_v55 = vld [vmem:[%s1029_s28 + $0xb4] sm:$0xf]  ;;  %v785_v57 = vor.u32 %v899_v49, %v784_v48 }
  0x24   : > { %572 = vmatpush.bf16.msra.mxu3 %v869_v39  ;;  %v850_v56 = vld [vmem:[%s1029_s28 + $0xb8] sm:$0xf0]  ;;  %v849_v58 = vor.u32 %v915_v52, %v848_v50  ;;  %v789_v59 = vor.u32 %v898_v53, %v786_v54  ;;  %v776_v60 = vld [vmem:[%s1029_s28 + $0x20] sm:$0xf]  ;;  %v897_v61 = vld [vmem:[%s1029_s28 + $0x24] sm:$0xf0] }
  0x25   : > { %v840_v62 = vld [vmem:[%s1029_s28 + $0xa0] sm:$0xf]  ;;  %v853_v63 = vor.u32 %v914_v55, %v850_v56  ;;  %v913_v0 = vld [vmem:[%s1029_s28 + $0xa4] sm:$0xf0]  ;;  %v896_v1 = vld [vmem:[%s1029_s28 + $0x24] sm:$0xf]  ;;  %v777_v5 = vor.u32 %v897_v61, %v776_v60 }
  0x26   : > { %534 = vmatpush.bf16.msra.mxu0 %v793_v45  ;;  %v778_v2 = vld [vmem:[%s1029_s28 + $0x28] sm:$0xf0]  ;;  %v912_v3 = vld [vmem:[%s1029_s28 + $0xa4] sm:$0xf]  ;;  %v841_v6 = vor.u32 %v913_v0, %v840_v62  ;;  %v768_v8 = vld [vmem:[%s1029_s28 + $0x10] sm:$0xf] }
  0x27   : > { %547 = vmatpush.bf16.msra.mxu1 %v857_v46  ;;  %560 = vmatpush.bf16.msra.mxu2 %v797_v47  ;;  %v842_v4 = vld [vmem:[%s1029_s28 + $0xa8] sm:$0xf0]  ;;  %v781_v7 = vor.u32 %v896_v1, %v778_v2  ;;  %v895_v9 = vld [vmem:[%s1029_s28 + $0x14] sm:$0xf0]  ;;  %v832_v10 = vld [vmem:[%s1029_s28 + $0x90] sm:$0xf] }
  0x28   : > { %573 = vmatpush.bf16.msra.mxu3 %v861_v51  ;;  %v845_v11 = vor.u32 %v912_v3, %v842_v4  ;;  %v911_v12 = vld [vmem:[%s1029_s28 + $0x94] sm:$0xf0]  ;;  %v894_v13 = vld [vmem:[%s1029_s28 + $0x14] sm:$0xf]  ;;  %v770_v14 = vld [vmem:[%s1029_s28 + $0x18] sm:$0xf0]  ;;  %v769_v17 = vor.u32 %v895_v9, %v768_v8 }
  0x29   : > { %v910_v15 = vld [vmem:[%s1029_s28 + $0x94] sm:$0xf]  ;;  %v834_v16 = vld [vmem:[%s1029_s28 + $0x98] sm:$0xf0]  ;;  %v331_v18 = vld [vmem:[%s1024_s24] sm:$0xff]  ;;  %v833_v19 = vor.u32 %v911_v12, %v832_v10  ;;  %v773_v20 = vor.u32 %v894_v13, %v770_v14  ;;  %p886_p7 = scmp.ne.s32.totalorder %s963_s15, 8 }
  0x2a   : > { %535 = vmatpush.bf16.msra.mxu0 %v785_v57  ;;  %v760_v21 = vld [vmem:[%s1029_s28] sm:$0xf]  ;;  %v893_v22 = vld [vmem:[%s1029_s28 + $0x4] sm:$0xf0]  ;;  %v837_v24 = vor.u32 %v910_v15, %v834_v16  ;;  %v892_v26 = vld [vmem:[%s1029_s28 + $0x4] sm:$0xf]  ;;  %v365_v30 = vunpack.c.l.b16 %v331_v18  ;;  %v366_v32 = vunpack.c.h.b16 %v331_v18 }
  0x2b   : > { %548 = vmatpush.bf16.msra.mxu1 %v849_v58  ;;  %561 = vmatpush.bf16.msra.mxu2 %v789_v59  ;;  %v824_v23 = vld [vmem:[%s1029_s28 + $0x80] sm:$0xf]  ;;  %v909_v25 = vld [vmem:[%s1029_s28 + $0x84] sm:$0xf0]  ;;  %v762_v27 = vld [vmem:[%s1029_s28 + $0x8] sm:$0xf0]  ;;  %v761_v31 = vor.u32 %v893_v22, %v760_v21 }
  0x2c   : > { %574 = vmatpush.bf16.msra.mxu3 %v853_v63  ;;  %v908_v28 = vld [vmem:[%s1029_s28 + $0x84] sm:$0xf]  ;;  %v826_v29 = vld [vmem:[%s1029_s28 + $0x88] sm:$0xf0]  ;;  %v825_v33 = vor.u32 %v909_v25, %v824_v23  ;;  %v765_v34 = vor.u32 %v892_v26, %v762_v27  ;;  %v367_v36 = vpack.c.b16 %v365_v30, %v365_v30  ;;  %v368_v37 = vpack.c.b16 %v366_v32, %v366_v32 }
  0x2d   : > { %v829_v35 = vor.u32 %v908_v28, %v826_v29  ;;  %v329_v39 = vld [vmem:[#allocation2] sm:$0xff]  ;;  %v330_v44 = vld [vmem:[#allocation2 + $0x8] sm:$0xff] }
  0x2e   : > { %536 = vmatpush.bf16.msra.mxu0 %v777_v5 }
  0x2f   : > { %549 = vmatpush.bf16.msra.mxu1 %v841_v6  ;;  %562 = vmatpush.bf16.msra.mxu2 %v781_v7 }
  0x30   : > { %575 = vmatpush.bf16.msra.mxu3 %v845_v11 }
  0x32   : > { %537 = vmatpush.bf16.msra.mxu0 %v769_v17 }
  0x33   : > { %550 = vmatpush.bf16.msra.mxu1 %v833_v19  ;;  %563 = vmatpush.bf16.msra.mxu2 %v773_v20 }
  0x34   : > { %576 = vmatpush.bf16.msra.mxu3 %v837_v24 }
  0x36   : > { %538 = vmatpush.bf16.msra.mxu0 %v761_v31 }
  0x37   : > { %551 = vmatpush.bf16.msra.mxu1 %v825_v33  ;;  %564 = vmatpush.bf16.msra.mxu2 %v765_v34 }
  0x38   : > { %577 = vmatpush.bf16.msra.mxu3 %v829_v35 }
  0x39   : > { %539 = vmatmul.bf16.vlgmr.msra.gmra.mxu0 %v367_v36 }
  0x3a   : > { %552 = vmatmul.bf16.vlgmr.msra.gmra.mxu1 %v368_v37  ;;  %565 = vmatmul.bf16.vlgmr.msra.gmra.mxu2 %v367_v36 }
  0x3b   : > { %578 = vmatmul.bf16.vlgmr.msra.gmra.mxu3 %v368_v37 }
  0xb6   : > { %v540_v38 = vpop.f32.mrf.mxu0 }
  0xb7   : > { %v553_v40 = vpop.f32.mrf.mxu1 }
  0xb8   : > { %v554_v41 = vadd.f32 %v553_v40, %v540_v38 }
  0xba   : > { %v583_v42 = vadd.f32 %v554_v41, %v329_v39 }
  0xbc   : > { %585 = vst [vmem:[#allocation2] sm:$0xff] %v583_v42 }
  0xbd   : > { %v566_v43 = vpop.f32.mrf.mxu2 }
  0xbe   : > { %v579_v45 = vpop.f32.mrf.mxu3  ;;  %v542_v46 = vpop.f32.mrf.mxu0 }
  0xbf   : > { %v580_v47 = vadd.f32 %v579_v45, %v566_v43  ;;  %v555_v48 = vpop.f32.mrf.mxu1 }
  0xc1   : > { %v584_v49 = vadd.f32 %v580_v47, %v330_v44 }
  0xc2   : > { %590 = sbr.rel (%p886_p7) target bundleno = 212 (0xd4), region = 44 }
  0xc3   : > { %586 = vst [vmem:[#allocation2 + $0x8] sm:$0xff] %v584_v49 }
  0xc5   : > { %v568_v50 = vpop.f32.mrf.mxu2 }
  0xc6   : > { %v581_v51 = vpop.f32.mrf.mxu3 }
  0xc7   : > { %v591_v52 = vld [vmem:[#allocation2] sm:$0xff] }
  0xc8   : > { %v593_v53 = vld [vmem:[%s1121_s2] sm:$0x3] }
  0xc9   : > { %v601_v54 = vld [vmem:[%s1122_s3] sm:$0x3]  ;;  %v595_v55 = vperm.slane %v593_v53, 0  ;;  %v596_v58 = vperm.slane %v593_v53, 1 }
  0xca   : > { %v603_v56 = vperm.slane %v601_v54, 0  ;;  %v592_v57 = vld [vmem:[#allocation2 + $0x8] sm:$0xff]  ;;  %v604_v59 = vperm.slane %v601_v54, 1 }
  0xcb   : > { %v599_v60 = vmul.f32 %v595_v55, %v591_v52  ;;  %v600_v61 = vmul.f32 %v596_v58, %v592_v57 }
  0xcd   : > { %v607_v62 = vadd.f32 %v603_v56, %v599_v60  ;;  %v608_v63 = vadd.f32 %v604_v59, %v600_v61 }
  0xcf   : > { %vm609_vm0 = vcmp.gt.f32.partialorder %v607_v62, 0.0  ;;  %v611_v0 = vmul.f32 0.2, %v607_v62  ;;  %vm610_vm1 = vcmp.gt.f32.partialorder %v608_v63, 0.0  ;;  %v612_v1 = vmul.f32 0.2, %v608_v63 }
  0xd1   : > { %v613_v2 = vsel %vm609_vm0, %v607_v62, %v611_v0  ;;  %v614_v3 = vsel %vm610_vm1, %v608_v63, %v612_v1 }
  0xd2   : > { %615 = vst [vmem:[%s1123_s4] sm:$0xff] %v613_v2 }
  0xd3   : > { %616 = vst [vmem:[%s1123_s4 + $0x8] sm:$0xff] %v614_v3 }
  0xd4 PF: > { %s14_s17 = sadd.s32 1, %s971_s17   ;;  %s1124_s15 = smov %s967_s16 }
  0xd5   : > { %p11_p8 = scmp.ge.s32.totalorder %s14_s17, 11   ;;  %s1125_s16 = smov %s1127_s18 }
  0xd7   :  { %13 = sbr.rel (!%p11_p8) target bundleno = 2 (0x2), region = 83 }

// kernel: memae_forward.14
= control target key start
LH: loop header
LB: loop body
LE: loop exit
PB: predicated region body
PF: predicated region fallthrough
CT: control target
= control target key end

     0   :  { %s393_s0 = inlined_call_operand.vmem [shape: f32[8,256], index: 0, kind: input, shape index: {}]   ;;  %s394_s1 = inlined_call_operand.vmem [shape: f32[128,256], index: 1, kind: input, shape index: {}]   ;;  %s395_s2 = inlined_call_operand.vmem [shape: f32[8,256], index: 2, kind: output, shape index: {0}]   ;;  %s396_s3 = inlined_call_operand.hbm [shape: f32[1,1], index: 3, kind: output, shape index: {1}]  }
   0x1   :  { %v52_v0 = vld [vmem:[%s394_s1 + $0xf0] sm:$0xff]  ;;  %v53_v1 = vld [vmem:[%s394_s1 + $0xf8] sm:$0xff]  ;;  %v50_v2 = vld [vmem:[%s394_s1 + $0xe0] sm:$0xff] }
   0x2   :  { %54 = vmatpush.xpose.msra.mxu0 %v52_v0  ;;  %74 = vmatpush.xpose.msra.mxu1 %v53_v1  ;;  %v51_v3 = vld [vmem:[%s394_s1 + $0xe8] sm:$0xff]  ;;  %v48_v4 = vld [vmem:[%s394_s1 + $0xd0] sm:$0xff]  ;;  %v49_v5 = vld [vmem:[%s394_s1 + $0xd8] sm:$0xff] }
   0x3   :  { %129 = vmatpush.msra.mxu2 %v52_v0  ;;  %149 = vmatpush.msra.mxu3 %v53_v1  ;;  %v46_v6 = vld [vmem:[%s394_s1 + $0xc0] sm:$0xff]  ;;  %v47_v7 = vld [vmem:[%s394_s1 + $0xc8] sm:$0xff] }
   0x5   :  { %130 = vmatpush.msra.mxu2 %v50_v2  ;;  %150 = vmatpush.msra.mxu3 %v51_v3 }
   0x6   :  { %55 = vmatpush.xpose.msra.mxu0 %v50_v2  ;;  %75 = vmatpush.xpose.msra.mxu1 %v51_v3 }
   0x7   :  { %131 = vmatpush.msra.mxu2 %v48_v4  ;;  %151 = vmatpush.msra.mxu3 %v49_v5 }
   0x8   :  { %9 = vsyncpa [#allocation3], 0  ;;  %v44_v8 = vld [vmem:[%s394_s1 + $0xb0] sm:$0xff]  ;;  %v45_v9 = vld [vmem:[%s394_s1 + $0xb8] sm:$0xff]  ;;  %vm18_vm4 = vcmask 0   ;;  %s259_s28 = smov [#allocation2]  }
   0x9   :  { %132 = vmatpush.msra.mxu2 %v46_v6  ;;  %152 = vmatpush.msra.mxu3 %v47_v7  ;;  %v42_v10 = vld [vmem:[%s394_s1 + $0xa0] sm:$0xff]  ;;  %v43_v11 = vld [vmem:[%s394_s1 + $0xa8] sm:$0xff]  ;;  %v40_v12 = vld [vmem:[%s394_s1 + $0x90] sm:$0xff]  ;;  %s205_s29 = sshll.u32 %s259_s28, 4  ;;  %s207_s5 = sshll.u32 %s396_s3, 4  ;;  %s206_s29 = int_to_ptr.vmem [resolvable:$true] %s205_s29  ;;  %s208_s5 = int_to_ptr.hbm [resolvable:$true] %s207_s5 }
   0xa   :  { %56 = vmatpush.xpose.msra.mxu0 %v48_v4  ;;  %76 = vmatpush.xpose.msra.mxu1 %v49_v5  ;;  %v41_v13 = vld [vmem:[%s394_s1 + $0x98] sm:$0xff]  ;;  %v38_v14 = vld [vmem:[%s394_s1 + $0x80] sm:$0xff]  ;;  %v39_v15 = vld [vmem:[%s394_s1 + $0x88] sm:$0xff]  ;;  %v258_v5 = vmov 0.0  }
   0xb   :  { %133 = vmatpush.msra.mxu2 %v44_v8  ;;  %153 = vmatpush.msra.mxu3 %v45_v9  ;;  %v36_v16 = vld [vmem:[%s394_s1 + $0x70] sm:$0xff]  ;;  %v37_v17 = vld [vmem:[%s394_s1 + $0x78] sm:$0xff]  ;;  %v34_v18 = vld [vmem:[%s394_s1 + $0x60] sm:$0xff]  ;;  %19 = vst.msk [vmem:[#allocation2] sm:$0x1] %vm18_vm4, %v258_v5 }
   0xc   :  { %v35_v19 = vld [vmem:[%s394_s1 + $0x68] sm:$0xff]  ;;  %v32_v20 = vld [vmem:[%s394_s1 + $0x50] sm:$0xff]  ;;  %v33_v21 = vld [vmem:[%s394_s1 + $0x58] sm:$0xff] }
   0xd   :  { %134 = vmatpush.msra.mxu2 %v42_v10  ;;  %154 = vmatpush.msra.mxu3 %v43_v11  ;;  %v30_v22 = vld [vmem:[%s394_s1 + $0x40] sm:$0xff]  ;;  %v31_v23 = vld [vmem:[%s394_s1 + $0x48] sm:$0xff]  ;;  %v28_v24 = vld [vmem:[%s394_s1 + $0x30] sm:$0xff] }
   0xe   :  { %57 = vmatpush.xpose.msra.mxu0 %v46_v6  ;;  %77 = vmatpush.xpose.msra.mxu1 %v47_v7  ;;  %v29_v25 = vld [vmem:[%s394_s1 + $0x38] sm:$0xff]  ;;  %v26_v26 = vld [vmem:[%s394_s1 + $0x20] sm:$0xff]  ;;  %v27_v27 = vld [vmem:[%s394_s1 + $0x28] sm:$0xff]  ;;  %v171_v6 = vlaneseq }
   0xf   :  { %135 = vmatpush.msra.mxu2 %v40_v12  ;;  %155 = vmatpush.msra.mxu3 %v41_v13  ;;  %v24_v28 = vld [vmem:[%s394_s1 + $0x10] sm:$0xff]  ;;  %v25_v29 = vld [vmem:[%s394_s1 + $0x18] sm:$0xff]  ;;  %v22_v30 = vld [vmem:[%s394_s1] sm:$0xff] }
  0x10   :  { %v23_v31 = vld [vmem:[%s394_s1 + $0x8] sm:$0xff]  ;;  %v20_v32 = vld [vmem:[%s393_s0] sm:$0xff]  ;;  %v172_v7 = vshrl.u32 %v171_v6, 7 }
  0x11   :  { %136 = vmatpush.msra.mxu2 %v38_v14  ;;  %156 = vmatpush.msra.mxu3 %v39_v15  ;;  %v21_v33 = vld [vmem:[%s393_s0 + $0x8] sm:$0xff] }
  0x12   :  { %58 = vmatpush.xpose.msra.mxu0 %v44_v8  ;;  %78 = vmatpush.xpose.msra.mxu1 %v45_v9  ;;  %vm176_vm5 = vcmp.lt.s32.totalorder %v172_v7, 2 }
  0x13   :  { %137 = vmatpush.msra.mxu2 %v36_v16  ;;  %157 = vmatpush.msra.mxu3 %v37_v17  ;;  %v219_v9 = vsel %vm176_vm5, 1.0, %v258_v5 }
  0x15   :  { %138 = vmatpush.msra.mxu2 %v34_v18  ;;  %158 = vmatpush.msra.mxu3 %v35_v19 }
  0x16   :  { %59 = vmatpush.xpose.msra.mxu0 %v42_v10  ;;  %79 = vmatpush.xpose.msra.mxu1 %v43_v11 }
  0x17   :  { %139 = vmatpush.msra.mxu2 %v32_v20  ;;  %159 = vmatpush.msra.mxu3 %v33_v21 }
  0x19   :  { %140 = vmatpush.msra.mxu2 %v30_v22  ;;  %160 = vmatpush.msra.mxu3 %v31_v23 }
  0x1a   :  { %60 = vmatpush.xpose.msra.mxu0 %v40_v12  ;;  %80 = vmatpush.xpose.msra.mxu1 %v41_v13 }
  0x1b   :  { %141 = vmatpush.msra.mxu2 %v28_v24  ;;  %161 = vmatpush.msra.mxu3 %v29_v25 }
  0x1d   :  { %142 = vmatpush.msra.mxu2 %v26_v26  ;;  %162 = vmatpush.msra.mxu3 %v27_v27 }
  0x1e   :  { %61 = vmatpush.xpose.msra.mxu0 %v38_v14  ;;  %81 = vmatpush.xpose.msra.mxu1 %v39_v15 }
  0x1f   :  { %143 = vmatpush.msra.mxu2 %v24_v28  ;;  %163 = vmatpush.msra.mxu3 %v25_v29 }
  0x21   :  { %144 = vmatpush.msra.mxu2 %v22_v30  ;;  %164 = vmatpush.msra.mxu3 %v23_v31 }
  0x22   :  { %62 = vmatpush.xpose.msra.mxu0 %v36_v16  ;;  %82 = vmatpush.xpose.msra.mxu1 %v37_v17 }
  0x26   :  { %63 = vmatpush.xpose.msra.mxu0 %v34_v18  ;;  %83 = vmatpush.xpose.msra.mxu1 %v35_v19 }
  0x2a   :  { %64 = vmatpush.xpose.msra.mxu0 %v32_v20  ;;  %84 = vmatpush.xpose.msra.mxu1 %v33_v21  ;;  %v186_v20 = vld [vmem:[#allocation2] sm:$0x1] }
  0x2e   :  { %65 = vmatpush.xpose.msra.mxu0 %v30_v22  ;;  %85 = vmatpush.xpose.msra.mxu1 %v31_v23 }
  0x32   :  { %66 = vmatpush.xpose.msra.mxu0 %v28_v24  ;;  %86 = vmatpush.xpose.msra.mxu1 %v29_v25 }
  0x36   :  { %67 = vmatpush.xpose.msra.mxu0 %v26_v26  ;;  %87 = vmatpush.xpose.msra.mxu1 %v27_v27 }
  0x3a   :  { %68 = vmatpush.xpose.msra.mxu0 %v24_v28  ;;  %88 = vmatpush.xpose.msra.mxu1 %v25_v29 }
  0x3e   :  { %69 = vmatpush.xpose.msra.mxu0 %v22_v30  ;;  %89 = vmatpush.xpose.msra.mxu1 %v23_v31 }
  0x41   :  { %70 = vmatmul.f32.vlgmr.msra.gmra.mxu0 %v20_v32  ;;  %90 = vmatmul.f32.vlgmr.msra.gmra.mxu1 %v21_v33 }
  0xbe   :  { %v71_v34 = vpop.f32.mrf.mxu0  ;;  %v91_v35 = vpop.f32.mrf.mxu1 }
  0xbf   :  { %v92_v36 = vadd.f32 %v91_v35, %v71_v34 }
  0xc1   :  { %94 = vmax.xlane.f32.xlu0 %v92_v36 }
 0x134   :  { %v95_v37 = vpop.xlane.xlu0 %94 }
 0x135   :  { %v96_v38 = vsub.f32 %v92_v36, %v95_v37 }
 0x137   :  { %v97_v39 = vmul.f32 1.442695, %v96_v38 }
 0x139   :  { %222 = vpow2.f32 %v97_v39 }
 0x13f   :  { %v223_v40 = vpop.eup %222 }
 0x140   :  { %99 = vadd.xlane.f32.xlu0 %v223_v40 }
 0x1b3   :  { %v100_v41 = vpop.xlane.xlu0 %99 }
 0x1b4   :  { %224 = vrcp.f32 %v100_v41 }
 0x1ba   :  { %v225_v42 = vpop.eup %224 }
 0x1bb   :  { %v102_v43 = vmul.f32 %v225_v42, %v223_v40 }
 0x1bd   :  { %v218_v44 = vadd.f32 -0.0025, %v102_v43 }
 0x1bf   :  { %v106_v45 = vand.u32 2147483647, %v218_v44  ;;  %v104_v51 = vmax.f32 %v218_v44, 0.0 }
 0x1c1   :  { %v107_v46 = vadd.f32 1e-12, %v106_v45  ;;  %v105_v56 = vmul.f32 %v104_v51, %v102_v43 }
 0x1c3   :  { %226 = vrcp.f32 %v107_v46  ;;  %v119_v50 = vand.u32 2147483648, %v107_v46  ;;  %v117_v53 = vand.u32 2147483647, %v107_v46  ;;  %vm113_vm1 = vweird.f32 %v107_v46 }
 0x1c5   :  { %v120_v55 = vor.u32 1.1754944e-38, %v119_v50  ;;  %vm118_vm3 = vcmp.eq.f32.partialorder %v117_v53, 8.507059e+37 }
 0x1c9   :  { %v227_v47 = vpop.eup %226 }
 0x1ca   :  { %v109_v48 = vmul.f32 %v227_v47, %v107_v46  ;;  %vm114_vm0 = vweird.f32 %v227_v47 }
 0x1cb   :  { %vm115_vm2 = vmor %vm113_vm1, %vm114_vm0 }
 0x1cc   :  { %v110_v49 = vsub.f32 1.0, %v109_v48 }
 0x1ce   :  { %v111_v52 = vmul.f32 %v227_v47, %v110_v49 }
 0x1d0   :  { %v112_v54 = vadd.f32 %v227_v47, %v111_v52 }
 0x1d2   :  { %v116_v57 = vsel %vm115_vm2, %v227_v47, %v112_v54 }
 0x1d3   :  { %v121_v58 = vsel %vm118_vm3, %v120_v55, %v116_v57 }
 0x1d4   :  { %v122_v59 = vmul.f32 %v121_v58, %v105_v56 }
 0x1d6   :  { %v123_v60 = vand.u32 2147483647, %v122_v59 }
 0x1d8   :  { %124 = vadd.xlane.f32.xlu1 %v123_v60 }
 0x24b   :  { %v125_v61 = vpop.xlane.xlu1 %124 }
 0x24c   :  { %v126_v62 = vmax.f32 %v125_v61, 1e-12 }
 0x24e   :  { %228 = vrcp.f32 %v126_v62 }
 0x254   :  { %v229_v63 = vpop.eup %228 }
 0x255   :  { %v128_v0 = vmul.f32 %v229_v63, %v122_v59 }
 0x257   :  { %145 = vmatmul.f32.vlgmr.msra.gmra.mxu2 %v128_v0  ;;  %165 = vmatmul.f32.vlgmr.msra.gmra.mxu3 %v128_v0  ;;  %v179_v1 = vadd.f32 1e-12, %v128_v0 }
 0x259   :  { %230 = vlog2.f32 %v179_v1 }
 0x25f   :  { %v231_v2 = vpop.eup %230 }
 0x260   :  { %v181_v3 = vmul.f32 0.6931472, %v231_v2 }
 0x262   :  { %v182_v4 = vmul.f32 %v181_v3, %v128_v0 }
 0x264   :  { %183 = vadd.xlane.f32.xlu1 %v182_v4 }
 0x2d7   :  { %v184_v8 = vpop.xlane.xlu1 %183 }
 0x2d8   :  { %v185_v10 = vsub.f32 0.0, %v184_v8 }
 0x2da   :  { %v187_v11 = vmul.f32 %v219_v9, %v185_v10  ;;  %v146_v12 = vpop.f32.mrf.mxu2  ;;  %v166_v13 = vpop.f32.mrf.mxu3 }
 0x2db   :  { %169 = vst [vmem:[%s395_s2] sm:$0xff] %v146_v12 }
 0x2dc   :  { %v188_v14 = vrot.slane %v187_v11, 4  ;;  %170 = vst [vmem:[%s395_s2 + $0x8] sm:$0xff] %v166_v13 }
 0x2de   :  { %v189_v15 = vadd.f32 %v188_v14, %v187_v11 }
 0x2e0   :  { %v190_v16 = vrot.slane %v189_v15, 2 }
 0x2e2   :  { %v191_v17 = vadd.f32 %v190_v16, %v189_v15 }
 0x2e4   :  { %v192_v18 = vrot.slane %v191_v17, 1 }
 0x2e6   :  { %v193_v19 = vadd.f32 %v192_v18, %v191_v17 }
 0x2e8   :  { %v194_v21 = vmul.f32 0.5, %v193_v19 }
 0x2ea   :  { %v195_v22 = vadd.f32 %v194_v21, %v186_v20 }
 0x2ec   :  { %197 = vst.msk [vmem:[#allocation2] sm:$0x1] %vm18_vm4, %v195_v22 }
 0x2ed   :  { %210 = dma.vmem_to_hbm [thread:$0]  %s206_s29, 16, %s208_s5, [#allocation3]  }
 0x2ee   :  { %256 = dma.done.wait [#allocation3], 16  }
 0x2ef   :  { %257 = vsyncadd [#allocation3], 4294967280 }
 0x2f0   :  { %217 = vsyncpa [#allocation3], 1 }

// kernel: memae_forward.15
= control target key start
LH: loop header
LB: loop body
LE: loop exit
PB: predicated region body
PF: predicated region fallthrough
CT: control target
= control target key end

     0   :  { %s2796_s15 = smov 0   ;;  %s2798_s16 = smov 0   ;;  %s3433_s0 = inlined_call_operand.vmem [shape: bf16[8,1024], index: 0, kind: input, shape index: {}]   ;;  %s3434_s1 = inlined_call_operand.vmem [shape: bf16[1024,1024], index: 1, kind: input, shape index: {}]   ;;  %s3435_s2 = inlined_call_operand.vmem [shape: f32[1,1024], index: 2, kind: input, shape index: {}]   ;;  %s3436_s3 = inlined_call_operand.vmem [shape: f32[1,1024], index: 3, kind: input, shape index: {}]   ;;  %s3437_s4 = inlined_call_operand.vmem [shape: f32[8,1024], index: 4, kind: output, shape index: {}]  }
   0x1   :  { %s2800_s17 = smov 0   ;;  %s2802_s18 = smov 0  }
   0x2   :  { %s2804_s19 = smov 0  }
   0x3 LB: > { %s29_s20 = sadd.s32 1, %s2765_s18  ;;  %p77_p1 = scmp.ne.s32.totalorder %s2757_s16, %s2753_s15  ;;  %s2769_s19 = sphi %s2804_s19, %s14_s19   ;;  %s2765_s18 = sphi %s2802_s18, %s3441_s18   ;;  %s2761_s17 = sphi %s2800_s17, %s3440_s17   ;;  %s2757_s16 = sphi %s2798_s16, %s3439_s16   ;;  %s2753_s15 = sphi %s2796_s15, %s3438_s15  }
   0x4   : > { %p31_p0 = scmp.ge.s32.totalorder %s29_s20, 4  ;;  %p78_p2 = scmp.eq.s32.totalorder %s2769_s19, 0 }
   0x5   : > { %s70_s22 = sadd.s32 1, %s2757_s16  ;;  %p2038_p5 = scmp.ge.s32.totalorder %s2769_s19, 4 }
   0x6   : > { %s3443_s20 = smov (%p31_p0, %s29_s20), 0  ;;  %p79_p3 = por %p78_p2, %p77_p1 }
   0x7   : > { %s66_s21 = ssub.s32 %s2765_s18, %s3443_s20  ;;  %196 = sbr.rel (%p2038_p5) target bundleno = 144 (0x90), region = 20 }
   0x8   : > { %p68_p4 = scmp.eq.s32.totalorder %s66_s21, 0 }
   0xa   : > { %s2831_s23 = scalar_select %p68_p4, %s2757_s16, %s70_s22  }
   0xc   : > { %199 = sbr.rel (!%p79_p3) target bundleno = 144 (0x90), region = 24  ;;  %s201_s24 = sand.u32 (%p79_p3), 1, %s2757_s16  }
   0xd   : > { %s2562_s25 = sshll.u32 (%p79_p3), %s2765_s18, 3  ;;  %s2039_s26 = sshll.u32 (%p79_p3), %s201_s24, 10 }
   0xe   : > { %s2839_s29 = scalar_lea.vmem (%p79_p3), %s3434_s1, %s2562_s25  ;;  %s2844_s30 = scalar_lea.vmem (%p79_p3), [#allocation3], %s2039_s26 }
   0xf   : > { %v492_v0 = vld [vmem:[%s2839_s29] sm:$0xff] (%p79_p3) }
  0x10   : > { %v494_v1 = vld [vmem:[%s2839_s29 + $0x20] sm:$0xff] (%p79_p3)  ;;  %493 = vst [vmem:[%s2844_s30] sm:$0xff] (%p79_p3), %v492_v0 }
  0x11   : > { %v496_v2 = vld [vmem:[%s2839_s29 + $0x40] sm:$0xff]  ;;  %495 = vst [vmem:[%s2844_s30 + $0x8] sm:$0xff] %v494_v1 }
  0x12   : > { %v498_v3 = vld [vmem:[%s2839_s29 + $0x60] sm:$0xff]  ;;  %497 = vst [vmem:[%s2844_s30 + $0x10] sm:$0xff] %v496_v2 }
  0x13   : > { %v500_v4 = vld [vmem:[%s2839_s29 + $0x80] sm:$0xff]  ;;  %499 = vst [vmem:[%s2844_s30 + $0x18] sm:$0xff] %v498_v3 }
  0x14   : > { %v502_v5 = vld [vmem:[%s2839_s29 + $0xa0] sm:$0xff]  ;;  %501 = vst [vmem:[%s2844_s30 + $0x20] sm:$0xff] %v500_v4 }
  0x15   : > { %v504_v6 = vld [vmem:[%s2839_s29 + $0xc0] sm:$0xff]  ;;  %503 = vst [vmem:[%s2844_s30 + $0x28] sm:$0xff] %v502_v5 }
  0x16   : > { %v506_v7 = vld [vmem:[%s2839_s29 + $0xe0] sm:$0xff]  ;;  %505 = vst [vmem:[%s2844_s30 + $0x30] sm:$0xff] %v504_v6 }
  0x17   : > { %v508_v8 = vld [vmem:[%s2839_s29 + $0x100] sm:$0xff]  ;;  %507 = vst [vmem:[%s2844_s30 + $0x38] sm:$0xff] %v506_v7 }
  0x18   : > { %v510_v9 = vld [vmem:[%s2839_s29 + $0x120] sm:$0xff]  ;;  %509 = vst [vmem:[%s2844_s30 + $0x40] sm:$0xff] %v508_v8 }
  0x19   : > { %v512_v10 = vld [vmem:[%s2839_s29 + $0x140] sm:$0xff]  ;;  %511 = vst [vmem:[%s2844_s30 + $0x48] sm:$0xff] %v510_v9 }
  0x1a   : > { %v514_v11 = vld [vmem:[%s2839_s29 + $0x160] sm:$0xff]  ;;  %513 = vst [vmem:[%s2844_s30 + $0x50] sm:$0xff] %v512_v10 }
  0x1b   : > { %v516_v12 = vld [vmem:[%s2839_s29 + $0x180] sm:$0xff]  ;;  %515 = vst [vmem:[%s2844_s30 + $0x58] sm:$0xff] %v514_v11 }
  0x1c   : > { %v518_v13 = vld [vmem:[%s2839_s29 + $0x1a0] sm:$0xff]  ;;  %517 = vst [vmem:[%s2844_s30 + $0x60] sm:$0xff] %v516_v12 }
  0x1d   : > { %v520_v14 = vld [vmem:[%s2839_s29 + $0x1c0] sm:$0xff]  ;;  %519 = vst [vmem:[%s2844_s30 + $0x68] sm:$0xff] %v518_v13 }
  0x1e   : > { %v522_v15 = vld [vmem:[%s2839_s29 + $0x1e0] sm:$0xff]  ;;  %521 = vst [vmem:[%s2844_s30 + $0x70] sm:$0xff] %v520_v14 }
  0x1f   : > { %v524_v16 = vld [vmem:[%s2839_s29 + $0x200] sm:$0xff]  ;;  %523 = vst [vmem:[%s2844_s30 + $0x78] sm:$0xff] %v522_v15 }
  0x20   : > { %v526_v17 = vld [vmem:[%s2839_s29 + $0x220] sm:$0xff]  ;;  %525 = vst [vmem:[%s2844_s30 + $0x80] sm:$0xff] %v524_v16 }
  0x21   : > { %v528_v18 = vld [vmem:[%s2839_s29 + $0x240] sm:$0xff]  ;;  %527 = vst [vmem:[%s2844_s30 + $0x88] sm:$0xff] %v526_v17 }
  0x22   : > { %v530_v19 = vld [vmem:[%s2839_s29 + $0x260] sm:$0xff]  ;;  %529 = vst [vmem:[%s2844_s30 + $0x90] sm:$0xff] %v528_v18 }
  0x23   : > { %v532_v20 = vld [vmem:[%s2839_s29 + $0x280] sm:$0xff]  ;;  %531 = vst [vmem:[%s2844_s30 + $0x98] sm:$0xff] %v530_v19 }
  0x24   : > { %v534_v21 = vld [vmem:[%s2839_s29 + $0x2a0] sm:$0xff]  ;;  %533 = vst [vmem:[%s2844_s30 + $0xa0] sm:$0xff] %v532_v20 }
  0x25   : > { %v536_v22 = vld [vmem:[%s2839_s29 + $0x2c0] sm:$0xff]  ;;  %535 = vst [vmem:[%s2844_s30 + $0xa8] sm:$0xff] %v534_v21 }
  0x26   : > { %v538_v23 = vld [vmem:[%s2839_s29 + $0x2e0] sm:$0xff]  ;;  %537 = vst [vmem:[%s2844_s30 + $0xb0] sm:$0xff] %v536_v22 }
  0x27   : > { %v540_v24 = vld [vmem:[%s2839_s29 + $0x300] sm:$0xff]  ;;  %539 = vst [vmem:[%s2844_s30 + $0xb8] sm:$0xff] %v538_v23 }
  0x28   : > { %v542_v25 = vld [vmem:[%s2839_s29 + $0x320] sm:$0xff]  ;;  %541 = vst [vmem:[%s2844_s30 + $0xc0] sm:$0xff] %v540_v24 }
  0x29   : > { %v544_v26 = vld [vmem:[%s2839_s29 + $0x340] sm:$0xff]  ;;  %543 = vst [vmem:[%s2844_s30 + $0xc8] sm:$0xff] %v542_v25 }
  0x2a   : > { %v546_v27 = vld [vmem:[%s2839_s29 + $0x360] sm:$0xff]  ;;  %545 = vst [vmem:[%s2844_s30 + $0xd0] sm:$0xff] %v544_v26 }
  0x2b   : > { %v548_v28 = vld [vmem:[%s2839_s29 + $0x380] sm:$0xff]  ;;  %547 = vst [vmem:[%s2844_s30 + $0xd8] sm:$0xff] %v546_v27 }
  0x2c   : > { %v550_v29 = vld [vmem:[%s2839_s29 + $0x3a0] sm:$0xff]  ;;  %549 = vst [vmem:[%s2844_s30 + $0xe0] sm:$0xff] %v548_v28 }
  0x2d   : > { %v552_v30 = vld [vmem:[%s2839_s29 + $0x3c0] sm:$0xff]  ;;  %551 = vst [vmem:[%s2844_s30 + $0xe8] sm:$0xff] %v550_v29 }
  0x2e   : > { %v554_v31 = vld [vmem:[%s2839_s29 + $0x3e0] sm:$0xff]  ;;  %553 = vst [vmem:[%s2844_s30 + $0xf0] sm:$0xff] %v552_v30 }
  0x2f   : > { %v556_v32 = vld [vmem:[%s2839_s29 + $0x400] sm:$0xff]  ;;  %555 = vst [vmem:[%s2844_s30 + $0xf8] sm:$0xff] %v554_v31 }
  0x30   : > { %v558_v33 = vld [vmem:[%s2839_s29 + $0x420] sm:$0xff]  ;;  %557 = vst [vmem:[%s2844_s30 + $0x100] sm:$0xff] %v556_v32 }
  0x31   : > { %v560_v34 = vld [vmem:[%s2839_s29 + $0x440] sm:$0xff]  ;;  %559 = vst [vmem:[%s2844_s30 + $0x108] sm:$0xff] %v558_v33 }
  0x32   : > { %v562_v35 = vld [vmem:[%s2839_s29 + $0x460] sm:$0xff]  ;;  %561 = vst [vmem:[%s2844_s30 + $0x110] sm:$0xff] %v560_v34 }
  0x33   : > { %v564_v36 = vld [vmem:[%s2839_s29 + $0x480] sm:$0xff]  ;;  %563 = vst [vmem:[%s2844_s30 + $0x118] sm:$0xff] %v562_v35 }
  0x34   : > { %v566_v37 = vld [vmem:[%s2839_s29 + $0x4a0] sm:$0xff]  ;;  %565 = vst [vmem:[%s2844_s30 + $0x120] sm:$0xff] %v564_v36 }
  0x35   : > { %v568_v38 = vld [vmem:[%s2839_s29 + $0x4c0] sm:$0xff]  ;;  %567 = vst [vmem:[%s2844_s30 + $0x128] sm:$0xff] %v566_v37 }
  0x36   : > { %v570_v39 = vld [vmem:[%s2839_s29 + $0x4e0] sm:$0xff]  ;;  %569 = vst [vmem:[%s2844_s30 + $0x130] sm:$0xff] %v568_v38 }
  0x37   : > { %v572_v40 = vld [vmem:[%s2839_s29 + $0x500] sm:$0xff]  ;;  %571 = vst [vmem:[%s2844_s30 + $0x138] sm:$0xff] %v570_v39 }
  0x38   : > { %v574_v41 = vld [vmem:[%s2839_s29 + $0x520] sm:$0xff]  ;;  %573 = vst [vmem:[%s2844_s30 + $0x140] sm:$0xff] %v572_v40 }
  0x39   : > { %v576_v42 = vld [vmem:[%s2839_s29 + $0x540] sm:$0xff]  ;;  %575 = vst [vmem:[%s2844_s30 + $0x148] sm:$0xff] %v574_v41 }
  0x3a   : > { %v578_v43 = vld [vmem:[%s2839_s29 + $0x560] sm:$0xff]  ;;  %577 = vst [vmem:[%s2844_s30 + $0x150] sm:$0xff] %v576_v42 }
  0x3b   : > { %v580_v44 = vld [vmem:[%s2839_s29 + $0x580] sm:$0xff]  ;;  %579 = vst [vmem:[%s2844_s30 + $0x158] sm:$0xff] %v578_v43 }
  0x3c   : > { %v582_v45 = vld [vmem:[%s2839_s29 + $0x5a0] sm:$0xff]  ;;  %581 = vst [vmem:[%s2844_s30 + $0x160] sm:$0xff] %v580_v44 }
  0x3d   : > { %v584_v46 = vld [vmem:[%s2839_s29 + $0x5c0] sm:$0xff]  ;;  %583 = vst [vmem:[%s2844_s30 + $0x168] sm:$0xff] %v582_v45 }
  0x3e   : > { %v586_v47 = vld [vmem:[%s2839_s29 + $0x5e0] sm:$0xff]  ;;  %585 = vst [vmem:[%s2844_s30 + $0x170] sm:$0xff] %v584_v46 }
  0x3f   : > { %v588_v48 = vld [vmem:[%s2839_s29 + $0x600] sm:$0xff]  ;;  %587 = vst [vmem:[%s2844_s30 + $0x178] sm:$0xff] %v586_v47 }
  0x40   : > { %v590_v49 = vld [vmem:[%s2839_s29 + $0x620] sm:$0xff]  ;;  %589 = vst [vmem:[%s2844_s30 + $0x180] sm:$0xff] %v588_v48 }
  0x41   : > { %v592_v50 = vld [vmem:[%s2839_s29 + $0x640] sm:$0xff]  ;;  %591 = vst [vmem:[%s2844_s30 + $0x188] sm:$0xff] %v590_v49 }
  0x42   : > { %v594_v51 = vld [vmem:[%s2839_s29 + $0x660] sm:$0xff]  ;;  %593 = vst [vmem:[%s2844_s30 + $0x190] sm:$0xff] %v592_v50 }
  0x43   : > { %v596_v52 = vld [vmem:[%s2839_s29 + $0x680] sm:$0xff]  ;;  %595 = vst [vmem:[%s2844_s30 + $0x198] sm:$0xff] %v594_v51 }
  0x44   : > { %v598_v53 = vld [vmem:[%s2839_s29 + $0x6a0] sm:$0xff]  ;;  %597 = vst [vmem:[%s2844_s30 + $0x1a0] sm:$0xff] %v596_v52 }
  0x45   : > { %v600_v54 = vld [vmem:[%s2839_s29 + $0x6c0] sm:$0xff]  ;;  %599 = vst [vmem:[%s2844_s30 + $0x1a8] sm:$0xff] %v598_v53 }
  0x46   : > { %v602_v55 = vld [vmem:[%s2839_s29 + $0x6e0] sm:$0xff]  ;;  %601 = vst [vmem:[%s2844_s30 + $0x1b0] sm:$0xff] %v600_v54 }
  0x47   : > { %v604_v56 = vld [vmem:[%s2839_s29 + $0x700] sm:$0xff]  ;;  %603 = vst [vmem:[%s2844_s30 + $0x1b8] sm:$0xff] %v602_v55 }
  0x48   : > { %v606_v57 = vld [vmem:[%s2839_s29 + $0x720] sm:$0xff]  ;;  %605 = vst [vmem:[%s2844_s30 + $0x1c0] sm:$0xff] %v604_v56 }
  0x49   : > { %v608_v58 = vld [vmem:[%s2839_s29 + $0x740] sm:$0xff]  ;;  %607 = vst [vmem:[%s2844_s30 + $0x1c8] sm:$0xff] %v606_v57 }
  0x4a   : > { %v610_v59 = vld [vmem:[%s2839_s29 + $0x760] sm:$0xff]  ;;  %609 = vst [vmem:[%s2844_s30 + $0x1d0] sm:$0xff] %v608_v58 }
  0x4b   : > { %v612_v60 = vld [vmem:[%s2839_s29 + $0x780] sm:$0xff]  ;;  %611 = vst [vmem:[%s2844_s30 + $0x1d8] sm:$0xff] %v610_v59 }
  0x4c   : > { %v614_v61 = vld [vmem:[%s2839_s29 + $0x7a0] sm:$0xff]  ;;  %613 = vst [vmem:[%s2844_s30 + $0x1e0] sm:$0xff] %v612_v60 }
  0x4d   : > { %v616_v62 = vld [vmem:[%s2839_s29 + $0x7c0] sm:$0xff]  ;;  %615 = vst [vmem:[%s2844_s30 + $0x1e8] sm:$0xff] %v614_v61 }
  0x4e   : > { %v618_v63 = vld [vmem:[%s2839_s29 + $0x7e0] sm:$0xff]  ;;  %617 = vst [vmem:[%s2844_s30 + $0x1f0] sm:$0xff] %v616_v62 }
  0x4f   : > { %v620_v0 = vld [vmem:[%s2839_s29 + $0x800] sm:$0xff]  ;;  %619 = vst [vmem:[%s2844_s30 + $0x1f8] sm:$0xff] %v618_v63 }
  0x50   : > { %v622_v1 = vld [vmem:[%s2839_s29 + $0x820] sm:$0xff]  ;;  %621 = vst [vmem:[%s2844_s30 + $0x200] sm:$0xff] %v620_v0 }
  0x51   : > { %v624_v2 = vld [vmem:[%s2839_s29 + $0x840] sm:$0xff]  ;;  %623 = vst [vmem:[%s2844_s30 + $0x208] sm:$0xff] %v622_v1 }
  0x52   : > { %v626_v3 = vld [vmem:[%s2839_s29 + $0x860] sm:$0xff]  ;;  %625 = vst [vmem:[%s2844_s30 + $0x210] sm:$0xff] %v624_v2 }
  0x53   : > { %v628_v4 = vld [vmem:[%s2839_s29 + $0x880] sm:$0xff]  ;;  %627 = vst [vmem:[%s2844_s30 + $0x218] sm:$0xff] %v626_v3 }
  0x54   : > { %v630_v5 = vld [vmem:[%s2839_s29 + $0x8a0] sm:$0xff]  ;;  %629 = vst [vmem:[%s2844_s30 + $0x220] sm:$0xff] %v628_v4 }
  0x55   : > { %v632_v6 = vld [vmem:[%s2839_s29 + $0x8c0] sm:$0xff]  ;;  %631 = vst [vmem:[%s2844_s30 + $0x228] sm:$0xff] %v630_v5 }
  0x56   : > { %v634_v7 = vld [vmem:[%s2839_s29 + $0x8e0] sm:$0xff]  ;;  %633 = vst [vmem:[%s2844_s30 + $0x230] sm:$0xff] %v632_v6 }
  0x57   : > { %v636_v8 = vld [vmem:[%s2839_s29 + $0x900] sm:$0xff]  ;;  %635 = vst [vmem:[%s2844_s30 + $0x238] sm:$0xff] %v634_v7 }
  0x58   : > { %v638_v9 = vld [vmem:[%s2839_s29 + $0x920] sm:$0xff]  ;;  %637 = vst [vmem:[%s2844_s30 + $0x240] sm:$0xff] %v636_v8 }
  0x59   : > { %v640_v10 = vld [vmem:[%s2839_s29 + $0x940] sm:$0xff]  ;;  %639 = vst [vmem:[%s2844_s30 + $0x248] sm:$0xff] %v638_v9 }
  0x5a   : > { %v642_v11 = vld [vmem:[%s2839_s29 + $0x960] sm:$0xff]  ;;  %641 = vst [vmem:[%s2844_s30 + $0x250] sm:$0xff] %v640_v10 }
  0x5b   : > { %v644_v12 = vld [vmem:[%s2839_s29 + $0x980] sm:$0xff]  ;;  %643 = vst [vmem:[%s2844_s30 + $0x258] sm:$0xff] %v642_v11 }
  0x5c   : > { %v646_v13 = vld [vmem:[%s2839_s29 + $0x9a0] sm:$0xff]  ;;  %645 = vst [vmem:[%s2844_s30 + $0x260] sm:$0xff] %v644_v12 }
  0x5d   : > { %v648_v14 = vld [vmem:[%s2839_s29 + $0x9c0] sm:$0xff]  ;;  %647 = vst [vmem:[%s2844_s30 + $0x268] sm:$0xff] %v646_v13 }
  0x5e   : > { %v650_v15 = vld [vmem:[%s2839_s29 + $0x9e0] sm:$0xff]  ;;  %649 = vst [vmem:[%s2844_s30 + $0x270] sm:$0xff] %v648_v14 }
  0x5f   : > { %v652_v16 = vld [vmem:[%s2839_s29 + $0xa00] sm:$0xff]  ;;  %651 = vst [vmem:[%s2844_s30 + $0x278] sm:$0xff] %v650_v15 }
  0x60   : > { %v654_v17 = vld [vmem:[%s2839_s29 + $0xa20] sm:$0xff]  ;;  %653 = vst [vmem:[%s2844_s30 + $0x280] sm:$0xff] %v652_v16 }
  0x61   : > { %v656_v18 = vld [vmem:[%s2839_s29 + $0xa40] sm:$0xff]  ;;  %655 = vst [vmem:[%s2844_s30 + $0x288] sm:$0xff] %v654_v17 }
  0x62   : > { %v658_v19 = vld [vmem:[%s2839_s29 + $0xa60] sm:$0xff]  ;;  %657 = vst [vmem:[%s2844_s30 + $0x290] sm:$0xff] %v656_v18 }
  0x63   : > { %v660_v20 = vld [vmem:[%s2839_s29 + $0xa80] sm:$0xff]  ;;  %659 = vst [vmem:[%s2844_s30 + $0x298] sm:$0xff] %v658_v19 }
  0x64   : > { %v662_v21 = vld [vmem:[%s2839_s29 + $0xaa0] sm:$0xff]  ;;  %661 = vst [vmem:[%s2844_s30 + $0x2a0] sm:$0xff] %v660_v20 }
  0x65   : > { %v664_v22 = vld [vmem:[%s2839_s29 + $0xac0] sm:$0xff]  ;;  %663 = vst [vmem:[%s2844_s30 + $0x2a8] sm:$0xff] %v662_v21 }
  0x66   : > { %v666_v23 = vld [vmem:[%s2839_s29 + $0xae0] sm:$0xff]  ;;  %665 = vst [vmem:[%s2844_s30 + $0x2b0] sm:$0xff] %v664_v22 }
  0x67   : > { %v668_v24 = vld [vmem:[%s2839_s29 + $0xb00] sm:$0xff]  ;;  %667 = vst [vmem:[%s2844_s30 + $0x2b8] sm:$0xff] %v666_v23 }
  0x68   : > { %v670_v25 = vld [vmem:[%s2839_s29 + $0xb20] sm:$0xff]  ;;  %669 = vst [vmem:[%s2844_s30 + $0x2c0] sm:$0xff] %v668_v24 }
  0x69   : > { %v672_v26 = vld [vmem:[%s2839_s29 + $0xb40] sm:$0xff]  ;;  %671 = vst [vmem:[%s2844_s30 + $0x2c8] sm:$0xff] %v670_v25 }
  0x6a   : > { %v674_v27 = vld [vmem:[%s2839_s29 + $0xb60] sm:$0xff]  ;;  %673 = vst [vmem:[%s2844_s30 + $0x2d0] sm:$0xff] %v672_v26 }
  0x6b   : > { %v676_v28 = vld [vmem:[%s2839_s29 + $0xb80] sm:$0xff]  ;;  %675 = vst [vmem:[%s2844_s30 + $0x2d8] sm:$0xff] %v674_v27 }
  0x6c   : > { %v678_v29 = vld [vmem:[%s2839_s29 + $0xba0] sm:$0xff]  ;;  %677 = vst [vmem:[%s2844_s30 + $0x2e0] sm:$0xff] %v676_v28 }
  0x6d   : > { %v680_v30 = vld [vmem:[%s2839_s29 + $0xbc0] sm:$0xff]  ;;  %679 = vst [vmem:[%s2844_s30 + $0x2e8] sm:$0xff] %v678_v29 }
  0x6e   : > { %v682_v31 = vld [vmem:[%s2839_s29 + $0xbe0] sm:$0xff]  ;;  %681 = vst [vmem:[%s2844_s30 + $0x2f0] sm:$0xff] %v680_v30 }
  0x6f   : > { %v684_v32 = vld [vmem:[%s2839_s29 + $0xc00] sm:$0xff]  ;;  %683 = vst [vmem:[%s2844_s30 + $0x2f8] sm:$0xff] %v682_v31 }
  0x70   : > { %v686_v33 = vld [vmem:[%s2839_s29 + $0xc20] sm:$0xff]  ;;  %685 = vst [vmem:[%s2844_s30 + $0x300] sm:$0xff] %v684_v32 }
  0x71   : > { %v688_v34 = vld [vmem:[%s2839_s29 + $0xc40] sm:$0xff]  ;;  %687 = vst [vmem:[%s2844_s30 + $0x308] sm:$0xff] %v686_v33 }
  0x72   : > { %v690_v35 = vld [vmem:[%s2839_s29 + $0xc60] sm:$0xff]  ;;  %689 = vst [vmem:[%s2844_s30 + $0x310] sm:$0xff] %v688_v34 }
  0x73   : > { %v692_v36 = vld [vmem:[%s2839_s29 + $0xc80] sm:$0xff]  ;;  %691 = vst [vmem:[%s2844_s30 + $0x318] sm:$0xff] %v690_v35 }
  0x74   : > { %v694_v37 = vld [vmem:[%s2839_s29 + $0xca0] sm:$0xff]  ;;  %693 = vst [vmem:[%s2844_s30 + $0x320] sm:$0xff] %v692_v36 }
  0x75   : > { %v696_v38 = vld [vmem:[%s2839_s29 + $0xcc0] sm:$0xff]  ;;  %695 = vst [vmem:[%s2844_s30 + $0x328] sm:$0xff] %v694_v37 }
  0x76   : > { %v698_v39 = vld [vmem:[%s2839_s29 + $0xce0] sm:$0xff]  ;;  %697 = vst [vmem:[%s2844_s30 + $0x330] sm:$0xff] %v696_v38 }
  0x77   : > { %v700_v40 = vld [vmem:[%s2839_s29 + $0xd00] sm:$0xff]  ;;  %699 = vst [vmem:[%s2844_s30 + $0x338] sm:$0xff] %v698_v39 }
  0x78   : > { %v702_v41 = vld [vmem:[%s2839_s29 + $0xd20] sm:$0xff]  ;;  %701 = vst [vmem:[%s2844_s30 + $0x340] sm:$0xff] %v700_v40 }
  0x79   : > { %v704_v42 = vld [vmem:[%s2839_s29 + $0xd40] sm:$0xff]  ;;  %703 = vst [vmem:[%s2844_s30 + $0x348] sm:$0xff] %v702_v41 }
  0x7a   : > { %v706_v43 = vld [vmem:[%s2839_s29 + $0xd60] sm:$0xff]  ;;  %705 = vst [vmem:[%s2844_s30 + $0x350] sm:$0xff] %v704_v42 }
  0x7b   : > { %v708_v44 = vld [vmem:[%s2839_s29 + $0xd80] sm:$0xff]  ;;  %707 = vst [vmem:[%s2844_s30 + $0x358] sm:$0xff] %v706_v43 }
  0x7c   : > { %v710_v45 = vld [vmem:[%s2839_s29 + $0xda0] sm:$0xff]  ;;  %709 = vst [vmem:[%s2844_s30 + $0x360] sm:$0xff] %v708_v44 }
  0x7d   : > { %v712_v46 = vld [vmem:[%s2839_s29 + $0xdc0] sm:$0xff]  ;;  %711 = vst [vmem:[%s2844_s30 + $0x368] sm:$0xff] %v710_v45 }
  0x7e   : > { %v714_v47 = vld [vmem:[%s2839_s29 + $0xde0] sm:$0xff]  ;;  %713 = vst [vmem:[%s2844_s30 + $0x370] sm:$0xff] %v712_v46 }
  0x7f   : > { %v716_v48 = vld [vmem:[%s2839_s29 + $0xe00] sm:$0xff]  ;;  %715 = vst [vmem:[%s2844_s30 + $0x378] sm:$0xff] %v714_v47 }
  0x80   : > { %v718_v49 = vld [vmem:[%s2839_s29 + $0xe20] sm:$0xff]  ;;  %717 = vst [vmem:[%s2844_s30 + $0x380] sm:$0xff] %v716_v48 }
  0x81   : > { %v720_v50 = vld [vmem:[%s2839_s29 + $0xe40] sm:$0xff]  ;;  %719 = vst [vmem:[%s2844_s30 + $0x388] sm:$0xff] %v718_v49 }
  0x82   : > { %v722_v51 = vld [vmem:[%s2839_s29 + $0xe60] sm:$0xff]  ;;  %721 = vst [vmem:[%s2844_s30 + $0x390] sm:$0xff] %v720_v50 }
  0x83   : > { %v724_v52 = vld [vmem:[%s2839_s29 + $0xe80] sm:$0xff]  ;;  %723 = vst [vmem:[%s2844_s30 + $0x398] sm:$0xff] %v722_v51 }
  0x84   : > { %v726_v53 = vld [vmem:[%s2839_s29 + $0xea0] sm:$0xff]  ;;  %725 = vst [vmem:[%s2844_s30 + $0x3a0] sm:$0xff] %v724_v52 }
  0x85   : > { %v728_v54 = vld [vmem:[%s2839_s29 + $0xec0] sm:$0xff]  ;;  %727 = vst [vmem:[%s2844_s30 + $0x3a8] sm:$0xff] %v726_v53 }
  0x86   : > { %v730_v55 = vld [vmem:[%s2839_s29 + $0xee0] sm:$0xff]  ;;  %729 = vst [vmem:[%s2844_s30 + $0x3b0] sm:$0xff] %v728_v54 }
  0x87   : > { %v732_v56 = vld [vmem:[%s2839_s29 + $0xf00] sm:$0xff]  ;;  %731 = vst [vmem:[%s2844_s30 + $0x3b8] sm:$0xff] %v730_v55 }
  0x88   : > { %v734_v57 = vld [vmem:[%s2839_s29 + $0xf20] sm:$0xff]  ;;  %733 = vst [vmem:[%s2844_s30 + $0x3c0] sm:$0xff] %v732_v56 }
  0x89   : > { %v736_v58 = vld [vmem:[%s2839_s29 + $0xf40] sm:$0xff]  ;;  %735 = vst [vmem:[%s2844_s30 + $0x3c8] sm:$0xff] %v734_v57 }
  0x8a   : > { %v738_v59 = vld [vmem:[%s2839_s29 + $0xf60] sm:$0xff]  ;;  %737 = vst [vmem:[%s2844_s30 + $0x3d0] sm:$0xff] %v736_v58 }
  0x8b   : > { %v740_v60 = vld [vmem:[%s2839_s29 + $0xf80] sm:$0xff]  ;;  %739 = vst [vmem:[%s2844_s30 + $0x3d8] sm:$0xff] %v738_v59 }
  0x8c   : > { %v742_v61 = vld [vmem:[%s2839_s29 + $0xfa0] sm:$0xff]  ;;  %741 = vst [vmem:[%s2844_s30 + $0x3e0] sm:$0xff] %v740_v60 }
  0x8d   : > { %v744_v62 = vld [vmem:[%s2839_s29 + $0xfc0] sm:$0xff]  ;;  %743 = vst [vmem:[%s2844_s30 + $0x3e8] sm:$0xff] %v742_v61 }
  0x8e   : > { %v746_v63 = vld [vmem:[%s2839_s29 + $0xfe0] sm:$0xff]  ;;  %745 = vst [vmem:[%s2844_s30 + $0x3f0] sm:$0xff] %v744_v62 }
  0x8f   : > { %747 = vst [vmem:[%s2844_s30 + $0x3f8] sm:$0xff] %v746_v63 }
  0x90 PF: > { %p2042_p6 = scmp.ge.s32.totalorder %s2769_s19, 1  ;;  %p768_p7 = scmp.lt.s32.totalorder %s2769_s19, 5 }
  0x92   : > { %p769_p8 = pnand %p2042_p6, %p768_p7 }
  0x93   : > { %s775_s5 = sand.u32 (!%p769_p8), 1, %s2753_s15   ;;  %s2044_s21 = sshll.u32 (!%p769_p8), %s2761_s17, 1 }
  0x94   : > { %772 = sbr.rel (%p769_p8) target bundleno = 429 (0x1ad), region = 70  ;;  %s2043_s6 = sshll.u32 (!%p769_p8), %s775_s5, 10 }
  0x95   : > { %s3102_s7 = scalar_lea.vmem (!%p769_p8), [#allocation3], %s2043_s6  ;;  %p834_p9 = scmp.lt.s32.totalorder (!%p769_p8), %s2044_s21, 7 }
  0x99   : > { %v2106_v0 = vld [vmem:[%s3102_s7 + $0x70] sm:$0xf]  ;;  %v2578_v1 = vld [vmem:[%s3102_s7 + $0x74] sm:$0xf0]  ;;  %v2098_v11 = vld [vmem:[%s3102_s7 + $0x60] sm:$0xf] }
  0x9a   : > { %v2170_v2 = vld [vmem:[%s3102_s7 + $0xf0] sm:$0xf]  ;;  %v2107_v3 = vor.u32 %v2578_v1, %v2106_v0  ;;  %v2594_v4 = vld [vmem:[%s3102_s7 + $0xf4] sm:$0xf0]  ;;  %v2576_v13 = vld [vmem:[%s3102_s7 + $0x64] sm:$0xf0] }
  0x9b   : > { %v2234_v5 = vld [vmem:[%s3102_s7 + $0x170] sm:$0xf]  ;;  %v2610_v6 = vld [vmem:[%s3102_s7 + $0x174] sm:$0xf0]  ;;  %v2171_v7 = vor.u32 %v2594_v4, %v2170_v2  ;;  %v2162_v14 = vld [vmem:[%s3102_s7 + $0xe0] sm:$0xf]  ;;  %v2099_v16 = vor.u32 %v2576_v13, %v2098_v11 }
  0x9c   : > { %v2235_v8 = vor.u32 %v2610_v6, %v2234_v5  ;;  %v2298_v9 = vld [vmem:[%s3102_s7 + $0x1f0] sm:$0xf]  ;;  %v2626_v10 = vld [vmem:[%s3102_s7 + $0x1f4] sm:$0xf0]  ;;  %1661 = vmatpush.bf16.msra.mxu0 %v2107_v3  ;;  %v2592_v15 = vld [vmem:[%s3102_s7 + $0xe4] sm:$0xf0] }
  0x9d   : > { %v2299_v12 = vor.u32 %v2626_v10, %v2298_v9  ;;  %1674 = vmatpush.bf16.msra.mxu1 %v2171_v7  ;;  %v2163_v17 = vor.u32 %v2592_v15, %v2162_v14  ;;  %v2226_v18 = vld [vmem:[%s3102_s7 + $0x160] sm:$0xf]  ;;  %v2608_v19 = vld [vmem:[%s3102_s7 + $0x164] sm:$0xf0]  ;;  %v2090_v23 = vld [vmem:[%s3102_s7 + $0x50] sm:$0xf] }
  0x9e   : > { %1687 = vmatpush.bf16.msra.mxu2 %v2235_v8  ;;  %v2290_v20 = vld [vmem:[%s3102_s7 + $0x1e0] sm:$0xf]  ;;  %v2227_v21 = vor.u32 %v2608_v19, %v2226_v18  ;;  %v2624_v22 = vld [vmem:[%s3102_s7 + $0x1e4] sm:$0xf0]  ;;  %v2574_v24 = vld [vmem:[%s3102_s7 + $0x54] sm:$0xf0] }
  0x9f   : > { %1700 = vmatpush.bf16.msra.mxu3 %v2299_v12  ;;  %v2291_v25 = vor.u32 %v2624_v22, %v2290_v20  ;;  %v2154_v26 = vld [vmem:[%s3102_s7 + $0xd0] sm:$0xf]  ;;  %v2590_v27 = vld [vmem:[%s3102_s7 + $0xd4] sm:$0xf0]  ;;  %v2091_v29 = vor.u32 %v2574_v24, %v2090_v23  ;;  %v2082_v35 = vld [vmem:[%s3102_s7 + $0x40] sm:$0xf] }
  0xa0   : > { %v2218_v28 = vld [vmem:[%s3102_s7 + $0x150] sm:$0xf]  ;;  %1662 = vmatpush.bf16.msra.mxu0 %v2099_v16  ;;  %v2606_v30 = vld [vmem:[%s3102_s7 + $0x154] sm:$0xf0]  ;;  %v2155_v33 = vor.u32 %v2590_v27, %v2154_v26  ;;  %v2572_v36 = vld [vmem:[%s3102_s7 + $0x44] sm:$0xf0] }
  0xa1   : > { %v2282_v31 = vld [vmem:[%s3102_s7 + $0x1d0] sm:$0xf]  ;;  %v2622_v32 = vld [vmem:[%s3102_s7 + $0x1d4] sm:$0xf0]  ;;  %1675 = vmatpush.bf16.msra.mxu1 %v2163_v17  ;;  %v2219_v34 = vor.u32 %v2606_v30, %v2218_v28  ;;  %v2146_v37 = vld [vmem:[%s3102_s7 + $0xc0] sm:$0xf]  ;;  %v2083_v44 = vor.u32 %v2572_v36, %v2082_v35 }
  0xa2   : > { %1688 = vmatpush.bf16.msra.mxu2 %v2227_v21  ;;  %v2283_v38 = vor.u32 %v2622_v32, %v2282_v31  ;;  %v2588_v39 = vld [vmem:[%s3102_s7 + $0xc4] sm:$0xf0]  ;;  %v2210_v40 = vld [vmem:[%s3102_s7 + $0x140] sm:$0xf]  ;;  %v2074_v47 = vld [vmem:[%s3102_s7 + $0x30] sm:$0xf] }
  0xa3   : > { %1701 = vmatpush.bf16.msra.mxu3 %v2291_v25  ;;  %v2604_v41 = vld [vmem:[%s3102_s7 + $0x144] sm:$0xf0]  ;;  %v2274_v42 = vld [vmem:[%s3102_s7 + $0x1c0] sm:$0xf]  ;;  %v2147_v45 = vor.u32 %v2588_v39, %v2146_v37  ;;  %v2570_v48 = vld [vmem:[%s3102_s7 + $0x34] sm:$0xf0] }
  0xa4   : > { %v2620_v43 = vld [vmem:[%s3102_s7 + $0x1c4] sm:$0xf0]  ;;  %1663 = vmatpush.bf16.msra.mxu0 %v2091_v29  ;;  %v2211_v46 = vor.u32 %v2604_v41, %v2210_v40  ;;  %v2138_v49 = vld [vmem:[%s3102_s7 + $0xb0] sm:$0xf]  ;;  %v2586_v51 = vld [vmem:[%s3102_s7 + $0xb4] sm:$0xf0]  ;;  %v2075_v56 = vor.u32 %v2570_v48, %v2074_v47 }
  0xa5   : > { %1676 = vmatpush.bf16.msra.mxu1 %v2155_v33  ;;  %v2275_v50 = vor.u32 %v2620_v43, %v2274_v42  ;;  %v2202_v52 = vld [vmem:[%s3102_s7 + $0x130] sm:$0xf]  ;;  %v2602_v53 = vld [vmem:[%s3102_s7 + $0x134] sm:$0xf0]  ;;  %v2139_v57 = vor.u32 %v2586_v51, %v2138_v49  ;;  %v2066_v59 = vld [vmem:[%s3102_s7 + $0x20] sm:$0xf] }
  0xa6   : > { %1689 = vmatpush.bf16.msra.mxu2 %v2219_v34  ;;  %v2266_v54 = vld [vmem:[%s3102_s7 + $0x1b0] sm:$0xf]  ;;  %v2618_v55 = vld [vmem:[%s3102_s7 + $0x1b4] sm:$0xf0]  ;;  %v2203_v58 = vor.u32 %v2602_v53, %v2202_v52  ;;  %v2568_v60 = vld [vmem:[%s3102_s7 + $0x24] sm:$0xf0] }
  0xa7   : > { %1702 = vmatpush.bf16.msra.mxu3 %v2283_v38  ;;  %v2130_v61 = vld [vmem:[%s3102_s7 + $0xa0] sm:$0xf]  ;;  %v2267_v62 = vor.u32 %v2618_v55, %v2266_v54  ;;  %v2584_v63 = vld [vmem:[%s3102_s7 + $0xa4] sm:$0xf0]  ;;  %v2067_v4 = vor.u32 %v2568_v60, %v2066_v59  ;;  %v2058_v7 = vld [vmem:[%s3102_s7 + $0x10] sm:$0xf] }
  0xa8   : > { %1664 = vmatpush.bf16.msra.mxu0 %v2083_v44  ;;  %v2194_v0 = vld [vmem:[%s3102_s7 + $0x120] sm:$0xf]  ;;  %v2600_v1 = vld [vmem:[%s3102_s7 + $0x124] sm:$0xf0]  ;;  %v2131_v5 = vor.u32 %v2584_v63, %v2130_v61  ;;  %v2566_v8 = vld [vmem:[%s3102_s7 + $0x14] sm:$0xf0] }
  0xa9   : > { %1677 = vmatpush.bf16.msra.mxu1 %v2147_v45  ;;  %v2258_v2 = vld [vmem:[%s3102_s7 + $0x1a0] sm:$0xf]  ;;  %v2616_v3 = vld [vmem:[%s3102_s7 + $0x1a4] sm:$0xf0]  ;;  %v2195_v6 = vor.u32 %v2600_v1, %v2194_v0  ;;  %v2122_v9 = vld [vmem:[%s3102_s7 + $0x90] sm:$0xf]  ;;  %v2059_v16 = vor.u32 %v2566_v8, %v2058_v7 }
  0xaa   : > { %1690 = vmatpush.bf16.msra.mxu2 %v2211_v46  ;;  %v2259_v10 = vor.u32 %v2616_v3, %v2258_v2  ;;  %v2582_v11 = vld [vmem:[%s3102_s7 + $0x94] sm:$0xf0]  ;;  %v2186_v12 = vld [vmem:[%s3102_s7 + $0x110] sm:$0xf]  ;;  %v2050_v17 = vld [vmem:[%s3102_s7] sm:$0xf] }
  0xab   : > { %1703 = vmatpush.bf16.msra.mxu3 %v2275_v50  ;;  %v2598_v13 = vld [vmem:[%s3102_s7 + $0x114] sm:$0xf0]  ;;  %v2250_v14 = vld [vmem:[%s3102_s7 + $0x190] sm:$0xf]  ;;  %v2564_v18 = vld [vmem:[%s3102_s7 + $0x4] sm:$0xf0]  ;;  %v2123_v19 = vor.u32 %v2582_v11, %v2122_v9 }
  0xac   : > { %1665 = vmatpush.bf16.msra.mxu0 %v2075_v56  ;;  %v2614_v15 = vld [vmem:[%s3102_s7 + $0x194] sm:$0xf0]  ;;  %v2187_v20 = vor.u32 %v2598_v13, %v2186_v12  ;;  %v2114_v21 = vld [vmem:[%s3102_s7 + $0x80] sm:$0xf]  ;;  %v2580_v22 = vld [vmem:[%s3102_s7 + $0x84] sm:$0xf0]  ;;  %v2051_v31 = vor.u32 %v2564_v18, %v2050_v17 }
  0xad   : > { %1678 = vmatpush.bf16.msra.mxu1 %v2139_v57  ;;  %v2178_v23 = vld [vmem:[%s3102_s7 + $0x100] sm:$0xf]  ;;  %v2251_v24 = vor.u32 %v2614_v15, %v2250_v14  ;;  %v2596_v25 = vld [vmem:[%s3102_s7 + $0x104] sm:$0xf0]  ;;  %v2362_v28 = vld [vmem:[%s3102_s7 + $0x270] sm:$0xf]  ;;  %v2115_v35 = vor.u32 %v2580_v22, %v2114_v21 }
  0xae   : > { %1691 = vmatpush.bf16.msra.mxu2 %v2203_v58  ;;  %v2242_v26 = vld [vmem:[%s3102_s7 + $0x180] sm:$0xf]  ;;  %v2612_v27 = vld [vmem:[%s3102_s7 + $0x184] sm:$0xf0]  ;;  %v2642_v29 = vld [vmem:[%s3102_s7 + $0x274] sm:$0xf0]  ;;  %v2179_v36 = vor.u32 %v2596_v25, %v2178_v23 }
  0xaf   : > { %1704 = vmatpush.bf16.msra.mxu3 %v2267_v62  ;;  %v2426_v30 = vld [vmem:[%s3102_s7 + $0x2f0] sm:$0xf]  ;;  %v2658_v32 = vld [vmem:[%s3102_s7 + $0x2f4] sm:$0xf0]  ;;  %v2243_v39 = vor.u32 %v2612_v27, %v2242_v26  ;;  %v2363_v40 = vor.u32 %v2642_v29, %v2362_v28  ;;  %v2354_v43 = vld [vmem:[%s3102_s7 + $0x260] sm:$0xf] }
  0xb0   : > { %1666 = vmatpush.bf16.msra.mxu0 %v2067_v4  ;;  %v2490_v33 = vld [vmem:[%s3102_s7 + $0x370] sm:$0xf]  ;;  %v2674_v34 = vld [vmem:[%s3102_s7 + $0x374] sm:$0xf0]  ;;  %v2427_v41 = vor.u32 %v2658_v32, %v2426_v30  ;;  %v2640_v44 = vld [vmem:[%s3102_s7 + $0x264] sm:$0xf0] }
  0xb1   : > { %1679 = vmatpush.bf16.msra.mxu1 %v2131_v5  ;;  %v2554_v37 = vld [vmem:[%s3102_s7 + $0x3f0] sm:$0xf]  ;;  %v2690_v38 = vld [vmem:[%s3102_s7 + $0x3f4] sm:$0xf0]  ;;  %v2491_v42 = vor.u32 %v2674_v34, %v2490_v33  ;;  %v2418_v45 = vld [vmem:[%s3102_s7 + $0x2e0] sm:$0xf]  ;;  %v2355_v52 = vor.u32 %v2640_v44, %v2354_v43 }
  0xb2   : > { %1692 = vmatpush.bf16.msra.mxu2 %v2195_v6  ;;  %v2555_v46 = vor.u32 %v2690_v38, %v2554_v37  ;;  %v2656_v47 = vld [vmem:[%s3102_s7 + $0x2e4] sm:$0xf0]  ;;  %v2482_v48 = vld [vmem:[%s3102_s7 + $0x360] sm:$0xf]  ;;  %v2346_v53 = vld [vmem:[%s3102_s7 + $0x250] sm:$0xf] }
  0xb3   : > { %1705 = vmatpush.bf16.msra.mxu3 %v2259_v10  ;;  %v2672_v49 = vld [vmem:[%s3102_s7 + $0x364] sm:$0xf0]  ;;  %v2546_v50 = vld [vmem:[%s3102_s7 + $0x3e0] sm:$0xf]  ;;  %v2638_v54 = vld [vmem:[%s3102_s7 + $0x254] sm:$0xf0]  ;;  %v2419_v55 = vor.u32 %v2656_v47, %v2418_v45 }
  0xb4   : > { %1667 = vmatpush.bf16.msra.mxu0 %v2059_v16  ;;  %v2688_v51 = vld [vmem:[%s3102_s7 + $0x3e4] sm:$0xf0]  ;;  %v2483_v56 = vor.u32 %v2672_v49, %v2482_v48  ;;  %v2410_v57 = vld [vmem:[%s3102_s7 + $0x2d0] sm:$0xf]  ;;  %v2654_v58 = vld [vmem:[%s3102_s7 + $0x2d4] sm:$0xf0]  ;;  %v2347_v6 = vor.u32 %v2638_v54, %v2346_v53 }
  0xb5   : > { %1680 = vmatpush.bf16.msra.mxu1 %v2123_v19  ;;  %v862_v59 = vld [vmem:[%s3433_s0 + $0x8] sm:$0xff]  ;;  %v2547_v60 = vor.u32 %v2688_v51, %v2546_v50  ;;  %v2474_v61 = vld [vmem:[%s3102_s7 + $0x350] sm:$0xf]  ;;  %v2670_v62 = vld [vmem:[%s3102_s7 + $0x354] sm:$0xf0]  ;;  %v2411_v9 = vor.u32 %v2654_v58, %v2410_v57  ;;  %s3445_s21 = smov (!%p834_p9, %s2044_s21), 7 }
  0xb6   : > { %1693 = vmatpush.bf16.msra.mxu2 %v2187_v20  ;;  %v999_v63 = vunpack.c.l.b16 %v862_v59  ;;  %v861_v0 = vld [vmem:[%s3433_s0] sm:$0xff]  ;;  %v1000_v1 = vunpack.c.h.b16 %v862_v59  ;;  %v2538_v2 = vld [vmem:[%s3102_s7 + $0x3d0] sm:$0xf]  ;;  %v2686_v3 = vld [vmem:[%s3102_s7 + $0x3d4] sm:$0xf0]  ;;  %v2475_v10 = vor.u32 %v2670_v62, %v2474_v61  ;;  %s836_s25 = scalar_lea.vmem %s3435_s2, %s3445_s21  ;;  %s841_s28 = scalar_lea.vmem %s3436_s3, %s3445_s21 }
  0xb7   : > { %1706 = vmatpush.bf16.msra.mxu3 %v2251_v24  ;;  %v997_v4 = vunpack.c.l.b16 %v861_v0  ;;  %v998_v5 = vunpack.c.h.b16 %v861_v0  ;;  %v2338_v11 = vld [vmem:[%s3102_s7 + $0x240] sm:$0xf]  ;;  %v2636_v12 = vld [vmem:[%s3102_s7 + $0x244] sm:$0xf0]  ;;  %v2539_v15 = vor.u32 %v2686_v3, %v2538_v2  ;;  %v2330_v25 = vld [vmem:[%s3102_s7 + $0x230] sm:$0xf] }
  0xb8   : > { %1668 = vmatpush.bf16.msra.mxu0 %v2051_v31  ;;  %v3198_v7 = vpack.c.b16 %v999_v63, %v999_v63  ;;  %v3200_v8 = vpack.c.b16 %v1000_v1, %v1000_v1  ;;  %v2402_v13 = vld [vmem:[%s3102_s7 + $0x2c0] sm:$0xf]  ;;  %v2652_v16 = vld [vmem:[%s3102_s7 + $0x2c4] sm:$0xf0]  ;;  %v2339_v22 = vor.u32 %v2636_v12, %v2338_v11  ;;  %v2634_v26 = vld [vmem:[%s3102_s7 + $0x234] sm:$0xf0] }
  0xb9   : > { %1681 = vmatpush.bf16.msra.mxu1 %v2115_v35  ;;  %v3205_v14 = vpack.c.b16 %v997_v4, %v997_v4  ;;  %v2466_v17 = vld [vmem:[%s3102_s7 + $0x340] sm:$0xf]  ;;  %v2668_v18 = vld [vmem:[%s3102_s7 + $0x344] sm:$0xf0]  ;;  %v3211_v19 = vpack.c.b16 %v998_v5, %v998_v5  ;;  %v2403_v23 = vor.u32 %v2652_v16, %v2402_v13  ;;  %v2394_v27 = vld [vmem:[%s3102_s7 + $0x2b0] sm:$0xf]  ;;  %v2331_v34 = vor.u32 %v2634_v26, %v2330_v25 }
  0xba   : > { %1694 = vmatpush.bf16.msra.mxu2 %v2179_v36  ;;  %v2530_v20 = vld [vmem:[%s3102_s7 + $0x3c0] sm:$0xf]  ;;  %v2684_v21 = vld [vmem:[%s3102_s7 + $0x3c4] sm:$0xf0]  ;;  %v2467_v24 = vor.u32 %v2668_v18, %v2466_v17  ;;  %v2650_v29 = vld [vmem:[%s3102_s7 + $0x2b4] sm:$0xf0] }
  0xbb   : > { %1707 = vmatpush.bf16.msra.mxu3 %v2243_v39  ;;  %1669 = vmatmul.bf16.vlgmr.msra.gmra.mxu0 %v3205_v14  ;;  %v2531_v28 = vor.u32 %v2684_v21, %v2530_v20  ;;  %v2458_v30 = vld [vmem:[%s3102_s7 + $0x330] sm:$0xf]  ;;  %v2666_v31 = vld [vmem:[%s3102_s7 + $0x334] sm:$0xf0]  ;;  %v2395_v35 = vor.u32 %v2650_v29, %v2394_v27  ;;  %v2322_v37 = vld [vmem:[%s3102_s7 + $0x220] sm:$0xf] }
  0xbc   : > { %1713 = vmatpush.bf16.msrb.mxu0 %v2363_v40  ;;  %1682 = vmatmul.bf16.vlgmr.msra.gmra.mxu1 %v3211_v19  ;;  %v2522_v32 = vld [vmem:[%s3102_s7 + $0x3b0] sm:$0xf]  ;;  %v2682_v33 = vld [vmem:[%s3102_s7 + $0x3b4] sm:$0xf0]  ;;  %v2459_v36 = vor.u32 %v2666_v31, %v2458_v30  ;;  %v2632_v38 = vld [vmem:[%s3102_s7 + $0x224] sm:$0xf0] }
  0xbd   : > { %1726 = vmatpush.bf16.msrb.mxu1 %v2427_v41  ;;  %1695 = vmatmul.bf16.vlgmr.msra.gmra.mxu2 %v3198_v7  ;;  %v2386_v39 = vld [vmem:[%s3102_s7 + $0x2a0] sm:$0xf]  ;;  %v2523_v40 = vor.u32 %v2682_v33, %v2522_v32  ;;  %v2648_v41 = vld [vmem:[%s3102_s7 + $0x2a4] sm:$0xf0]  ;;  %v2314_v49 = vld [vmem:[%s3102_s7 + $0x210] sm:$0xf] }
  0xbe   : > { %1739 = vmatpush.bf16.msrb.mxu2 %v2491_v42  ;;  %1708 = vmatmul.bf16.vlgmr.msra.gmra.mxu3 %v3200_v8  ;;  %v2450_v42 = vld [vmem:[%s3102_s7 + $0x320] sm:$0xf]  ;;  %v2664_v43 = vld [vmem:[%s3102_s7 + $0x324] sm:$0xf0]  ;;  %v2387_v47 = vor.u32 %v2648_v41, %v2386_v39  ;;  %v2630_v50 = vld [vmem:[%s3102_s7 + $0x214] sm:$0xf0] }
  0xbf   : > { %1752 = vmatpush.bf16.msrb.mxu3 %v2555_v46  ;;  %v2514_v44 = vld [vmem:[%s3102_s7 + $0x3a0] sm:$0xf]  ;;  %v2680_v45 = vld [vmem:[%s3102_s7 + $0x3a4] sm:$0xf0]  ;;  %v2323_v46 = vor.u32 %v2632_v38, %v2322_v37  ;;  %v2451_v48 = vor.u32 %v2664_v43, %v2450_v42  ;;  %v2378_v51 = vld [vmem:[%s3102_s7 + $0x290] sm:$0xf]  ;;  %v2315_v59 = vor.u32 %v2630_v50, %v2314_v49 }
  0xc0   : > { %1714 = vmatpush.bf16.msrb.mxu0 %v2355_v52  ;;  %v2515_v52 = vor.u32 %v2680_v45, %v2514_v44  ;;  %v2646_v53 = vld [vmem:[%s3102_s7 + $0x294] sm:$0xf0]  ;;  %v2442_v54 = vld [vmem:[%s3102_s7 + $0x310] sm:$0xf]  ;;  %v2306_v58 = vld [vmem:[%s3102_s7 + $0x200] sm:$0xf] }
  0xc1   : > { %1727 = vmatpush.bf16.msrb.mxu1 %v2419_v55  ;;  %v2662_v55 = vld [vmem:[%s3102_s7 + $0x314] sm:$0xf0]  ;;  %v2370_v61 = vld [vmem:[%s3102_s7 + $0x280] sm:$0xf]  ;;  %v2644_v62 = vld [vmem:[%s3102_s7 + $0x284] sm:$0xf0]  ;;  %v2379_v63 = vor.u32 %v2646_v53, %v2378_v51 }
  0xc2   : > { %1740 = vmatpush.bf16.msrb.mxu2 %v2483_v56  ;;  %v2506_v56 = vld [vmem:[%s3102_s7 + $0x390] sm:$0xf]  ;;  %v2678_v57 = vld [vmem:[%s3102_s7 + $0x394] sm:$0xf0]  ;;  %v2443_v0 = vor.u32 %v2662_v55, %v2442_v54  ;;  %v2434_v1 = vld [vmem:[%s3102_s7 + $0x300] sm:$0xf]  ;;  %v2371_v20 = vor.u32 %v2644_v62, %v2370_v61 }
  0xc3   : > { %1753 = vmatpush.bf16.msrb.mxu3 %v2547_v60  ;;  %v2628_v60 = vld [vmem:[%s3102_s7 + $0x204] sm:$0xf0]  ;;  %v864_v3 = vld [vmem:[%s3433_s0 + $0x18] sm:$0xff]  ;;  %v2507_v4 = vor.u32 %v2678_v57, %v2506_v56  ;;  %v2498_v5 = vld [vmem:[%s3102_s7 + $0x380] sm:$0xf]  ;;  %s2047_s17 = sshll.u32 %s3445_s21, 3 }
  0xc4   : > { %1715 = vmatpush.bf16.msrb.mxu0 %v2347_v6  ;;  %v2660_v2 = vld [vmem:[%s3102_s7 + $0x304] sm:$0xf0]  ;;  %v2108_v11 = vld [vmem:[%s3102_s7 + $0x78] sm:$0xf0]  ;;  %v2593_v12 = vld [vmem:[%s3102_s7 + $0xf4] sm:$0xf]  ;;  %v2307_v13 = vor.u32 %v2628_v60, %v2306_v58  ;;  %v1003_v18 = vunpack.c.l.b16 %v864_v3  ;;  %v1004_v25 = vunpack.c.h.b16 %v864_v3  ;;  %s3414_s5 = scalar_lea.vmem %s3437_s4, %s2047_s17 }
  0xc5   : > { %1728 = vmatpush.bf16.msrb.mxu1 %v2411_v9  ;;  %v2676_v6 = vld [vmem:[%s3102_s7 + $0x384] sm:$0xf0]  ;;  %v863_v9 = vld [vmem:[%s3433_s0 + $0x10] sm:$0xff]  ;;  %v2236_v17 = vld [vmem:[%s3102_s7 + $0x178] sm:$0xf0]  ;;  %v2435_v21 = vor.u32 %v2660_v2, %v2434_v1 }
  0xc6   : > { %1741 = vmatpush.bf16.msrb.mxu2 %v2475_v10  ;;  %v2577_v10 = vld [vmem:[%s3102_s7 + $0x74] sm:$0xf]  ;;  %v2499_v26 = vor.u32 %v2676_v6, %v2498_v5  ;;  %v2575_v31 = vld [vmem:[%s3102_s7 + $0x64] sm:$0xf]  ;;  %v2100_v32 = vld [vmem:[%s3102_s7 + $0x68] sm:$0xf0]  ;;  %v3276_v42 = vpack.c.b16 %v1004_v25, %v1004_v25 }
  0xc7   : > { %1754 = vmatpush.bf16.msrb.mxu3 %v2539_v15  ;;  %v2172_v15 = vld [vmem:[%s3102_s7 + $0xf8] sm:$0xf0]  ;;  %v2609_v16 = vld [vmem:[%s3102_s7 + $0x174] sm:$0xf]  ;;  %v2111_v27 = vor.u32 %v2577_v10, %v2108_v11  ;;  %v2591_v33 = vld [vmem:[%s3102_s7 + $0xe4] sm:$0xf]  ;;  %v2103_v43 = vor.u32 %v2575_v31, %v2100_v32 }
  0xc8   : > { %1716 = vmatpush.bf16.msrb.mxu0 %v2339_v22  ;;  %v2625_v22 = vld [vmem:[%s3102_s7 + $0x1f4] sm:$0xf]  ;;  %v2175_v29 = vor.u32 %v2593_v12, %v2172_v15  ;;  %v2239_v30 = vor.u32 %v2609_v16, %v2236_v17  ;;  %v2607_v37 = vld [vmem:[%s3102_s7 + $0x164] sm:$0xf]  ;;  %v2228_v38 = vld [vmem:[%s3102_s7 + $0x168] sm:$0xf0] }
  0xc9   : > { %1729 = vmatpush.bf16.msrb.mxu1 %v2403_v23  ;;  %v2300_v23 = vld [vmem:[%s3102_s7 + $0x1f8] sm:$0xf0]  ;;  %v2623_v39 = vld [vmem:[%s3102_s7 + $0x1e4] sm:$0xf]  ;;  %v2589_v49 = vld [vmem:[%s3102_s7 + $0xd4] sm:$0xf] }
  0xca   : > { %1742 = vmatpush.bf16.msrb.mxu2 %v2467_v24  ;;  %v1001_v24 = vunpack.c.l.b16 %v863_v9  ;;  %v2156_v51 = vld [vmem:[%s3102_s7 + $0xd8] sm:$0xf0]  ;;  %v2621_v54 = vld [vmem:[%s3102_s7 + $0x1d4] sm:$0xf]  ;;  %v2084_v60 = vld [vmem:[%s3102_s7 + $0x48] sm:$0xf0] }
  0xcb   : > { %1755 = vmatpush.bf16.msrb.mxu3 %v2531_v28  ;;  %v1002_v28 = vunpack.c.h.b16 %v863_v9  ;;  %v2220_v53 = vld [vmem:[%s3102_s7 + $0x158] sm:$0xf0]  ;;  %v2159_v57 = vor.u32 %v2589_v49, %v2156_v51  ;;  %v2587_v61 = vld [vmem:[%s3102_s7 + $0xc4] sm:$0xf]  ;;  %v2212_v1 = vld [vmem:[%s3102_s7 + $0x148] sm:$0xf0] }
  0xcc   : > { %1717 = vmatpush.bf16.msrb.mxu0 %v2331_v34  ;;  %v2303_v34 = vor.u32 %v2625_v22, %v2300_v23  ;;  %v3274_v41 = vpack.c.b16 %v1001_v24, %v1001_v24  ;;  %v2284_v55 = vld [vmem:[%s3102_s7 + $0x1d8] sm:$0xf0]  ;;  %v2619_v2 = vld [vmem:[%s3102_s7 + $0x1c4] sm:$0xf]  ;;  %v2276_v3 = vld [vmem:[%s3102_s7 + $0x1c8] sm:$0xf0] }
  0xcd   : > { %1730 = vmatpush.bf16.msrb.mxu1 %v2395_v35  ;;  %v3267_v35 = vpack.c.b16 %v1003_v18, %v1003_v18  ;;  %v3278_v44 = vpack.c.b16 %v1002_v28, %v1002_v28  ;;  %v2287_v62 = vor.u32 %v2621_v54, %v2284_v55  ;;  %v2569_v9 = vld [vmem:[%s3102_s7 + $0x34] sm:$0xf]  ;;  %v2076_v10 = vld [vmem:[%s3102_s7 + $0x38] sm:$0xf0]  ;;  %v2279_v12 = vor.u32 %v2619_v2, %v2276_v3  ;;  %v2567_v23 = vld [vmem:[%s3102_s7 + $0x24] sm:$0xf] }
  0xce   : > { %1743 = vmatpush.bf16.msrb.mxu2 %v2459_v36  ;;  %v2164_v36 = vld [vmem:[%s3102_s7 + $0xe8] sm:$0xf0]  ;;  %v2585_v11 = vld [vmem:[%s3102_s7 + $0xb4] sm:$0xf]  ;;  %v2204_v16 = vld [vmem:[%s3102_s7 + $0x138] sm:$0xf0] }
  0xcf   : > { %1756 = vmatpush.bf16.msrb.mxu3 %v2523_v40  ;;  %v2292_v40 = vld [vmem:[%s3102_s7 + $0x1e8] sm:$0xf0]  ;;  %v2167_v45 = vor.u32 %v2591_v33, %v2164_v36  ;;  %v2601_v15 = vld [vmem:[%s3102_s7 + $0x134] sm:$0xf]  ;;  %v2268_v18 = vld [vmem:[%s3102_s7 + $0x1b8] sm:$0xf0] }
  0xd0   : > { %1718 = vmatpush.bf16.msrb.mxu0 %v2323_v46  ;;  %v2231_v46 = vor.u32 %v2607_v37, %v2228_v38  ;;  %v2295_v50 = vor.u32 %v2623_v39, %v2292_v40  ;;  %v2617_v17 = vld [vmem:[%s3102_s7 + $0x1b4] sm:$0xf]  ;;  %v2207_v22 = vor.u32 %v2601_v15, %v2204_v16  ;;  %v2068_v24 = vld [vmem:[%s3102_s7 + $0x28] sm:$0xf0]  ;;  %v2583_v25 = vld [vmem:[%s3102_s7 + $0xa4] sm:$0xf] }
  0xd1   : > { %1731 = vmatpush.bf16.msrb.mxu1 %v2387_v47  ;;  %v2573_v47 = vld [vmem:[%s3102_s7 + $0x54] sm:$0xf]  ;;  %v2599_v28 = vld [vmem:[%s3102_s7 + $0x124] sm:$0xf]  ;;  %v2260_v31 = vld [vmem:[%s3102_s7 + $0x1a8] sm:$0xf0]  ;;  %v2071_v32 = vor.u32 %v2567_v23, %v2068_v24 }
  0xd2   : > { %1744 = vmatpush.bf16.msrb.mxu2 %v2451_v48  ;;  %v2092_v48 = vld [vmem:[%s3102_s7 + $0x58] sm:$0xf0]  ;;  %v2565_v36 = vld [vmem:[%s3102_s7 + $0x14] sm:$0xf]  ;;  %v2563_v49 = vld [vmem:[%s3102_s7 + $0x4] sm:$0xf] }
  0xd3   : > { %1757 = vmatpush.bf16.msrb.mxu3 %v2515_v52  ;;  %v2605_v52 = vld [vmem:[%s3102_s7 + $0x154] sm:$0xf]  ;;  %v2095_v56 = vor.u32 %v2573_v47, %v2092_v48  ;;  %v2060_v37 = vld [vmem:[%s3102_s7 + $0x18] sm:$0xf0]  ;;  %v2116_v54 = vld [vmem:[%s3102_s7 + $0x88] sm:$0xf0] }
  0xd4   : > { %1719 = vmatpush.bf16.msrb.mxu0 %v2315_v59  ;;  %v2223_v58 = vor.u32 %v2605_v52, %v2220_v53  ;;  %v2571_v59 = vld [vmem:[%s3102_s7 + $0x44] sm:$0xf]  ;;  %v2581_v38 = vld [vmem:[%s3102_s7 + $0x94] sm:$0xf]  ;;  %v2124_v40 = vld [vmem:[%s3102_s7 + $0x98] sm:$0xf0]  ;;  %v2063_v48 = vor.u32 %v2565_v36, %v2060_v37 }
  0xd5   : > { %1732 = vmatpush.bf16.msrb.mxu1 %v2379_v63  ;;  %v2148_v63 = vld [vmem:[%s3102_s7 + $0xc8] sm:$0xf0]  ;;  %v2252_v47 = vld [vmem:[%s3102_s7 + $0x198] sm:$0xf0]  ;;  %v2127_v51 = vor.u32 %v2581_v38, %v2124_v40  ;;  %v2579_v53 = vld [vmem:[%s3102_s7 + $0x84] sm:$0xf] }
  0xd6   : > { %1745 = vmatpush.bf16.msrb.mxu2 %v2443_v0  ;;  %v2603_v0 = vld [vmem:[%s3102_s7 + $0x144] sm:$0xf]  ;;  %v2151_v5 = vor.u32 %v2587_v61, %v2148_v63  ;;  %v2364_v61 = vld [vmem:[%s3102_s7 + $0x278] sm:$0xf0]  ;;  %v2119_v3 = vor.u32 %v2579_v53, %v2116_v54  ;;  %v2356_v15 = vld [vmem:[%s3102_s7 + $0x268] sm:$0xf0] }
  0xd7   : > { %1758 = vmatpush.bf16.msrb.mxu3 %v2507_v4  ;;  %v2087_v4 = vor.u32 %v2571_v59, %v2084_v60  ;;  %v2215_v6 = vor.u32 %v2603_v0, %v2212_v1  ;;  %v2595_v55 = vld [vmem:[%s3102_s7 + $0x104] sm:$0xf]  ;;  %v2244_v59 = vld [vmem:[%s3102_s7 + $0x188] sm:$0xf0]  ;;  %v2641_v60 = vld [vmem:[%s3102_s7 + $0x274] sm:$0xf] }
  0xd8   : > { %1720 = vmatpush.bf16.msrb.mxu0 %v2307_v13  ;;  %v2140_v13 = vld [vmem:[%s3102_s7 + $0xb8] sm:$0xf0]  ;;  %v2673_v1 = vld [vmem:[%s3102_s7 + $0x374] sm:$0xf]  ;;  %v2655_v16 = vld [vmem:[%s3102_s7 + $0x2e4] sm:$0xf] }
  0xd9   : > { %1733 = vmatpush.bf16.msrb.mxu1 %v2371_v20  ;;  %v2079_v20 = vor.u32 %v2569_v9, %v2076_v10  ;;  %v2428_v0 = vld [vmem:[%s3102_s7 + $0x2f8] sm:$0xf0]  ;;  %v2367_v10 = vor.u32 %v2641_v60, %v2364_v61  ;;  %v2548_v23 = vld [vmem:[%s3102_s7 + $0x3e8] sm:$0xf0]  ;;  %v2649_v53 = vld [vmem:[%s3102_s7 + $0x2b4] sm:$0xf] }
  0xda   : > { %1746 = vmatpush.bf16.msrb.mxu2 %v2435_v21  ;;  %v2143_v21 = vor.u32 %v2585_v11, %v2140_v13  ;;  %v2492_v2 = vld [vmem:[%s3102_s7 + $0x378] sm:$0xf0]  ;;  %v2639_v13 = vld [vmem:[%s3102_s7 + $0x264] sm:$0xf]  ;;  %v2340_v40 = vld [vmem:[%s3102_s7 + $0x248] sm:$0xf0] }
  0xdb   : > { %1759 = vmatpush.bf16.msrb.mxu3 %v2499_v26  ;;  %1721 = vmatmul.bf16.vlgmr.msrb.gmra.mxu0 %v3274_v41  ;;  %v2271_v26 = vor.u32 %v2617_v17, %v2268_v18  ;;  %v2420_v18 = vld [vmem:[%s3102_s7 + $0x2e8] sm:$0xf0]  ;;  %v2359_v24 = vor.u32 %v2639_v13, %v2356_v15  ;;  %v2540_v36 = vld [vmem:[%s3102_s7 + $0x3d8] sm:$0xf0]  ;;  %v2629_v13 = vld [vmem:[%s3102_s7 + $0x214] sm:$0xf] }
  0xdc   : > { %1765 = vmatpush.bf16.msra.mxu0 %v2111_v27  ;;  %1734 = vmatmul.bf16.vlgmr.msrb.gmra.mxu1 %v3278_v44  ;;  %v2132_v27 = vld [vmem:[%s3102_s7 + $0xa8] sm:$0xf0]  ;;  %v2316_v15 = vld [vmem:[%s3102_s7 + $0x218] sm:$0xf0] }
  0xdd   : > { %1778 = vmatpush.bf16.msra.mxu1 %v2175_v29  ;;  %1747 = vmatmul.bf16.vlgmr.msrb.gmra.mxu2 %v3267_v35  ;;  %v2196_v29 = vld [vmem:[%s3102_s7 + $0x128] sm:$0xf0]  ;;  %v2135_v33 = vor.u32 %v2583_v25, %v2132_v27  ;;  %v2423_v25 = vor.u32 %v2655_v16, %v2420_v18  ;;  %v2637_v27 = vld [vmem:[%s3102_s7 + $0x254] sm:$0xf]  ;;  %v2380_v18 = vld [vmem:[%s3102_s7 + $0x298] sm:$0xf0] }
  0xde   : > { %1791 = vmatpush.bf16.msra.mxu2 %v2239_v30  ;;  %1760 = vmatmul.bf16.vlgmr.msrb.gmra.mxu3 %v3276_v42  ;;  %v2615_v30 = vld [vmem:[%s3102_s7 + $0x1a4] sm:$0xf]  ;;  %v2645_v16 = vld [vmem:[%s3102_s7 + $0x294] sm:$0xf] }
  0xdf   : > { %1804 = vmatpush.bf16.msra.mxu3 %v2303_v34  ;;  %v2199_v34 = vor.u32 %v2599_v28, %v2196_v29  ;;  %v2263_v39 = vor.u32 %v2615_v30, %v2260_v31  ;;  %v2348_v28 = vld [vmem:[%s3102_s7 + $0x258] sm:$0xf0]  ;;  %v2653_v29 = vld [vmem:[%s3102_s7 + $0x2d4] sm:$0xf] }
  0xe0   : > { %1766 = vmatpush.bf16.msra.mxu0 %v2103_v43  ;;  %v2597_v43 = vld [vmem:[%s3102_s7 + $0x114] sm:$0xf]  ;;  %v2412_v31 = vld [vmem:[%s3102_s7 + $0x2d8] sm:$0xf0]  ;;  %v2351_v37 = vor.u32 %v2637_v27, %v2348_v28  ;;  %v2627_v27 = vld [vmem:[%s3102_s7 + $0x204] sm:$0xf] }
  0xe1   : > { %1779 = vmatpush.bf16.msra.mxu1 %v2167_v45  ;;  %v2188_v45 = vld [vmem:[%s3102_s7 + $0x118] sm:$0xf0]  ;;  %v2308_v28 = vld [vmem:[%s3102_s7 + $0x208] sm:$0xf0] }
  0xe2   : > { %1792 = vmatpush.bf16.msra.mxu2 %v2231_v46  ;;  %v2613_v46 = vld [vmem:[%s3102_s7 + $0x194] sm:$0xf]  ;;  %v2191_v52 = vor.u32 %v2597_v43, %v2188_v45  ;;  %v2651_v43 = vld [vmem:[%s3102_s7 + $0x2c4] sm:$0xf]  ;;  %v2404_v45 = vld [vmem:[%s3102_s7 + $0x2c8] sm:$0xf0] }
  0xe3   : > { %1805 = vmatpush.bf16.msra.mxu3 %v2295_v50  ;;  %v2052_v50 = vld [vmem:[%s3102_s7 + $0x8] sm:$0xf0] }
  0xe4   : > { %1767 = vmatpush.bf16.msra.mxu0 %v2095_v56  ;;  %v2255_v56 = vor.u32 %v2613_v46, %v2252_v47  ;;  %v2055_v63 = vor.u32 %v2563_v49, %v2052_v50  ;;  %v2468_v46 = vld [vmem:[%s3102_s7 + $0x348] sm:$0xf0]  ;;  %v2683_v47 = vld [vmem:[%s3102_s7 + $0x3c4] sm:$0xf]  ;;  %v2407_v49 = vor.u32 %v2651_v43, %v2404_v45 }
  0xe5   : > { %1780 = vmatpush.bf16.msra.mxu1 %v2159_v57  ;;  %v2180_v57 = vld [vmem:[%s3102_s7 + $0x108] sm:$0xf0] }
  0xe6   : > { %1793 = vmatpush.bf16.msra.mxu2 %v2223_v58  ;;  %v2611_v58 = vld [vmem:[%s3102_s7 + $0x184] sm:$0xf] }
  0xe7   : > { %1806 = vmatpush.bf16.msra.mxu3 %v2287_v62  ;;  %v2657_v62 = vld [vmem:[%s3102_s7 + $0x2f4] sm:$0xf]  ;;  %v2247_v9 = vor.u32 %v2611_v58, %v2244_v59  ;;  %v2524_v59 = vld [vmem:[%s3102_s7 + $0x3b8] sm:$0xf0] }
  0xe8   : > { %1768 = vmatpush.bf16.msra.mxu0 %v2087_v4  ;;  %v2183_v4 = vor.u32 %v2595_v55, %v2180_v57  ;;  %v2431_v11 = vor.u32 %v2657_v62, %v2428_v0  ;;  %v2396_v55 = vld [vmem:[%s3102_s7 + $0x2b8] sm:$0xf0]  ;;  %v2681_v58 = vld [vmem:[%s3102_s7 + $0x3b4] sm:$0xf]  ;;  %v2324_v0 = vld [vmem:[%s3102_s7 + $0x228] sm:$0xf0] }
  0xe9   : > { %1781 = vmatpush.bf16.msra.mxu1 %v2151_v5  ;;  %v2689_v5 = vld [vmem:[%s3102_s7 + $0x3f4] sm:$0xf]  ;;  %v2460_v57 = vld [vmem:[%s3102_s7 + $0x338] sm:$0xf0]  ;;  %v2399_v61 = vor.u32 %v2649_v53, %v2396_v55  ;;  %v1886_v53 = vld [vmem:[%s841_s28] sm:$0x3] }
  0xea   : > { %1794 = vmatpush.bf16.msra.mxu2 %v2215_v6  ;;  %v2556_v6 = vld [vmem:[%s3102_s7 + $0x3f8] sm:$0xf0] }
  0xeb   : > { %1807 = vmatpush.bf16.msra.mxu3 %v2279_v12  ;;  %v2495_v12 = vor.u32 %v2673_v1, %v2492_v2  ;;  %v2559_v17 = vor.u32 %v2689_v5, %v2556_v6  ;;  %v2647_v1 = vld [vmem:[%s3102_s7 + $0x2a4] sm:$0xf]  ;;  %v2527_v2 = vor.u32 %v2681_v58, %v2524_v59  ;;  %v2452_v5 = vld [vmem:[%s3102_s7 + $0x328] sm:$0xf0]  ;;  %v1888_v58 = vperm.slane %v1886_v53, 0 }
  0xec   : > { %1769 = vmatpush.bf16.msra.mxu0 %v2079_v20  ;;  %v2671_v20 = vld [vmem:[%s3102_s7 + $0x364] sm:$0xf] }
  0xed   : > { %1782 = vmatpush.bf16.msra.mxu1 %v2143_v21  ;;  %v2484_v21 = vld [vmem:[%s3102_s7 + $0x368] sm:$0xf0]  ;;  %v2679_v6 = vld [vmem:[%s3102_s7 + $0x3a4] sm:$0xf] }
  0xee   : > { %1795 = vmatpush.bf16.msra.mxu2 %v2207_v22  ;;  %v2687_v22 = vld [vmem:[%s3102_s7 + $0x3e4] sm:$0xf] }
  0xef   : > { %1808 = vmatpush.bf16.msra.mxu3 %v2271_v26  ;;  %v2487_v26 = vor.u32 %v2671_v20, %v2484_v21  ;;  %v2551_v30 = vor.u32 %v2687_v22, %v2548_v23  ;;  %v2661_v20 = vld [vmem:[%s3102_s7 + $0x314] sm:$0xf]  ;;  %v2444_v21 = vld [vmem:[%s3102_s7 + $0x318] sm:$0xf0] }
  0xf0   : > { %1770 = vmatpush.bf16.msra.mxu0 %v2071_v32  ;;  %v2669_v32 = vld [vmem:[%s3102_s7 + $0x354] sm:$0xf]  ;;  %v2508_v23 = vld [vmem:[%s3102_s7 + $0x398] sm:$0xf0] }
  0xf1   : > { %1783 = vmatpush.bf16.msra.mxu1 %v2135_v33  ;;  %v2476_v33 = vld [vmem:[%s3102_s7 + $0x358] sm:$0xf0]  ;;  %v2677_v22 = vld [vmem:[%s3102_s7 + $0x394] sm:$0xf] }
  0xf2   : > { %1796 = vmatpush.bf16.msra.mxu2 %v2199_v34  ;;  %v2685_v34 = vld [vmem:[%s3102_s7 + $0x3d4] sm:$0xf]  ;;  %v2479_v38 = vor.u32 %v2669_v32, %v2476_v33  ;;  %v2659_v32 = vld [vmem:[%s3102_s7 + $0x304] sm:$0xf]  ;;  %v2436_v33 = vld [vmem:[%s3102_s7 + $0x308] sm:$0xf0] }
  0xf3   : > { %1809 = vmatpush.bf16.msra.mxu3 %v2263_v39  ;;  %v2635_v39 = vld [vmem:[%s3102_s7 + $0x244] sm:$0xf] }
  0xf4   : > { %1771 = vmatpush.bf16.msra.mxu0 %v2063_v48  ;;  %v2343_v48 = vor.u32 %v2635_v39, %v2340_v40 }
  0xf5   : > { %1784 = vmatpush.bf16.msra.mxu1 %v2127_v51  ;;  %v2633_v51 = vld [vmem:[%s3102_s7 + $0x234] sm:$0xf] }
  0xf6   : > { %1797 = vmatpush.bf16.msra.mxu2 %v2191_v52  ;;  %v2332_v52 = vld [vmem:[%s3102_s7 + $0x238] sm:$0xf0] }
  0xf7   : > { %1810 = vmatpush.bf16.msra.mxu3 %v2255_v56  ;;  %v2665_v56 = vld [vmem:[%s3102_s7 + $0x334] sm:$0xf]  ;;  %v2335_v60 = vor.u32 %v2633_v51, %v2332_v52  ;;  %v1878_v51 = vld [vmem:[%s836_s25] sm:$0x3] }
  0xf8   : > { %1772 = vmatpush.bf16.msra.mxu0 %v2055_v63  ;;  %v2463_v62 = vor.u32 %v2665_v56, %v2460_v57  ;;  %v2631_v63 = vld [vmem:[%s3102_s7 + $0x224] sm:$0xf]  ;;  %v1880_v56 = vperm.slane %v1878_v51, 0 }
  0xf9   : > { %1785 = vmatpush.bf16.msra.mxu1 %v2119_v3  ;;  %v2388_v3 = vld [vmem:[%s3102_s7 + $0x2a8] sm:$0xf0] }
  0xfa   : > { %1798 = vmatpush.bf16.msra.mxu2 %v2183_v4  ;;  %v2663_v4 = vld [vmem:[%s3102_s7 + $0x324] sm:$0xf] }
  0xfb   : > { %1811 = vmatpush.bf16.msra.mxu3 %v2247_v9  ;;  %1773 = vmatmul.bf16.vlgmr.msra.gmra.mxu0 %v3205_v14  ;;  %v2543_v14 = vor.u32 %v2685_v34, %v2540_v36  ;;  %v2516_v9 = vld [vmem:[%s3102_s7 + $0x3a8] sm:$0xf0]  ;;  %v2675_v34 = vld [vmem:[%s3102_s7 + $0x384] sm:$0xf] }
  0xfc   : > { %1817 = vmatpush.bf16.msrb.mxu0 %v2367_v10  ;;  %1786 = vmatmul.bf16.vlgmr.msra.gmra.mxu1 %v3211_v19  ;;  %v2532_v19 = vld [vmem:[%s3102_s7 + $0x3c8] sm:$0xf0]  ;;  %v2327_v10 = vor.u32 %v2631_v63, %v2324_v0 }
  0xfd   : > { %1830 = vmatpush.bf16.msrb.mxu1 %v2431_v11  ;;  %1799 = vmatmul.bf16.vlgmr.msra.gmra.mxu2 %v3198_v7  ;;  %v2415_v7 = vor.u32 %v2653_v29, %v2412_v31  ;;  %v2535_v54 = vor.u32 %v2683_v47, %v2532_v19  ;;  %v2391_v11 = vor.u32 %v2647_v1, %v2388_v3  ;;  %v2643_v29 = vld [vmem:[%s3102_s7 + $0x284] sm:$0xf]  ;;  %v2372_v31 = vld [vmem:[%s3102_s7 + $0x288] sm:$0xf0] }
  0xfe   : > { %1843 = vmatpush.bf16.msrb.mxu2 %v2495_v12  ;;  %1812 = vmatmul.bf16.vlgmr.msra.gmra.mxu3 %v3200_v8  ;;  %v2667_v8 = vld [vmem:[%s3102_s7 + $0x344] sm:$0xf]  ;;  %v2455_v12 = vor.u32 %v2663_v4, %v2452_v5  ;;  %v2500_v36 = vld [vmem:[%s3102_s7 + $0x388] sm:$0xf0] }
  0xff   : > { %1856 = vmatpush.bf16.msrb.mxu3 %v2559_v17  ;;  %v2471_v50 = vor.u32 %v2667_v8, %v2468_v46  ;;  %v2519_v17 = vor.u32 %v2679_v6, %v2516_v9  ;;  %v2503_v39 = vor.u32 %v2675_v34, %v2500_v36 }
 0x100   : > { %1818 = vmatpush.bf16.msrb.mxu0 %v2359_v24  ;;  %v2319_v24 = vor.u32 %v2629_v13, %v2316_v15 }
 0x101   : > { %1831 = vmatpush.bf16.msrb.mxu1 %v2423_v25  ;;  %v2383_v25 = vor.u32 %v2645_v16, %v2380_v18 }
 0x102   : > { %1844 = vmatpush.bf16.msrb.mxu2 %v2487_v26  ;;  %v2447_v26 = vor.u32 %v2661_v20, %v2444_v21 }
 0x103   : > { %1857 = vmatpush.bf16.msrb.mxu3 %v2551_v30  ;;  %v2511_v30 = vor.u32 %v2677_v22, %v2508_v23 }
 0x104   : > { %1819 = vmatpush.bf16.msrb.mxu0 %v2351_v37  ;;  %v2311_v37 = vor.u32 %v2627_v27, %v2308_v28 }
 0x105   : > { %1832 = vmatpush.bf16.msrb.mxu1 %v2415_v7  ;;  %v2375_v7 = vor.u32 %v2643_v29, %v2372_v31  ;;  %v1889_v29 = vperm.slane %v1886_v53, 1 }
 0x106   : > { %1845 = vmatpush.bf16.msrb.mxu2 %v2479_v38  ;;  %v2439_v38 = vor.u32 %v2659_v32, %v2436_v33 }
 0x107   : > { %1858 = vmatpush.bf16.msrb.mxu3 %v2543_v14 }
 0x108   : > { %1820 = vmatpush.bf16.msrb.mxu0 %v2343_v48 }
 0x109   : > { %1833 = vmatpush.bf16.msrb.mxu1 %v2407_v49 }
 0x10a   : > { %1846 = vmatpush.bf16.msrb.mxu2 %v2471_v50 }
 0x10b   : > { %1859 = vmatpush.bf16.msrb.mxu3 %v2535_v54 }
 0x10c   : > { %1821 = vmatpush.bf16.msrb.mxu0 %v2335_v60 }
 0x10d   : > { %1834 = vmatpush.bf16.msrb.mxu1 %v2399_v61 }
 0x10e   : > { %1847 = vmatpush.bf16.msrb.mxu2 %v2463_v62 }
 0x10f   : > { %1860 = vmatpush.bf16.msrb.mxu3 %v2527_v2 }
 0x110   : > { %1822 = vmatpush.bf16.msrb.mxu0 %v2327_v10 }
 0x111   : > { %1835 = vmatpush.bf16.msrb.mxu1 %v2391_v11 }
 0x112   : > { %1848 = vmatpush.bf16.msrb.mxu2 %v2455_v12 }
 0x113   : > { %1861 = vmatpush.bf16.msrb.mxu3 %v2519_v17 }
 0x114   : > { %1823 = vmatpush.bf16.msrb.mxu0 %v2319_v24 }
 0x115   : > { %1836 = vmatpush.bf16.msrb.mxu1 %v2383_v25  ;;  %v1881_v25 = vperm.slane %v1878_v51, 1 }
 0x116   : > { %1849 = vmatpush.bf16.msrb.mxu2 %v2447_v26 }
 0x117   : > { %1862 = vmatpush.bf16.msrb.mxu3 %v2511_v30 }
 0x118   : > { %1824 = vmatpush.bf16.msrb.mxu0 %v2311_v37 }
 0x119   : > { %1837 = vmatpush.bf16.msrb.mxu1 %v2375_v7 }
 0x11a   : > { %1850 = vmatpush.bf16.msrb.mxu2 %v2439_v38 }
 0x11b   : > { %1863 = vmatpush.bf16.msrb.mxu3 %v2503_v39  ;;  %1825 = vmatmul.bf16.vlgmr.msrb.gmra.mxu0 %v3274_v41 }
 0x11c   : > { %1838 = vmatmul.bf16.vlgmr.msrb.gmra.mxu1 %v3278_v44 }
 0x11d   : > { %1851 = vmatmul.bf16.vlgmr.msrb.gmra.mxu2 %v3267_v35 }
 0x11e   : > { %1864 = vmatmul.bf16.vlgmr.msrb.gmra.mxu3 %v3276_v42 }
 0x138   : > { %v1670_v40 = vpop.f32.mrf.mxu0 }
 0x139   : > { %v1683_v43 = vpop.f32.mrf.mxu1 }
 0x13a   : > { %v1684_v48 = vadd.f32 %v1683_v43, %v1670_v40 }
 0x140   : > { %v1696_v14 = vpop.f32.mrf.mxu2  ;;  %v1672_v8 = vpop.f32.mrf.mxu0 }
 0x141   : > { %v1709_v45 = vpop.f32.mrf.mxu3  ;;  %v1685_v46 = vpop.f32.mrf.mxu1  ;;  %v1697_v49 = vadd.f32 %v1696_v14, %v1684_v48 }
 0x143   : > { %v1710_v41 = vadd.f32 %v1709_v45, %v1697_v49 }
 0x148   : > { %v1698_v47 = vpop.f32.mrf.mxu2 }
 0x149   : > { %v1711_v19 = vpop.f32.mrf.mxu3 }
 0x158   : > { %v1722_v50 = vpop.f32.mrf.mxu0 }
 0x159   : > { %v1723_v35 = vadd.f32 %v1722_v50, %v1710_v41  ;;  %v1735_v42 = vpop.f32.mrf.mxu1 }
 0x15b   : > { %v1736_v44 = vadd.f32 %v1735_v42, %v1723_v35 }
 0x160   : > { %v1748_v52 = vpop.f32.mrf.mxu2  ;;  %v1724_v59 = vpop.f32.mrf.mxu0 }
 0x161   : > { %v1749_v54 = vadd.f32 %v1748_v52, %v1736_v44  ;;  %v1761_v55 = vpop.f32.mrf.mxu3  ;;  %v1737_v60 = vpop.f32.mrf.mxu1 }
 0x163   : > { %v1762_v57 = vadd.f32 %v1761_v55, %v1749_v54 }
 0x165   : > { %v1884_v61 = vmul.f32 %v1880_v56, %v1762_v57 }
 0x167   : > { %v1892_v62 = vadd.f32 %v1888_v58, %v1884_v61 }
 0x168   : > { %v1750_v63 = vpop.f32.mrf.mxu2 }
 0x169   : > { %vm1894_vm0 = vcmp.gt.f32.partialorder %v1892_v62, 0.0  ;;  %v1896_v0 = vmul.f32 0.2, %v1892_v62  ;;  %v1763_v1 = vpop.f32.mrf.mxu3 }
 0x16b   : > { %v1898_v2 = vsel %vm1894_vm0, %v1892_v62, %v1896_v0 }
 0x16c   : > { %1900 = vst [vmem:[%s3414_s5] sm:$0xff] %v1898_v2 }
 0x178   : > { %v1774_v3 = vpop.f32.mrf.mxu0 }
 0x179   : > { %v1787_v4 = vpop.f32.mrf.mxu1 }
 0x17a   : > { %v1788_v13 = vadd.f32 %v1787_v4, %v1774_v3 }
 0x180   : > { %v1800_v5 = vpop.f32.mrf.mxu2  ;;  %v1776_v9 = vpop.f32.mrf.mxu0 }
 0x181   : > { %v1813_v6 = vpop.f32.mrf.mxu3  ;;  %v1789_v10 = vpop.f32.mrf.mxu1  ;;  %v1801_v15 = vadd.f32 %v1800_v5, %v1788_v13 }
 0x183   : > { %v1814_v16 = vadd.f32 %v1813_v6, %v1801_v15 }
 0x188   : > { %v1802_v11 = vpop.f32.mrf.mxu2 }
 0x189   : > { %v1815_v12 = vpop.f32.mrf.mxu3 }
 0x198   : > { %v1826_v17 = vpop.f32.mrf.mxu0 }
 0x199   : > { %v1839_v18 = vpop.f32.mrf.mxu1  ;;  %v1827_v20 = vadd.f32 %v1826_v17, %v1814_v16 }
 0x19b   : > { %v1840_v21 = vadd.f32 %v1839_v18, %v1827_v20 }
 0x1a0   : > { %v1852_v22 = vpop.f32.mrf.mxu2  ;;  %v1828_v26 = vpop.f32.mrf.mxu0 }
 0x1a1   : > { %v1853_v23 = vadd.f32 %v1852_v22, %v1840_v21  ;;  %v1865_v24 = vpop.f32.mrf.mxu3  ;;  %v1841_v27 = vpop.f32.mrf.mxu1 }
 0x1a3   : > { %v1866_v28 = vadd.f32 %v1865_v24, %v1853_v23 }
 0x1a5   : > { %v1885_v30 = vmul.f32 %v1881_v25, %v1866_v28 }
 0x1a7   : > { %v1893_v31 = vadd.f32 %v1889_v29, %v1885_v30 }
 0x1a8   : > { %v1854_v32 = vpop.f32.mrf.mxu2 }
 0x1a9   : > { %vm1895_vm1 = vcmp.gt.f32.partialorder %v1893_v31, 0.0  ;;  %v1897_v33 = vmul.f32 0.2, %v1893_v31  ;;  %v1867_v34 = vpop.f32.mrf.mxu3 }
 0x1ab   : > { %v1899_v36 = vsel %vm1895_vm1, %v1893_v31, %v1897_v33 }
 0x1ac   : > { %1901 = vst [vmem:[%s3414_s5 + $0x8] sm:$0xff] %v1899_v36 }
 0x1ad PF: > { %s14_s19 = sadd.s32 1, %s2769_s19   ;;  %s3438_s15 = smov %s2757_s16 }
 0x1ae   : > { %p11_p10 = scmp.ge.s32.totalorder %s14_s19, 6   ;;  %s3439_s16 = smov %s2831_s23 }
 0x1af   : > { %s3440_s17 = smov %s2765_s18  ;;  %s3441_s18 = smov %s3443_s20 }
 0x1b0   :  { %13 = sbr.rel (!%p11_p10) target bundleno = 3 (0x3), region = 126 }

// kernel: memae_forward.16
= control target key start
LH: loop header
LB: loop body
LE: loop exit
PB: predicated region body
PF: predicated region fallthrough
CT: control target
= control target key end

     0   :  { %s2796_s15 = smov 0   ;;  %s2798_s16 = smov 0   ;;  %s3433_s0 = inlined_call_operand.vmem [shape: bf16[8,1024], index: 0, kind: input, shape index: {}]   ;;  %s3434_s1 = inlined_call_operand.vmem [shape: bf16[1024,512], index: 1, kind: input, shape index: {}]   ;;  %s3435_s2 = inlined_call_operand.vmem [shape: f32[1,512], index: 2, kind: input, shape index: {}]   ;;  %s3436_s3 = inlined_call_operand.vmem [shape: f32[1,512], index: 3, kind: input, shape index: {}]   ;;  %s3437_s4 = inlined_call_operand.vmem [shape: f32[8,512], index: 4, kind: output, shape index: {}]  }
   0x1   :  { %s2800_s17 = smov 0   ;;  %s2802_s18 = smov 0  }
   0x2   :  { %s2804_s19 = smov 0  }
   0x3 LB: > { %s29_s20 = sadd.s32 1, %s2765_s18  ;;  %p77_p1 = scmp.ne.s32.totalorder %s2757_s16, %s2753_s15  ;;  %s2769_s19 = sphi %s2804_s19, %s14_s19   ;;  %s2765_s18 = sphi %s2802_s18, %s3441_s18   ;;  %s2761_s17 = sphi %s2800_s17, %s3440_s17   ;;  %s2757_s16 = sphi %s2798_s16, %s3439_s16   ;;  %s2753_s15 = sphi %s2796_s15, %s3438_s15  }
   0x4   : > { %p31_p0 = scmp.ge.s32.totalorder %s29_s20, 2  ;;  %p78_p2 = scmp.eq.s32.totalorder %s2769_s19, 0 }
   0x5   : > { %s70_s22 = sadd.s32 1, %s2757_s16  ;;  %p2038_p5 = scmp.ge.s32.totalorder %s2769_s19, 2 }
   0x6   : > { %s3443_s20 = smov (%p31_p0, %s29_s20), 0  ;;  %p79_p3 = por %p78_p2, %p77_p1 }
   0x7   : > { %s66_s21 = ssub.s32 %s2765_s18, %s3443_s20  ;;  %196 = sbr.rel (%p2038_p5) target bundleno = 144 (0x90), region = 20 }
   0x8   : > { %p68_p4 = scmp.eq.s32.totalorder %s66_s21, 0 }
   0xa   : > { %s2831_s23 = scalar_select %p68_p4, %s2757_s16, %s70_s22  }
   0xc   : > { %199 = sbr.rel (!%p79_p3) target bundleno = 144 (0x90), region = 24  ;;  %s201_s24 = sand.u32 (%p79_p3), 1, %s2757_s16  }
   0xd   : > { %s2562_s25 = sshll.u32 (%p79_p3), %s2765_s18, 3  ;;  %s2039_s26 = sshll.u32 (%p79_p3), %s201_s24, 10 }
   0xe   : > { %s2839_s29 = scalar_lea.vmem (%p79_p3), %s3434_s1, %s2562_s25  ;;  %s2844_s30 = scalar_lea.vmem (%p79_p3), [#allocation3], %s2039_s26 }
   0xf   : > { %v492_v0 = vld [vmem:[%s2839_s29] sm:$0xff] (%p79_p3)  ;;  %v494_v1 = vld [vmem:[%s2839_s29 + $0x10] sm:$0xff] (%p79_p3) }
  0x10   : > { %v496_v2 = vld [vmem:[%s2839_s29 + $0x20] sm:$0xff] (%p79_p3)  ;;  %493 = vst [vmem:[%s2844_s30] sm:$0xff] (%p79_p3), %v492_v0  ;;  %v498_v3 = vld [vmem:[%s2839_s29 + $0x30] sm:$0xff] (%p79_p3) }
  0x11   : > { %495 = vst [vmem:[%s2844_s30 + $0x8] sm:$0xff] %v494_v1  ;;  %v500_v4 = vld [vmem:[%s2839_s29 + $0x40] sm:$0xff]  ;;  %v502_v5 = vld [vmem:[%s2839_s29 + $0x50] sm:$0xff] }
  0x12   : > { %497 = vst [vmem:[%s2844_s30 + $0x10] sm:$0xff] %v496_v2  ;;  %v504_v6 = vld [vmem:[%s2839_s29 + $0x60] sm:$0xff]  ;;  %v506_v7 = vld [vmem:[%s2839_s29 + $0x70] sm:$0xff] }
  0x13   : > { %499 = vst [vmem:[%s2844_s30 + $0x18] sm:$0xff] %v498_v3  ;;  %v508_v8 = vld [vmem:[%s2839_s29 + $0x80] sm:$0xff]  ;;  %v510_v9 = vld [vmem:[%s2839_s29 + $0x90] sm:$0xff] }
  0x14   : > { %501 = vst [vmem:[%s2844_s30 + $0x20] sm:$0xff] %v500_v4  ;;  %v512_v10 = vld [vmem:[%s2839_s29 + $0xa0] sm:$0xff]  ;;  %v514_v11 = vld [vmem:[%s2839_s29 + $0xb0] sm:$0xff] }
  0x15   : > { %503 = vst [vmem:[%s2844_s30 + $0x28] sm:$0xff] %v502_v5  ;;  %v516_v12 = vld [vmem:[%s2839_s29 + $0xc0] sm:$0xff]  ;;  %v518_v13 = vld [vmem:[%s2839_s29 + $0xd0] sm:$0xff] }
  0x16   : > { %505 = vst [vmem:[%s2844_s30 + $0x30] sm:$0xff] %v504_v6  ;;  %v520_v14 = vld [vmem:[%s2839_s29 + $0xe0] sm:$0xff]  ;;  %v522_v15 = vld [vmem:[%s2839_s29 + $0xf0] sm:$0xff] }
  0x17   : > { %507 = vst [vmem:[%s2844_s30 + $0x38] sm:$0xff] %v506_v7  ;;  %v524_v16 = vld [vmem:[%s2839_s29 + $0x100] sm:$0xff]  ;;  %v526_v17 = vld [vmem:[%s2839_s29 + $0x110] sm:$0xff] }
  0x18   : > { %509 = vst [vmem:[%s2844_s30 + $0x40] sm:$0xff] %v508_v8  ;;  %v528_v18 = vld [vmem:[%s2839_s29 + $0x120] sm:$0xff]  ;;  %v530_v19 = vld [vmem:[%s2839_s29 + $0x130] sm:$0xff] }
  0x19   : > { %511 = vst [vmem:[%s2844_s30 + $0x48] sm:$0xff] %v510_v9  ;;  %v532_v20 = vld [vmem:[%s2839_s29 + $0x140] sm:$0xff]  ;;  %v534_v21 = vld [vmem:[%s2839_s29 + $0x150] sm:$0xff] }
  0x1a   : > { %513 = vst [vmem:[%s2844_s30 + $0x50] sm:$0xff] %v512_v10  ;;  %v536_v22 = vld [vmem:[%s2839_s29 + $0x160] sm:$0xff]  ;;  %v538_v23 = vld [vmem:[%s2839_s29 + $0x170] sm:$0xff] }
  0x1b   : > { %515 = vst [vmem:[%s2844_s30 + $0x58] sm:$0xff] %v514_v11  ;;  %v540_v24 = vld [vmem:[%s2839_s29 + $0x180] sm:$0xff]  ;;  %v542_v25 = vld [vmem:[%s2839_s29 + $0x190] sm:$0xff] }
  0x1c   : > { %517 = vst [vmem:[%s2844_s30 + $0x60] sm:$0xff] %v516_v12  ;;  %v544_v26 = vld [vmem:[%s2839_s29 + $0x1a0] sm:$0xff]  ;;  %v546_v27 = vld [vmem:[%s2839_s29 + $0x1b0] sm:$0xff] }
  0x1d   : > { %519 = vst [vmem:[%s2844_s30 + $0x68] sm:$0xff] %v518_v13  ;;  %v548_v28 = vld [vmem:[%s2839_s29 + $0x1c0] sm:$0xff]  ;;  %v550_v29 = vld [vmem:[%s2839_s29 + $0x1d0] sm:$0xff] }
  0x1e   : > { %521 = vst [vmem:[%s2844_s30 + $0x70] sm:$0xff] %v520_v14  ;;  %v552_v30 = vld [vmem:[%s2839_s29 + $0x1e0] sm:$0xff]  ;;  %v554_v31 = vld [vmem:[%s2839_s29 + $0x1f0] sm:$0xff] }
  0x1f   : > { %523 = vst [vmem:[%s2844_s30 + $0x78] sm:$0xff] %v522_v15  ;;  %v556_v32 = vld [vmem:[%s2839_s29 + $0x200] sm:$0xff]  ;;  %v558_v33 = vld [vmem:[%s2839_s29 + $0x210] sm:$0xff] }
  0x20   : > { %525 = vst [vmem:[%s2844_s30 + $0x80] sm:$0xff] %v524_v16  ;;  %v560_v34 = vld [vmem:[%s2839_s29 + $0x220] sm:$0xff]  ;;  %v562_v35 = vld [vmem:[%s2839_s29 + $0x230] sm:$0xff] }
  0x21   : > { %527 = vst [vmem:[%s2844_s30 + $0x88] sm:$0xff] %v526_v17  ;;  %v564_v36 = vld [vmem:[%s2839_s29 + $0x240] sm:$0xff]  ;;  %v566_v37 = vld [vmem:[%s2839_s29 + $0x250] sm:$0xff] }
  0x22   : > { %529 = vst [vmem:[%s2844_s30 + $0x90] sm:$0xff] %v528_v18  ;;  %v568_v38 = vld [vmem:[%s2839_s29 + $0x260] sm:$0xff]  ;;  %v570_v39 = vld [vmem:[%s2839_s29 + $0x270] sm:$0xff] }
  0x23   : > { %531 = vst [vmem:[%s2844_s30 + $0x98] sm:$0xff] %v530_v19  ;;  %v572_v40 = vld [vmem:[%s2839_s29 + $0x280] sm:$0xff]  ;;  %v574_v41 = vld [vmem:[%s2839_s29 + $0x290] sm:$0xff] }
  0x24   : > { %533 = vst [vmem:[%s2844_s30 + $0xa0] sm:$0xff] %v532_v20  ;;  %v576_v42 = vld [vmem:[%s2839_s29 + $0x2a0] sm:$0xff]  ;;  %v578_v43 = vld [vmem:[%s2839_s29 + $0x2b0] sm:$0xff] }
  0x25   : > { %535 = vst [vmem:[%s2844_s30 + $0xa8] sm:$0xff] %v534_v21  ;;  %v580_v44 = vld [vmem:[%s2839_s29 + $0x2c0] sm:$0xff]  ;;  %v582_v45 = vld [vmem:[%s2839_s29 + $0x2d0] sm:$0xff] }
  0x26   : > { %537 = vst [vmem:[%s2844_s30 + $0xb0] sm:$0xff] %v536_v22  ;;  %v584_v46 = vld [vmem:[%s2839_s29 + $0x2e0] sm:$0xff]  ;;  %v586_v47 = vld [vmem:[%s2839_s29 + $0x2f0] sm:$0xff] }
  0x27   : > { %539 = vst [vmem:[%s2844_s30 + $0xb8] sm:$0xff] %v538_v23  ;;  %v588_v48 = vld [vmem:[%s2839_s29 + $0x300] sm:$0xff]  ;;  %v590_v49 = vld [vmem:[%s2839_s29 + $0x310] sm:$0xff] }
  0x28   : > { %541 = vst [vmem:[%s2844_s30 + $0xc0] sm:$0xff] %v540_v24  ;;  %v592_v50 = vld [vmem:[%s2839_s29 + $0x320] sm:$0xff]  ;;  %v594_v51 = vld [vmem:[%s2839_s29 + $0x330] sm:$0xff] }
  0x29   : > { %543 = vst [vmem:[%s2844_s30 + $0xc8] sm:$0xff] %v542_v25  ;;  %v596_v52 = vld [vmem:[%s2839_s29 + $0x340] sm:$0xff]  ;;  %v598_v53 = vld [vmem:[%s2839_s29 + $0x350] sm:$0xff] }
  0x2a   : > { %545 = vst [vmem:[%s2844_s30 + $0xd0] sm:$0xff] %v544_v26  ;;  %v600_v54 = vld [vmem:[%s2839_s29 + $0x360] sm:$0xff]  ;;  %v602_v55 = vld [vmem:[%s2839_s29 + $0x370] sm:$0xff] }
  0x2b   : > { %547 = vst [vmem:[%s2844_s30 + $0xd8] sm:$0xff] %v546_v27  ;;  %v604_v56 = vld [vmem:[%s2839_s29 + $0x380] sm:$0xff]  ;;  %v606_v57 = vld [vmem:[%s2839_s29 + $0x390] sm:$0xff] }
  0x2c   : > { %549 = vst [vmem:[%s2844_s30 + $0xe0] sm:$0xff] %v548_v28  ;;  %v608_v58 = vld [vmem:[%s2839_s29 + $0x3a0] sm:$0xff]  ;;  %v610_v59 = vld [vmem:[%s2839_s29 + $0x3b0] sm:$0xff] }
  0x2d   : > { %551 = vst [vmem:[%s2844_s30 + $0xe8] sm:$0xff] %v550_v29  ;;  %v612_v60 = vld [vmem:[%s2839_s29 + $0x3c0] sm:$0xff]  ;;  %v614_v61 = vld [vmem:[%s2839_s29 + $0x3d0] sm:$0xff] }
  0x2e   : > { %553 = vst [vmem:[%s2844_s30 + $0xf0] sm:$0xff] %v552_v30  ;;  %v616_v62 = vld [vmem:[%s2839_s29 + $0x3e0] sm:$0xff]  ;;  %v618_v63 = vld [vmem:[%s2839_s29 + $0x3f0] sm:$0xff] }
  0x2f   : > { %555 = vst [vmem:[%s2844_s30 + $0xf8] sm:$0xff] %v554_v31  ;;  %v620_v0 = vld [vmem:[%s2839_s29 + $0x400] sm:$0xff]  ;;  %v622_v1 = vld [vmem:[%s2839_s29 + $0x410] sm:$0xff] }
  0x30   : > { %557 = vst [vmem:[%s2844_s30 + $0x100] sm:$0xff] %v556_v32  ;;  %v624_v2 = vld [vmem:[%s2839_s29 + $0x420] sm:$0xff]  ;;  %v626_v3 = vld [vmem:[%s2839_s29 + $0x430] sm:$0xff] }
  0x31   : > { %559 = vst [vmem:[%s2844_s30 + $0x108] sm:$0xff] %v558_v33  ;;  %v628_v4 = vld [vmem:[%s2839_s29 + $0x440] sm:$0xff]  ;;  %v630_v5 = vld [vmem:[%s2839_s29 + $0x450] sm:$0xff] }
  0x32   : > { %561 = vst [vmem:[%s2844_s30 + $0x110] sm:$0xff] %v560_v34  ;;  %v632_v6 = vld [vmem:[%s2839_s29 + $0x460] sm:$0xff]  ;;  %v634_v7 = vld [vmem:[%s2839_s29 + $0x470] sm:$0xff] }
  0x33   : > { %563 = vst [vmem:[%s2844_s30 + $0x118] sm:$0xff] %v562_v35  ;;  %v636_v8 = vld [vmem:[%s2839_s29 + $0x480] sm:$0xff]  ;;  %v638_v9 = vld [vmem:[%s2839_s29 + $0x490] sm:$0xff] }
  0x34   : > { %565 = vst [vmem:[%s2844_s30 + $0x120] sm:$0xff] %v564_v36  ;;  %v640_v10 = vld [vmem:[%s2839_s29 + $0x4a0] sm:$0xff]  ;;  %v642_v11 = vld [vmem:[%s2839_s29 + $0x4b0] sm:$0xff] }
  0x35   : > { %567 = vst [vmem:[%s2844_s30 + $0x128] sm:$0xff] %v566_v37  ;;  %v644_v12 = vld [vmem:[%s2839_s29 + $0x4c0] sm:$0xff]  ;;  %v646_v13 = vld [vmem:[%s2839_s29 + $0x4d0] sm:$0xff] }
  0x36   : > { %569 = vst [vmem:[%s2844_s30 + $0x130] sm:$0xff] %v568_v38  ;;  %v648_v14 = vld [vmem:[%s2839_s29 + $0x4e0] sm:$0xff]  ;;  %v650_v15 = vld [vmem:[%s2839_s29 + $0x4f0] sm:$0xff] }
  0x37   : > { %571 = vst [vmem:[%s2844_s30 + $0x138] sm:$0xff] %v570_v39  ;;  %v652_v16 = vld [vmem:[%s2839_s29 + $0x500] sm:$0xff]  ;;  %v654_v17 = vld [vmem:[%s2839_s29 + $0x510] sm:$0xff] }
  0x38   : > { %573 = vst [vmem:[%s2844_s30 + $0x140] sm:$0xff] %v572_v40  ;;  %v656_v18 = vld [vmem:[%s2839_s29 + $0x520] sm:$0xff]  ;;  %v658_v19 = vld [vmem:[%s2839_s29 + $0x530] sm:$0xff] }
  0x39   : > { %575 = vst [vmem:[%s2844_s30 + $0x148] sm:$0xff] %v574_v41  ;;  %v660_v20 = vld [vmem:[%s2839_s29 + $0x540] sm:$0xff]  ;;  %v662_v21 = vld [vmem:[%s2839_s29 + $0x550] sm:$0xff] }
  0x3a   : > { %577 = vst [vmem:[%s2844_s30 + $0x150] sm:$0xff] %v576_v42  ;;  %v664_v22 = vld [vmem:[%s2839_s29 + $0x560] sm:$0xff]  ;;  %v666_v23 = vld [vmem:[%s2839_s29 + $0x570] sm:$0xff] }
  0x3b   : > { %579 = vst [vmem:[%s2844_s30 + $0x158] sm:$0xff] %v578_v43  ;;  %v668_v24 = vld [vmem:[%s2839_s29 + $0x580] sm:$0xff]  ;;  %v670_v25 = vld [vmem:[%s2839_s29 + $0x590] sm:$0xff] }
  0x3c   : > { %581 = vst [vmem:[%s2844_s30 + $0x160] sm:$0xff] %v580_v44  ;;  %v672_v26 = vld [vmem:[%s2839_s29 + $0x5a0] sm:$0xff]  ;;  %v674_v27 = vld [vmem:[%s2839_s29 + $0x5b0] sm:$0xff] }
  0x3d   : > { %583 = vst [vmem:[%s2844_s30 + $0x168] sm:$0xff] %v582_v45  ;;  %v676_v28 = vld [vmem:[%s2839_s29 + $0x5c0] sm:$0xff]  ;;  %v678_v29 = vld [vmem:[%s2839_s29 + $0x5d0] sm:$0xff] }
  0x3e   : > { %585 = vst [vmem:[%s2844_s30 + $0x170] sm:$0xff] %v584_v46  ;;  %v680_v30 = vld [vmem:[%s2839_s29 + $0x5e0] sm:$0xff]  ;;  %v682_v31 = vld [vmem:[%s2839_s29 + $0x5f0] sm:$0xff] }
  0x3f   : > { %587 = vst [vmem:[%s2844_s30 + $0x178] sm:$0xff] %v586_v47  ;;  %v684_v32 = vld [vmem:[%s2839_s29 + $0x600] sm:$0xff]  ;;  %v686_v33 = vld [vmem:[%s2839_s29 + $0x610] sm:$0xff] }
  0x40   : > { %589 = vst [vmem:[%s2844_s30 + $0x180] sm:$0xff] %v588_v48  ;;  %v688_v34 = vld [vmem:[%s2839_s29 + $0x620] sm:$0xff]  ;;  %v690_v35 = vld [vmem:[%s2839_s29 + $0x630] sm:$0xff] }
  0x41   : > { %591 = vst [vmem:[%s2844_s30 + $0x188] sm:$0xff] %v590_v49  ;;  %v692_v36 = vld [vmem:[%s2839_s29 + $0x640] sm:$0xff]  ;;  %v694_v37 = vld [vmem:[%s2839_s29 + $0x650] sm:$0xff] }
  0x42   : > { %593 = vst [vmem:[%s2844_s30 + $0x190] sm:$0xff] %v592_v50  ;;  %v696_v38 = vld [vmem:[%s2839_s29 + $0x660] sm:$0xff]  ;;  %v698_v39 = vld [vmem:[%s2839_s29 + $0x670] sm:$0xff] }
  0x43   : > { %595 = vst [vmem:[%s2844_s30 + $0x198] sm:$0xff] %v594_v51  ;;  %v700_v40 = vld [vmem:[%s2839_s29 + $0x680] sm:$0xff]  ;;  %v702_v41 = vld [vmem:[%s2839_s29 + $0x690] sm:$0xff] }
  0x44   : > { %597 = vst [vmem:[%s2844_s30 + $0x1a0] sm:$0xff] %v596_v52  ;;  %v704_v42 = vld [vmem:[%s2839_s29 + $0x6a0] sm:$0xff]  ;;  %v706_v43 = vld [vmem:[%s2839_s29 + $0x6b0] sm:$0xff] }
  0x45   : > { %599 = vst [vmem:[%s2844_s30 + $0x1a8] sm:$0xff] %v598_v53  ;;  %v708_v44 = vld [vmem:[%s2839_s29 + $0x6c0] sm:$0xff]  ;;  %v710_v45 = vld [vmem:[%s2839_s29 + $0x6d0] sm:$0xff] }
  0x46   : > { %601 = vst [vmem:[%s2844_s30 + $0x1b0] sm:$0xff] %v600_v54  ;;  %v712_v46 = vld [vmem:[%s2839_s29 + $0x6e0] sm:$0xff]  ;;  %v714_v47 = vld [vmem:[%s2839_s29 + $0x6f0] sm:$0xff] }
  0x47   : > { %603 = vst [vmem:[%s2844_s30 + $0x1b8] sm:$0xff] %v602_v55  ;;  %v716_v48 = vld [vmem:[%s2839_s29 + $0x700] sm:$0xff]  ;;  %v718_v49 = vld [vmem:[%s2839_s29 + $0x710] sm:$0xff] }
  0x48   : > { %605 = vst [vmem:[%s2844_s30 + $0x1c0] sm:$0xff] %v604_v56  ;;  %v720_v50 = vld [vmem:[%s2839_s29 + $0x720] sm:$0xff]  ;;  %v722_v51 = vld [vmem:[%s2839_s29 + $0x730] sm:$0xff] }
  0x49   : > { %607 = vst [vmem:[%s2844_s30 + $0x1c8] sm:$0xff] %v606_v57  ;;  %v724_v52 = vld [vmem:[%s2839_s29 + $0x740] sm:$0xff]  ;;  %v726_v53 = vld [vmem:[%s2839_s29 + $0x750] sm:$0xff] }
  0x4a   : > { %609 = vst [vmem:[%s2844_s30 + $0x1d0] sm:$0xff] %v608_v58  ;;  %v728_v54 = vld [vmem:[%s2839_s29 + $0x760] sm:$0xff]  ;;  %v730_v55 = vld [vmem:[%s2839_s29 + $0x770] sm:$0xff] }
  0x4b   : > { %611 = vst [vmem:[%s2844_s30 + $0x1d8] sm:$0xff] %v610_v59  ;;  %v732_v56 = vld [vmem:[%s2839_s29 + $0x780] sm:$0xff]  ;;  %v734_v57 = vld [vmem:[%s2839_s29 + $0x790] sm:$0xff] }
  0x4c   : > { %613 = vst [vmem:[%s2844_s30 + $0x1e0] sm:$0xff] %v612_v60  ;;  %v736_v58 = vld [vmem:[%s2839_s29 + $0x7a0] sm:$0xff]  ;;  %v738_v59 = vld [vmem:[%s2839_s29 + $0x7b0] sm:$0xff] }
  0x4d   : > { %615 = vst [vmem:[%s2844_s30 + $0x1e8] sm:$0xff] %v614_v61  ;;  %v740_v60 = vld [vmem:[%s2839_s29 + $0x7c0] sm:$0xff]  ;;  %v742_v61 = vld [vmem:[%s2839_s29 + $0x7d0] sm:$0xff] }
  0x4e   : > { %617 = vst [vmem:[%s2844_s30 + $0x1f0] sm:$0xff] %v616_v62  ;;  %v744_v62 = vld [vmem:[%s2839_s29 + $0x7e0] sm:$0xff] }
  0x4f   : > { %619 = vst [vmem:[%s2844_s30 + $0x1f8] sm:$0xff] %v618_v63  ;;  %v746_v63 = vld [vmem:[%s2839_s29 + $0x7f0] sm:$0xff] }
  0x50   : > { %621 = vst [vmem:[%s2844_s30 + $0x200] sm:$0xff] %v620_v0 }
  0x51   : > { %623 = vst [vmem:[%s2844_s30 + $0x208] sm:$0xff] %v622_v1 }
  0x52   : > { %625 = vst [vmem:[%s2844_s30 + $0x210] sm:$0xff] %v624_v2 }
  0x53   : > { %627 = vst [vmem:[%s2844_s30 + $0x218] sm:$0xff] %v626_v3 }
  0x54   : > { %629 = vst [vmem:[%s2844_s30 + $0x220] sm:$0xff] %v628_v4 }
  0x55   : > { %631 = vst [vmem:[%s2844_s30 + $0x228] sm:$0xff] %v630_v5 }
  0x56   : > { %633 = vst [vmem:[%s2844_s30 + $0x230] sm:$0xff] %v632_v6 }
  0x57   : > { %635 = vst [vmem:[%s2844_s30 + $0x238] sm:$0xff] %v634_v7 }
  0x58   : > { %637 = vst [vmem:[%s2844_s30 + $0x240] sm:$0xff] %v636_v8 }
  0x59   : > { %639 = vst [vmem:[%s2844_s30 + $0x248] sm:$0xff] %v638_v9 }
  0x5a   : > { %641 = vst [vmem:[%s2844_s30 + $0x250] sm:$0xff] %v640_v10 }
  0x5b   : > { %643 = vst [vmem:[%s2844_s30 + $0x258] sm:$0xff] %v642_v11 }
  0x5c   : > { %645 = vst [vmem:[%s2844_s30 + $0x260] sm:$0xff] %v644_v12 }
  0x5d   : > { %647 = vst [vmem:[%s2844_s30 + $0x268] sm:$0xff] %v646_v13 }
  0x5e   : > { %649 = vst [vmem:[%s2844_s30 + $0x270] sm:$0xff] %v648_v14 }
  0x5f   : > { %651 = vst [vmem:[%s2844_s30 + $0x278] sm:$0xff] %v650_v15 }
  0x60   : > { %653 = vst [vmem:[%s2844_s30 + $0x280] sm:$0xff] %v652_v16 }
  0x61   : > { %655 = vst [vmem:[%s2844_s30 + $0x288] sm:$0xff] %v654_v17 }
  0x62   : > { %657 = vst [vmem:[%s2844_s30 + $0x290] sm:$0xff] %v656_v18 }
  0x63   : > { %659 = vst [vmem:[%s2844_s30 + $0x298] sm:$0xff] %v658_v19 }
  0x64   : > { %661 = vst [vmem:[%s2844_s30 + $0x2a0] sm:$0xff] %v660_v20 }
  0x65   : > { %663 = vst [vmem:[%s2844_s30 + $0x2a8] sm:$0xff] %v662_v21 }
  0x66   : > { %665 = vst [vmem:[%s2844_s30 + $0x2b0] sm:$0xff] %v664_v22 }
  0x67   : > { %667 = vst [vmem:[%s2844_s30 + $0x2b8] sm:$0xff] %v666_v23 }
  0x68   : > { %669 = vst [vmem:[%s2844_s30 + $0x2c0] sm:$0xff] %v668_v24 }
  0x69   : > { %671 = vst [vmem:[%s2844_s30 + $0x2c8] sm:$0xff] %v670_v25 }
  0x6a   : > { %673 = vst [vmem:[%s2844_s30 + $0x2d0] sm:$0xff] %v672_v26 }
  0x6b   : > { %675 = vst [vmem:[%s2844_s30 + $0x2d8] sm:$0xff] %v674_v27 }
  0x6c   : > { %677 = vst [vmem:[%s2844_s30 + $0x2e0] sm:$0xff] %v676_v28 }
  0x6d   : > { %679 = vst [vmem:[%s2844_s30 + $0x2e8] sm:$0xff] %v678_v29 }
  0x6e   : > { %681 = vst [vmem:[%s2844_s30 + $0x2f0] sm:$0xff] %v680_v30 }
  0x6f   : > { %683 = vst [vmem:[%s2844_s30 + $0x2f8] sm:$0xff] %v682_v31 }
  0x70   : > { %685 = vst [vmem:[%s2844_s30 + $0x300] sm:$0xff] %v684_v32 }
  0x71   : > { %687 = vst [vmem:[%s2844_s30 + $0x308] sm:$0xff] %v686_v33 }
  0x72   : > { %689 = vst [vmem:[%s2844_s30 + $0x310] sm:$0xff] %v688_v34 }
  0x73   : > { %691 = vst [vmem:[%s2844_s30 + $0x318] sm:$0xff] %v690_v35 }
  0x74   : > { %693 = vst [vmem:[%s2844_s30 + $0x320] sm:$0xff] %v692_v36 }
  0x75   : > { %695 = vst [vmem:[%s2844_s30 + $0x328] sm:$0xff] %v694_v37 }
  0x76   : > { %697 = vst [vmem:[%s2844_s30 + $0x330] sm:$0xff] %v696_v38 }
  0x77   : > { %699 = vst [vmem:[%s2844_s30 + $0x338] sm:$0xff] %v698_v39 }
  0x78   : > { %701 = vst [vmem:[%s2844_s30 + $0x340] sm:$0xff] %v700_v40 }
  0x79   : > { %703 = vst [vmem:[%s2844_s30 + $0x348] sm:$0xff] %v702_v41 }
  0x7a   : > { %705 = vst [vmem:[%s2844_s30 + $0x350] sm:$0xff] %v704_v42 }
  0x7b   : > { %707 = vst [vmem:[%s2844_s30 + $0x358] sm:$0xff] %v706_v43 }
  0x7c   : > { %709 = vst [vmem:[%s2844_s30 + $0x360] sm:$0xff] %v708_v44 }
  0x7d   : > { %711 = vst [vmem:[%s2844_s30 + $0x368] sm:$0xff] %v710_v45 }
  0x7e   : > { %713 = vst [vmem:[%s2844_s30 + $0x370] sm:$0xff] %v712_v46 }
  0x7f   : > { %715 = vst [vmem:[%s2844_s30 + $0x378] sm:$0xff] %v714_v47 }
  0x80   : > { %717 = vst [vmem:[%s2844_s30 + $0x380] sm:$0xff] %v716_v48 }
  0x81   : > { %719 = vst [vmem:[%s2844_s30 + $0x388] sm:$0xff] %v718_v49 }
  0x82   : > { %721 = vst [vmem:[%s2844_s30 + $0x390] sm:$0xff] %v720_v50 }
  0x83   : > { %723 = vst [vmem:[%s2844_s30 + $0x398] sm:$0xff] %v722_v51 }
  0x84   : > { %725 = vst [vmem:[%s2844_s30 + $0x3a0] sm:$0xff] %v724_v52 }
  0x85   : > { %727 = vst [vmem:[%s2844_s30 + $0x3a8] sm:$0xff] %v726_v53 }
  0x86   : > { %729 = vst [vmem:[%s2844_s30 + $0x3b0] sm:$0xff] %v728_v54 }
  0x87   : > { %731 = vst [vmem:[%s2844_s30 + $0x3b8] sm:$0xff] %v730_v55 }
  0x88   : > { %733 = vst [vmem:[%s2844_s30 + $0x3c0] sm:$0xff] %v732_v56 }
  0x89   : > { %735 = vst [vmem:[%s2844_s30 + $0x3c8] sm:$0xff] %v734_v57 }
  0x8a   : > { %737 = vst [vmem:[%s2844_s30 + $0x3d0] sm:$0xff] %v736_v58 }
  0x8b   : > { %739 = vst [vmem:[%s2844_s30 + $0x3d8] sm:$0xff] %v738_v59 }
  0x8c   : > { %741 = vst [vmem:[%s2844_s30 + $0x3e0] sm:$0xff] %v740_v60 }
  0x8d   : > { %743 = vst [vmem:[%s2844_s30 + $0x3e8] sm:$0xff] %v742_v61 }
  0x8e   : > { %745 = vst [vmem:[%s2844_s30 + $0x3f0] sm:$0xff] %v744_v62 }
  0x8f   : > { %747 = vst [vmem:[%s2844_s30 + $0x3f8] sm:$0xff] %v746_v63 }
  0x90 PF: > { %p2042_p6 = scmp.ge.s32.totalorder %s2769_s19, 1  ;;  %p768_p7 = scmp.lt.s32.totalorder %s2769_s19, 3 }
  0x92   : > { %p769_p8 = pnand %p2042_p6, %p768_p7 }
  0x93   : > { %s775_s5 = sand.u32 (!%p769_p8), 1, %s2753_s15   ;;  %s2044_s21 = sshll.u32 (!%p769_p8), %s2761_s17, 1 }
  0x94   : > { %772 = sbr.rel (%p769_p8) target bundleno = 429 (0x1ad), region = 70  ;;  %s2043_s6 = sshll.u32 (!%p769_p8), %s775_s5, 10 }
  0x95   : > { %s3102_s7 = scalar_lea.vmem (!%p769_p8), [#allocation3], %s2043_s6  ;;  %p834_p9 = scmp.lt.s32.totalorder (!%p769_p8), %s2044_s21, 3 }
  0x99   : > { %v2106_v0 = vld [vmem:[%s3102_s7 + $0x70] sm:$0xf]  ;;  %v2578_v1 = vld [vmem:[%s3102_s7 + $0x74] sm:$0xf0]  ;;  %v2098_v11 = vld [vmem:[%s3102_s7 + $0x60] sm:$0xf] }
  0x9a   : > { %v2170_v2 = vld [vmem:[%s3102_s7 + $0xf0] sm:$0xf]  ;;  %v2107_v3 = vor.u32 %v2578_v1, %v2106_v0  ;;  %v2594_v4 = vld [vmem:[%s3102_s7 + $0xf4] sm:$0xf0]  ;;  %v2576_v13 = vld [vmem:[%s3102_s7 + $0x64] sm:$0xf0] }
  0x9b   : > { %v2234_v5 = vld [vmem:[%s3102_s7 + $0x170] sm:$0xf]  ;;  %v2610_v6 = vld [vmem:[%s3102_s7 + $0x174] sm:$0xf0]  ;;  %v2171_v7 = vor.u32 %v2594_v4, %v2170_v2  ;;  %v2162_v14 = vld [vmem:[%s3102_s7 + $0xe0] sm:$0xf]  ;;  %v2099_v16 = vor.u32 %v2576_v13, %v2098_v11 }
  0x9c   : > { %v2235_v8 = vor.u32 %v2610_v6, %v2234_v5  ;;  %v2298_v9 = vld [vmem:[%s3102_s7 + $0x1f0] sm:$0xf]  ;;  %v2626_v10 = vld [vmem:[%s3102_s7 + $0x1f4] sm:$0xf0]  ;;  %1661 = vmatpush.bf16.msra.mxu0 %v2107_v3  ;;  %v2592_v15 = vld [vmem:[%s3102_s7 + $0xe4] sm:$0xf0] }
  0x9d   : > { %v2299_v12 = vor.u32 %v2626_v10, %v2298_v9  ;;  %1674 = vmatpush.bf16.msra.mxu1 %v2171_v7  ;;  %v2163_v17 = vor.u32 %v2592_v15, %v2162_v14  ;;  %v2226_v18 = vld [vmem:[%s3102_s7 + $0x160] sm:$0xf]  ;;  %v2608_v19 = vld [vmem:[%s3102_s7 + $0x164] sm:$0xf0]  ;;  %v2090_v23 = vld [vmem:[%s3102_s7 + $0x50] sm:$0xf] }
  0x9e   : > { %1687 = vmatpush.bf16.msra.mxu2 %v2235_v8  ;;  %v2290_v20 = vld [vmem:[%s3102_s7 + $0x1e0] sm:$0xf]  ;;  %v2227_v21 = vor.u32 %v2608_v19, %v2226_v18  ;;  %v2624_v22 = vld [vmem:[%s3102_s7 + $0x1e4] sm:$0xf0]  ;;  %v2574_v24 = vld [vmem:[%s3102_s7 + $0x54] sm:$0xf0] }
  0x9f   : > { %1700 = vmatpush.bf16.msra.mxu3 %v2299_v12  ;;  %v2291_v25 = vor.u32 %v2624_v22, %v2290_v20  ;;  %v2154_v26 = vld [vmem:[%s3102_s7 + $0xd0] sm:$0xf]  ;;  %v2590_v27 = vld [vmem:[%s3102_s7 + $0xd4] sm:$0xf0]  ;;  %v2091_v29 = vor.u32 %v2574_v24, %v2090_v23  ;;  %v2082_v35 = vld [vmem:[%s3102_s7 + $0x40] sm:$0xf] }
  0xa0   : > { %v2218_v28 = vld [vmem:[%s3102_s7 + $0x150] sm:$0xf]  ;;  %1662 = vmatpush.bf16.msra.mxu0 %v2099_v16  ;;  %v2606_v30 = vld [vmem:[%s3102_s7 + $0x154] sm:$0xf0]  ;;  %v2155_v33 = vor.u32 %v2590_v27, %v2154_v26  ;;  %v2572_v36 = vld [vmem:[%s3102_s7 + $0x44] sm:$0xf0] }
  0xa1   : > { %v2282_v31 = vld [vmem:[%s3102_s7 + $0x1d0] sm:$0xf]  ;;  %v2622_v32 = vld [vmem:[%s3102_s7 + $0x1d4] sm:$0xf0]  ;;  %1675 = vmatpush.bf16.msra.mxu1 %v2163_v17  ;;  %v2219_v34 = vor.u32 %v2606_v30, %v2218_v28  ;;  %v2146_v37 = vld [vmem:[%s3102_s7 + $0xc0] sm:$0xf]  ;;  %v2083_v44 = vor.u32 %v2572_v36, %v2082_v35 }
  0xa2   : > { %1688 = vmatpush.bf16.msra.mxu2 %v2227_v21  ;;  %v2283_v38 = vor.u32 %v2622_v32, %v2282_v31  ;;  %v2588_v39 = vld [vmem:[%s3102_s7 + $0xc4] sm:$0xf0]  ;;  %v2210_v40 = vld [vmem:[%s3102_s7 + $0x140] sm:$0xf]  ;;  %v2074_v47 = vld [vmem:[%s3102_s7 + $0x30] sm:$0xf] }
  0xa3   : > { %1701 = vmatpush.bf16.msra.mxu3 %v2291_v25  ;;  %v2604_v41 = vld [vmem:[%s3102_s7 + $0x144] sm:$0xf0]  ;;  %v2274_v42 = vld [vmem:[%s3102_s7 + $0x1c0] sm:$0xf]  ;;  %v2147_v45 = vor.u32 %v2588_v39, %v2146_v37  ;;  %v2570_v48 = vld [vmem:[%s3102_s7 + $0x34] sm:$0xf0] }
  0xa4   : > { %v2620_v43 = vld [vmem:[%s3102_s7 + $0x1c4] sm:$0xf0]  ;;  %1663 = vmatpush.bf16.msra.mxu0 %v2091_v29  ;;  %v2211_v46 = vor.u32 %v2604_v41, %v2210_v40  ;;  %v2138_v49 = vld [vmem:[%s3102_s7 + $0xb0] sm:$0xf]  ;;  %v2586_v51 = vld [vmem:[%s3102_s7 + $0xb4] sm:$0xf0]  ;;  %v2075_v56 = vor.u32 %v2570_v48, %v2074_v47 }
  0xa5   : > { %1676 = vmatpush.bf16.msra.mxu1 %v2155_v33  ;;  %v2275_v50 = vor.u32 %v2620_v43, %v2274_v42  ;;  %v2202_v52 = vld [vmem:[%s3102_s7 + $0x130] sm:$0xf]  ;;  %v2602_v53 = vld [vmem:[%s3102_s7 + $0x134] sm:$0xf0]  ;;  %v2139_v57 = vor.u32 %v2586_v51, %v2138_v49  ;;  %v2066_v59 = vld [vmem:[%s3102_s7 + $0x20] sm:$0xf] }
  0xa6   : > { %1689 = vmatpush.bf16.msra.mxu2 %v2219_v34  ;;  %v2266_v54 = vld [vmem:[%s3102_s7 + $0x1b0] sm:$0xf]  ;;  %v2618_v55 = vld [vmem:[%s3102_s7 + $0x1b4] sm:$0xf0]  ;;  %v2203_v58 = vor.u32 %v2602_v53, %v2202_v52  ;;  %v2568_v60 = vld [vmem:[%s3102_s7 + $0x24] sm:$0xf0] }
  0xa7   : > { %1702 = vmatpush.bf16.msra.mxu3 %v2283_v38  ;;  %v2130_v61 = vld [vmem:[%s3102_s7 + $0xa0] sm:$0xf]  ;;  %v2267_v62 = vor.u32 %v2618_v55, %v2266_v54  ;;  %v2584_v63 = vld [vmem:[%s3102_s7 + $0xa4] sm:$0xf0]  ;;  %v2067_v4 = vor.u32 %v2568_v60, %v2066_v59  ;;  %v2058_v7 = vld [vmem:[%s3102_s7 + $0x10] sm:$0xf] }
  0xa8   : > { %1664 = vmatpush.bf16.msra.mxu0 %v2083_v44  ;;  %v2194_v0 = vld [vmem:[%s3102_s7 + $0x120] sm:$0xf]  ;;  %v2600_v1 = vld [vmem:[%s3102_s7 + $0x124] sm:$0xf0]  ;;  %v2131_v5 = vor.u32 %v2584_v63, %v2130_v61  ;;  %v2566_v8 = vld [vmem:[%s3102_s7 + $0x14] sm:$0xf0] }
  0xa9   : > { %1677 = vmatpush.bf16.msra.mxu1 %v2147_v45  ;;  %v2258_v2 = vld [vmem:[%s3102_s7 + $0x1a0] sm:$0xf]  ;;  %v2616_v3 = vld [vmem:[%s3102_s7 + $0x1a4] sm:$0xf0]  ;;  %v2195_v6 = vor.u32 %v2600_v1, %v2194_v0  ;;  %v2122_v9 = vld [vmem:[%s3102_s7 + $0x90] sm:$0xf]  ;;  %v2059_v16 = vor.u32 %v2566_v8, %v2058_v7 }
  0xaa   : > { %1690 = vmatpush.bf16.msra.mxu2 %v2211_v46  ;;  %v2259_v10 = vor.u32 %v2616_v3, %v2258_v2  ;;  %v2582_v11 = vld [vmem:[%s3102_s7 + $0x94] sm:$0xf0]  ;;  %v2186_v12 = vld [vmem:[%s3102_s7 + $0x110] sm:$0xf]  ;;  %v2050_v17 = vld [vmem:[%s3102_s7] sm:$0xf] }
  0xab   : > { %1703 = vmatpush.bf16.msra.mxu3 %v2275_v50  ;;  %v2598_v13 = vld [vmem:[%s3102_s7 + $0x114] sm:$0xf0]  ;;  %v2250_v14 = vld [vmem:[%s3102_s7 + $0x190] sm:$0xf]  ;;  %v2564_v18 = vld [vmem:[%s3102_s7 + $0x4] sm:$0xf0]  ;;  %v2123_v19 = vor.u32 %v2582_v11, %v2122_v9 }
  0xac   : > { %1665 = vmatpush.bf16.msra.mxu0 %v2075_v56  ;;  %v2614_v15 = vld [vmem:[%s3102_s7 + $0x194] sm:$0xf0]  ;;  %v2187_v20 = vor.u32 %v2598_v13, %v2186_v12  ;;  %v2114_v21 = vld [vmem:[%s3102_s7 + $0x80] sm:$0xf]  ;;  %v2580_v22 = vld [vmem:[%s3102_s7 + $0x84] sm:$0xf0]  ;;  %v2051_v31 = vor.u32 %v2564_v18, %v2050_v17 }
  0xad   : > { %1678 = vmatpush.bf16.msra.mxu1 %v2139_v57  ;;  %v2178_v23 = vld [vmem:[%s3102_s7 + $0x100] sm:$0xf]  ;;  %v2251_v24 = vor.u32 %v2614_v15, %v2250_v14  ;;  %v2596_v25 = vld [vmem:[%s3102_s7 + $0x104] sm:$0xf0]  ;;  %v2362_v28 = vld [vmem:[%s3102_s7 + $0x270] sm:$0xf]  ;;  %v2115_v35 = vor.u32 %v2580_v22, %v2114_v21 }
  0xae   : > { %1691 = vmatpush.bf16.msra.mxu2 %v2203_v58  ;;  %v2242_v26 = vld [vmem:[%s3102_s7 + $0x180] sm:$0xf]  ;;  %v2612_v27 = vld [vmem:[%s3102_s7 + $0x184] sm:$0xf0]  ;;  %v2642_v29 = vld [vmem:[%s3102_s7 + $0x274] sm:$0xf0]  ;;  %v2179_v36 = vor.u32 %v2596_v25, %v2178_v23 }
  0xaf   : > { %1704 = vmatpush.bf16.msra.mxu3 %v2267_v62  ;;  %v2426_v30 = vld [vmem:[%s3102_s7 + $0x2f0] sm:$0xf]  ;;  %v2658_v32 = vld [vmem:[%s3102_s7 + $0x2f4] sm:$0xf0]  ;;  %v2243_v39 = vor.u32 %v2612_v27, %v2242_v26  ;;  %v2363_v40 = vor.u32 %v2642_v29, %v2362_v28  ;;  %v2354_v43 = vld [vmem:[%s3102_s7 + $0x260] sm:$0xf] }
  0xb0   : > { %1666 = vmatpush.bf16.msra.mxu0 %v2067_v4  ;;  %v2490_v33 = vld [vmem:[%s3102_s7 + $0x370] sm:$0xf]  ;;  %v2674_v34 = vld [vmem:[%s3102_s7 + $0x374] sm:$0xf0]  ;;  %v2427_v41 = vor.u32 %v2658_v32, %v2426_v30  ;;  %v2640_v44 = vld [vmem:[%s3102_s7 + $0x264] sm:$0xf0] }
  0xb1   : > { %1679 = vmatpush.bf16.msra.mxu1 %v2131_v5  ;;  %v2554_v37 = vld [vmem:[%s3102_s7 + $0x3f0] sm:$0xf]  ;;  %v2690_v38 = vld [vmem:[%s3102_s7 + $0x3f4] sm:$0xf0]  ;;  %v2491_v42 = vor.u32 %v2674_v34, %v2490_v33  ;;  %v2418_v45 = vld [vmem:[%s3102_s7 + $0x2e0] sm:$0xf]  ;;  %v2355_v52 = vor.u32 %v2640_v44, %v2354_v43 }
  0xb2   : > { %1692 = vmatpush.bf16.msra.mxu2 %v2195_v6  ;;  %v2555_v46 = vor.u32 %v2690_v38, %v2554_v37  ;;  %v2656_v47 = vld [vmem:[%s3102_s7 + $0x2e4] sm:$0xf0]  ;;  %v2482_v48 = vld [vmem:[%s3102_s7 + $0x360] sm:$0xf]  ;;  %v2346_v53 = vld [vmem:[%s3102_s7 + $0x250] sm:$0xf] }
  0xb3   : > { %1705 = vmatpush.bf16.msra.mxu3 %v2259_v10  ;;  %v2672_v49 = vld [vmem:[%s3102_s7 + $0x364] sm:$0xf0]  ;;  %v2546_v50 = vld [vmem:[%s3102_s7 + $0x3e0] sm:$0xf]  ;;  %v2638_v54 = vld [vmem:[%s3102_s7 + $0x254] sm:$0xf0]  ;;  %v2419_v55 = vor.u32 %v2656_v47, %v2418_v45 }
  0xb4   : > { %1667 = vmatpush.bf16.msra.mxu0 %v2059_v16  ;;  %v2688_v51 = vld [vmem:[%s3102_s7 + $0x3e4] sm:$0xf0]  ;;  %v2483_v56 = vor.u32 %v2672_v49, %v2482_v48  ;;  %v2410_v57 = vld [vmem:[%s3102_s7 + $0x2d0] sm:$0xf]  ;;  %v2654_v58 = vld [vmem:[%s3102_s7 + $0x2d4] sm:$0xf0]  ;;  %v2347_v6 = vor.u32 %v2638_v54, %v2346_v53 }
  0xb5   : > { %1680 = vmatpush.bf16.msra.mxu1 %v2123_v19  ;;  %v862_v59 = vld [vmem:[%s3433_s0 + $0x8] sm:$0xff]  ;;  %v2547_v60 = vor.u32 %v2688_v51, %v2546_v50  ;;  %v2474_v61 = vld [vmem:[%s3102_s7 + $0x350] sm:$0xf]  ;;  %v2670_v62 = vld [vmem:[%s3102_s7 + $0x354] sm:$0xf0]  ;;  %v2411_v9 = vor.u32 %v2654_v58, %v2410_v57  ;;  %s3445_s21 = smov (!%p834_p9, %s2044_s21), 3 }
  0xb6   : > { %1693 = vmatpush.bf16.msra.mxu2 %v2187_v20  ;;  %v999_v63 = vunpack.c.l.b16 %v862_v59  ;;  %v861_v0 = vld [vmem:[%s3433_s0] sm:$0xff]  ;;  %v1000_v1 = vunpack.c.h.b16 %v862_v59  ;;  %v2538_v2 = vld [vmem:[%s3102_s7 + $0x3d0] sm:$0xf]  ;;  %v2686_v3 = vld [vmem:[%s3102_s7 + $0x3d4] sm:$0xf0]  ;;  %v2475_v10 = vor.u32 %v2670_v62, %v2474_v61  ;;  %s836_s25 = scalar_lea.vmem %s3435_s2, %s3445_s21  ;;  %s841_s28 = scalar_lea.vmem %s3436_s3, %s3445_s21 }
  0xb7   : > { %1706 = vmatpush.bf16.msra.mxu3 %v2251_v24  ;;  %v997_v4 = vunpack.c.l.b16 %v861_v0  ;;  %v998_v5 = vunpack.c.h.b16 %v861_v0  ;;  %v2338_v11 = vld [vmem:[%s3102_s7 + $0x240] sm:$0xf]  ;;  %v2636_v12 = vld [vmem:[%s3102_s7 + $0x244] sm:$0xf0]  ;;  %v2539_v15 = vor.u32 %v2686_v3, %v2538_v2  ;;  %v2330_v25 = vld [vmem:[%s3102_s7 + $0x230] sm:$0xf] }
  0xb8   : > { %1668 = vmatpush.bf16.msra.mxu0 %v2051_v31  ;;  %v3198_v7 = vpack.c.b16 %v999_v63, %v999_v63  ;;  %v3200_v8 = vpack.c.b16 %v1000_v1, %v1000_v1  ;;  %v2402_v13 = vld [vmem:[%s3102_s7 + $0x2c0] sm:$0xf]  ;;  %v2652_v16 = vld [vmem:[%s3102_s7 + $0x2c4] sm:$0xf0]  ;;  %v2339_v22 = vor.u32 %v2636_v12, %v2338_v11  ;;  %v2634_v26 = vld [vmem:[%s3102_s7 + $0x234] sm:$0xf0] }
  0xb9   : > { %1681 = vmatpush.bf16.msra.mxu1 %v2115_v35  ;;  %v3205_v14 = vpack.c.b16 %v997_v4, %v997_v4  ;;  %v2466_v17 = vld [vmem:[%s3102_s7 + $0x340] sm:$0xf]  ;;  %v2668_v18 = vld [vmem:[%s3102_s7 + $0x344] sm:$0xf0]  ;;  %v3211_v19 = vpack.c.b16 %v998_v5, %v998_v5  ;;  %v2403_v23 = vor.u32 %v2652_v16, %v2402_v13  ;;  %v2394_v27 = vld [vmem:[%s3102_s7 + $0x2b0] sm:$0xf]  ;;  %v2331_v34 = vor.u32 %v2634_v26, %v2330_v25 }
  0xba   : > { %1694 = vmatpush.bf16.msra.mxu2 %v2179_v36  ;;  %v2530_v20 = vld [vmem:[%s3102_s7 + $0x3c0] sm:$0xf]  ;;  %v2684_v21 = vld [vmem:[%s3102_s7 + $0x3c4] sm:$0xf0]  ;;  %v2467_v24 = vor.u32 %v2668_v18, %v2466_v17  ;;  %v2650_v29 = vld [vmem:[%s3102_s7 + $0x2b4] sm:$0xf0] }
  0xbb   : > { %1707 = vmatpush.bf16.msra.mxu3 %v2243_v39  ;;  %1669 = vmatmul.bf16.vlgmr.msra.gmra.mxu0 %v3205_v14  ;;  %v2531_v28 = vor.u32 %v2684_v21, %v2530_v20  ;;  %v2458_v30 = vld [vmem:[%s3102_s7 + $0x330] sm:$0xf]  ;;  %v2666_v31 = vld [vmem:[%s3102_s7 + $0x334] sm:$0xf0]  ;;  %v2395_v35 = vor.u32 %v2650_v29, %v2394_v27  ;;  %v2322_v37 = vld [vmem:[%s3102_s7 + $0x220] sm:$0xf] }
  0xbc   : > { %1713 = vmatpush.bf16.msrb.mxu0 %v2363_v40  ;;  %1682 = vmatmul.bf16.vlgmr.msra.gmra.mxu1 %v3211_v19  ;;  %v2522_v32 = vld [vmem:[%s3102_s7 + $0x3b0] sm:$0xf]  ;;  %v2682_v33 = vld [vmem:[%s3102_s7 + $0x3b4] sm:$0xf0]  ;;  %v2459_v36 = vor.u32 %v2666_v31, %v2458_v30  ;;  %v2632_v38 = vld [vmem:[%s3102_s7 + $0x224] sm:$0xf0] }
  0xbd   : > { %1726 = vmatpush.bf16.msrb.mxu1 %v2427_v41  ;;  %1695 = vmatmul.bf16.vlgmr.msra.gmra.mxu2 %v3198_v7  ;;  %v2386_v39 = vld [vmem:[%s3102_s7 + $0x2a0] sm:$0xf]  ;;  %v2523_v40 = vor.u32 %v2682_v33, %v2522_v32  ;;  %v2648_v41 = vld [vmem:[%s3102_s7 + $0x2a4] sm:$0xf0]  ;;  %v2314_v49 = vld [vmem:[%s3102_s7 + $0x210] sm:$0xf] }
  0xbe   : > { %1739 = vmatpush.bf16.msrb.mxu2 %v2491_v42  ;;  %1708 = vmatmul.bf16.vlgmr.msra.gmra.mxu3 %v3200_v8  ;;  %v2450_v42 = vld [vmem:[%s3102_s7 + $0x320] sm:$0xf]  ;;  %v2664_v43 = vld [vmem:[%s3102_s7 + $0x324] sm:$0xf0]  ;;  %v2387_v47 = vor.u32 %v2648_v41, %v2386_v39  ;;  %v2630_v50 = vld [vmem:[%s3102_s7 + $0x214] sm:$0xf0] }
  0xbf   : > { %1752 = vmatpush.bf16.msrb.mxu3 %v2555_v46  ;;  %v2514_v44 = vld [vmem:[%s3102_s7 + $0x3a0] sm:$0xf]  ;;  %v2680_v45 = vld [vmem:[%s3102_s7 + $0x3a4] sm:$0xf0]  ;;  %v2323_v46 = vor.u32 %v2632_v38, %v2322_v37  ;;  %v2451_v48 = vor.u32 %v2664_v43, %v2450_v42  ;;  %v2378_v51 = vld [vmem:[%s3102_s7 + $0x290] sm:$0xf]  ;;  %v2315_v59 = vor.u32 %v2630_v50, %v2314_v49 }
  0xc0   : > { %1714 = vmatpush.bf16.msrb.mxu0 %v2355_v52  ;;  %v2515_v52 = vor.u32 %v2680_v45, %v2514_v44  ;;  %v2646_v53 = vld [vmem:[%s3102_s7 + $0x294] sm:$0xf0]  ;;  %v2442_v54 = vld [vmem:[%s3102_s7 + $0x310] sm:$0xf]  ;;  %v2306_v58 = vld [vmem:[%s3102_s7 + $0x200] sm:$0xf] }
  0xc1   : > { %1727 = vmatpush.bf16.msrb.mxu1 %v2419_v55  ;;  %v2662_v55 = vld [vmem:[%s3102_s7 + $0x314] sm:$0xf0]  ;;  %v2370_v61 = vld [vmem:[%s3102_s7 + $0x280] sm:$0xf]  ;;  %v2644_v62 = vld [vmem:[%s3102_s7 + $0x284] sm:$0xf0]  ;;  %v2379_v63 = vor.u32 %v2646_v53, %v2378_v51 }
  0xc2   : > { %1740 = vmatpush.bf16.msrb.mxu2 %v2483_v56  ;;  %v2506_v56 = vld [vmem:[%s3102_s7 + $0x390] sm:$0xf]  ;;  %v2678_v57 = vld [vmem:[%s3102_s7 + $0x394] sm:$0xf0]  ;;  %v2443_v0 = vor.u32 %v2662_v55, %v2442_v54  ;;  %v2434_v1 = vld [vmem:[%s3102_s7 + $0x300] sm:$0xf]  ;;  %v2371_v20 = vor.u32 %v2644_v62, %v2370_v61 }
  0xc3   : > { %1753 = vmatpush.bf16.msrb.mxu3 %v2547_v60  ;;  %v2628_v60 = vld [vmem:[%s3102_s7 + $0x204] sm:$0xf0]  ;;  %v864_v3 = vld [vmem:[%s3433_s0 + $0x18] sm:$0xff]  ;;  %v2507_v4 = vor.u32 %v2678_v57, %v2506_v56  ;;  %v2498_v5 = vld [vmem:[%s3102_s7 + $0x380] sm:$0xf]  ;;  %s2047_s17 = sshll.u32 %s3445_s21, 3 }
  0xc4   : > { %1715 = vmatpush.bf16.msrb.mxu0 %v2347_v6  ;;  %v2660_v2 = vld [vmem:[%s3102_s7 + $0x304] sm:$0xf0]  ;;  %v2108_v11 = vld [vmem:[%s3102_s7 + $0x78] sm:$0xf0]  ;;  %v2593_v12 = vld [vmem:[%s3102_s7 + $0xf4] sm:$0xf]  ;;  %v2307_v13 = vor.u32 %v2628_v60, %v2306_v58  ;;  %v1003_v18 = vunpack.c.l.b16 %v864_v3  ;;  %v1004_v25 = vunpack.c.h.b16 %v864_v3  ;;  %s3414_s5 = scalar_lea.vmem %s3437_s4, %s2047_s17 }
  0xc5   : > { %1728 = vmatpush.bf16.msrb.mxu1 %v2411_v9  ;;  %v2676_v6 = vld [vmem:[%s3102_s7 + $0x384] sm:$0xf0]  ;;  %v863_v9 = vld [vmem:[%s3433_s0 + $0x10] sm:$0xff]  ;;  %v2236_v17 = vld [vmem:[%s3102_s7 + $0x178] sm:$0xf0]  ;;  %v2435_v21 = vor.u32 %v2660_v2, %v2434_v1 }
  0xc6   : > { %1741 = vmatpush.bf16.msrb.mxu2 %v2475_v10  ;;  %v2577_v10 = vld [vmem:[%s3102_s7 + $0x74] sm:$0xf]  ;;  %v2499_v26 = vor.u32 %v2676_v6, %v2498_v5  ;;  %v2575_v31 = vld [vmem:[%s3102_s7 + $0x64] sm:$0xf]  ;;  %v2100_v32 = vld [vmem:[%s3102_s7 + $0x68] sm:$0xf0]  ;;  %v3276_v42 = vpack.c.b16 %v1004_v25, %v1004_v25 }
  0xc7   : > { %1754 = vmatpush.bf16.msrb.mxu3 %v2539_v15  ;;  %v2172_v15 = vld [vmem:[%s3102_s7 + $0xf8] sm:$0xf0]  ;;  %v2609_v16 = vld [vmem:[%s3102_s7 + $0x174] sm:$0xf]  ;;  %v2111_v27 = vor.u32 %v2577_v10, %v2108_v11  ;;  %v2591_v33 = vld [vmem:[%s3102_s7 + $0xe4] sm:$0xf]  ;;  %v2103_v43 = vor.u32 %v2575_v31, %v2100_v32 }
  0xc8   : > { %1716 = vmatpush.bf16.msrb.mxu0 %v2339_v22  ;;  %v2625_v22 = vld [vmem:[%s3102_s7 + $0x1f4] sm:$0xf]  ;;  %v2175_v29 = vor.u32 %v2593_v12, %v2172_v15  ;;  %v2239_v30 = vor.u32 %v2609_v16, %v2236_v17  ;;  %v2607_v37 = vld [vmem:[%s3102_s7 + $0x164] sm:$0xf]  ;;  %v2228_v38 = vld [vmem:[%s3102_s7 + $0x168] sm:$0xf0] }
  0xc9   : > { %1729 = vmatpush.bf16.msrb.mxu1 %v2403_v23  ;;  %v2300_v23 = vld [vmem:[%s3102_s7 + $0x1f8] sm:$0xf0]  ;;  %v2623_v39 = vld [vmem:[%s3102_s7 + $0x1e4] sm:$0xf]  ;;  %v2589_v49 = vld [vmem:[%s3102_s7 + $0xd4] sm:$0xf] }
  0xca   : > { %1742 = vmatpush.bf16.msrb.mxu2 %v2467_v24  ;;  %v1001_v24 = vunpack.c.l.b16 %v863_v9  ;;  %v2156_v51 = vld [vmem:[%s3102_s7 + $0xd8] sm:$0xf0]  ;;  %v2621_v54 = vld [vmem:[%s3102_s7 + $0x1d4] sm:$0xf]  ;;  %v2084_v60 = vld [vmem:[%s3102_s7 + $0x48] sm:$0xf0] }
  0xcb   : > { %1755 = vmatpush.bf16.msrb.mxu3 %v2531_v28  ;;  %v1002_v28 = vunpack.c.h.b16 %v863_v9  ;;  %v2220_v53 = vld [vmem:[%s3102_s7 + $0x158] sm:$0xf0]  ;;  %v2159_v57 = vor.u32 %v2589_v49, %v2156_v51  ;;  %v2587_v61 = vld [vmem:[%s3102_s7 + $0xc4] sm:$0xf]  ;;  %v2212_v1 = vld [vmem:[%s3102_s7 + $0x148] sm:$0xf0] }
  0xcc   : > { %1717 = vmatpush.bf16.msrb.mxu0 %v2331_v34  ;;  %v2303_v34 = vor.u32 %v2625_v22, %v2300_v23  ;;  %v3274_v41 = vpack.c.b16 %v1001_v24, %v1001_v24  ;;  %v2284_v55 = vld [vmem:[%s3102_s7 + $0x1d8] sm:$0xf0]  ;;  %v2619_v2 = vld [vmem:[%s3102_s7 + $0x1c4] sm:$0xf]  ;;  %v2276_v3 = vld [vmem:[%s3102_s7 + $0x1c8] sm:$0xf0] }
  0xcd   : > { %1730 = vmatpush.bf16.msrb.mxu1 %v2395_v35  ;;  %v3267_v35 = vpack.c.b16 %v1003_v18, %v1003_v18  ;;  %v3278_v44 = vpack.c.b16 %v1002_v28, %v1002_v28  ;;  %v2287_v62 = vor.u32 %v2621_v54, %v2284_v55  ;;  %v2569_v9 = vld [vmem:[%s3102_s7 + $0x34] sm:$0xf]  ;;  %v2076_v10 = vld [vmem:[%s3102_s7 + $0x38] sm:$0xf0]  ;;  %v2279_v12 = vor.u32 %v2619_v2, %v2276_v3  ;;  %v2567_v23 = vld [vmem:[%s3102_s7 + $0x24] sm:$0xf] }
  0xce   : > { %1743 = vmatpush.bf16.msrb.mxu2 %v2459_v36  ;;  %v2164_v36 = vld [vmem:[%s3102_s7 + $0xe8] sm:$0xf0]  ;;  %v2585_v11 = vld [vmem:[%s3102_s7 + $0xb4] sm:$0xf]  ;;  %v2204_v16 = vld [vmem:[%s3102_s7 + $0x138] sm:$0xf0] }
  0xcf   : > { %1756 = vmatpush.bf16.msrb.mxu3 %v2523_v40  ;;  %v2292_v40 = vld [vmem:[%s3102_s7 + $0x1e8] sm:$0xf0]  ;;  %v2167_v45 = vor.u32 %v2591_v33, %v2164_v36  ;;  %v2601_v15 = vld [vmem:[%s3102_s7 + $0x134] sm:$0xf]  ;;  %v2268_v18 = vld [vmem:[%s3102_s7 + $0x1b8] sm:$0xf0] }
  0xd0   : > { %1718 = vmatpush.bf16.msrb.mxu0 %v2323_v46  ;;  %v2231_v46 = vor.u32 %v2607_v37, %v2228_v38  ;;  %v2295_v50 = vor.u32 %v2623_v39, %v2292_v40  ;;  %v2617_v17 = vld [vmem:[%s3102_s7 + $0x1b4] sm:$0xf]  ;;  %v2207_v22 = vor.u32 %v2601_v15, %v2204_v16  ;;  %v2068_v24 = vld [vmem:[%s3102_s7 + $0x28] sm:$0xf0]  ;;  %v2583_v25 = vld [vmem:[%s3102_s7 + $0xa4] sm:$0xf] }
  0xd1   : > { %1731 = vmatpush.bf16.msrb.mxu1 %v2387_v47  ;;  %v2573_v47 = vld [vmem:[%s3102_s7 + $0x54] sm:$0xf]  ;;  %v2599_v28 = vld [vmem:[%s3102_s7 + $0x124] sm:$0xf]  ;;  %v2260_v31 = vld [vmem:[%s3102_s7 + $0x1a8] sm:$0xf0]  ;;  %v2071_v32 = vor.u32 %v2567_v23, %v2068_v24 }
  0xd2   : > { %1744 = vmatpush.bf16.msrb.mxu2 %v2451_v48  ;;  %v2092_v48 = vld [vmem:[%s3102_s7 + $0x58] sm:$0xf0]  ;;  %v2565_v36 = vld [vmem:[%s3102_s7 + $0x14] sm:$0xf]  ;;  %v2563_v49 = vld [vmem:[%s3102_s7 + $0x4] sm:$0xf] }
  0xd3   : > { %1757 = vmatpush.bf16.msrb.mxu3 %v2515_v52  ;;  %v2605_v52 = vld [vmem:[%s3102_s7 + $0x154] sm:$0xf]  ;;  %v2095_v56 = vor.u32 %v2573_v47, %v2092_v48  ;;  %v2060_v37 = vld [vmem:[%s3102_s7 + $0x18] sm:$0xf0]  ;;  %v2116_v54 = vld [vmem:[%s3102_s7 + $0x88] sm:$0xf0] }
  0xd4   : > { %1719 = vmatpush.bf16.msrb.mxu0 %v2315_v59  ;;  %v2223_v58 = vor.u32 %v2605_v52, %v2220_v53  ;;  %v2571_v59 = vld [vmem:[%s3102_s7 + $0x44] sm:$0xf]  ;;  %v2581_v38 = vld [vmem:[%s3102_s7 + $0x94] sm:$0xf]  ;;  %v2124_v40 = vld [vmem:[%s3102_s7 + $0x98] sm:$0xf0]  ;;  %v2063_v48 = vor.u32 %v2565_v36, %v2060_v37 }
  0xd5   : > { %1732 = vmatpush.bf16.msrb.mxu1 %v2379_v63  ;;  %v2148_v63 = vld [vmem:[%s3102_s7 + $0xc8] sm:$0xf0]  ;;  %v2252_v47 = vld [vmem:[%s3102_s7 + $0x198] sm:$0xf0]  ;;  %v2127_v51 = vor.u32 %v2581_v38, %v2124_v40  ;;  %v2579_v53 = vld [vmem:[%s3102_s7 + $0x84] sm:$0xf] }
  0xd6   : > { %1745 = vmatpush.bf16.msrb.mxu2 %v2443_v0  ;;  %v2603_v0 = vld [vmem:[%s3102_s7 + $0x144] sm:$0xf]  ;;  %v2151_v5 = vor.u32 %v2587_v61, %v2148_v63  ;;  %v2364_v61 = vld [vmem:[%s3102_s7 + $0x278] sm:$0xf0]  ;;  %v2119_v3 = vor.u32 %v2579_v53, %v2116_v54  ;;  %v2356_v15 = vld [vmem:[%s3102_s7 + $0x268] sm:$0xf0] }
  0xd7   : > { %1758 = vmatpush.bf16.msrb.mxu3 %v2507_v4  ;;  %v2087_v4 = vor.u32 %v2571_v59, %v2084_v60  ;;  %v2215_v6 = vor.u32 %v2603_v0, %v2212_v1  ;;  %v2595_v55 = vld [vmem:[%s3102_s7 + $0x104] sm:$0xf]  ;;  %v2244_v59 = vld [vmem:[%s3102_s7 + $0x188] sm:$0xf0]  ;;  %v2641_v60 = vld [vmem:[%s3102_s7 + $0x274] sm:$0xf] }
  0xd8   : > { %1720 = vmatpush.bf16.msrb.mxu0 %v2307_v13  ;;  %v2140_v13 = vld [vmem:[%s3102_s7 + $0xb8] sm:$0xf0]  ;;  %v2673_v1 = vld [vmem:[%s3102_s7 + $0x374] sm:$0xf]  ;;  %v2655_v16 = vld [vmem:[%s3102_s7 + $0x2e4] sm:$0xf] }
  0xd9   : > { %1733 = vmatpush.bf16.msrb.mxu1 %v2371_v20  ;;  %v2079_v20 = vor.u32 %v2569_v9, %v2076_v10  ;;  %v2428_v0 = vld [vmem:[%s3102_s7 + $0x2f8] sm:$0xf0]  ;;  %v2367_v10 = vor.u32 %v2641_v60, %v2364_v61  ;;  %v2548_v23 = vld [vmem:[%s3102_s7 + $0x3e8] sm:$0xf0]  ;;  %v2649_v53 = vld [vmem:[%s3102_s7 + $0x2b4] sm:$0xf] }
  0xda   : > { %1746 = vmatpush.bf16.msrb.mxu2 %v2435_v21  ;;  %v2143_v21 = vor.u32 %v2585_v11, %v2140_v13  ;;  %v2492_v2 = vld [vmem:[%s3102_s7 + $0x378] sm:$0xf0]  ;;  %v2639_v13 = vld [vmem:[%s3102_s7 + $0x264] sm:$0xf]  ;;  %v2340_v40 = vld [vmem:[%s3102_s7 + $0x248] sm:$0xf0] }
  0xdb   : > { %1759 = vmatpush.bf16.msrb.mxu3 %v2499_v26  ;;  %1721 = vmatmul.bf16.vlgmr.msrb.gmra.mxu0 %v3274_v41  ;;  %v2271_v26 = vor.u32 %v2617_v17, %v2268_v18  ;;  %v2420_v18 = vld [vmem:[%s3102_s7 + $0x2e8] sm:$0xf0]  ;;  %v2359_v24 = vor.u32 %v2639_v13, %v2356_v15  ;;  %v2540_v36 = vld [vmem:[%s3102_s7 + $0x3d8] sm:$0xf0]  ;;  %v2629_v13 = vld [vmem:[%s3102_s7 + $0x214] sm:$0xf] }
  0xdc   : > { %1765 = vmatpush.bf16.msra.mxu0 %v2111_v27  ;;  %1734 = vmatmul.bf16.vlgmr.msrb.gmra.mxu1 %v3278_v44  ;;  %v2132_v27 = vld [vmem:[%s3102_s7 + $0xa8] sm:$0xf0]  ;;  %v2316_v15 = vld [vmem:[%s3102_s7 + $0x218] sm:$0xf0] }
  0xdd   : > { %1778 = vmatpush.bf16.msra.mxu1 %v2175_v29  ;;  %1747 = vmatmul.bf16.vlgmr.msrb.gmra.mxu2 %v3267_v35  ;;  %v2196_v29 = vld [vmem:[%s3102_s7 + $0x128] sm:$0xf0]  ;;  %v2135_v33 = vor.u32 %v2583_v25, %v2132_v27  ;;  %v2423_v25 = vor.u32 %v2655_v16, %v2420_v18  ;;  %v2637_v27 = vld [vmem:[%s3102_s7 + $0x254] sm:$0xf]  ;;  %v2380_v18 = vld [vmem:[%s3102_s7 + $0x298] sm:$0xf0] }
  0xde   : > { %1791 = vmatpush.bf16.msra.mxu2 %v2239_v30  ;;  %1760 = vmatmul.bf16.vlgmr.msrb.gmra.mxu3 %v3276_v42  ;;  %v2615_v30 = vld [vmem:[%s3102_s7 + $0x1a4] sm:$0xf]  ;;  %v2645_v16 = vld [vmem:[%s3102_s7 + $0x294] sm:$0xf] }
  0xdf   : > { %1804 = vmatpush.bf16.msra.mxu3 %v2303_v34  ;;  %v2199_v34 = vor.u32 %v2599_v28, %v2196_v29  ;;  %v2263_v39 = vor.u32 %v2615_v30, %v2260_v31  ;;  %v2348_v28 = vld [vmem:[%s3102_s7 + $0x258] sm:$0xf0]  ;;  %v2653_v29 = vld [vmem:[%s3102_s7 + $0x2d4] sm:$0xf] }
  0xe0   : > { %1766 = vmatpush.bf16.msra.mxu0 %v2103_v43  ;;  %v2597_v43 = vld [vmem:[%s3102_s7 + $0x114] sm:$0xf]  ;;  %v2412_v31 = vld [vmem:[%s3102_s7 + $0x2d8] sm:$0xf0]  ;;  %v2351_v37 = vor.u32 %v2637_v27, %v2348_v28  ;;  %v2627_v27 = vld [vmem:[%s3102_s7 + $0x204] sm:$0xf] }
  0xe1   : > { %1779 = vmatpush.bf16.msra.mxu1 %v2167_v45  ;;  %v2188_v45 = vld [vmem:[%s3102_s7 + $0x118] sm:$0xf0]  ;;  %v2308_v28 = vld [vmem:[%s3102_s7 + $0x208] sm:$0xf0] }
  0xe2   : > { %1792 = vmatpush.bf16.msra.mxu2 %v2231_v46  ;;  %v2613_v46 = vld [vmem:[%s3102_s7 + $0x194] sm:$0xf]  ;;  %v2191_v52 = vor.u32 %v2597_v43, %v2188_v45  ;;  %v2651_v43 = vld [vmem:[%s3102_s7 + $0x2c4] sm:$0xf]  ;;  %v2404_v45 = vld [vmem:[%s3102_s7 + $0x2c8] sm:$0xf0] }
  0xe3   : > { %1805 = vmatpush.bf16.msra.mxu3 %v2295_v50  ;;  %v2052_v50 = vld [vmem:[%s3102_s7 + $0x8] sm:$0xf0] }
  0xe4   : > { %1767 = vmatpush.bf16.msra.mxu0 %v2095_v56  ;;  %v2255_v56 = vor.u32 %v2613_v46, %v2252_v47  ;;  %v2055_v63 = vor.u32 %v2563_v49, %v2052_v50  ;;  %v2468_v46 = vld [vmem:[%s3102_s7 + $0x348] sm:$0xf0]  ;;  %v2683_v47 = vld [vmem:[%s3102_s7 + $0x3c4] sm:$0xf]  ;;  %v2407_v49 = vor.u32 %v2651_v43, %v2404_v45 }
  0xe5   : > { %1780 = vmatpush.bf16.msra.mxu1 %v2159_v57  ;;  %v2180_v57 = vld [vmem:[%s3102_s7 + $0x108] sm:$0xf0] }
  0xe6   : > { %1793 = vmatpush.bf16.msra.mxu2 %v2223_v58  ;;  %v2611_v58 = vld [vmem:[%s3102_s7 + $0x184] sm:$0xf] }
  0xe7   : > { %1806 = vmatpush.bf16.msra.mxu3 %v2287_v62  ;;  %v2657_v62 = vld [vmem:[%s3102_s7 + $0x2f4] sm:$0xf]  ;;  %v2247_v9 = vor.u32 %v2611_v58, %v2244_v59  ;;  %v2524_v59 = vld [vmem:[%s3102_s7 + $0x3b8] sm:$0xf0] }
  0xe8   : > { %1768 = vmatpush.bf16.msra.mxu0 %v2087_v4  ;;  %v2183_v4 = vor.u32 %v2595_v55, %v2180_v57  ;;  %v2431_v11 = vor.u32 %v2657_v62, %v2428_v0  ;;  %v2396_v55 = vld [vmem:[%s3102_s7 + $0x2b8] sm:$0xf0]  ;;  %v2681_v58 = vld [vmem:[%s3102_s7 + $0x3b4] sm:$0xf]  ;;  %v2324_v0 = vld [vmem:[%s3102_s7 + $0x228] sm:$0xf0] }
  0xe9   : > { %1781 = vmatpush.bf16.msra.mxu1 %v2151_v5  ;;  %v2689_v5 = vld [vmem:[%s3102_s7 + $0x3f4] sm:$0xf]  ;;  %v2460_v57 = vld [vmem:[%s3102_s7 + $0x338] sm:$0xf0]  ;;  %v2399_v61 = vor.u32 %v2649_v53, %v2396_v55  ;;  %v1886_v53 = vld [vmem:[%s841_s28] sm:$0x3] }
  0xea   : > { %1794 = vmatpush.bf16.msra.mxu2 %v2215_v6  ;;  %v2556_v6 = vld [vmem:[%s3102_s7 + $0x3f8] sm:$0xf0] }
  0xeb   : > { %1807 = vmatpush.bf16.msra.mxu3 %v2279_v12  ;;  %v2495_v12 = vor.u32 %v2673_v1, %v2492_v2  ;;  %v2559_v17 = vor.u32 %v2689_v5, %v2556_v6  ;;  %v2647_v1 = vld [vmem:[%s3102_s7 + $0x2a4] sm:$0xf]  ;;  %v2527_v2 = vor.u32 %v2681_v58, %v2524_v59  ;;  %v2452_v5 = vld [vmem:[%s3102_s7 + $0x328] sm:$0xf0]  ;;  %v1888_v58 = vperm.slane %v1886_v53, 0 }
  0xec   : > { %1769 = vmatpush.bf16.msra.mxu0 %v2079_v20  ;;  %v2671_v20 = vld [vmem:[%s3102_s7 + $0x364] sm:$0xf] }
  0xed   : > { %1782 = vmatpush.bf16.msra.mxu1 %v2143_v21  ;;  %v2484_v21 = vld [vmem:[%s3102_s7 + $0x368] sm:$0xf0]  ;;  %v2679_v6 = vld [vmem:[%s3102_s7 + $0x3a4] sm:$0xf] }
  0xee   : > { %1795 = vmatpush.bf16.msra.mxu2 %v2207_v22  ;;  %v2687_v22 = vld [vmem:[%s3102_s7 + $0x3e4] sm:$0xf] }
  0xef   : > { %1808 = vmatpush.bf16.msra.mxu3 %v2271_v26  ;;  %v2487_v26 = vor.u32 %v2671_v20, %v2484_v21  ;;  %v2551_v30 = vor.u32 %v2687_v22, %v2548_v23  ;;  %v2661_v20 = vld [vmem:[%s3102_s7 + $0x314] sm:$0xf]  ;;  %v2444_v21 = vld [vmem:[%s3102_s7 + $0x318] sm:$0xf0] }
  0xf0   : > { %1770 = vmatpush.bf16.msra.mxu0 %v2071_v32  ;;  %v2669_v32 = vld [vmem:[%s3102_s7 + $0x354] sm:$0xf]  ;;  %v2508_v23 = vld [vmem:[%s3102_s7 + $0x398] sm:$0xf0] }
  0xf1   : > { %1783 = vmatpush.bf16.msra.mxu1 %v2135_v33  ;;  %v2476_v33 = vld [vmem:[%s3102_s7 + $0x358] sm:$0xf0]  ;;  %v2677_v22 = vld [vmem:[%s3102_s7 + $0x394] sm:$0xf] }
  0xf2   : > { %1796 = vmatpush.bf16.msra.mxu2 %v2199_v34  ;;  %v2685_v34 = vld [vmem:[%s3102_s7 + $0x3d4] sm:$0xf]  ;;  %v2479_v38 = vor.u32 %v2669_v32, %v2476_v33  ;;  %v2659_v32 = vld [vmem:[%s3102_s7 + $0x304] sm:$0xf]  ;;  %v2436_v33 = vld [vmem:[%s3102_s7 + $0x308] sm:$0xf0] }
  0xf3   : > { %1809 = vmatpush.bf16.msra.mxu3 %v2263_v39  ;;  %v2635_v39 = vld [vmem:[%s3102_s7 + $0x244] sm:$0xf] }
  0xf4   : > { %1771 = vmatpush.bf16.msra.mxu0 %v2063_v48  ;;  %v2343_v48 = vor.u32 %v2635_v39, %v2340_v40 }
  0xf5   : > { %1784 = vmatpush.bf16.msra.mxu1 %v2127_v51  ;;  %v2633_v51 = vld [vmem:[%s3102_s7 + $0x234] sm:$0xf] }
  0xf6   : > { %1797 = vmatpush.bf16.msra.mxu2 %v2191_v52  ;;  %v2332_v52 = vld [vmem:[%s3102_s7 + $0x238] sm:$0xf0] }
  0xf7   : > { %1810 = vmatpush.bf16.msra.mxu3 %v2255_v56  ;;  %v2665_v56 = vld [vmem:[%s3102_s7 + $0x334] sm:$0xf]  ;;  %v2335_v60 = vor.u32 %v2633_v51, %v2332_v52  ;;  %v1878_v51 = vld [vmem:[%s836_s25] sm:$0x3] }
  0xf8   : > { %1772 = vmatpush.bf16.msra.mxu0 %v2055_v63  ;;  %v2463_v62 = vor.u32 %v2665_v56, %v2460_v57  ;;  %v2631_v63 = vld [vmem:[%s3102_s7 + $0x224] sm:$0xf]  ;;  %v1880_v56 = vperm.slane %v1878_v51, 0 }
  0xf9   : > { %1785 = vmatpush.bf16.msra.mxu1 %v2119_v3  ;;  %v2388_v3 = vld [vmem:[%s3102_s7 + $0x2a8] sm:$0xf0] }
  0xfa   : > { %1798 = vmatpush.bf16.msra.mxu2 %v2183_v4  ;;  %v2663_v4 = vld [vmem:[%s3102_s7 + $0x324] sm:$0xf] }
  0xfb   : > { %1811 = vmatpush.bf16.msra.mxu3 %v2247_v9  ;;  %1773 = vmatmul.bf16.vlgmr.msra.gmra.mxu0 %v3205_v14  ;;  %v2543_v14 = vor.u32 %v2685_v34, %v2540_v36  ;;  %v2516_v9 = vld [vmem:[%s3102_s7 + $0x3a8] sm:$0xf0]  ;;  %v2675_v34 = vld [vmem:[%s3102_s7 + $0x384] sm:$0xf] }
  0xfc   : > { %1817 = vmatpush.bf16.msrb.mxu0 %v2367_v10  ;;  %1786 = vmatmul.bf16.vlgmr.msra.gmra.mxu1 %v3211_v19  ;;  %v2532_v19 = vld [vmem:[%s3102_s7 + $0x3c8] sm:$0xf0]  ;;  %v2327_v10 = vor.u32 %v2631_v63, %v2324_v0 }
  0xfd   : > { %1830 = vmatpush.bf16.msrb.mxu1 %v2431_v11  ;;  %1799 = vmatmul.bf16.vlgmr.msra.gmra.mxu2 %v3198_v7  ;;  %v2415_v7 = vor.u32 %v2653_v29, %v2412_v31  ;;  %v2535_v54 = vor.u32 %v2683_v47, %v2532_v19  ;;  %v2391_v11 = vor.u32 %v2647_v1, %v2388_v3  ;;  %v2643_v29 = vld [vmem:[%s3102_s7 + $0x284] sm:$0xf]  ;;  %v2372_v31 = vld [vmem:[%s3102_s7 + $0x288] sm:$0xf0] }
  0xfe   : > { %1843 = vmatpush.bf16.msrb.mxu2 %v2495_v12  ;;  %1812 = vmatmul.bf16.vlgmr.msra.gmra.mxu3 %v3200_v8  ;;  %v2667_v8 = vld [vmem:[%s3102_s7 + $0x344] sm:$0xf]  ;;  %v2455_v12 = vor.u32 %v2663_v4, %v2452_v5  ;;  %v2500_v36 = vld [vmem:[%s3102_s7 + $0x388] sm:$0xf0] }
  0xff   : > { %1856 = vmatpush.bf16.msrb.mxu3 %v2559_v17  ;;  %v2471_v50 = vor.u32 %v2667_v8, %v2468_v46  ;;  %v2519_v17 = vor.u32 %v2679_v6, %v2516_v9  ;;  %v2503_v39 = vor.u32 %v2675_v34, %v2500_v36 }
 0x100   : > { %1818 = vmatpush.bf16.msrb.mxu0 %v2359_v24  ;;  %v2319_v24 = vor.u32 %v2629_v13, %v2316_v15 }
 0x101   : > { %1831 = vmatpush.bf16.msrb.mxu1 %v2423_v25  ;;  %v2383_v25 = vor.u32 %v2645_v16, %v2380_v18 }
 0x102   : > { %1844 = vmatpush.bf16.msrb.mxu2 %v2487_v26  ;;  %v2447_v26 = vor.u32 %v2661_v20, %v2444_v21 }
 0x103   : > { %1857 = vmatpush.bf16.msrb.mxu3 %v2551_v30  ;;  %v2511_v30 = vor.u32 %v2677_v22, %v2508_v23 }
 0x104   : > { %1819 = vmatpush.bf16.msrb.mxu0 %v2351_v37  ;;  %v2311_v37 = vor.u32 %v2627_v27, %v2308_v28 }
 0x105   : > { %1832 = vmatpush.bf16.msrb.mxu1 %v2415_v7  ;;  %v2375_v7 = vor.u32 %v2643_v29, %v2372_v31  ;;  %v1889_v29 = vperm.slane %v1886_v53, 1 }
 0x106   : > { %1845 = vmatpush.bf16.msrb.mxu2 %v2479_v38  ;;  %v2439_v38 = vor.u32 %v2659_v32, %v2436_v33 }
 0x107   : > { %1858 = vmatpush.bf16.msrb.mxu3 %v2543_v14 }
 0x108   : > { %1820 = vmatpush.bf16.msrb.mxu0 %v2343_v48 }
 0x109   : > { %1833 = vmatpush.bf16.msrb.mxu1 %v2407_v49 }
 0x10a   : > { %1846 = vmatpush.bf16.msrb.mxu2 %v2471_v50 }
 0x10b   : > { %1859 = vmatpush.bf16.msrb.mxu3 %v2535_v54 }
 0x10c   : > { %1821 = vmatpush.bf16.msrb.mxu0 %v2335_v60 }
 0x10d   : > { %1834 = vmatpush.bf16.msrb.mxu1 %v2399_v61 }
 0x10e   : > { %1847 = vmatpush.bf16.msrb.mxu2 %v2463_v62 }
 0x10f   : > { %1860 = vmatpush.bf16.msrb.mxu3 %v2527_v2 }
 0x110   : > { %1822 = vmatpush.bf16.msrb.mxu0 %v2327_v10 }
 0x111   : > { %1835 = vmatpush.bf16.msrb.mxu1 %v2391_v11 }
 0x112   : > { %1848 = vmatpush.bf16.msrb.mxu2 %v2455_v12 }
 0x113   : > { %1861 = vmatpush.bf16.msrb.mxu3 %v2519_v17 }
 0x114   : > { %1823 = vmatpush.bf16.msrb.mxu0 %v2319_v24 }
 0x115   : > { %1836 = vmatpush.bf16.msrb.mxu1 %v2383_v25  ;;  %v1881_v25 = vperm.slane %v1878_v51, 1 }
 0x116   : > { %1849 = vmatpush.bf16.msrb.mxu2 %v2447_v26 }
 0x117   : > { %1862 = vmatpush.bf16.msrb.mxu3 %v2511_v30 }
 0x118   : > { %1824 = vmatpush.bf16.msrb.mxu0 %v2311_v37 }
 0x119   : > { %1837 = vmatpush.bf16.msrb.mxu1 %v2375_v7 }
 0x11a   : > { %1850 = vmatpush.bf16.msrb.mxu2 %v2439_v38 }
 0x11b   : > { %1863 = vmatpush.bf16.msrb.mxu3 %v2503_v39  ;;  %1825 = vmatmul.bf16.vlgmr.msrb.gmra.mxu0 %v3274_v41 }
 0x11c   : > { %1838 = vmatmul.bf16.vlgmr.msrb.gmra.mxu1 %v3278_v44 }
 0x11d   : > { %1851 = vmatmul.bf16.vlgmr.msrb.gmra.mxu2 %v3267_v35 }
 0x11e   : > { %1864 = vmatmul.bf16.vlgmr.msrb.gmra.mxu3 %v3276_v42 }
 0x138   : > { %v1670_v40 = vpop.f32.mrf.mxu0 }
 0x139   : > { %v1683_v43 = vpop.f32.mrf.mxu1 }
 0x13a   : > { %v1684_v48 = vadd.f32 %v1683_v43, %v1670_v40 }
 0x140   : > { %v1696_v14 = vpop.f32.mrf.mxu2  ;;  %v1672_v8 = vpop.f32.mrf.mxu0 }
 0x141   : > { %v1709_v45 = vpop.f32.mrf.mxu3  ;;  %v1685_v46 = vpop.f32.mrf.mxu1  ;;  %v1697_v49 = vadd.f32 %v1696_v14, %v1684_v48 }
 0x143   : > { %v1710_v41 = vadd.f32 %v1709_v45, %v1697_v49 }
 0x148   : > { %v1698_v47 = vpop.f32.mrf.mxu2 }
 0x149   : > { %v1711_v19 = vpop.f32.mrf.mxu3 }
 0x158   : > { %v1722_v50 = vpop.f32.mrf.mxu0 }
 0x159   : > { %v1723_v35 = vadd.f32 %v1722_v50, %v1710_v41  ;;  %v1735_v42 = vpop.f32.mrf.mxu1 }
 0x15b   : > { %v1736_v44 = vadd.f32 %v1735_v42, %v1723_v35 }
 0x160   : > { %v1748_v52 = vpop.f32.mrf.mxu2  ;;  %v1724_v59 = vpop.f32.mrf.mxu0 }
 0x161   : > { %v1749_v54 = vadd.f32 %v1748_v52, %v1736_v44  ;;  %v1761_v55 = vpop.f32.mrf.mxu3  ;;  %v1737_v60 = vpop.f32.mrf.mxu1 }
 0x163   : > { %v1762_v57 = vadd.f32 %v1761_v55, %v1749_v54 }
 0x165   : > { %v1884_v61 = vmul.f32 %v1880_v56, %v1762_v57 }
 0x167   : > { %v1892_v62 = vadd.f32 %v1888_v58, %v1884_v61 }
 0x168   : > { %v1750_v63 = vpop.f32.mrf.mxu2 }
 0x169   : > { %vm1894_vm0 = vcmp.gt.f32.partialorder %v1892_v62, 0.0  ;;  %v1896_v0 = vmul.f32 0.2, %v1892_v62  ;;  %v1763_v1 = vpop.f32.mrf.mxu3 }
 0x16b   : > { %v1898_v2 = vsel %vm1894_vm0, %v1892_v62, %v1896_v0 }
 0x16c   : > { %1900 = vst [vmem:[%s3414_s5] sm:$0xff] %v1898_v2 }
 0x178   : > { %v1774_v3 = vpop.f32.mrf.mxu0 }
 0x179   : > { %v1787_v4 = vpop.f32.mrf.mxu1 }
 0x17a   : > { %v1788_v13 = vadd.f32 %v1787_v4, %v1774_v3 }
 0x180   : > { %v1800_v5 = vpop.f32.mrf.mxu2  ;;  %v1776_v9 = vpop.f32.mrf.mxu0 }
 0x181   : > { %v1813_v6 = vpop.f32.mrf.mxu3  ;;  %v1789_v10 = vpop.f32.mrf.mxu1  ;;  %v1801_v15 = vadd.f32 %v1800_v5, %v1788_v13 }
 0x183   : > { %v1814_v16 = vadd.f32 %v1813_v6, %v1801_v15 }
 0x188   : > { %v1802_v11 = vpop.f32.mrf.mxu2 }
 0x189   : > { %v1815_v12 = vpop.f32.mrf.mxu3 }
 0x198   : > { %v1826_v17 = vpop.f32.mrf.mxu0 }
 0x199   : > { %v1839_v18 = vpop.f32.mrf.mxu1  ;;  %v1827_v20 = vadd.f32 %v1826_v17, %v1814_v16 }
 0x19b   : > { %v1840_v21 = vadd.f32 %v1839_v18, %v1827_v20 }
 0x1a0   : > { %v1852_v22 = vpop.f32.mrf.mxu2  ;;  %v1828_v26 = vpop.f32.mrf.mxu0 }
 0x1a1   : > { %v1853_v23 = vadd.f32 %v1852_v22, %v1840_v21  ;;  %v1865_v24 = vpop.f32.mrf.mxu3  ;;  %v1841_v27 = vpop.f32.mrf.mxu1 }
 0x1a3   : > { %v1866_v28 = vadd.f32 %v1865_v24, %v1853_v23 }
 0x1a5   : > { %v1885_v30 = vmul.f32 %v1881_v25, %v1866_v28 }
 0x1a7   : > { %v1893_v31 = vadd.f32 %v1889_v29, %v1885_v30 }
 0x1a8   : > { %v1854_v32 = vpop.f32.mrf.mxu2 }
 0x1a9   : > { %vm1895_vm1 = vcmp.gt.f32.partialorder %v1893_v31, 0.0  ;;  %v1897_v33 = vmul.f32 0.2, %v1893_v31  ;;  %v1867_v34 = vpop.f32.mrf.mxu3 }
 0x1ab   : > { %v1899_v36 = vsel %vm1895_vm1, %v1893_v31, %v1897_v33 }
 0x1ac   : > { %1901 = vst [vmem:[%s3414_s5 + $0x8] sm:$0xff] %v1899_v36 }
 0x1ad PF: > { %s14_s19 = sadd.s32 1, %s2769_s19   ;;  %s3438_s15 = smov %s2757_s16 }
 0x1ae   : > { %p11_p10 = scmp.ge.s32.totalorder %s14_s19, 4   ;;  %s3439_s16 = smov %s2831_s23 }
 0x1af   : > { %s3440_s17 = smov %s2765_s18  ;;  %s3441_s18 = smov %s3443_s20 }
 0x1b0   :  { %13 = sbr.rel (!%p11_p10) target bundleno = 3 (0x3), region = 126 }

// kernel: memae_forward.17
= control target key start
LH: loop header
LB: loop body
LE: loop exit
PB: predicated region body
PF: predicated region fallthrough
CT: control target
= control target key end

     0   :  { %s1512_s15 = smov 0   ;;  %s1514_s16 = smov 0   ;;  %s1824_s0 = inlined_call_operand.vmem [shape: bf16[32,512], index: 0, kind: input, shape index: {}]   ;;  %s1825_s1 = inlined_call_operand.vmem [shape: bf16[512,384], index: 1, kind: input, shape index: {}]   ;;  %s1826_s2 = inlined_call_operand.vmem [shape: f32[1,384], index: 2, kind: input, shape index: {}]   ;;  %s1827_s3 = inlined_call_operand.vmem [shape: f32[1,384], index: 3, kind: input, shape index: {}]   ;;  %s1828_s4 = inlined_call_operand.vmem [shape: f32[32,384], index: 4, kind: output, shape index: {}]  }
   0x1   :  { %s1516_s17 = smov 0   ;;  %s1518_s18 = smov 0  }
   0x2   :  { %s1520_s19 = smov 0  }
   0x3 LB: > { %s29_s20 = sadd.s32 1, %s1481_s18  ;;  %s1191_s21 = sadd.s32 4294967295, %s1485_s19   ;;  %s1485_s19 = sphi %s1520_s19, %s14_s19   ;;  %s1481_s18 = sphi %s1518_s18, %s1833_s18   ;;  %s1477_s17 = sphi %s1516_s17, %s1832_s17   ;;  %s1473_s16 = sphi %s1514_s16, %s1831_s16   ;;  %s1469_s15 = sphi %s1512_s15, %s1830_s15  }
   0x4   : > { %p31_p0 = scmp.ge.s32.totalorder %s29_s20, 3  ;;  %p77_p1 = scmp.ne.s32.totalorder %s1473_s16, %s1469_s15 }
   0x5   : > { %p78_p2 = scmp.eq.s32.totalorder %s1485_s19, 0  ;;  %p161_p4 = scmp.eq.s32.totalorder %s1191_s21, 2 }
   0x6   : > { %s1835_s20 = smov (%p31_p0, %s29_s20), 0  ;;  %s70_s23 = sadd.s32 1, %s1473_s16 }
   0x7   : > { %p79_p3 = por %p78_p2, %p77_p1  ;;  %s66_s22 = ssub.s32 %s1481_s18, %s1835_s20 }
   0x8   : > { %p68_p5 = scmp.eq.s32.totalorder %s66_s22, 0  ;;  %p1547_p6 = por %p161_p4, %p77_p1 }
   0x9   : > { %p1195_p7 = scmp.ge.s32.totalorder %s1485_s19, 3 }
   0xa   : > { %s1552_s25 = scalar_select %p68_p5, %s1473_s16, %s70_s23  }
   0xb   : > { %198 = sbr.rel (%p1195_p7) target bundleno = 84 (0x54), region = 20 }
  0x10   : > { %201 = sbr.rel (!%p79_p3) target bundleno = 84 (0x54), region = 24  ;;  %s203_s26 = sand.u32 (%p79_p3), 1, %s1473_s16  }
  0x11   : > { %s1197_s27 = sshll.u32 (%p79_p3), %s1481_s18, 2  ;;  %s1196_s28 = sshll.u32 (%p79_p3), %s203_s26, 8 }
  0x12   : > { %s1560_s5 = scalar_lea.vmem (%p79_p3), %s1825_s1, %s1197_s27  ;;  %s1564_s6 = scalar_lea.vmem (%p79_p3), [#allocation3], %s1196_s28 }
  0x13   : > { %v227_v0 = vld [vmem:[%s1560_s5] sm:$0xf] (%p79_p3)  ;;  %v229_v1 = vld [vmem:[%s1560_s5 + $0xc] sm:$0xf] (%p79_p3)  ;;  %v231_v2 = vld [vmem:[%s1560_s5 + $0x18] sm:$0xf] (%p79_p3) }
  0x14   : > { %228 = vst [vmem:[%s1564_s6] sm:$0xf] (%p79_p3), %v227_v0  ;;  %v233_v3 = vld [vmem:[%s1560_s5 + $0x24] sm:$0xf] (%p79_p3)  ;;  %v235_v4 = vld [vmem:[%s1560_s5 + $0x30] sm:$0xf] (%p79_p3) }
  0x15   : > { %230 = vst [vmem:[%s1564_s6 + $0x4] sm:$0xf] %v229_v1  ;;  %v237_v5 = vld [vmem:[%s1560_s5 + $0x3c] sm:$0xf]  ;;  %v239_v6 = vld [vmem:[%s1560_s5 + $0x48] sm:$0xf] }
  0x16   : > { %232 = vst [vmem:[%s1564_s6 + $0x8] sm:$0xf] %v231_v2  ;;  %v241_v7 = vld [vmem:[%s1560_s5 + $0x54] sm:$0xf]  ;;  %v243_v8 = vld [vmem:[%s1560_s5 + $0x60] sm:$0xf] }
  0x17   : > { %234 = vst [vmem:[%s1564_s6 + $0xc] sm:$0xf] %v233_v3  ;;  %v245_v9 = vld [vmem:[%s1560_s5 + $0x6c] sm:$0xf]  ;;  %v247_v10 = vld [vmem:[%s1560_s5 + $0x78] sm:$0xf] }
  0x18   : > { %236 = vst [vmem:[%s1564_s6 + $0x10] sm:$0xf] %v235_v4  ;;  %v249_v11 = vld [vmem:[%s1560_s5 + $0x84] sm:$0xf]  ;;  %v251_v12 = vld [vmem:[%s1560_s5 + $0x90] sm:$0xf] }
  0x19   : > { %238 = vst [vmem:[%s1564_s6 + $0x14] sm:$0xf] %v237_v5  ;;  %v253_v13 = vld [vmem:[%s1560_s5 + $0x9c] sm:$0xf]  ;;  %v255_v14 = vld [vmem:[%s1560_s5 + $0xa8] sm:$0xf] }
  0x1a   : > { %240 = vst [vmem:[%s1564_s6 + $0x18] sm:$0xf] %v239_v6  ;;  %v257_v15 = vld [vmem:[%s1560_s5 + $0xb4] sm:$0xf]  ;;  %v259_v16 = vld [vmem:[%s1560_s5 + $0xc0] sm:$0xf] }
  0x1b   : > { %242 = vst [vmem:[%s1564_s6 + $0x1c] sm:$0xf] %v241_v7  ;;  %v261_v17 = vld [vmem:[%s1560_s5 + $0xcc] sm:$0xf]  ;;  %v263_v18 = vld [vmem:[%s1560_s5 + $0xd8] sm:$0xf] }
  0x1c   : > { %244 = vst [vmem:[%s1564_s6 + $0x20] sm:$0xf] %v243_v8  ;;  %v265_v19 = vld [vmem:[%s1560_s5 + $0xe4] sm:$0xf]  ;;  %v267_v20 = vld [vmem:[%s1560_s5 + $0xf0] sm:$0xf] }
  0x1d   : > { %246 = vst [vmem:[%s1564_s6 + $0x24] sm:$0xf] %v245_v9  ;;  %v269_v21 = vld [vmem:[%s1560_s5 + $0xfc] sm:$0xf]  ;;  %v271_v22 = vld [vmem:[%s1560_s5 + $0x108] sm:$0xf] }
  0x1e   : > { %248 = vst [vmem:[%s1564_s6 + $0x28] sm:$0xf] %v247_v10  ;;  %v273_v23 = vld [vmem:[%s1560_s5 + $0x114] sm:$0xf]  ;;  %v275_v24 = vld [vmem:[%s1560_s5 + $0x120] sm:$0xf] }
  0x1f   : > { %250 = vst [vmem:[%s1564_s6 + $0x2c] sm:$0xf] %v249_v11  ;;  %v277_v25 = vld [vmem:[%s1560_s5 + $0x12c] sm:$0xf]  ;;  %v279_v26 = vld [vmem:[%s1560_s5 + $0x138] sm:$0xf] }
  0x20   : > { %252 = vst [vmem:[%s1564_s6 + $0x30] sm:$0xf] %v251_v12  ;;  %v281_v27 = vld [vmem:[%s1560_s5 + $0x144] sm:$0xf]  ;;  %v283_v28 = vld [vmem:[%s1560_s5 + $0x150] sm:$0xf] }
  0x21   : > { %254 = vst [vmem:[%s1564_s6 + $0x34] sm:$0xf] %v253_v13  ;;  %v285_v29 = vld [vmem:[%s1560_s5 + $0x15c] sm:$0xf]  ;;  %v287_v30 = vld [vmem:[%s1560_s5 + $0x168] sm:$0xf] }
  0x22   : > { %256 = vst [vmem:[%s1564_s6 + $0x38] sm:$0xf] %v255_v14  ;;  %v289_v31 = vld [vmem:[%s1560_s5 + $0x174] sm:$0xf]  ;;  %v291_v32 = vld [vmem:[%s1560_s5 + $0x180] sm:$0xf] }
  0x23   : > { %258 = vst [vmem:[%s1564_s6 + $0x3c] sm:$0xf] %v257_v15  ;;  %v293_v33 = vld [vmem:[%s1560_s5 + $0x18c] sm:$0xf]  ;;  %v295_v34 = vld [vmem:[%s1560_s5 + $0x198] sm:$0xf] }
  0x24   : > { %260 = vst [vmem:[%s1564_s6 + $0x40] sm:$0xf] %v259_v16  ;;  %v297_v35 = vld [vmem:[%s1560_s5 + $0x1a4] sm:$0xf]  ;;  %v299_v36 = vld [vmem:[%s1560_s5 + $0x1b0] sm:$0xf] }
  0x25   : > { %262 = vst [vmem:[%s1564_s6 + $0x44] sm:$0xf] %v261_v17  ;;  %v301_v37 = vld [vmem:[%s1560_s5 + $0x1bc] sm:$0xf]  ;;  %v303_v38 = vld [vmem:[%s1560_s5 + $0x1c8] sm:$0xf] }
  0x26   : > { %264 = vst [vmem:[%s1564_s6 + $0x48] sm:$0xf] %v263_v18  ;;  %v305_v39 = vld [vmem:[%s1560_s5 + $0x1d4] sm:$0xf]  ;;  %v307_v40 = vld [vmem:[%s1560_s5 + $0x1e0] sm:$0xf] }
  0x27   : > { %266 = vst [vmem:[%s1564_s6 + $0x4c] sm:$0xf] %v265_v19  ;;  %v309_v41 = vld [vmem:[%s1560_s5 + $0x1ec] sm:$0xf]  ;;  %v311_v42 = vld [vmem:[%s1560_s5 + $0x1f8] sm:$0xf] }
  0x28   : > { %268 = vst [vmem:[%s1564_s6 + $0x50] sm:$0xf] %v267_v20  ;;  %v313_v43 = vld [vmem:[%s1560_s5 + $0x204] sm:$0xf]  ;;  %v315_v44 = vld [vmem:[%s1560_s5 + $0x210] sm:$0xf] }
  0x29   : > { %270 = vst [vmem:[%s1564_s6 + $0x54] sm:$0xf] %v269_v21  ;;  %v317_v45 = vld [vmem:[%s1560_s5 + $0x21c] sm:$0xf]  ;;  %v319_v46 = vld [vmem:[%s1560_s5 + $0x228] sm:$0xf] }
  0x2a   : > { %272 = vst [vmem:[%s1564_s6 + $0x58] sm:$0xf] %v271_v22  ;;  %v321_v47 = vld [vmem:[%s1560_s5 + $0x234] sm:$0xf]  ;;  %v323_v48 = vld [vmem:[%s1560_s5 + $0x240] sm:$0xf] }
  0x2b   : > { %274 = vst [vmem:[%s1564_s6 + $0x5c] sm:$0xf] %v273_v23  ;;  %v325_v49 = vld [vmem:[%s1560_s5 + $0x24c] sm:$0xf]  ;;  %v327_v50 = vld [vmem:[%s1560_s5 + $0x258] sm:$0xf] }
  0x2c   : > { %276 = vst [vmem:[%s1564_s6 + $0x60] sm:$0xf] %v275_v24  ;;  %v329_v51 = vld [vmem:[%s1560_s5 + $0x264] sm:$0xf]  ;;  %v331_v52 = vld [vmem:[%s1560_s5 + $0x270] sm:$0xf] }
  0x2d   : > { %278 = vst [vmem:[%s1564_s6 + $0x64] sm:$0xf] %v277_v25  ;;  %v333_v53 = vld [vmem:[%s1560_s5 + $0x27c] sm:$0xf]  ;;  %v335_v54 = vld [vmem:[%s1560_s5 + $0x288] sm:$0xf] }
  0x2e   : > { %280 = vst [vmem:[%s1564_s6 + $0x68] sm:$0xf] %v279_v26  ;;  %v337_v55 = vld [vmem:[%s1560_s5 + $0x294] sm:$0xf]  ;;  %v339_v56 = vld [vmem:[%s1560_s5 + $0x2a0] sm:$0xf] }
  0x2f   : > { %282 = vst [vmem:[%s1564_s6 + $0x6c] sm:$0xf] %v281_v27  ;;  %v341_v57 = vld [vmem:[%s1560_s5 + $0x2ac] sm:$0xf]  ;;  %v343_v58 = vld [vmem:[%s1560_s5 + $0x2b8] sm:$0xf] }
  0x30   : > { %284 = vst [vmem:[%s1564_s6 + $0x70] sm:$0xf] %v283_v28  ;;  %v345_v59 = vld [vmem:[%s1560_s5 + $0x2c4] sm:$0xf]  ;;  %v347_v60 = vld [vmem:[%s1560_s5 + $0x2d0] sm:$0xf] }
  0x31   : > { %286 = vst [vmem:[%s1564_s6 + $0x74] sm:$0xf] %v285_v29  ;;  %v349_v61 = vld [vmem:[%s1560_s5 + $0x2dc] sm:$0xf]  ;;  %v351_v62 = vld [vmem:[%s1560_s5 + $0x2e8] sm:$0xf] }
  0x32   : > { %288 = vst [vmem:[%s1564_s6 + $0x78] sm:$0xf] %v287_v30  ;;  %v353_v63 = vld [vmem:[%s1560_s5 + $0x2f4] sm:$0xf] }
  0x33   : > { %290 = vst [vmem:[%s1564_s6 + $0x7c] sm:$0xf] %v289_v31 }
  0x34   : > { %292 = vst [vmem:[%s1564_s6 + $0x80] sm:$0xf] %v291_v32 }
  0x35   : > { %294 = vst [vmem:[%s1564_s6 + $0x84] sm:$0xf] %v293_v33 }
  0x36   : > { %296 = vst [vmem:[%s1564_s6 + $0x88] sm:$0xf] %v295_v34 }
  0x37   : > { %298 = vst [vmem:[%s1564_s6 + $0x8c] sm:$0xf] %v297_v35 }
  0x38   : > { %300 = vst [vmem:[%s1564_s6 + $0x90] sm:$0xf] %v299_v36 }
  0x39   : > { %302 = vst [vmem:[%s1564_s6 + $0x94] sm:$0xf] %v301_v37 }
  0x3a   : > { %304 = vst [vmem:[%s1564_s6 + $0x98] sm:$0xf] %v303_v38 }
  0x3b   : > { %306 = vst [vmem:[%s1564_s6 + $0x9c] sm:$0xf] %v305_v39 }
  0x3c   : > { %308 = vst [vmem:[%s1564_s6 + $0xa0] sm:$0xf] %v307_v40 }
  0x3d   : > { %310 = vst [vmem:[%s1564_s6 + $0xa4] sm:$0xf] %v309_v41 }
  0x3e   : > { %312 = vst [vmem:[%s1564_s6 + $0xa8] sm:$0xf] %v311_v42 }
  0x3f   : > { %314 = vst [vmem:[%s1564_s6 + $0xac] sm:$0xf] %v313_v43 }
  0x40   : > { %316 = vst [vmem:[%s1564_s6 + $0xb0] sm:$0xf] %v315_v44 }
  0x41   : > { %318 = vst [vmem:[%s1564_s6 + $0xb4] sm:$0xf] %v317_v45 }
  0x42   : > { %320 = vst [vmem:[%s1564_s6 + $0xb8] sm:$0xf] %v319_v46 }
  0x43   : > { %322 = vst [vmem:[%s1564_s6 + $0xbc] sm:$0xf] %v321_v47 }
  0x44   : > { %324 = vst [vmem:[%s1564_s6 + $0xc0] sm:$0xf] %v323_v48 }
  0x45   : > { %326 = vst [vmem:[%s1564_s6 + $0xc4] sm:$0xf] %v325_v49 }
  0x46   : > { %328 = vst [vmem:[%s1564_s6 + $0xc8] sm:$0xf] %v327_v50 }
  0x47   : > { %330 = vst [vmem:[%s1564_s6 + $0xcc] sm:$0xf] %v329_v51 }
  0x48   : > { %332 = vst [vmem:[%s1564_s6 + $0xd0] sm:$0xf] %v331_v52 }
  0x49   : > { %334 = vst [vmem:[%s1564_s6 + $0xd4] sm:$0xf] %v333_v53 }
  0x4a   : > { %336 = vst [vmem:[%s1564_s6 + $0xd8] sm:$0xf] %v335_v54 }
  0x4b   : > { %338 = vst [vmem:[%s1564_s6 + $0xdc] sm:$0xf] %v337_v55 }
  0x4c   : > { %340 = vst [vmem:[%s1564_s6 + $0xe0] sm:$0xf] %v339_v56 }
  0x4d   : > { %342 = vst [vmem:[%s1564_s6 + $0xe4] sm:$0xf] %v341_v57 }
  0x4e   : > { %344 = vst [vmem:[%s1564_s6 + $0xe8] sm:$0xf] %v343_v58 }
  0x4f   : > { %346 = vst [vmem:[%s1564_s6 + $0xec] sm:$0xf] %v345_v59 }
  0x50   : > { %348 = vst [vmem:[%s1564_s6 + $0xf0] sm:$0xf] %v347_v60 }
  0x51   : > { %350 = vst [vmem:[%s1564_s6 + $0xf4] sm:$0xf] %v349_v61 }
  0x52   : > { %352 = vst [vmem:[%s1564_s6 + $0xf8] sm:$0xf] %v351_v62 }
  0x53   : > { %354 = vst [vmem:[%s1564_s6 + $0xfc] sm:$0xf] %v353_v63 }
  0x54 PF: > { %p1198_p8 = scmp.ge.s32.totalorder %s1485_s19, 1  ;;  %p517_p9 = scmp.lt.s32.totalorder %s1485_s19, 4 }
  0x56   : > { %p518_p10 = pnand %p1198_p8, %p517_p9 }
  0x57   : > { %s524_s7 = sand.u32 (!%p518_p10), 1, %s1469_s15   ;;  %p577_p11 = scmp.lt.s32.totalorder (!%p518_p10), %s1477_s17, 2 }
  0x58   : > { %521 = sbr.rel (%p518_p10) target bundleno = 303 (0x12f), region = 73  ;;  %s1199_s8 = sshll.u32 (!%p518_p10), %s524_s7, 8 }
  0x59   : > { %s1697_s9 = scalar_lea.vmem (!%p518_p10), [#allocation3], %s1199_s8  ;;  %s1200_s23 = sshll.u32 (!%p518_p10), %s524_s7, 5 }
  0x5a   : > { %s1793_s26 = scalar_lea.vmem (!%p518_p10), [#allocation4], %s1200_s23 }
  0x5d   : > { %v1380_v0 = vld [vmem:[%s1697_s9 + $0x38] sm:$0xff]  ;;  %v1379_v4 = vld [vmem:[%s1697_s9 + $0x30] sm:$0xff]  ;;  %v1378_v8 = vld [vmem:[%s1697_s9 + $0x28] sm:$0xff]  ;;  %s1362_s15 = sshll.u32 (%p1547_p6), %s1477_s17, 3 }
  0x5e   : > { %v1388_v1 = vld [vmem:[%s1697_s9 + $0x78] sm:$0xff]  ;;  %900 = vmatpush.bf16.msra.mxu0 %v1380_v0  ;;  %v1387_v5 = vld [vmem:[%s1697_s9 + $0x70] sm:$0xff]  ;;  %v1386_v9 = vld [vmem:[%s1697_s9 + $0x68] sm:$0xff] }
  0x5f   : > { %v1396_v2 = vld [vmem:[%s1697_s9 + $0xb8] sm:$0xff]  ;;  %919 = vmatpush.bf16.msra.mxu1 %v1388_v1  ;;  %v1395_v6 = vld [vmem:[%s1697_s9 + $0xb0] sm:$0xff]  ;;  %v1394_v10 = vld [vmem:[%s1697_s9 + $0xa8] sm:$0xff] }
  0x60   : > { %v1404_v3 = vld [vmem:[%s1697_s9 + $0xf8] sm:$0xff]  ;;  %938 = vmatpush.bf16.msra.mxu2 %v1396_v2  ;;  %v1403_v7 = vld [vmem:[%s1697_s9 + $0xf0] sm:$0xff]  ;;  %v1402_v11 = vld [vmem:[%s1697_s9 + $0xe8] sm:$0xff] }
  0x61   : > { %957 = vmatpush.bf16.msra.mxu3 %v1404_v3  ;;  %v1377_v12 = vld [vmem:[%s1697_s9 + $0x20] sm:$0xff]  ;;  %v1376_v16 = vld [vmem:[%s1697_s9 + $0x18] sm:$0xff]  ;;  %v1375_v20 = vld [vmem:[%s1697_s9 + $0x10] sm:$0xff] }
  0x62   : > { %901 = vmatpush.bf16.msra.mxu0 %v1379_v4  ;;  %v1385_v13 = vld [vmem:[%s1697_s9 + $0x60] sm:$0xff]  ;;  %v1384_v17 = vld [vmem:[%s1697_s9 + $0x58] sm:$0xff]  ;;  %v1383_v21 = vld [vmem:[%s1697_s9 + $0x50] sm:$0xff] }
  0x63   : > { %920 = vmatpush.bf16.msra.mxu1 %v1387_v5  ;;  %v1393_v14 = vld [vmem:[%s1697_s9 + $0xa0] sm:$0xff]  ;;  %v1392_v18 = vld [vmem:[%s1697_s9 + $0x98] sm:$0xff]  ;;  %v1391_v22 = vld [vmem:[%s1697_s9 + $0x90] sm:$0xff] }
  0x64   : > { %939 = vmatpush.bf16.msra.mxu2 %v1395_v6  ;;  %v1401_v15 = vld [vmem:[%s1697_s9 + $0xe0] sm:$0xff]  ;;  %v1400_v19 = vld [vmem:[%s1697_s9 + $0xd8] sm:$0xff]  ;;  %v1399_v23 = vld [vmem:[%s1697_s9 + $0xd0] sm:$0xff] }
  0x65   : > { %958 = vmatpush.bf16.msra.mxu3 %v1403_v7  ;;  %v1374_v24 = vld [vmem:[%s1697_s9 + $0x8] sm:$0xff]  ;;  %v1373_v28 = vld [vmem:[%s1697_s9] sm:$0xff]  ;;  %v1367_v30 = vld [vmem:[%s1824_s0 + $0xc] sm:$0xf0] }
  0x66   : > { %902 = vmatpush.bf16.msra.mxu0 %v1378_v8  ;;  %v1382_v25 = vld [vmem:[%s1697_s9 + $0x48] sm:$0xff]  ;;  %v1203_v29 = vld [vmem:[%s1824_s0] sm:$0xf]  ;;  %v1365_v34 = vld [vmem:[%s1824_s0 + $0x4] sm:$0xf] }
  0x67   : > { %921 = vmatpush.bf16.msra.mxu1 %v1386_v9  ;;  %v1390_v26 = vld [vmem:[%s1697_s9 + $0x88] sm:$0xff]  ;;  %v1381_v31 = vld [vmem:[%s1697_s9 + $0x40] sm:$0xff]  ;;  %v1205_v35 = vld [vmem:[%s1824_s0 + $0x10] sm:$0xf0]  ;;  %v1204_v40 = vor.u32 %v1367_v30, %v1203_v29 }
  0x68   : > { %940 = vmatpush.bf16.msra.mxu2 %v1394_v10  ;;  %v1398_v27 = vld [vmem:[%s1697_s9 + $0xc8] sm:$0xff]  ;;  %v1389_v32 = vld [vmem:[%s1697_s9 + $0x80] sm:$0xff]  ;;  %v1368_v37 = vld [vmem:[%s1824_s0 + $0x14] sm:$0xf0]  ;;  %v1208_v41 = vor.u32 %v1365_v34, %v1205_v35 }
  0x69   : > { %959 = vmatpush.bf16.msra.mxu3 %v1402_v11  ;;  %v1397_v33 = vld [vmem:[%s1697_s9 + $0xc0] sm:$0xff]  ;;  %v1211_v36 = vld [vmem:[%s1824_s0 + $0x8] sm:$0xf]  ;;  %v1366_v38 = vld [vmem:[%s1824_s0 + $0xc] sm:$0xf]  ;;  %s1757_s9 = scalar_select %p577_p11, %s1477_s17, 2 }
  0x6a   : > { %903 = vmatpush.bf16.msra.mxu0 %v1377_v12  ;;  %v1213_v39 = vld [vmem:[%s1824_s0 + $0x18] sm:$0xf0]  ;;  %v1212_v42 = vor.u32 %v1368_v37, %v1211_v36  ;;  %v1219_v44 = vld [vmem:[%s1824_s0 + $0x20] sm:$0xf]  ;;  %v1371_v45 = vld [vmem:[%s1824_s0 + $0x2c] sm:$0xf0] }
  0x6b   : > { %922 = vmatpush.bf16.msra.mxu1 %v1385_v13  ;;  %v1216_v43 = vor.u32 %v1366_v38, %v1213_v39  ;;  %s579_s12 = scalar_lea.vmem %s1826_s2, %s1757_s9  ;;  %s582_s21 = scalar_lea.vmem %s1827_s3, %s1757_s9  ;;  %v1369_v46 = vld [vmem:[%s1824_s0 + $0x24] sm:$0xf]  ;;  %v1221_v47 = vld [vmem:[%s1824_s0 + $0x30] sm:$0xf0]  ;;  %v1227_v48 = vld [vmem:[%s1824_s0 + $0x28] sm:$0xf]  ;;  %v1220_v52 = vor.u32 %v1371_v45, %v1219_v44 }
  0x6c   : > { %941 = vmatpush.bf16.msra.mxu2 %v1393_v14  ;;  %v1372_v49 = vld [vmem:[%s1824_s0 + $0x34] sm:$0xf0]  ;;  %v1370_v50 = vld [vmem:[%s1824_s0 + $0x2c] sm:$0xf]  ;;  %v1229_v51 = vld [vmem:[%s1824_s0 + $0x38] sm:$0xf0]  ;;  %v1224_v53 = vor.u32 %v1369_v46, %v1221_v47 }
  0x6d   : > { %960 = vmatpush.bf16.msra.mxu3 %v1401_v15  ;;  %v1228_v54 = vor.u32 %v1372_v49, %v1227_v48  ;;  %v1232_v55 = vor.u32 %v1370_v50, %v1229_v51  ;;  %v1445_v62 = vld [vmem:[%s579_s12] ss:$0 sm:$0xff] }
  0x6e   : > { %904 = vmatpush.bf16.msra.mxu0 %v1376_v16  ;;  %v1446_v2 = vld [vmem:[%s582_s21] ss:$0 sm:$0xff]  ;;  %s1034_s21 = scalar_lea.vmem (%p1547_p6), %s1828_s4, %s1362_s15 }
  0x6f   : > { %923 = vmatpush.bf16.msra.mxu1 %v1384_v17 }
  0x70   : > { %942 = vmatpush.bf16.msra.mxu2 %v1392_v18 }
  0x71   : > { %961 = vmatpush.bf16.msra.mxu3 %v1400_v19 }
  0x72   : > { %905 = vmatpush.bf16.msra.mxu0 %v1375_v20 }
  0x73   : > { %924 = vmatpush.bf16.msra.mxu1 %v1383_v21 }
  0x74   : > { %943 = vmatpush.bf16.msra.mxu2 %v1391_v22 }
  0x75   : > { %962 = vmatpush.bf16.msra.mxu3 %v1399_v23 }
  0x76   : > { %906 = vmatpush.bf16.msra.mxu0 %v1374_v24 }
  0x77   : > { %925 = vmatpush.bf16.msra.mxu1 %v1382_v25 }
  0x78   : > { %944 = vmatpush.bf16.msra.mxu2 %v1390_v26 }
  0x79   : > { %963 = vmatpush.bf16.msra.mxu3 %v1398_v27 }
  0x7a   : > { %907 = vmatpush.bf16.msra.mxu0 %v1373_v28 }
  0x7b   : > { %926 = vmatpush.bf16.msra.mxu1 %v1381_v31 }
  0x7c   : > { %945 = vmatpush.bf16.msra.mxu2 %v1389_v32 }
  0x7d   : > { %964 = vmatpush.bf16.msra.mxu3 %v1397_v33  ;;  %908 = vmatmul.bf16.vlgmr.msra.gmra.mxu0 %v1204_v40 }
  0x7e   : > { %927 = vmatmul.bf16.vlgmr.msra.gmra.mxu1 %v1208_v41 }
  0x7f   : > { %946 = vmatmul.bf16.vlgmr.msra.gmra.mxu2 %v1212_v42 }
  0x80   : > { %965 = vmatmul.bf16.vlgmr.msra.gmra.mxu3 %v1216_v43 }
  0x8d   : > { %913 = vmatmul.bf16.gmra.mxu0 %v1220_v52 }
  0x8e   : > { %932 = vmatmul.bf16.gmra.mxu1 %v1224_v53 }
  0x8f   : > { %951 = vmatmul.bf16.gmra.mxu2 %v1228_v54 }
  0x90   : > { %970 = vmatmul.bf16.gmra.mxu3 %v1232_v55 }
  0xfa   : > { %v909_v56 = vpop.f32.mrf.mxu0 }
  0xfb   : > { %v928_v57 = vpop.f32.mrf.mxu1 }
  0xfc   : > { %v929_v58 = vadd.f32 %v928_v57, %v909_v56 }
 0x102   : > { %v947_v59 = vpop.f32.mrf.mxu2  ;;  %v911_v63 = vpop.f32.mrf.mxu0 }
 0x103   : > { %v966_v60 = vpop.f32.mrf.mxu3  ;;  %v948_v61 = vadd.f32 %v947_v59, %v929_v58  ;;  %v930_v0 = vpop.f32.mrf.mxu1 }
 0x104   : > { %v931_v5 = vadd.f32 %v930_v0, %v911_v63 }
 0x105   : > { %v967_v1 = vadd.f32 %v966_v60, %v948_v61 }
 0x107   : > { %v995_v3 = vmul.f32 %v1445_v62, %v967_v1 }
 0x109   : > { %v1003_v4 = vadd.f32 %v1446_v2, %v995_v3 }
 0x10a   : > { %v949_v6 = vpop.f32.mrf.mxu2  ;;  %v914_v10 = vpop.f32.mrf.mxu0 }
 0x10b   : > { %v968_v7 = vpop.f32.mrf.mxu3  ;;  %vm1007_vm0 = vcmp.gt.f32.partialorder %v1003_v4, 0.0  ;;  %v1011_v8 = vmul.f32 0.2, %v1003_v4  ;;  %v950_v9 = vadd.f32 %v949_v6, %v931_v5  ;;  %v933_v11 = vpop.f32.mrf.mxu1 }
 0x10c   : > { %v934_v15 = vadd.f32 %v933_v11, %v914_v10 }
 0x10d   : > { %v1015_v12 = vsel %vm1007_vm0, %v1003_v4, %v1011_v8  ;;  %v969_v13 = vadd.f32 %v968_v7, %v950_v9 }
 0x10e   : > { %1019 = vst [vmem:[%s1793_s26] sm:$0xff] %v1015_v12 }
 0x10f   : > { %v996_v14 = vmul.f32 %v1445_v62, %v969_v13 }
 0x111   : > { %v1004_v16 = vadd.f32 %v1446_v2, %v996_v14 }
 0x112   : > { %v952_v17 = vpop.f32.mrf.mxu2  ;;  %v916_v23 = vpop.f32.mrf.mxu0 }
 0x113   : > { %v971_v18 = vpop.f32.mrf.mxu3  ;;  %vm1008_vm1 = vcmp.gt.f32.partialorder %v1004_v16, 0.0  ;;  %v1012_v19 = vmul.f32 0.2, %v1004_v16  ;;  %v953_v20 = vadd.f32 %v952_v17, %v934_v15  ;;  %v935_v24 = vpop.f32.mrf.mxu1 }
 0x114   : > { %v936_v27 = vadd.f32 %v935_v24, %v916_v23 }
 0x115   : > { %v1016_v21 = vsel %vm1008_vm1, %v1004_v16, %v1012_v19  ;;  %v972_v22 = vadd.f32 %v971_v18, %v953_v20  ;;  %v1069_v38 = vld [vmem:[%s1793_s26] sm:$0xff] (%p1547_p6) }
 0x116   : > { %1020 = vst [vmem:[%s1793_s26 + $0x8] sm:$0xff] %v1016_v21 }
 0x117   : > { %v997_v25 = vmul.f32 %v1445_v62, %v972_v22  ;;  %1070 = vst [vmem:[%s1034_s21] sm:$0xff] (%p1547_p6), %v1069_v38 }
 0x119   : > { %v1005_v26 = vadd.f32 %v1446_v2, %v997_v25 }
 0x11a   : > { %v954_v28 = vpop.f32.mrf.mxu2 }
 0x11b   : > { %vm1009_vm2 = vcmp.gt.f32.partialorder %v1005_v26, 0.0  ;;  %v1013_v29 = vmul.f32 0.2, %v1005_v26  ;;  %v955_v30 = vadd.f32 %v954_v28, %v936_v27  ;;  %v973_v31 = vpop.f32.mrf.mxu3 }
 0x11d   : > { %v1017_v32 = vsel %vm1009_vm2, %v1005_v26, %v1013_v29  ;;  %v974_v33 = vadd.f32 %v973_v31, %v955_v30  ;;  %v1071_v39 = vld [vmem:[%s1793_s26 + $0x8] sm:$0xff] (%p1547_p6) }
 0x11e   : > { %1021 = vst [vmem:[%s1793_s26 + $0x10] sm:$0xff] %v1017_v32 }
 0x11f   : > { %v998_v34 = vmul.f32 %v1445_v62, %v974_v33  ;;  %1072 = vst [vmem:[%s1034_s21 + $0x18] sm:$0xff] (%p1547_p6), %v1071_v39 }
 0x121   : > { %v1006_v35 = vadd.f32 %v1446_v2, %v998_v34 }
 0x122   : > { %1029 = sbr.rel (!%p1547_p6) target bundleno = 303 (0x12f), region = 89 }
 0x123   : > { %vm1010_vm3 = vcmp.gt.f32.partialorder %v1006_v35, 0.0  ;;  %v1014_v36 = vmul.f32 0.2, %v1006_v35 }
 0x125   : > { %v1018_v37 = vsel %vm1010_vm3, %v1006_v35, %v1014_v36  ;;  %v1073_v40 = vld [vmem:[%s1793_s26 + $0x10] sm:$0xff] (%p1547_p6) }
 0x126   : > { %1022 = vst [vmem:[%s1793_s26 + $0x18] sm:$0xff] %v1018_v37 }
 0x127   : > { %1074 = vst [vmem:[%s1034_s21 + $0x30] sm:$0xff] %v1073_v40 }
 0x12d   : > { %v1075_v41 = vld [vmem:[%s1793_s26 + $0x18] sm:$0xff] }
 0x12e   : > { %1076 = vst [vmem:[%s1034_s21 + $0x48] sm:$0xff] %v1075_v41 }
 0x12f PF: > { %s14_s19 = sadd.s32 1, %s1485_s19   ;;  %s1830_s15 = smov %s1473_s16 }
 0x130   : > { %p11_p12 = scmp.ge.s32.totalorder %s14_s19, 5   ;;  %s1831_s16 = smov %s1552_s25 }
 0x131   : > { %s1832_s17 = smov %s1481_s18  ;;  %s1833_s18 = smov %s1835_s20 }
 0x132   :  { %13 = sbr.rel (!%p11_p12) target bundleno = 3 (0x3), region = 167 }

// kernel: memae_forward.18
= control target key start
LH: loop header
LB: loop body
LE: loop exit
PB: predicated region body
PF: predicated region fallthrough
CT: control target
= control target key end

     0   :  { %s1069_s15 = smov 0   ;;  %s1071_s16 = smov 0   ;;  %s1228_s0 = inlined_call_operand.vmem [shape: bf16[128,384], index: 0, kind: input, shape index: {}]   ;;  %s1229_s1 = inlined_call_operand.vmem [shape: bf16[384,128], index: 1, kind: input, shape index: {}]   ;;  %s1230_s2 = inlined_call_operand.vmem [shape: f32[1,128], index: 2, kind: input, shape index: {}]   ;;  %s1231_s3 = inlined_call_operand.vmem [shape: f32[1,128], index: 3, kind: input, shape index: {}]   ;;  %s1232_s4 = inlined_call_operand.vmem [shape: f32[128,128], index: 4, kind: output, shape index: {}]  }
   0x1   :  { %s1073_s17 = smov 0   ;;  %s1075_s18 = smov 0  }
   0x2   :  { %s1077_s19 = smov 0  }
   0x3 LB: > { %s26_s20 = sadd.s32 1, %s1037_s18  ;;  %p49_p1 = scmp.ne.s32.totalorder %s1029_s16, %s1025_s15  ;;  %s1041_s19 = sphi %s1077_s19, %s14_s19   ;;  %s1037_s18 = sphi %s1075_s18, %s1236_s18   ;;  %s1033_s17 = sphi %s1073_s17, %s1235_s17   ;;  %s1029_s16 = sphi %s1071_s16, %s1234_s16   ;;  %s1025_s15 = sphi %s1069_s15, %s1233_s15  }
   0x4   : > { %p27_p0 = scmp.ge.s32.totalorder %s26_s20, 3  ;;  %p50_p2 = scmp.eq.s32.totalorder %s1041_s19, 0 }
   0x5   : > { %s42_s22 = sadd.s32 1, %s1029_s16  ;;  %p843_p5 = scmp.ge.s32.totalorder %s1041_s19, 3 }
   0x6   : > { %s1238_s20 = smov (%p27_p0, %s26_s20), 0  ;;  %p51_p3 = por %p50_p2, %p49_p1 }
   0x7   : > { %s38_s21 = ssub.s32 %s1037_s18, %s1238_s20  ;;  %195 = sbr.rel (%p843_p5) target bundleno = 32 (0x20), region = 24 }
   0x8   : > { %p40_p4 = scmp.eq.s32.totalorder %s38_s21, 0 }
   0xa   : > { %s1104_s23 = scalar_select %p40_p4, %s1029_s16, %s42_s22  }
   0xc   : > { %198 = sbr.rel (!%p51_p3) target bundleno = 32 (0x20), region = 28  ;;  %s200_s24 = sand.u32 (%p51_p3), 1, %s1029_s16  }
   0xd   : > { %s845_s25 = sshll.u32 (%p51_p3), %s1037_s18, 2  ;;  %s844_s26 = sshll.u32 (%p51_p3), %s200_s24, 6 }
   0xe   : > { %s1112_s29 = scalar_lea.vmem (%p51_p3), %s1228_s0, %s845_s25  ;;  %s202_s30 = scalar_lea.vmem (%p51_p3), [#allocation3], %s844_s26 }
   0xf   : > { %v224_v0 = vld [vmem:[%s1112_s29] sm:$0xf] (%p51_p3)  ;;  %v226_v1 = vld [vmem:[%s1112_s29 + $0xc] sm:$0xf] (%p51_p3)  ;;  %v228_v2 = vld [vmem:[%s1112_s29 + $0x18] sm:$0xf] (%p51_p3) }
  0x10   : > { %225 = vst [vmem:[%s202_s30] sm:$0xf] (%p51_p3), %v224_v0  ;;  %v230_v3 = vld [vmem:[%s1112_s29 + $0x24] sm:$0xf] (%p51_p3)  ;;  %v232_v4 = vld [vmem:[%s1112_s29 + $0x30] sm:$0xf] (%p51_p3) }
  0x11   : > { %227 = vst [vmem:[%s202_s30 + $0x4] sm:$0xf] %v226_v1  ;;  %v234_v5 = vld [vmem:[%s1112_s29 + $0x3c] sm:$0xf]  ;;  %v236_v6 = vld [vmem:[%s1112_s29 + $0x48] sm:$0xf] }
  0x12   : > { %229 = vst [vmem:[%s202_s30 + $0x8] sm:$0xf] %v228_v2  ;;  %v238_v7 = vld [vmem:[%s1112_s29 + $0x54] sm:$0xf]  ;;  %v240_v8 = vld [vmem:[%s1112_s29 + $0x60] sm:$0xf] }
  0x13   : > { %231 = vst [vmem:[%s202_s30 + $0xc] sm:$0xf] %v230_v3  ;;  %v242_v9 = vld [vmem:[%s1112_s29 + $0x6c] sm:$0xf]  ;;  %v244_v10 = vld [vmem:[%s1112_s29 + $0x78] sm:$0xf] }
  0x14   : > { %233 = vst [vmem:[%s202_s30 + $0x10] sm:$0xf] %v232_v4  ;;  %v246_v11 = vld [vmem:[%s1112_s29 + $0x84] sm:$0xf]  ;;  %v248_v12 = vld [vmem:[%s1112_s29 + $0x90] sm:$0xf] }
  0x15   : > { %235 = vst [vmem:[%s202_s30 + $0x14] sm:$0xf] %v234_v5  ;;  %v250_v13 = vld [vmem:[%s1112_s29 + $0x9c] sm:$0xf]  ;;  %v252_v14 = vld [vmem:[%s1112_s29 + $0xa8] sm:$0xf] }
  0x16   : > { %237 = vst [vmem:[%s202_s30 + $0x18] sm:$0xf] %v236_v6  ;;  %v254_v15 = vld [vmem:[%s1112_s29 + $0xb4] sm:$0xf] }
  0x17   : > { %239 = vst [vmem:[%s202_s30 + $0x1c] sm:$0xf] %v238_v7 }
  0x18   : > { %241 = vst [vmem:[%s202_s30 + $0x20] sm:$0xf] %v240_v8 }
  0x19   : > { %243 = vst [vmem:[%s202_s30 + $0x24] sm:$0xf] %v242_v9 }
  0x1a   : > { %245 = vst [vmem:[%s202_s30 + $0x28] sm:$0xf] %v244_v10 }
  0x1b   : > { %247 = vst [vmem:[%s202_s30 + $0x2c] sm:$0xf] %v246_v11 }
  0x1c   : > { %249 = vst [vmem:[%s202_s30 + $0x30] sm:$0xf] %v248_v12 }
  0x1d   : > { %251 = vst [vmem:[%s202_s30 + $0x34] sm:$0xf] %v250_v13 }
  0x1e   : > { %253 = vst [vmem:[%s202_s30 + $0x38] sm:$0xf] %v252_v14 }
  0x1f   : > { %255 = vst [vmem:[%s202_s30 + $0x3c] sm:$0xf] %v254_v15 }
  0x20 PF: > { %p846_p6 = scmp.ge.s32.totalorder %s1041_s19, 1  ;;  %p322_p7 = scmp.lt.s32.totalorder %s1041_s19, 4 }
  0x22   : > { %p323_p8 = pnand %p846_p6, %p322_p7 }
  0x23   : > { %s329_s5 = sand.u32 (!%p323_p8), 1, %s1025_s15   ;;  %s848_s6 = sshll.u32 (!%p323_p8), %s1033_s17, 4 }
  0x24   : > { %326 = sbr.rel (%p323_p8) target bundleno = 277 (0x115), region = 73  ;;  %s847_s7 = sshll.u32 (!%p323_p8), %s329_s5, 6 }
  0x25   : > { %p373_p9 = scmp.lt.s32.totalorder (!%p323_p8), %s848_s6, 47  ;;  %s1139_s12 = scalar_lea.vmem (!%p323_p8), [#allocation3], %s847_s7 }
  0x26   : > { %p850_p10 = scmp.ne.s32.totalorder (!%p323_p8), %s1033_s17, 0 }
  0x29   : > { %s1240_s6 = smov (!%p373_p9, %s848_s6), 47  ;;  %399 = sbr.rel (%p850_p10) target bundleno = 63 (0x3f), region = 81 }
  0x2a   : > { %s849_s8 = sshll.u32 %s1240_s6, 2 }
  0x2b   : > { %s1137_s11 = scalar_lea.vmem %s1229_s1, %s849_s8 }
  0x2e   : > { %v1043_v16 = vmov 0.0  }
  0x2f   : > { %400 = vst [vmem:[#allocation2 + $0x30] sm:$0xff] %v1043_v16 }
  0x30   : > { %401 = vst [vmem:[#allocation2] sm:$0xff] %v1043_v16 }
  0x31   : > { %402 = vst [vmem:[#allocation2 + $0x58] sm:$0xff] %v1043_v16 }
  0x32   : > { %403 = vst [vmem:[#allocation2 + $0x18] sm:$0xff] %v1043_v16 }
  0x33   : > { %404 = vst [vmem:[#allocation2 + $0x50] sm:$0xff] %v1043_v16 }
  0x34   : > { %405 = vst [vmem:[#allocation2 + $0x68] sm:$0xff] %v1043_v16 }
  0x35   : > { %406 = vst [vmem:[#allocation2 + $0x8] sm:$0xff] %v1043_v16 }
  0x36   : > { %407 = vst [vmem:[#allocation2 + $0x48] sm:$0xff] %v1043_v16 }
  0x37   : > { %408 = vst [vmem:[#allocation2 + $0x40] sm:$0xff] %v1043_v16 }
  0x38   : > { %409 = vst [vmem:[#allocation2 + $0x20] sm:$0xff] %v1043_v16 }
  0x39   : > { %410 = vst [vmem:[#allocation2 + $0x10] sm:$0xff] %v1043_v16 }
  0x3a   : > { %411 = vst [vmem:[#allocation2 + $0x38] sm:$0xff] %v1043_v16 }
  0x3b   : > { %412 = vst [vmem:[#allocation2 + $0x60] sm:$0xff] %v1043_v16 }
  0x3c   : > { %413 = vst [vmem:[#allocation2 + $0x70] sm:$0xff] %v1043_v16 }
  0x3d   : > { %414 = vst [vmem:[#allocation2 + $0x78] sm:$0xff] %v1043_v16 }
  0x3e   : > { %415 = vst [vmem:[#allocation2 + $0x28] sm:$0xff] %v1043_v16 }
  0x3f PF: > { %v935_v17 = vld [vmem:[%s1137_s11 + $0x38] sm:$0xff]  ;;  %v934_v18 = vld [vmem:[%s1137_s11 + $0x30] sm:$0xff]  ;;  %v933_v19 = vld [vmem:[%s1137_s11 + $0x28] sm:$0xff]  ;;  %p915_p11 = scmp.ne.s32.totalorder %s1033_s17, 2 }
  0x40   : > { %560 = vmatpush.bf16.msra.mxu0 %v935_v17  ;;  %936 = vmatpush.bf16.msra.mxu1 %v935_v17  ;;  %v932_v20 = vld [vmem:[%s1137_s11 + $0x20] sm:$0xff]  ;;  %v931_v21 = vld [vmem:[%s1137_s11 + $0x18] sm:$0xff]  ;;  %v930_v22 = vld [vmem:[%s1137_s11 + $0x10] sm:$0xff] }
  0x41   : > { %937 = vmatpush.bf16.msra.mxu2 %v935_v17  ;;  %938 = vmatpush.bf16.msra.mxu3 %v935_v17  ;;  %v929_v23 = vld [vmem:[%s1137_s11 + $0x8] sm:$0xff]  ;;  %v928_v24 = vld [vmem:[%s1137_s11] sm:$0xff]  ;;  %v922_v26 = vld [vmem:[%s1139_s12 + $0x10] sm:$0xff] }
  0x42   : > { %v920_v25 = vld [vmem:[%s1139_s12] sm:$0xff]  ;;  %v926_v28 = vld [vmem:[%s1139_s12 + $0x30] sm:$0xff]  ;;  %v921_v29 = vld [vmem:[%s1139_s12 + $0x8] sm:$0xff] }
  0x43   : > { %v924_v27 = vld [vmem:[%s1139_s12 + $0x20] sm:$0xff]  ;;  %v923_v30 = vld [vmem:[%s1139_s12 + $0x18] sm:$0xff]  ;;  %v925_v31 = vld [vmem:[%s1139_s12 + $0x28] sm:$0xff] }
  0x44   : > { %561 = vmatpush.bf16.msra.mxu0 %v934_v18  ;;  %939 = vmatpush.bf16.msra.mxu1 %v934_v18  ;;  %v927_v32 = vld [vmem:[%s1139_s12 + $0x38] sm:$0xff]  ;;  %v416_v33 = vld [vmem:[#allocation2 + $0x30] sm:$0xff]  ;;  %v424_v39 = vld [vmem:[#allocation2 + $0x40] sm:$0xff] }
  0x45   : > { %940 = vmatpush.bf16.msra.mxu2 %v934_v18  ;;  %941 = vmatpush.bf16.msra.mxu3 %v934_v18  ;;  %v420_v34 = vld [vmem:[#allocation2 + $0x50] sm:$0xff]  ;;  %v428_v40 = vld [vmem:[#allocation2 + $0x60] sm:$0xff]  ;;  %v421_v42 = vld [vmem:[#allocation2 + $0x68] sm:$0xff] }
  0x46   : > { %v417_v41 = vld [vmem:[#allocation2] sm:$0xff]  ;;  %v429_v52 = vld [vmem:[#allocation2 + $0x70] sm:$0xff]  ;;  %v418_v53 = vld [vmem:[#allocation2 + $0x58] sm:$0xff] }
  0x47   : > { %v425_v51 = vld [vmem:[#allocation2 + $0x20] sm:$0xff]  ;;  %v422_v54 = vld [vmem:[#allocation2 + $0x8] sm:$0xff]  ;;  %v426_v63 = vld [vmem:[#allocation2 + $0x10] sm:$0xff] }
  0x48   : > { %562 = vmatpush.bf16.msra.mxu0 %v933_v19  ;;  %942 = vmatpush.bf16.msra.mxu1 %v933_v19  ;;  %v430_v0 = vld [vmem:[#allocation2 + $0x78] sm:$0xff]  ;;  %v423_v2 = vld [vmem:[#allocation2 + $0x48] sm:$0xff] }
  0x49   : > { %943 = vmatpush.bf16.msra.mxu2 %v933_v19  ;;  %944 = vmatpush.bf16.msra.mxu3 %v933_v19  ;;  %v419_v1 = vld [vmem:[#allocation2 + $0x18] sm:$0xff]  ;;  %v431_v12 = vld [vmem:[#allocation2 + $0x28] sm:$0xff] }
  0x4a   : > { %v427_v11 = vld [vmem:[#allocation2 + $0x38] sm:$0xff] }
  0x4c   : > { %563 = vmatpush.bf16.msra.mxu0 %v932_v20  ;;  %945 = vmatpush.bf16.msra.mxu1 %v932_v20 }
  0x4d   : > { %946 = vmatpush.bf16.msra.mxu2 %v932_v20  ;;  %947 = vmatpush.bf16.msra.mxu3 %v932_v20 }
  0x50   : > { %564 = vmatpush.bf16.msra.mxu0 %v931_v21  ;;  %948 = vmatpush.bf16.msra.mxu1 %v931_v21 }
  0x51   : > { %949 = vmatpush.bf16.msra.mxu2 %v931_v21  ;;  %950 = vmatpush.bf16.msra.mxu3 %v931_v21 }
  0x54   : > { %565 = vmatpush.bf16.msra.mxu0 %v930_v22  ;;  %951 = vmatpush.bf16.msra.mxu1 %v930_v22 }
  0x55   : > { %952 = vmatpush.bf16.msra.mxu2 %v930_v22  ;;  %953 = vmatpush.bf16.msra.mxu3 %v930_v22 }
  0x58   : > { %566 = vmatpush.bf16.msra.mxu0 %v929_v23  ;;  %954 = vmatpush.bf16.msra.mxu1 %v929_v23 }
  0x59   : > { %955 = vmatpush.bf16.msra.mxu2 %v929_v23  ;;  %956 = vmatpush.bf16.msra.mxu3 %v929_v23 }
  0x5c   : > { %567 = vmatpush.bf16.msra.mxu0 %v928_v24  ;;  %957 = vmatpush.bf16.msra.mxu1 %v928_v24 }
  0x5d   : > { %958 = vmatpush.bf16.msra.mxu2 %v928_v24  ;;  %959 = vmatpush.bf16.msra.mxu3 %v928_v24 }
  0x5f   : > { %568 = vmatmul.bf16.vlgmr.msra.gmra.mxu0 %v920_v25  ;;  %578 = vmatmul.bf16.vlgmr.msra.gmra.mxu1 %v922_v26 }
  0x60   : > { %588 = vmatmul.bf16.vlgmr.msra.gmra.mxu2 %v924_v27  ;;  %598 = vmatmul.bf16.vlgmr.msra.gmra.mxu3 %v926_v28 }
  0x6f   : > { %573 = vmatmul.bf16.gmra.mxu0 %v921_v29  ;;  %583 = vmatmul.bf16.gmra.mxu1 %v923_v30 }
  0x70   : > { %593 = vmatmul.bf16.gmra.mxu2 %v925_v31  ;;  %603 = vmatmul.bf16.gmra.mxu3 %v927_v32 }
  0xdc   : > { %v569_v35 = vpop.f32.mrf.mxu0  ;;  %v579_v36 = vpop.f32.mrf.mxu1 }
  0xdd   : > { %v609_v37 = vadd.f32 %v569_v35, %v416_v33  ;;  %v613_v38 = vadd.f32 %v579_v36, %v420_v34 }
  0xdf   : > { %625 = vst [vmem:[#allocation2 + $0x30] sm:$0xff] %v609_v37 }
  0xe0   : > { %629 = vst [vmem:[#allocation2 + $0x50] sm:$0xff] %v613_v38 }
  0xe3   : > { %v589_v43 = vpop.f32.mrf.mxu2  ;;  %v599_v44 = vpop.f32.mrf.mxu3 }
  0xe4   : > { %v617_v45 = vadd.f32 %v589_v43, %v424_v39  ;;  %v621_v46 = vadd.f32 %v599_v44, %v428_v40  ;;  %v571_v47 = vpop.f32.mrf.mxu0  ;;  %v581_v48 = vpop.f32.mrf.mxu1 }
  0xe5   : > { %v610_v49 = vadd.f32 %v571_v47, %v417_v41  ;;  %v614_v50 = vadd.f32 %v581_v48, %v421_v42 }
  0xe6   : > { %633 = vst [vmem:[#allocation2 + $0x40] sm:$0xff] %v617_v45 }
  0xe7   : > { %637 = vst [vmem:[#allocation2 + $0x60] sm:$0xff] %v621_v46 }
  0xe8   : > { %626 = vst [vmem:[#allocation2] sm:$0xff] %v610_v49 }
  0xe9   : > { %630 = vst [vmem:[#allocation2 + $0x68] sm:$0xff] %v614_v50 }
  0xeb   : > { %v591_v55 = vpop.f32.mrf.mxu2  ;;  %v601_v56 = vpop.f32.mrf.mxu3 }
  0xec   : > { %v618_v57 = vadd.f32 %v591_v55, %v425_v51  ;;  %v622_v58 = vadd.f32 %v601_v56, %v429_v52  ;;  %v574_v59 = vpop.f32.mrf.mxu0  ;;  %v584_v60 = vpop.f32.mrf.mxu1 }
  0xed   : > { %v611_v61 = vadd.f32 %v574_v59, %v418_v53  ;;  %v615_v62 = vadd.f32 %v584_v60, %v422_v54 }
  0xee   : > { %634 = vst [vmem:[#allocation2 + $0x20] sm:$0xff] %v618_v57 }
  0xef   : > { %638 = vst [vmem:[#allocation2 + $0x70] sm:$0xff] %v622_v58 }
  0xf0   : > { %627 = vst [vmem:[#allocation2 + $0x58] sm:$0xff] %v611_v61 }
  0xf1   : > { %631 = vst [vmem:[#allocation2 + $0x8] sm:$0xff] %v615_v62 }
  0xf3   : > { %v594_v3 = vpop.f32.mrf.mxu2  ;;  %v604_v4 = vpop.f32.mrf.mxu3 }
  0xf4   : > { %v619_v5 = vadd.f32 %v594_v3, %v426_v63  ;;  %v623_v6 = vadd.f32 %v604_v4, %v430_v0  ;;  %v576_v7 = vpop.f32.mrf.mxu0  ;;  %v586_v8 = vpop.f32.mrf.mxu1 }
  0xf5   : > { %v612_v9 = vadd.f32 %v576_v7, %v419_v1  ;;  %v616_v10 = vadd.f32 %v586_v8, %v423_v2 }
  0xf6   : > { %635 = vst [vmem:[#allocation2 + $0x10] sm:$0xff] %v619_v5 }
  0xf7   : > { %639 = vst [vmem:[#allocation2 + $0x78] sm:$0xff] %v623_v6 }
  0xf8   : > { %628 = vst [vmem:[#allocation2 + $0x18] sm:$0xff] %v612_v9 }
  0xf9   : > { %632 = vst [vmem:[#allocation2 + $0x48] sm:$0xff] %v616_v10 }
  0xfb   : > { %v596_v13 = vpop.f32.mrf.mxu2  ;;  %v606_v14 = vpop.f32.mrf.mxu3  ;;  %644 = sbr.rel (%p915_p11) target bundleno = 277 (0x115), region = 85 }
  0xfc   : > { %v620_v15 = vadd.f32 %v596_v13, %v427_v11  ;;  %v624_v16 = vadd.f32 %v606_v14, %v431_v12 }
  0xfe   : > { %636 = vst [vmem:[#allocation2 + $0x38] sm:$0xff] %v620_v15 }
  0xff   : > { %640 = vst [vmem:[#allocation2 + $0x28] sm:$0xff] %v624_v16 }
 0x100   : > { %v645_v17 = vld [vmem:[#allocation2 + $0x30] sm:$0xff]  ;;  %v1001_v18 = vld [vmem:[%s1230_s2] ss:$0 sm:$0xff]  ;;  %v647_v23 = vld [vmem:[#allocation2 + $0x58] sm:$0xff] }
 0x101   : > { %v1002_v19 = vld [vmem:[%s1231_s3] ss:$0 sm:$0xff]  ;;  %v665_v21 = vmul.f32 %v1001_v18, %v645_v17  ;;  %v648_v24 = vld [vmem:[#allocation2 + $0x18] sm:$0xff]  ;;  %v649_v25 = vld [vmem:[#allocation2 + $0x50] sm:$0xff]  ;;  %v667_v26 = vmul.f32 %v1001_v18, %v647_v23 }
 0x102   : > { %v646_v20 = vld [vmem:[#allocation2] sm:$0xff]  ;;  %v668_v27 = vmul.f32 %v1001_v18, %v648_v24  ;;  %v669_v28 = vmul.f32 %v1001_v18, %v649_v25  ;;  %v650_v29 = vld [vmem:[#allocation2 + $0x68] sm:$0xff]  ;;  %v655_v41 = vld [vmem:[#allocation2 + $0x10] sm:$0xff] }
 0x103   : > { %v666_v22 = vmul.f32 %v1001_v18, %v646_v20  ;;  %v651_v30 = vld [vmem:[#allocation2 + $0x8] sm:$0xff]  ;;  %v685_v32 = vadd.f32 %v1002_v19, %v665_v21  ;;  %v670_v34 = vmul.f32 %v1001_v18, %v650_v29  ;;  %v653_v36 = vld [vmem:[#allocation2 + $0x40] sm:$0xff]  ;;  %v687_v38 = vadd.f32 %v1002_v19, %v667_v26  ;;  %v658_v50 = vld [vmem:[#allocation2 + $0x70] sm:$0xff] }
 0x104   : > { %v652_v31 = vld [vmem:[#allocation2 + $0x48] sm:$0xff]  ;;  %v671_v35 = vmul.f32 %v1001_v18, %v651_v30  ;;  %v654_v37 = vld [vmem:[#allocation2 + $0x20] sm:$0xff]  ;;  %v688_v39 = vadd.f32 %v1002_v19, %v668_v27  ;;  %v689_v42 = vadd.f32 %v1002_v19, %v669_v28  ;;  %v673_v43 = vmul.f32 %v1001_v18, %v653_v36  ;;  %v659_v53 = vld [vmem:[#allocation2 + $0x78] sm:$0xff] }
 0x105   : > { %v686_v33 = vadd.f32 %v1002_v19, %v666_v22  ;;  %v672_v40 = vmul.f32 %v1001_v18, %v652_v31  ;;  %701 = vst [vmem:[%s1232_s4] sm:$0xff] %v685_v32  ;;  %v656_v44 = vld [vmem:[#allocation2 + $0x38] sm:$0xff]  ;;  %v690_v45 = vadd.f32 %v1002_v19, %v670_v34  ;;  %v674_v46 = vmul.f32 %v1001_v18, %v654_v37  ;;  %v657_v47 = vld [vmem:[#allocation2 + $0x60] sm:$0xff] }
 0x106   : > { %703 = vst [vmem:[%s1232_s4 + $0x10] sm:$0xff] %v687_v38  ;;  %v691_v48 = vadd.f32 %v1002_v19, %v671_v35  ;;  %v675_v49 = vmul.f32 %v1001_v18, %v655_v41  ;;  %v676_v52 = vmul.f32 %v1001_v18, %v656_v44  ;;  %v693_v54 = vadd.f32 %v1002_v19, %v673_v43  ;;  %v660_v56 = vld [vmem:[#allocation2 + $0x28] sm:$0xff] }
 0x107   : > { %702 = vst [vmem:[%s1232_s4 + $0x8] sm:$0xff] %v686_v33  ;;  %v692_v51 = vadd.f32 %v1002_v19, %v672_v40  ;;  %v677_v55 = vmul.f32 %v1001_v18, %v657_v47  ;;  %v694_v57 = vadd.f32 %v1002_v19, %v674_v46  ;;  %v678_v58 = vmul.f32 %v1001_v18, %v658_v50 }
 0x108   : > { %704 = vst [vmem:[%s1232_s4 + $0x18] sm:$0xff] %v688_v39  ;;  %v695_v59 = vadd.f32 %v1002_v19, %v675_v49  ;;  %v679_v60 = vmul.f32 %v1001_v18, %v659_v53  ;;  %v696_v61 = vadd.f32 %v1002_v19, %v676_v52  ;;  %v680_v62 = vmul.f32 %v1001_v18, %v660_v56 }
 0x109   : > { %705 = vst [vmem:[%s1232_s4 + $0x20] sm:$0xff] %v689_v42  ;;  %v697_v63 = vadd.f32 %v1002_v19, %v677_v55  ;;  %v698_v0 = vadd.f32 %v1002_v19, %v678_v58 }
 0x10a   : > { %706 = vst [vmem:[%s1232_s4 + $0x28] sm:$0xff] %v690_v45  ;;  %v699_v1 = vadd.f32 %v1002_v19, %v679_v60  ;;  %v700_v2 = vadd.f32 %v1002_v19, %v680_v62 }
 0x10b   : > { %707 = vst [vmem:[%s1232_s4 + $0x30] sm:$0xff] %v691_v48 }
 0x10c   : > { %708 = vst [vmem:[%s1232_s4 + $0x38] sm:$0xff] %v692_v51 }
 0x10d   : > { %709 = vst [vmem:[%s1232_s4 + $0x40] sm:$0xff] %v693_v54 }
 0x10e   : > { %710 = vst [vmem:[%s1232_s4 + $0x48] sm:$0xff] %v694_v57 }
 0x10f   : > { %711 = vst [vmem:[%s1232_s4 + $0x50] sm:$0xff] %v695_v59 }
 0x110   : > { %712 = vst [vmem:[%s1232_s4 + $0x58] sm:$0xff] %v696_v61 }
 0x111   : > { %713 = vst [vmem:[%s1232_s4 + $0x60] sm:$0xff] %v697_v63 }
 0x112   : > { %714 = vst [vmem:[%s1232_s4 + $0x68] sm:$0xff] %v698_v0 }
 0x113   : > { %715 = vst [vmem:[%s1232_s4 + $0x70] sm:$0xff] %v699_v1 }
 0x114   : > { %716 = vst [vmem:[%s1232_s4 + $0x78] sm:$0xff] %v700_v2 }
 0x115 PF: > { %s14_s19 = sadd.s32 1, %s1041_s19   ;;  %s1233_s15 = smov %s1029_s16 }
 0x116   : > { %p11_p12 = scmp.ge.s32.totalorder %s14_s19, 5   ;;  %s1234_s16 = smov %s1104_s23 }
 0x117   : > { %s1235_s17 = smov %s1037_s18  ;;  %s1236_s18 = smov %s1238_s20 }
 0x118   :  { %13 = sbr.rel (!%p11_p12) target bundleno = 3 (0x3), region = 129 }

// kernel: memae_forward.19
= control target key start
LH: loop header
LB: loop body
LE: loop exit
PB: predicated region body
PF: predicated region fallthrough
CT: control target
= control target key end

     0   :  { %s111_s0 = inlined_call_operand.vmem [shape: f32[8,128], index: 0, kind: input, shape index: {}]   ;;  %s112_s1 = inlined_call_operand.vmem [shape: f32[8,128], index: 1, kind: input, shape index: {}]   ;;  %s113_s2 = inlined_call_operand.hbm [shape: f32[1,1], index: 2, kind: output, shape index: {}]  }
   0x1   :  { %v18_v0 = vld [vmem:[%s111_s0] sm:$0xff] }
   0x2   :  { %v19_v1 = vld [vmem:[%s112_s1] sm:$0xff] }
   0x3   :  { %7 = vsyncpa [#allocation3], 0  ;;  %v20_v2 = vsub.f32 %v18_v0, %v19_v1  ;;  %vm16_vm0 = vcmask 0   ;;  %v83_v4 = vmov 0.0   ;;  %s84_s1 = smov [#allocation2]   ;;  %s44_s16 = sshll.u32 %s113_s2, 4  ;;  %s45_s16 = int_to_ptr.hbm [resolvable:$true] %s44_s16 }
   0x4   :  { %17 = vst.msk [vmem:[#allocation2] sm:$0x1] %vm16_vm0, %v83_v4  ;;  %s42_s13 = sshll.u32 %s84_s1, 4  ;;  %s43_s13 = int_to_ptr.vmem [resolvable:$true] %s42_s13 }
   0x5   :  { %v22_v3 = vmul.f32 %v20_v2, %v20_v2 }
   0x7   :  { %23 = vadd.xlane.f32.xlu0 %v22_v3 }
   0xb   :  { %v21_v12 = vld [vmem:[#allocation2] sm:$0x1] }
  0x7a   :  { %v24_v5 = vpop.xlane.xlu0 %23 }
  0x7b   :  { %v25_v6 = vrot.slane %v24_v5, 4 }
  0x7d   :  { %v26_v7 = vadd.f32 %v25_v6, %v24_v5 }
  0x7f   :  { %v27_v8 = vrot.slane %v26_v7, 2 }
  0x81   :  { %v28_v9 = vadd.f32 %v27_v8, %v26_v7 }
  0x83   :  { %v29_v10 = vrot.slane %v28_v9, 1 }
  0x85   :  { %v30_v11 = vadd.f32 %v29_v10, %v28_v9 }
  0x87   :  { %53 = vpush %v30_v11 }
  0xb8   :  { %s54_s0 = spop %53 }
  0xb9   :  { %v32_v13 = vstv %s54_s0 }
  0xba   :  { %v33_v14 = vmul.f32 0.001953125, %v32_v13 }
  0xbc   :  { %v34_v15 = vadd.f32 %v33_v14, %v21_v12 }
  0xbe   :  { %36 = vst.msk [vmem:[#allocation2] sm:$0x1] %vm16_vm0, %v34_v15 }
  0xbf   :  { %47 = dma.vmem_to_hbm [thread:$0]  %s43_s13, 16, %s45_s16, [#allocation3]  }
  0xc0   :  { %81 = dma.done.wait [#allocation3], 16  }
  0xc1   :  { %82 = vsyncadd [#allocation3], 4294967280 }
  0xc2   :  { %52 = vsyncpa [#allocation3], 1 }

</bundles_post_ra>
